<compile_context>
chip_gen: v5e
topology: v5e:2x2
jax: 0.10.0
libtpu: 0.0.40
codegen_flags: <defaults>
</compile_context>

<pallas_src>
import functools

import jax
import jax.numpy as jnp
from jax.experimental import pallas as pl
from jax.experimental.pallas import tpu as pltpu

BN_EPS = 1e-5


# ---------------------------------------------------------------------------
# Kernel 1: per-point MLP (conv1..3, BN folded) + running max over points.
# Grid = (B, N // NT); axis 0 "parallel", axis 1 "arbitrary" (reduction).
# ---------------------------------------------------------------------------
def stnkd_feat_kernel(x_ref,              # (1, K, NT)  bf16
                      w1_ref, b1_ref,     # (K, 64)   bf16, (1, 64)   f32
                      w2_ref, b2_ref,     # (64, 128) bf16, (1, 128)  f32
                      w3_ref, b3_ref,     # (128,1024)bf16, (1, 1024) f32
                      feat_ref,           # (1, 1, 1024) f32 out (global feature)
                      acc_ref):           # VMEM (8, 1024) f32 running max
    n = pl.program_id(1)
    n_last = pl.num_programs(1) - 1

    # Tiny tile-local layout switch: (K, NT) -> (NT, K).  ~16x less XLU
    # traffic than transposing the old (128, NT) h2 activation.
    xt = jnp.transpose(x_ref[0].astype(jnp.float32)).astype(jnp.bfloat16)   # (NT, K)

    h1 = jnp.dot(xt, w1_ref[...], preferred_element_type=jnp.float32)
    h1 = jnp.maximum(h1 + b1_ref[...], 0.0)                                 # (NT, 64)
    h2 = jnp.dot(h1.astype(jnp.bfloat16), w2_ref[...],
                 preferred_element_type=jnp.float32)
    h2 = jnp.maximum(h2 + b2_ref[...], 0.0)                                 # (NT, 128)

    # conv3 raw; bias + ReLU deferred past the max (exactly commutes).
    h3 = jnp.dot(h2.astype(jnp.bfloat16), w3_ref[...],
                 preferred_element_type=jnp.float32)                        # (NT, 1024)

    # Reduce only to sublane granularity per tile: pure vreg-wise VPU maxes.
    nt = h3.shape[0]
    tile_max = jnp.max(h3.reshape(nt // 8, 8, 1024), axis=0)                # (8, 1024)

    @pl.when(n == 0)
    def _():
        acc_ref[...] = jnp.full_like(acc_ref, -jnp.inf)

    acc_ref[...] = jnp.maximum(acc_ref[...], tile_max)

    # Epilogue once per batch: collapse sublanes, apply conv3 bias + ReLU.
    @pl.when(n == n_last)
    def _():
        gmax = jnp.max(acc_ref[...], axis=0, keepdims=True)                 # (1, 1024)
        feat_ref[0] = jnp.maximum(gmax + b3_ref[...], 0.0)


# ---------------------------------------------------------------------------
# Kernel 2: batched FC head  (B,1024) -> (B, k*k), identity folded into b6.
# Whole arrays resident in VMEM (no grid); M = B rows share one MXU pass.
# ---------------------------------------------------------------------------
def stnkd_head_kernel(feat_ref,           # (B, 1024) f32
                      w4_ref, b4_ref,     # (1024, 512) bf16, (1, 512) f32
                      w5_ref, b5_ref,     # (512, 256)  bf16, (1, 256) f32
                      w6_ref, b6_ref,     # (256, k*k)  bf16, (1, k*k) f32
                      out_ref):           # (B, k*k) f32
    f = feat_ref[...].astype(jnp.bfloat16)
    h4 = jnp.dot(f, w4_ref[...], preferred_element_type=jnp.float32)
    h4 = jnp.maximum(h4 + b4_ref[...], 0.0).astype(jnp.bfloat16)            # (B, 512)
    h5 = jnp.dot(h4, w5_ref[...], preferred_element_type=jnp.float32)
    h5 = jnp.maximum(h5 + b5_ref[...], 0.0).astype(jnp.bfloat16)            # (B, 256)
    out = jnp.dot(h5, w6_ref[...], preferred_element_type=jnp.float32)
    out_ref[...] = out + b6_ref[...]                                        # (B, k*k)


# ---------------------------------------------------------------------------
# Parameter init (deterministic, PyTorch-style uniform fan-in init).
# All weights stored (in, out); biases (1, out).  Eval-mode BatchNorm (default
# running stats) and the flattened identity are folded in.
# ---------------------------------------------------------------------------
def _layer_init(key, fan_in, w_shape, b_shape):
    bound = 1.0 / float(fan_in) ** 0.5
    kw, kb = jax.random.split(key)
    w = jax.random.uniform(kw, w_shape, jnp.float32, -bound, bound)
    b = jax.random.uniform(kb, b_shape, jnp.float32, -bound, bound)
    return w, b


def init_params(key, k):
    keys = jax.random.split(key, 6)
    bn_scale = (1.0 + BN_EPS) ** -0.5       # default-init eval-mode BatchNorm

    w1, b1 = _layer_init(keys[0], k,    (k, 64),      (1, 64))
    w2, b2 = _layer_init(keys[1], 64,   (64, 128),    (1, 128))
    w3, b3 = _layer_init(keys[2], 128,  (128, 1024),  (1, 1024))
    w4, b4 = _layer_init(keys[3], 1024, (1024, 512),  (1, 512))
    w5, b5 = _layer_init(keys[4], 512,  (512, 256),   (1, 256))
    w6, b6 = _layer_init(keys[5], 256,  (256, k * k), (1, k * k))

    layers = [(w * bn_scale, b * bn_scale) for w, b in
              [(w1, b1), (w2, b2), (w3, b3), (w4, b4), (w5, b5)]]
    # fc3 has no BN; fold the flattened identity into its bias.
    b6 = b6 + jnp.eye(k, dtype=jnp.float32).reshape(1, k * k)
    layers.append((w6, b6))

    # bf16 weights (f32 accumulation in-kernel), f32 biases.
    return [(w.astype(jnp.bfloat16), b) for w, b in layers]


def _points_tile(n_points, max_nt):
    for cand in (2048, 1024, 512, 256, 128):
        if cand <= max_nt and n_points % cand == 0:
            return cand
    raise ValueError("number of points must be a multiple of 128")


# ---------------------------------------------------------------------------
# Forward wrapper.  x has the native PyTorch layout (B, k, N).
# ---------------------------------------------------------------------------
@functools.partial(jax.jit, static_argnums=(2, 3))
def stnkd_forward(x_bkn, params, k, max_nt=2048):
    (w1, b1), (w2, b2), (w3, b3), (w4, b4), (w5, b5), (w6, b6) = params
    B, K, N = x_bkn.shape
    assert K == k
    NT = _points_tile(N, max_nt)
    x = x_bkn.astype(jnp.bfloat16)          # halve x DMA bytes; MXU eats bf16

    def const(a):   # weight / bias: whole array resident, loaded once
        return pl.BlockSpec(a.shape, lambda b, n: (0, 0))

    feat = pl.pallas_call(
        stnkd_feat_kernel,
        out_shape=jax.ShapeDtypeStruct((B, 1, 1024), jnp.float32),
        grid=(B, N // NT),
        in_specs=[
            pl.BlockSpec((1, K, NT), lambda b, n: (b, 0, n)),
            const(w1), const(b1),
            const(w2), const(b2),
            const(w3), const(b3),
        ],
        out_specs=pl.BlockSpec((1, 1, 1024), lambda b, n: (b, 0, 0)),
        scratch_shapes=[pltpu.VMEM((8, 1024), jnp.float32)],
        compiler_params=pltpu.CompilerParams(
            dimension_semantics=("parallel", "arbitrary"),
            vmem_limit_bytes=32 * 1024 * 1024),
    )(x, w1, b1, w2, b2, w3, b3)

    out = pl.pallas_call(
        stnkd_head_kernel,
        out_shape=jax.ShapeDtypeStruct((B, k * k), jnp.float32),
    )(feat.reshape(B, 1024), w4, b4, w5, b5, w6, b6)

    return out.reshape(B, k, k)


# ---------------------------------------------------------------------------
# Pure-JAX reference mirroring the kernel's bf16 casts (f32 accumulation).
# ---------------------------------------------------------------------------
def stnkd_reference(x_bkn, params, k):
    (w1, b1), (w2, b2), (w3, b3), (w4, b4), (w5, b5), (w6, b6) = params
    xt = jnp.swapaxes(x_bkn.astype(jnp.bfloat16), 1, 2)                 # (B, N, K)
    h1 = jnp.maximum(jnp.einsum("bnk,kc->bnc", xt, w1,
                                preferred_element_type=jnp.float32) + b1, 0.0)
    h2 = jnp.maximum(jnp.einsum("bnc,cd->bnd", h1.astype(jnp.bfloat16), w2,
                                preferred_element_type=jnp.float32) + b2, 0.0)
    h3 = jnp.einsum("bnd,de->bne", h2.astype(jnp.bfloat16), w3,
                    preferred_element_type=jnp.float32)
    feat = jnp.maximum(jnp.max(h3, axis=1) + b3, 0.0)                   # (B, 1024)
    h4 = jnp.maximum(jnp.dot(feat.astype(jnp.bfloat16), w4,
                             preferred_element_type=jnp.float32) + b4, 0.0)
    h5 = jnp.maximum(jnp.dot(h4.astype(jnp.bfloat16), w5,
                             preferred_element_type=jnp.float32) + b5, 0.0)
    out = jnp.dot(h5.astype(jnp.bfloat16), w6,
                  preferred_element_type=jnp.float32) + b6
    return out.reshape(-1, k, k)


if __name__ == "__main__":
    key = jax.random.PRNGKey(0)
    k = 16            # STNkd(k=16): identity is 16x16, k*k = 256 (lane-dense)
    B, N = 2, 1024    # small batch / point count

    k_x, k_p = jax.random.split(key)
    x = jax.random.normal(k_x, (B, k, N), dtype=jnp.float32)   # PyTorch NCL layout
    params = init_params(k_p, k)

    # Default tiling: NT = 1024 -> one points tile per batch element.
    y = stnkd_forward(x, params, k)
    jax.block_until_ready(y)
    assert y.shape == (B, k, k), y.shape
    assert bool(jnp.all(jnp.isfinite(y)))

    # Smaller tile (NT = 512 -> 2 tiles): exercises the running-max
    # accumulator; max over points is exact, so results must agree.
    y2 = stnkd_forward(x, params, k, 512)
    jax.block_until_ready(y2)
    assert bool(jnp.allclose(y, y2, rtol=1e-5, atol=1e-5))

    # Check against a pure-JAX reference using the same bf16 weights/activations.
    y_ref = stnkd_reference(x, params, k)
    assert bool(jnp.allclose(y, y_ref, rtol=1e-2, atol=1e-2)), \
        float(jnp.max(jnp.abs(y - y_ref)))

    print("KERNEL_OK")
</pallas_src>

<mosaic_0001>
module attributes {stable_mosaic.version = 11 : i64} {
  func.func @stnkd_head_kernel(%arg0: memref<2x1024xf32, #tpu.memory_space<vmem>>, %arg1: memref<1024x512xbf16, #tpu.memory_space<vmem>>, %arg2: memref<1x512xf32, #tpu.memory_space<vmem>>, %arg3: memref<512x256xbf16, #tpu.memory_space<vmem>>, %arg4: memref<1x256xf32, #tpu.memory_space<vmem>>, %arg5: memref<256x256xbf16, #tpu.memory_space<vmem>>, %arg6: memref<1x256xf32, #tpu.memory_space<vmem>>, %arg7: memref<2x256xf32, #tpu.memory_space<vmem>>) attributes {dimension_semantics = [], scalar_prefetch = 0 : i64, scratch_operands = 0 : i64, tpu.core_type = #tpu.core_type<tc>} {
    %c0 = arith.constant 0 : index
    %c0_0 = arith.constant 0 : index
    %0 = vector.load %arg0[%c0, %c0_0] : memref<2x1024xf32, #tpu.memory_space<vmem>>, vector<2x1024xf32>
    %1 = arith.truncf %0 : vector<2x1024xf32> to vector<2x1024xbf16>
    %c0_1 = arith.constant 0 : index
    %c0_2 = arith.constant 0 : index
    %2 = vector.load %arg1[%c0_1, %c0_2] : memref<1024x512xbf16, #tpu.memory_space<vmem>>, vector<1024x512xbf16>
    %cst = arith.constant dense<0.000000e+00> : vector<2x512xf32>
    %3 = tpu.matmul %1, %2, %cst {dimension_numbers = #tpu.dot_dimension_numbers<[1], [0], [0], [1], [0, 0, 1, 1], [], []>} : vector<2x1024xbf16>, vector<1024x512xbf16>, vector<2x512xf32> -> vector<2x512xf32>
    %c0_3 = arith.constant 0 : index
    %c0_4 = arith.constant 0 : index
    %4 = vector.load %arg2[%c0_3, %c0_4] : memref<1x512xf32, #tpu.memory_space<vmem>>, vector<1x512xf32>
    %5 = vector.broadcast %4 : vector<1x512xf32> to vector<2x512xf32>
    %6 = arith.addf %3, %5 : vector<2x512xf32>
    %cst_5 = arith.constant 0.000000e+00 : f32
    %7 = vector.broadcast %cst_5 : f32 to vector<2x512xf32>
    %8 = arith.maximumf %6, %7 : vector<2x512xf32>
    %9 = arith.truncf %8 : vector<2x512xf32> to vector<2x512xbf16>
    %c0_6 = arith.constant 0 : index
    %c0_7 = arith.constant 0 : index
    %10 = vector.load %arg3[%c0_6, %c0_7] : memref<512x256xbf16, #tpu.memory_space<vmem>>, vector<512x256xbf16>
    %cst_8 = arith.constant dense<0.000000e+00> : vector<2x256xf32>
    %11 = tpu.matmul %9, %10, %cst_8 {dimension_numbers = #tpu.dot_dimension_numbers<[1], [0], [0], [1], [0, 0, 1, 1], [], []>} : vector<2x512xbf16>, vector<512x256xbf16>, vector<2x256xf32> -> vector<2x256xf32>
    %c0_9 = arith.constant 0 : index
    %c0_10 = arith.constant 0 : index
    %12 = vector.load %arg4[%c0_9, %c0_10] : memref<1x256xf32, #tpu.memory_space<vmem>>, vector<1x256xf32>
    %13 = vector.broadcast %12 : vector<1x256xf32> to vector<2x256xf32>
    %14 = arith.addf %11, %13 : vector<2x256xf32>
    %cst_11 = arith.constant 0.000000e+00 : f32
    %15 = vector.broadcast %cst_11 : f32 to vector<2x256xf32>
    %16 = arith.maximumf %14, %15 : vector<2x256xf32>
    %17 = arith.truncf %16 : vector<2x256xf32> to vector<2x256xbf16>
    %c0_12 = arith.constant 0 : index
    %c0_13 = arith.constant 0 : index
    %18 = vector.load %arg5[%c0_12, %c0_13] : memref<256x256xbf16, #tpu.memory_space<vmem>>, vector<256x256xbf16>
    %cst_14 = arith.constant dense<0.000000e+00> : vector<2x256xf32>
    %19 = tpu.matmul %17, %18, %cst_14 {dimension_numbers = #tpu.dot_dimension_numbers<[1], [0], [0], [1], [0, 0, 1, 1], [], []>} : vector<2x256xbf16>, vector<256x256xbf16>, vector<2x256xf32> -> vector<2x256xf32>
    %c0_15 = arith.constant 0 : index
    %c0_16 = arith.constant 0 : index
    %20 = vector.load %arg6[%c0_15, %c0_16] : memref<1x256xf32, #tpu.memory_space<vmem>>, vector<1x256xf32>
    %21 = vector.broadcast %20 : vector<1x256xf32> to vector<2x256xf32>
    %22 = arith.addf %19, %21 : vector<2x256xf32>
    %c0_17 = arith.constant 0 : index
    %c0_18 = arith.constant 0 : index
    %23 = vector.load %arg7[%c0_17, %c0_18] : memref<2x256xf32, #tpu.memory_space<vmem>>, vector<2x256xf32>
    tpu.vector_store %arg7[%c0_17, %c0_18], %22 {strides = array<i32>} : memref<2x256xf32, #tpu.memory_space<vmem>>, vector<2x256xf32>,
    return
  }
}

module attributes {stable_mosaic.version = 11 : i64} {
  func.func @stnkd_feat_kernel(%arg0: i32, %arg1: i32, %arg2: memref<1x16x1024xbf16, #tpu.memory_space<vmem>>, %arg3: memref<16x64xbf16, #tpu.memory_space<vmem>>, %arg4: memref<1x64xf32, #tpu.memory_space<vmem>>, %arg5: memref<64x128xbf16, #tpu.memory_space<vmem>>, %arg6: memref<1x128xf32, #tpu.memory_space<vmem>>, %arg7: memref<128x1024xbf16, #tpu.memory_space<vmem>>, %arg8: memref<1x1024xf32, #tpu.memory_space<vmem>>, %arg9: memref<1x1x1024xf32, #tpu.memory_space<vmem>>, %arg10: memref<8x1024xf32, #tpu.memory_space<vmem>>) attributes {dimension_semantics = [#tpu.dimension_semantics<parallel>, #tpu.dimension_semantics<arbitrary>], iteration_bounds = array<i64: 2, 1>, scalar_prefetch = 0 : i64, scratch_operands = 1 : i64, tpu.core_type = #tpu.core_type<tc>, window_params = [{transform_indices = @transform_0, window_bounds = array<i64: 1, 16, 1024>}, {pipeline_mode = #tpu.pipeline_mode<synchronous>, transform_indices = @transform_1, window_bounds = array<i64: 16, 64>}, {pipeline_mode = #tpu.pipeline_mode<synchronous>, transform_indices = @transform_2, window_bounds = array<i64: 1, 64>}, {pipeline_mode = #tpu.pipeline_mode<synchronous>, transform_indices = @transform_3, window_bounds = array<i64: 64, 128>}, {pipeline_mode = #tpu.pipeline_mode<synchronous>, transform_indices = @transform_4, window_bounds = array<i64: 1, 128>}, {pipeline_mode = #tpu.pipeline_mode<synchronous>, transform_indices = @transform_5, window_bounds = array<i64: 128, 1024>}, {pipeline_mode = #tpu.pipeline_mode<synchronous>, transform_indices = @transform_6, window_bounds = array<i64: 1, 1024>}, {transform_indices = @transform_7, window_bounds = array<i64: 1, 1, 1024>}]} {
    %c0 = arith.constant 0 : index
    %c0_0 = arith.constant 0 : index
    %c0_1 = arith.constant 0 : index
    %0 = vector.load %arg2[%c0, %c0_0, %c0_1] : memref<1x16x1024xbf16, #tpu.memory_space<vmem>>, vector<1x16x1024xbf16>
    %1 = vector.shape_cast %0 : vector<1x16x1024xbf16> to vector<16x1024xbf16>
    %2 = arith.extf %1 : vector<16x1024xbf16> to vector<16x1024xf32>
    %3 = tpu.transpose %2, [1, 0] : vector<16x1024xf32> -> vector<1024x16xf32>
    %4 = arith.truncf %3 : vector<1024x16xf32> to vector<1024x16xbf16>
    %c0_2 = arith.constant 0 : index
    %c0_3 = arith.constant 0 : index
    %5 = vector.load %arg3[%c0_2, %c0_3] : memref<16x64xbf16, #tpu.memory_space<vmem>>, vector<16x64xbf16>
    %cst = arith.constant dense<0.000000e+00> : vector<1024x64xf32>
    %6 = tpu.matmul %4, %5, %cst {dimension_numbers = #tpu.dot_dimension_numbers<[1], [0], [0], [1], [0, 0, 1, 1], [], []>} : vector<1024x16xbf16>, vector<16x64xbf16>, vector<1024x64xf32> -> vector<1024x64xf32>
    %c0_4 = arith.constant 0 : index
    %c0_5 = arith.constant 0 : index
    %7 = vector.load %arg4[%c0_4, %c0_5] : memref<1x64xf32, #tpu.memory_space<vmem>>, vector<1x64xf32>
    %8 = vector.broadcast %7 : vector<1x64xf32> to vector<1024x64xf32>
    %9 = arith.addf %6, %8 : vector<1024x64xf32>
    %cst_6 = arith.constant 0.000000e+00 : f32
    %10 = vector.broadcast %cst_6 : f32 to vector<1024x64xf32>
    %11 = arith.maximumf %9, %10 : vector<1024x64xf32>
    %12 = arith.truncf %11 : vector<1024x64xf32> to vector<1024x64xbf16>
    %c0_7 = arith.constant 0 : index
    %c0_8 = arith.constant 0 : index
    %13 = vector.load %arg5[%c0_7, %c0_8] : memref<64x128xbf16, #tpu.memory_space<vmem>>, vector<64x128xbf16>
    %cst_9 = arith.constant dense<0.000000e+00> : vector<1024x128xf32>
    %14 = tpu.matmul %12, %13, %cst_9 {dimension_numbers = #tpu.dot_dimension_numbers<[1], [0], [0], [1], [0, 0, 1, 1], [], []>} : vector<1024x64xbf16>, vector<64x128xbf16>, vector<1024x128xf32> -> vector<1024x128xf32>
    %c0_10 = arith.constant 0 : index
    %c0_11 = arith.constant 0 : index
    %15 = vector.load %arg6[%c0_10, %c0_11] : memref<1x128xf32, #tpu.memory_space<vmem>>, vector<1x128xf32>
    %16 = vector.broadcast %15 : vector<1x128xf32> to vector<1024x128xf32>
    %17 = arith.addf %14, %16 : vector<1024x128xf32>
    %cst_12 = arith.constant 0.000000e+00 : f32
    %18 = vector.broadcast %cst_12 : f32 to vector<1024x128xf32>
    %19 = arith.maximumf %17, %18 : vector<1024x128xf32>
    %20 = arith.truncf %19 : vector<1024x128xf32> to vector<1024x128xbf16>
    %c0_13 = arith.constant 0 : index
    %c0_14 = arith.constant 0 : index
    %21 = vector.load %arg7[%c0_13, %c0_14] : memref<128x1024xbf16, #tpu.memory_space<vmem>>, vector<128x1024xbf16>
    %cst_15 = arith.constant dense<0.000000e+00> : vector<1024x1024xf32>
    %22 = tpu.matmul %20, %21, %cst_15 {dimension_numbers = #tpu.dot_dimension_numbers<[1], [0], [0], [1], [0, 0, 1, 1], [], []>} : vector<1024x128xbf16>, vector<128x1024xbf16>, vector<1024x1024xf32> -> vector<1024x1024xf32>
    %23 = vector.shape_cast %22 : vector<1024x1024xf32> to vector<128x8x1024xf32>
    %cst_16 = arith.constant dense<0xFF800000> : vector<8x1024xf32>
    %24 = vector.multi_reduction <maximumf>, %23, %cst_16 [0] : vector<128x8x1024xf32> to vector<8x1024xf32>
    %c0_i32 = arith.constant 0 : i32
    %25 = arith.cmpi eq, %arg1, %c0_i32 : i32
    %26 = arith.extui %25 : i1 to i32
    %c0_i32_17 = arith.constant 0 : i32
    %27 = arith.cmpi ne, %26, %c0_i32_17 : i32
    scf.if %27 {
      %cst_24 = arith.constant 0xFF800000 : f32
      %34 = vector.broadcast %cst_24 : f32 to vector<8x1024xf32>
      %c0_25 = arith.constant 0 : index
      %c0_26 = arith.constant 0 : index
      %35 = vector.load %arg10[%c0_25, %c0_26] : memref<8x1024xf32, #tpu.memory_space<vmem>>, vector<8x1024xf32>
      tpu.vector_store %arg10[%c0_25, %c0_26], %34 {strides = array<i32>} : memref<8x1024xf32, #tpu.memory_space<vmem>>, vector<8x1024xf32>,
    } else {
    }
    %c0_18 = arith.constant 0 : index
    %c0_19 = arith.constant 0 : index
    %28 = vector.load %arg10[%c0_18, %c0_19] : memref<8x1024xf32, #tpu.memory_space<vmem>>, vector<8x1024xf32>
    %29 = arith.maximumf %28, %24 : vector<8x1024xf32>
    %c0_20 = arith.constant 0 : index
    %c0_21 = arith.constant 0 : index
    %30 = vector.load %arg10[%c0_20, %c0_21] : memref<8x1024xf32, #tpu.memory_space<vmem>>, vector<8x1024xf32>
    tpu.vector_store %arg10[%c0_20, %c0_21], %29 {strides = array<i32>} : memref<8x1024xf32, #tpu.memory_space<vmem>>, vector<8x1024xf32>,
    %c0_i32_22 = arith.constant 0 : i32
    %31 = arith.cmpi eq, %arg1, %c0_i32_22 : i32
    %32 = arith.extui %31 : i1 to i32
    %c0_i32_23 = arith.constant 0 : i32
    %33 = arith.cmpi ne, %32, %c0_i32_23 : i32
    scf.if %33 {
      %c0_24 = arith.constant 0 : index
      %c0_25 = arith.constant 0 : index
      %34 = vector.load %arg10[%c0_24, %c0_25] : memref<8x1024xf32, #tpu.memory_space<vmem>>, vector<8x1024xf32>
      %cst_26 = arith.constant dense<0xFF800000> : vector<1024xf32>
      %35 = vector.multi_reduction <maximumf>, %34, %cst_26 [0] : vector<8x1024xf32> to vector<1024xf32>
      %36 = vector.shape_cast %35 : vector<1024xf32> to vector<1x1024xf32>
      %c0_27 = arith.constant 0 : index
      %c0_28 = arith.constant 0 : index
      %37 = vector.load %arg8[%c0_27, %c0_28] : memref<1x1024xf32, #tpu.memory_space<vmem>>, vector<1x1024xf32>
      %38 = arith.addf %36, %37 : vector<1x1024xf32>
      %cst_29 = arith.constant 0.000000e+00 : f32
      %39 = vector.broadcast %cst_29 : f32 to vector<1x1024xf32>
      %40 = arith.maximumf %38, %39 : vector<1x1024xf32>
      %c0_30 = arith.constant 0 : index
      %c0_31 = arith.constant 0 : index
      %c0_32 = arith.constant 0 : index
      %41 = vector.load %arg9[%c0_30, %c0_31, %c0_32] : memref<1x1x1024xf32, #tpu.memory_space<vmem>>, vector<1x1x1024xf32>
      %42 = vector.shape_cast %41 : vector<1x1x1024xf32> to vector<1x1024xf32>
      %43 = vector.shape_cast %40 : vector<1x1024xf32> to vector<1x1x1024xf32>
      tpu.vector_store %arg9[%c0_30, %c0_31, %c0_32], %43 {strides = array<i32>} : memref<1x1x1024xf32, #tpu.memory_space<vmem>>, vector<1x1x1024xf32>,
    } else {
    }
    return
  }
  func.func @transform_0(%arg0: i32, %arg1: i32) -> (i32, i32, i32) {
    %c0_i32 = arith.constant 0 : i32
    %c0_i32_0 = arith.constant 0 : i32
    return %arg0, %c0_i32, %arg1 : i32, i32, i32
  }
  func.func @transform_1(%arg0: i32, %arg1: i32) -> (i32, i32) {
    %c0_i32 = arith.constant 0 : i32
    %c0_i32_0 = arith.constant 0 : i32
    %c0_i32_1 = arith.constant 0 : i32
    return %c0_i32, %c0_i32_0 : i32, i32
  }
  func.func @transform_2(%arg0: i32, %arg1: i32) -> (i32, i32) {
    %c0_i32 = arith.constant 0 : i32
    %c0_i32_0 = arith.constant 0 : i32
    %c0_i32_1 = arith.constant 0 : i32
    return %c0_i32, %c0_i32_0 : i32, i32
  }
  func.func @transform_3(%arg0: i32, %arg1: i32) -> (i32, i32) {
    %c0_i32 = arith.constant 0 : i32
    %c0_i32_0 = arith.constant 0 : i32
    %c0_i32_1 = arith.constant 0 : i32
    return %c0_i32, %c0_i32_0 : i32, i32
  }
  func.func @transform_4(%arg0: i32, %arg1: i32) -> (i32, i32) {
    %c0_i32 = arith.constant 0 : i32
    %c0_i32_0 = arith.constant 0 : i32
    %c0_i32_1 = arith.constant 0 : i32
    return %c0_i32, %c0_i32_0 : i32, i32
  }
  func.func @transform_5(%arg0: i32, %arg1: i32) -> (i32, i32) {
    %c0_i32 = arith.constant 0 : i32
    %c0_i32_0 = arith.constant 0 : i32
    %c0_i32_1 = arith.constant 0 : i32
    return %c0_i32, %c0_i32_0 : i32, i32
  }
  func.func @transform_6(%arg0: i32, %arg1: i32) -> (i32, i32) {
    %c0_i32 = arith.constant 0 : i32
    %c0_i32_0 = arith.constant 0 : i32
    %c0_i32_1 = arith.constant 0 : i32
    return %c0_i32, %c0_i32_0 : i32, i32
  }
  func.func @transform_7(%arg0: i32, %arg1: i32) -> (i32, i32, i32) {
    %c0_i32 = arith.constant 0 : i32
    %c0_i32_0 = arith.constant 0 : i32
    %c0_i32_1 = arith.constant 0 : i32
    return %arg0, %c0_i32, %c0_i32_0 : i32, i32, i32
  }
}

</mosaic_0001>

<bundles_post_ra>
// kernel: stnkd_forward.2
= control target key start
LH: loop header
LB: loop body
LE: loop exit
PB: predicated region body
PF: predicated region fallthrough
CT: control target
= control target key end

     0   :  { %12 = vsyncpa [#allocation4], 0  ;;  %s7396_s24 = smov 0   ;;  %s7398_s25 = smov 0   ;;  %s8780_s0 = inlined_call_operand.vmem [shape: bf16[2,16,1024], index: 0, kind: input, shape index: {}]   ;;  %s8781_s1 = inlined_call_operand.vmem [shape: bf16[16,64], index: 1, kind: input, shape index: {}]   ;;  %s8782_s2 = inlined_call_operand.vmem [shape: f32[1,64], index: 2, kind: input, shape index: {}]   ;;  %s8783_s3 = inlined_call_operand.vmem [shape: bf16[64,128], index: 3, kind: input, shape index: {}]   ;;  %s8784_s4 = inlined_call_operand.vmem [shape: f32[1,128], index: 4, kind: input, shape index: {}]   ;;  %s8785_s5 = inlined_call_operand.hbm [shape: bf16[128,1024], index: 5, kind: input, shape index: {}]   ;;  %s8786_s6 = inlined_call_operand.vmem [shape: f32[1,1024], index: 6, kind: input, shape index: {}]   ;;  %s8787_s7 = inlined_call_operand.vmem [shape: f32[2,1,1024], index: 7, kind: output, shape index: {}]  }
   0x1   :  { %s7400_s26 = smov 0  }
   0x2 LB: > { %s6415_s27 = sadd.s32 4294967295, %s7351_s26   ;;  %s30_s28 = sadd.s32 1, %s7347_s25  ;;  %s7351_s26 = sphi %s7400_s26, %s18_s26   ;;  %s7347_s25 = sphi %s7398_s25, %s8954_s25   ;;  %s7343_s24 = sphi %s7396_s24, %s8953_s24  }
   0x3   : > { %p32_p0 = scmp.ge.s32.totalorder %s30_s28, 2  ;;  %p6417_p1 = scmp.ge.s32.totalorder %s7351_s26, 1 }
   0x4   : > { %p215_p2 = scmp.lt.s32.totalorder %s7351_s26, 3  ;;  %p6922_p4 = scmp.eq.s32.totalorder %s6415_s27, 0 }
   0x5   : > { %s8956_s28 = smov (%p32_p0, %s30_s28), 0  ;;  %s238_s8 = sshll.u32 %s8785_s5, 4  ;;  %s239_s8 = int_to_ptr.hbm [resolvable:$true] %s238_s8 }
   0x6   : > { %p216_p3 = pnand %p6417_p1, %p215_p2  ;;  %s7353_s9 = smov [#allocation3]  }
   0x7   : > { %s240_s10 = sshll.u32 %s7353_s9, 4  ;;  %s7354_s11 = smov 512   ;;  %s241_s10 = int_to_ptr.vmem [resolvable:$true] %s240_s10 }
   0x8   : > { %p6918_p5 = pneg %p216_p3  ;;  %s7355_s12 = smov 32  }
   0x9   : > { %272 = sbr.rel (%p216_p3) target bundleno = 3056 (0xbf0), region = 48 }
   0xa   : > { %p6919_p6 = pnand %p6922_p4, %p6918_p5 }
   0xc   : > { %6921 = dma.hbm_to_vmem [thread:$0]  (!%p6919_p6), %s239_s8, 8192, %s241_s10, [#allocation4], %s7354_s11, %s7354_s11, %s7355_s12  }
   0xe   : > { %7338 = dma.done.wait (%p6922_p4), [#allocation4], 8192  }
   0xf   : > { %7340 = vsyncadd (%p6922_p4), [#allocation4], 4294959104  ;;  %p309_p7 = scmp.lt.s32.totalorder %s7343_s24, 1  ;;  %v6832_v16 = vld [vmem:[%s8781_s1] sm:$0xff]  ;;  %vm679_vm0 = vcmask 130048   ;;  %vm1429_vm1 = vcmask 523264  }
  0x10   : > { %879 = vmatpush.bf16.msra.mxu0 %v6832_v16  ;;  %6901 = vmatpush.bf16.msra.mxu3 %v6832_v16  ;;  %vm6319_vm2 = vcmask 1040384   ;;  %vm6321_vm3 = vcmask 1042434   ;;  %vm6323_vm4 = vcmask 1041408   ;;  %vm6327_vm5 = vcmask 1046534  }
  0x11   : > { %s8958_s24 = smov (!%p309_p7, %s7343_s24), 1  ;;  %vm6325_vm6 = vcmask 1044484   ;;  %vm6329_vm7 = vcmask 1045508   ;;  %vm6331_vm8 = vcmask 1043456  }
  0x12   : > { %s6831_s13 = sshll.u32 %s8958_s24, 6  ;;  %s6424_s27 = sshll.u32 %s8958_s24, 3 }
  0x13   : > { %s7424_s16 = scalar_lea.vmem %s8780_s0, %s6831_s13  ;;  %s321_s8 = scalar_lea.vmem %s8787_s7, %s6424_s27 }
  0x14   : > { %v323_v0 = vld [vmem:[%s7424_s16] sm:$0xff]  ;;  %v325_v1 = vld [vmem:[%s7424_s16 + $0x10] sm:$0xff]  ;;  %v7441_v47 = vld [vmem:[%s7424_s16 + $0x8] sm:$0xff] }
  0x15   : > { %v331_v2 = vunpack.c.l.bf16 %v323_v0  ;;  %v335_v3 = vunpack.c.l.bf16 %v325_v1  ;;  %v332_v4 = vunpack.c.h.bf16 %v323_v0  ;;  %v327_v5 = vld [vmem:[%s7424_s16 + $0x20] sm:$0xff]  ;;  %v329_v6 = vld [vmem:[%s7424_s16 + $0x30] sm:$0xff]  ;;  %v336_v7 = vunpack.c.h.bf16 %v325_v1  ;;  %v7444_v48 = vld [vmem:[%s7424_s16 + $0x18] sm:$0xff] }
  0x16   : > { %v339_v10 = vunpack.c.l.bf16 %v327_v5  ;;  %v343_v11 = vunpack.c.l.bf16 %v329_v6  ;;  %v340_v12 = vunpack.c.h.bf16 %v327_v5  ;;  %v344_v13 = vunpack.c.h.bf16 %v329_v6  ;;  %v7451_v55 = vld [vmem:[%s7424_s16 + $0x28] sm:$0xff]  ;;  %v7454_v56 = vld [vmem:[%s7424_s16 + $0x38] sm:$0xff] }
  0x17   : > { %v6952_v8 = vpack.i.bf16 %v335_v3, %v331_v2  ;;  %v7036_v9 = vpack.i.bf16 %v332_v4, %v336_v7  ;;  %v333_v51 = vunpack.c.l.bf16 %v7441_v47  ;;  %v337_v52 = vunpack.c.l.bf16 %v7444_v48 }
  0x18   : > { %v6954_v14 = vpack.i.bf16 %v343_v11, %v339_v10  ;;  %v7038_v15 = vpack.i.bf16 %v340_v12, %v344_v13  ;;  %v341_v57 = vunpack.c.l.bf16 %v7451_v55  ;;  %v345_v58 = vunpack.c.l.bf16 %v7454_v56 }
  0x19   : > { %6953 = vxpose.xlu0.b32.start [1/2] (short) %v6952_v8, 128  ;;  %7037 = vxpose.xlu1.b32.start [1/2] (short) %v7036_v9, 128  ;;  %v7120_v53 = vpack.i.bf16 %v333_v51, %v337_v52 }
  0x1a   : > { %v7122_v59 = vpack.i.bf16 %v341_v57, %v345_v58 }
  0x1b   : > { %7121 = vxpose.xlu2.b32.start [1/2] (short) %v7120_v53, 128 }
  0x21   : > { %6955 = vxpose.xlu0.b32.end [2/2] (short) %v6954_v14, 128  ;;  %7039 = vxpose.xlu1.b32.end [2/2] (short) %v7038_v15, 128 }
  0x23   : > { %7123 = vxpose.xlu2.b32.end [2/2] (short) %v7122_v59, 128  ;;  %v7495_v59 = vld [vmem:[%s8782_s2] ss:$0 sm:$0xff] }
  0xbd   : > { %v6956_v17 = vpop.trf.xlu0  ;;  %v7460_v4 = vpop.trf.xlu1 }
  0xbe   : > { %v6960_v18 = vunpack.i.h.bf16 %v6956_v17  ;;  %v6957_v19 = vunpack.i.l.bf16 %v6956_v17  ;;  %v7041_v51 = vunpack.i.l.bf16 %v7460_v4 }
  0xc5   : > { %v6961_v20 = vpop.trf.xlu0  ;;  %v7045_v12 = vpop.trf.xlu1 }
  0xc6   : > { %v6965_v21 = vunpack.i.h.bf16 %v6961_v20  ;;  %v6962_v22 = vunpack.i.l.bf16 %v6961_v20  ;;  %v7049_v52 = vunpack.i.h.bf16 %v7045_v12  ;;  %v7046_v53 = vunpack.i.l.bf16 %v7045_v12 }
  0xc8   : > { %v603_v23 = vpack.c.bf16 %v6962_v22, %v6957_v19  ;;  %v7433_v24 = vpack.c.bf16 %v6965_v21, %v6960_v18  ;;  %v6836_v18 = vld [vmem:[%s8783_s3 + $0x18] sm:$0xff]  ;;  %v643_v58 = vpack.c.bf16 %v7046_v53, %v7041_v51  ;;  %v6775_v51 = vld [vmem:[#allocation3 + $0x188] sm:$0xf]  ;;  %v346_v53 = vunpack.c.h.bf16 %v7454_v56 }
  0xc9   : > { %1626 = vmatpush.bf16.msra.mxu1 %v6836_v18  ;;  %6902 = vmatpush.bf16.msra.mxu2 %v6836_v18 }
  0xca   : > { %6429 = vmatmul.msk.bf16.vlgmr.msra.gmra.mxu0 %vm679_vm0, %v603_v23  ;;  %v6835_v23 = vld [vmem:[%s8783_s3 + $0x10] sm:$0xff] }
  0xcd   : > { %v6966_v25 = vpop.trf.xlu0  ;;  %v7464_v14 = vpop.trf.xlu1  ;;  %1627 = vmatpush.bf16.msra.mxu1 %v6835_v23  ;;  %6903 = vmatpush.bf16.msra.mxu2 %v6835_v23 }
  0xce   : > { %v6970_v26 = vunpack.i.h.bf16 %v6966_v25  ;;  %v6967_v27 = vunpack.i.l.bf16 %v6966_v25 }
  0xd5   : > { %v6971_v28 = vpop.trf.xlu0  ;;  %v7474_v25 = vpop.trf.xlu1 }
  0xd6   : > { %v6975_v29 = vunpack.i.h.bf16 %v6971_v28  ;;  %v6972_v30 = vunpack.i.l.bf16 %v6971_v28  ;;  %v6833_v28 = vld [vmem:[%s8783_s3] sm:$0xff] }
  0xd8   : > { %v604_v31 = vpack.c.bf16 %v6972_v30, %v6967_v27  ;;  %v636_v32 = vpack.c.bf16 %v6975_v29, %v6970_v26  ;;  %v6834_v27 = vld [vmem:[%s8783_s3 + $0x8] sm:$0xff] }
  0xd9   : > { %1628 = vmatpush.bf16.msra.mxu1 %v6834_v27  ;;  %6904 = vmatpush.bf16.msra.mxu2 %v6834_v27  ;;  %v6807_v29 = vld [vmem:[#allocation3 + $0x1c8] sm:$0xf] }
  0xda   : > { %6430 = vmatmul.msk.bf16.gmra.mxu0 %vm679_vm0, %v604_v31  ;;  %6462 = vmatmul.msk.bf16.vlgmr.msra.gmra.mxu3 %vm679_vm0, %v636_v32  ;;  %v6898_v30 = vld [vmem:[#allocation3 + $0x1e4] sm:$0xf0] }
  0xdb   : > { %v6808_v32 = vor.u32 %v6898_v30, %v6807_v29 }
  0xdd   : > { %v6976_v33 = vpop.trf.xlu0  ;;  %v7482_v31 = vpop.trf.xlu1  ;;  %1629 = vmatpush.bf16.msra.mxu1 %v6833_v28  ;;  %6905 = vmatpush.bf16.msra.mxu2 %v6833_v28 }
  0xde   : > { %v6980_v34 = vunpack.i.h.bf16 %v6976_v33  ;;  %v6977_v35 = vunpack.i.l.bf16 %v6976_v33  ;;  %3185 = vmatpush.bf16.msrb.mxu0 %v6808_v32 }
  0xe5   : > { %v6981_v36 = vpop.trf.xlu0 }
  0xe6   : > { %v6985_v37 = vunpack.i.h.bf16 %v6981_v36  ;;  %v6982_v38 = vunpack.i.l.bf16 %v6981_v36 }
  0xe8   : > { %v605_v39 = vpack.c.bf16 %v6982_v38, %v6977_v35  ;;  %v637_v40 = vpack.c.bf16 %v6985_v37, %v6980_v34 }
  0xea   : > { %6431 = vmatmul.msk.bf16.gmra.mxu0 %vm679_vm0, %v605_v39  ;;  %6463 = vmatmul.msk.bf16.gmra.mxu3 %vm679_vm0, %v637_v40  ;;  %v6893_v40 = vld [vmem:[#allocation3 + $0x1c4] sm:$0xf] }
  0xed   : > { %v6986_v41 = vpop.trf.xlu0 }
  0xee   : > { %v6990_v42 = vunpack.i.h.bf16 %v6986_v41  ;;  %v6987_v43 = vunpack.i.l.bf16 %v6986_v41  ;;  %v6801_v41 = vld [vmem:[#allocation3 + $0x1e0] sm:$0xf0] }
  0xf5   : > { %v6991_v44 = vpop.trf.xlu0 }
  0xf6   : > { %v6995_v45 = vunpack.i.h.bf16 %v6991_v44  ;;  %v6992_v46 = vunpack.i.l.bf16 %v6991_v44  ;;  %v6894_v44 = vld [vmem:[#allocation3 + $0x1cc] sm:$0xf] }
  0xf8   : > { %v606_v49 = vpack.c.bf16 %v6992_v46, %v6987_v43  ;;  %v638_v50 = vpack.c.bf16 %v6995_v45, %v6990_v42  ;;  %v7486_v42 = vpop.trf.xlu1  ;;  %v6804_v43 = vor.u32 %v6893_v40, %v6801_v41  ;;  %v6809_v45 = vld [vmem:[#allocation3 + $0x1e8] sm:$0xf0]  ;;  %v334_v40 = vunpack.c.h.bf16 %v7441_v47 }
  0xf9   : > { %v6812_v46 = vor.u32 %v6894_v44, %v6809_v45  ;;  %v7069_v23 = vunpack.i.h.bf16 %v7486_v42  ;;  %v338_v41 = vunpack.c.h.bf16 %v7444_v48  ;;  %v342_v45 = vunpack.c.h.bf16 %v7451_v55 }
  0xfa   : > { %6432 = vmatmul.msk.bf16.gmra.mxu0 %vm679_vm0, %v606_v49  ;;  %6464 = vmatmul.msk.bf16.gmra.mxu3 %vm679_vm0, %v638_v50  ;;  %v7044_v50 = vunpack.i.h.bf16 %v7460_v4 }
  0xfb   : > { %2856 = vmatpush.bf16.msrb.mxu3 %v6804_v43  ;;  %3514 = vmatpush.bf16.msrb.mxu1 %v6812_v46  ;;  %v7204_v44 = vpack.i.bf16 %v334_v40, %v338_v41 }
  0xfc   : > { %v611_v57 = vpack.c.bf16 %v7049_v52, %v7044_v50  ;;  %v6890_v52 = vld [vmem:[#allocation3 + $0x1a4] sm:$0xf0] }
  0xfd   : > { %v6996_v54 = vpop.trf.xlu0  ;;  %7205 = vxpose.xlu0.b32.start [1/2] (short) %v7204_v44, 128  ;;  %v6776_v47 = vor.u32 %v6890_v52, %v6775_v51 }
  0xfe   : > { %v7000_v60 = vunpack.i.h.bf16 %v6996_v54  ;;  %v6997_v61 = vunpack.i.l.bf16 %v6996_v54 }
  0xff   : > { %3186 = vmatpush.bf16.msrb.mxu0 %v6776_v47  ;;  %v7573_v47 = vpop.trf.xlu2 }
 0x100   : > { %v7488_v49 = vpop.trf.xlu1 }
 0x105   : > { %v7001_v62 = vpop.trf.xlu0 }
 0x106   : > { %v7005_v63 = vunpack.i.h.bf16 %v7001_v62  ;;  %v7002_v0 = vunpack.i.l.bf16 %v7001_v62 }
 0x108   : > { %v607_v1 = vpack.c.bf16 %v7002_v0, %v6997_v61  ;;  %v639_v2 = vpack.c.bf16 %v7005_v63, %v7000_v60  ;;  %v6799_v60 = vld [vmem:[#allocation3 + $0x1c0] sm:$0xf]  ;;  %v7499_v62 = vpop.trf.xlu1 }
 0x109   : > { %v6897_v61 = vld [vmem:[#allocation3 + $0x1dc] sm:$0xf0]  ;;  %v7079_v48 = vunpack.i.h.bf16 %v7499_v62 }
 0x10a   : > { %6433 = vmatmul.msk.bf16.gmra.mxu0 %vm679_vm0, %v607_v1  ;;  %6465 = vmatmul.msk.bf16.gmra.mxu3 %vm679_vm0, %v639_v2  ;;  %v6800_v63 = vor.u32 %v6897_v61, %v6799_v60 }
 0x10c   : > { %2527 = vmatpush.bf16.msrb.mxu2 %v6800_v63 }
 0x10d   : > { %v7006_v3 = vpop.trf.xlu0 }
 0x10e   : > { %v7010_v5 = vunpack.i.h.bf16 %v7006_v3  ;;  %v7007_v6 = vunpack.i.l.bf16 %v7006_v3 }
 0x115   : > { %v7011_v7 = vpop.trf.xlu0 }
 0x116   : > { %v7015_v8 = vunpack.i.h.bf16 %v7011_v7  ;;  %v7012_v9 = vunpack.i.l.bf16 %v7011_v7  ;;  %v7059_v7 = vunpack.i.h.bf16 %v7474_v25 }
 0x118   : > { %v608_v10 = vpack.c.bf16 %v7012_v9, %v7007_v6  ;;  %v640_v11 = vpack.c.bf16 %v7015_v8, %v7010_v5  ;;  %v7054_v5 = vunpack.i.h.bf16 %v7464_v14  ;;  %v7051_v6 = vunpack.i.l.bf16 %v7464_v14 }
 0x119   : > { %v7056_v8 = vunpack.i.l.bf16 %v7474_v25  ;;  %v7066_v25 = vunpack.i.l.bf16 %v7486_v42 }
 0x11a   : > { %6434 = vmatmul.msk.bf16.gmra.mxu0 %vm679_vm0, %v608_v10  ;;  %6466 = vmatmul.msk.bf16.gmra.mxu3 %vm679_vm0, %v640_v11  ;;  %v7507_v10 = vpop.trf.xlu1  ;;  %v612_v12 = vpack.c.bf16 %v7059_v7, %v7054_v5  ;;  %v6885_v5 = vld [vmem:[#allocation3 + $0x184] sm:$0xf] }
 0x11d   : > { %v7016_v13 = vpop.trf.xlu0 }
 0x11e   : > { %v7020_v15 = vunpack.i.h.bf16 %v7016_v13  ;;  %v7017_v16 = vunpack.i.l.bf16 %v7016_v13  ;;  %v644_v13 = vpack.c.bf16 %v7056_v8, %v7051_v6  ;;  %v6769_v6 = vld [vmem:[#allocation3 + $0x1a0] sm:$0xf0] }
 0x11f   : > { %v6772_v7 = vor.u32 %v6885_v5, %v6769_v6 }
 0x121   : > { %2857 = vmatpush.bf16.msrb.mxu3 %v6772_v7 }
 0x125   : > { %v7021_v17 = vpop.trf.xlu0 }
 0x126   : > { %v7025_v19 = vunpack.i.h.bf16 %v7021_v17  ;;  %v7022_v20 = vunpack.i.l.bf16 %v7021_v17 }
 0x128   : > { %v609_v21 = vpack.c.bf16 %v7022_v20, %v7017_v16  ;;  %v641_v22 = vpack.c.bf16 %v7025_v19, %v7020_v15  ;;  %v7512_v15 = vpop.trf.xlu1 }
 0x12a   : > { %6435 = vmatmul.msk.bf16.gmra.mxu0 %vm679_vm0, %v609_v21  ;;  %6467 = vmatmul.msk.bf16.gmra.mxu3 %vm679_vm0, %v641_v22  ;;  %v7064_v21 = vunpack.i.h.bf16 %v7482_v31  ;;  %v7061_v22 = vunpack.i.l.bf16 %v7482_v31 }
 0x12d   : > { %v7026_v26 = vpop.trf.xlu0 }
 0x12e   : > { %v7030_v33 = vunpack.i.h.bf16 %v7026_v26  ;;  %v7027_v34 = vunpack.i.l.bf16 %v7026_v26 }
 0x130   : > { %v7521_v28 = vpop.trf.xlu1 }
 0x135   : > { %v7031_v35 = vpop.trf.xlu0 }
 0x136   : > { %v7035_v36 = vunpack.i.h.bf16 %v7031_v35  ;;  %v7032_v37 = vunpack.i.l.bf16 %v7031_v35  ;;  %v613_v35 = vpack.c.bf16 %v7069_v23, %v7064_v21  ;;  %v7086_v23 = vunpack.i.l.bf16 %v7512_v15 }
 0x138   : > { %v610_v38 = vpack.c.bf16 %v7032_v37, %v7027_v34  ;;  %v642_v39 = vpack.c.bf16 %v7035_v36, %v7030_v33  ;;  %v645_v36 = vpack.c.bf16 %v7066_v25, %v7061_v22  ;;  %v7528_v37 = vpop.trf.xlu1  ;;  %v7089_v22 = vunpack.i.h.bf16 %v7512_v15 }
 0x139   : > { %v7099_v51 = vunpack.i.h.bf16 %v7528_v37  ;;  %v7096_v52 = vunpack.i.l.bf16 %v7528_v37 }
 0x13a   : > { %6436 = vmatmul.msk.bf16.gmra.mxu0 %vm679_vm0, %v610_v38  ;;  %6468 = vmatmul.msk.bf16.gmra.mxu3 %vm679_vm0, %v642_v39 }
 0x140   : > { %v7541_v55 = vpop.trf.xlu1 }
 0x141   : > { %v7101_v5 = vunpack.i.l.bf16 %v7541_v55 }
 0x147   : > { %v881_v54 = vpop.f32.mrf.mxu0 }
 0x148   : > { %v882_v0 = vadd.f32 %v7495_v59, %v881_v54  ;;  %v7074_v54 = vunpack.i.h.bf16 %v7488_v49  ;;  %v7548_v8 = vpop.trf.xlu1 }
 0x149   : > { %v7109_v6 = vunpack.i.h.bf16 %v7548_v8  ;;  %v7106_v7 = vunpack.i.l.bf16 %v7548_v8 }
 0x14a   : > { %6437 = vmatmul.msk.bf16.gmra.mxu0 %vm679_vm0, %v611_v57  ;;  %6469 = vmatmul.msk.bf16.gmra.mxu3 %vm679_vm0, %v643_v58  ;;  %v1201_v3 = vmax.f32 %v882_v0, 0.0  ;;  %v7071_v57 = vunpack.i.l.bf16 %v7488_v49  ;;  %v7076_v58 = vunpack.i.l.bf16 %v7499_v62 }
 0x14f   : > { %v883_v1 = vpop.f32.mrf.mxu0 }
 0x150   : > { %v884_v2 = vadd.f32 %v7495_v59, %v883_v1  ;;  %v7206_v1 = vpack.i.bf16 %v342_v45, %v346_v53 }
 0x152   : > { %v1202_v4 = vmax.f32 %v884_v2, 0.0  ;;  %7207 = vxpose.xlu0.b32.end [2/2] (short) %v7206_v1, 128 }
 0x154   : > { %v1329_v9 = vpack.c.bf16 %v1202_v4, %v1201_v3  ;;  %v614_v3 = vpack.c.bf16 %v7079_v48, %v7074_v54  ;;  %v646_v4 = vpack.c.bf16 %v7076_v58, %v7071_v57 }
 0x156   : > { %6509 = vmatmul.msk.bf16.vlgmr.msra.gmra.mxu1 %vm1429_vm1, %v1329_v9 }
 0x157   : > { %v886_v11 = vpop.f32.mrf.mxu0 }
 0x158   : > { %v887_v14 = vadd.f32 %v7495_v59, %v886_v11 }
 0x15a   : > { %6438 = vmatmul.msk.bf16.gmra.mxu0 %vm679_vm0, %v612_v12  ;;  %6470 = vmatmul.msk.bf16.gmra.mxu3 %vm679_vm0, %v644_v13  ;;  %v1203_v19 = vmax.f32 %v887_v14, 0.0 }
 0x15d   : > { %v1046_v16 = vpop.f32.mrf.mxu3 }
 0x15e   : > { %v1047_v26 = vadd.f32 %v7495_v59, %v1046_v16 }
 0x15f   : > { %v888_v17 = vpop.f32.mrf.mxu0 }
 0x160   : > { %v889_v18 = vadd.f32 %v7495_v59, %v888_v17  ;;  %v1267_v33 = vmax.f32 %v1047_v26, 0.0  ;;  %v6886_v17 = vld [vmem:[#allocation3 + $0x18c] sm:$0xf] }
 0x162   : > { %v1204_v20 = vmax.f32 %v889_v18, 0.0  ;;  %v6777_v18 = vld [vmem:[#allocation3 + $0x1a8] sm:$0xf0] }
 0x163   : > { %v6780_v21 = vor.u32 %v6886_v17, %v6777_v18 }
 0x164   : > { %v1330_v27 = vpack.c.bf16 %v1204_v20, %v1203_v19  ;;  %v7084_v19 = vunpack.i.h.bf16 %v7507_v10  ;;  %v7081_v20 = vunpack.i.l.bf16 %v7507_v10 }
 0x165   : > { %v1048_v29 = vpop.f32.mrf.mxu3  ;;  %3515 = vmatpush.bf16.msrb.mxu1 %v6780_v21 }
 0x166   : > { %v1049_v30 = vadd.f32 %v7495_v59, %v1048_v29  ;;  %6510 = vmatmul.msk.bf16.gmra.mxu1 %vm1429_vm1, %v1330_v27  ;;  %v7557_v27 = vpop.trf.xlu1  ;;  %v615_v10 = vpack.c.bf16 %v7089_v22, %v7084_v19 }
 0x167   : > { %v891_v32 = vpop.f32.mrf.mxu0 }
 0x168   : > { %v1268_v34 = vmax.f32 %v1049_v30, 0.0  ;;  %v892_v39 = vadd.f32 %v7495_v59, %v891_v32 }
 0x16a   : > { %6439 = vmatmul.msk.bf16.gmra.mxu0 %vm679_vm0, %v613_v35  ;;  %6471 = vmatmul.msk.bf16.gmra.mxu3 %vm679_vm0, %v645_v36  ;;  %v1362_v31 = vpack.c.bf16 %v1268_v34, %v1267_v33  ;;  %v1205_v46 = vmax.f32 %v892_v39, 0.0  ;;  %v647_v35 = vpack.c.bf16 %v7086_v23, %v7081_v20  ;;  %v6767_v36 = vld [vmem:[#allocation3 + $0x180] sm:$0xf]  ;;  %v649_v20 = vpack.c.bf16 %v7106_v7, %v7101_v5 }
 0x16c   : > { %6542 = vmatmul.msk.bf16.vlgmr.msra.gmra.mxu2 %vm1429_vm1, %v1362_v31  ;;  %v6889_v31 = vld [vmem:[#allocation3 + $0x19c] sm:$0xf0] }
 0x16d   : > { %v1051_v38 = vpop.f32.mrf.mxu3 }
 0x16e   : > { %v1052_v60 = vadd.f32 %v7495_v59, %v1051_v38  ;;  %v6768_v38 = vor.u32 %v6889_v31, %v6767_v36  ;;  %v7564_v39 = vpop.trf.xlu1 }
 0x16f   : > { %v893_v42 = vpop.f32.mrf.mxu0 }
 0x170   : > { %v894_v43 = vadd.f32 %v7495_v59, %v893_v42  ;;  %v1269_v2 = vmax.f32 %v1052_v60, 0.0  ;;  %2528 = vmatpush.bf16.msrb.mxu2 %v6768_v38 }
 0x172   : > { %v1206_v50 = vmax.f32 %v894_v43, 0.0 }
 0x174   : > { %v1331_v61 = vpack.c.bf16 %v1206_v50, %v1205_v46  ;;  %v7094_v46 = vunpack.i.h.bf16 %v7521_v28  ;;  %v7091_v50 = vunpack.i.l.bf16 %v7521_v28 }
 0x175   : > { %v1053_v63 = vpop.f32.mrf.mxu3 }
 0x176   : > { %v1054_v0 = vadd.f32 %v7495_v59, %v1053_v63  ;;  %6511 = vmatmul.msk.bf16.gmra.mxu1 %vm1429_vm1, %v1331_v61  ;;  %v616_v63 = vpack.c.bf16 %v7099_v51, %v7094_v46  ;;  %v6877_v46 = vld [vmem:[#allocation3 + $0x144] sm:$0xf] }
 0x177   : > { %v896_v56 = vpop.f32.mrf.mxu0 }
 0x178   : > { %v1270_v49 = vmax.f32 %v1054_v0, 0.0  ;;  %v897_v11 = vadd.f32 %v7495_v59, %v896_v56  ;;  %v648_v0 = vpack.c.bf16 %v7096_v52, %v7091_v50  ;;  %v7580_v56 = vpop.trf.xlu2  ;;  %v6737_v50 = vld [vmem:[#allocation3 + $0x160] sm:$0xf0] }
 0x179   : > { %v6740_v51 = vor.u32 %v6877_v46, %v6737_v50 }
 0x17a   : > { %6440 = vmatmul.msk.bf16.gmra.mxu0 %vm679_vm0, %v614_v3  ;;  %6472 = vmatmul.msk.bf16.gmra.mxu3 %vm679_vm0, %v646_v4  ;;  %v1363_v62 = vpack.c.bf16 %v1270_v49, %v1269_v2  ;;  %v1207_v16 = vmax.f32 %v897_v11, 0.0 }
 0x17b   : > { %2858 = vmatpush.bf16.msrb.mxu3 %v6740_v51 }
 0x17c   : > { %6543 = vmatmul.msk.bf16.gmra.mxu2 %vm1429_vm1, %v1363_v62  ;;  %v7104_v62 = vunpack.i.h.bf16 %v7541_v55 }
 0x17d   : > { %v1056_v9 = vpop.f32.mrf.mxu3 }
 0x17e   : > { %v1057_v25 = vadd.f32 %v7495_v59, %v1056_v9  ;;  %v617_v19 = vpack.c.bf16 %v7109_v6, %v7104_v62 }
 0x17f   : > { %v898_v12 = vpop.f32.mrf.mxu0 }
 0x180   : > { %v899_v13 = vadd.f32 %v7495_v59, %v898_v12  ;;  %v1271_v33 = vmax.f32 %v1057_v25, 0.0 }
 0x182   : > { %v1208_v14 = vmax.f32 %v899_v13, 0.0  ;;  %v7589_v13 = vpop.trf.xlu2 }
 0x184   : > { %v1332_v26 = vpack.c.bf16 %v1208_v14, %v1207_v16 }
 0x185   : > { %v1058_v29 = vpop.f32.mrf.mxu3 }
 0x186   : > { %v1059_v30 = vadd.f32 %v7495_v59, %v1058_v29  ;;  %6512 = vmatmul.msk.bf16.gmra.mxu1 %vm1429_vm1, %v1332_v26 }
 0x187   : > { %v901_v32 = vpop.f32.mrf.mxu0 }
 0x188   : > { %v1272_v34 = vmax.f32 %v1059_v30, 0.0  ;;  %v902_v41 = vadd.f32 %v7495_v59, %v901_v32  ;;  %v7114_v30 = vunpack.i.h.bf16 %v7557_v27  ;;  %v7111_v32 = vunpack.i.l.bf16 %v7557_v27  ;;  %v6743_v27 = vld [vmem:[#allocation3 + $0x148] sm:$0xf] }
 0x18a   : > { %6441 = vmatmul.msk.bf16.gmra.mxu0 %vm679_vm0, %v615_v10  ;;  %6473 = vmatmul.msk.bf16.gmra.mxu3 %vm679_vm0, %v647_v35  ;;  %v1364_v15 = vpack.c.bf16 %v1272_v34, %v1271_v33  ;;  %v1209_v44 = vmax.f32 %v902_v41, 0.0  ;;  %v7596_v21 = vpop.trf.xlu2  ;;  %v7119_v33 = vunpack.i.h.bf16 %v7564_v39  ;;  %v7116_v34 = vunpack.i.l.bf16 %v7564_v39 }
 0x18c   : > { %6544 = vmatmul.msk.bf16.gmra.mxu2 %vm1429_vm1, %v1364_v15  ;;  %v650_v41 = vpack.c.bf16 %v7116_v34, %v7111_v32 }
 0x18d   : > { %v1061_v40 = vpop.f32.mrf.mxu3 }
 0x18e   : > { %v1062_v53 = vadd.f32 %v7495_v59, %v1061_v40  ;;  %v618_v40 = vpack.c.bf16 %v7119_v33, %v7114_v30  ;;  %v7140_v30 = vunpack.i.l.bf16 %v7596_v21 }
 0x18f   : > { %v903_v42 = vpop.f32.mrf.mxu0 }
 0x190   : > { %v904_v43 = vadd.f32 %v7495_v59, %v903_v42  ;;  %v1273_v60 = vmax.f32 %v1062_v53, 0.0 }
 0x192   : > { %v1210_v45 = vmax.f32 %v904_v43, 0.0  ;;  %v7605_v36 = vpop.trf.xlu2 }
 0x194   : > { %v1333_v54 = vpack.c.bf16 %v1210_v45, %v1209_v44  ;;  %v6882_v44 = vld [vmem:[#allocation3 + $0x164] sm:$0xf0] }
 0x195   : > { %v1063_v57 = vpop.f32.mrf.mxu3  ;;  %v6744_v45 = vor.u32 %v6882_v44, %v6743_v27 }
 0x196   : > { %v1064_v48 = vadd.f32 %v7495_v59, %v1063_v57  ;;  %6513 = vmatmul.msk.bf16.gmra.mxu1 %vm1429_vm1, %v1333_v54 }
 0x197   : > { %v906_v58 = vpop.f32.mrf.mxu0  ;;  %3187 = vmatpush.bf16.msrb.mxu0 %v6744_v45 }
 0x198   : > { %v1274_v61 = vmax.f32 %v1064_v48, 0.0  ;;  %v907_v1 = vadd.f32 %v7495_v59, %v906_v58 }
 0x19a   : > { %6442 = vmatmul.msk.bf16.gmra.mxu0 %vm679_vm0, %v616_v63  ;;  %6474 = vmatmul.msk.bf16.gmra.mxu3 %vm679_vm0, %v648_v0  ;;  %v1365_v28 = vpack.c.bf16 %v1274_v61, %v1273_v60  ;;  %v1211_v3 = vmax.f32 %v907_v1, 0.0  ;;  %v7612_v53 = vpop.trf.xlu2  ;;  %v6878_v61 = vld [vmem:[#allocation3 + $0x14c] sm:$0xf]  ;;  %v7128_v0 = vunpack.i.h.bf16 %v7573_v47  ;;  %v7133_v1 = vunpack.i.h.bf16 %v7580_v56 }
 0x19b   : > { %v6745_v63 = vld [vmem:[#allocation3 + $0x168] sm:$0xf0] }
 0x19c   : > { %6545 = vmatmul.msk.bf16.gmra.mxu2 %vm1429_vm1, %v1365_v28  ;;  %v7125_v28 = vunpack.i.l.bf16 %v7573_v47  ;;  %v619_v47 = vpack.c.bf16 %v7133_v1, %v7128_v0  ;;  %v7150_v0 = vunpack.i.l.bf16 %v7612_v53 }
 0x19d   : > { %v1066_v37 = vpop.f32.mrf.mxu3 }
 0x19e   : > { %v1067_v9 = vadd.f32 %v7495_v59, %v1066_v37  ;;  %v6748_v37 = vor.u32 %v6878_v61, %v6745_v63  ;;  %v7153_v63 = vunpack.i.h.bf16 %v7612_v53 }
 0x19f   : > { %v908_v2 = vpop.f32.mrf.mxu0 }
 0x1a0   : > { %v909_v49 = vadd.f32 %v7495_v59, %v908_v2  ;;  %v1275_v17 = vmax.f32 %v1067_v9, 0.0  ;;  %v7130_v2 = vunpack.i.l.bf16 %v7580_v56  ;;  %3516 = vmatpush.bf16.msrb.mxu1 %v6748_v37 }
 0x1a2   : > { %v1212_v4 = vmax.f32 %v909_v49, 0.0  ;;  %v7621_v62 = vpop.trf.xlu2 }
 0x1a4   : > { %v1334_v11 = vpack.c.bf16 %v1212_v4, %v1211_v3 }
 0x1a5   : > { %v1068_v12 = vpop.f32.mrf.mxu3 }
 0x1a6   : > { %v1069_v16 = vadd.f32 %v7495_v59, %v1068_v12  ;;  %6514 = vmatmul.msk.bf16.gmra.mxu1 %vm1429_vm1, %v1334_v11  ;;  %v651_v11 = vpack.c.bf16 %v7130_v2, %v7125_v28  ;;  %v6735_v12 = vld [vmem:[#allocation3 + $0x140] sm:$0xf] }
 0x1a7   : > { %v911_v14 = vpop.f32.mrf.mxu0 }
 0x1a8   : > { %v1276_v18 = vmax.f32 %v1069_v16, 0.0  ;;  %v912_v22 = vadd.f32 %v7495_v59, %v911_v14  ;;  %v6881_v16 = vld [vmem:[#allocation3 + $0x15c] sm:$0xf0] }
 0x1a9   : > { %v6736_v14 = vor.u32 %v6881_v16, %v6735_v12 }
 0x1aa   : > { %6443 = vmatmul.msk.bf16.gmra.mxu0 %vm679_vm0, %v617_v19  ;;  %6475 = vmatmul.msk.bf16.gmra.mxu3 %vm679_vm0, %v649_v20  ;;  %v1366_v55 = vpack.c.bf16 %v1276_v18, %v1275_v17  ;;  %v1213_v26 = vmax.f32 %v912_v22, 0.0  ;;  %v7628_v18 = vpop.trf.xlu2 }
 0x1ab   : > { %2529 = vmatpush.bf16.msrb.mxu2 %v6736_v14 }
 0x1ac   : > { %6546 = vmatmul.msk.bf16.gmra.mxu2 %vm1429_vm1, %v1366_v55 }
 0x1ad   : > { %v1071_v8 = vpop.f32.mrf.mxu3 }
 0x1ae   : > { %v1072_v10 = vadd.f32 %v7495_v59, %v1071_v8 }
 0x1af   : > { %v913_v23 = vpop.f32.mrf.mxu0 }
 0x1b0   : > { %v914_v25 = vadd.f32 %v7495_v59, %v913_v23  ;;  %v1277_v42 = vmax.f32 %v1072_v10, 0.0  ;;  %v7138_v23 = vunpack.i.h.bf16 %v7589_v13 }
 0x1b2   : > { %v1214_v29 = vmax.f32 %v914_v25, 0.0  ;;  %v7135_v25 = vunpack.i.l.bf16 %v7589_v13  ;;  %v7637_v10 = vpop.trf.xlu2 }
 0x1b4   : > { %v1335_v35 = vpack.c.bf16 %v1214_v29, %v1213_v26  ;;  %v7143_v29 = vunpack.i.h.bf16 %v7596_v21  ;;  %v652_v21 = vpack.c.bf16 %v7140_v30, %v7135_v25  ;;  %v7163_v25 = vunpack.i.h.bf16 %v7628_v18 }
 0x1b5   : > { %v1073_v15 = vpop.f32.mrf.mxu3  ;;  %v7160_v30 = vunpack.i.l.bf16 %v7628_v18 }
 0x1b6   : > { %v1074_v31 = vadd.f32 %v7495_v59, %v1073_v15  ;;  %6515 = vmatmul.msk.bf16.gmra.mxu1 %vm1429_vm1, %v1335_v35  ;;  %v7642_v35 = vld [vmem:[%s8784_s4] ss:$0 sm:$0xff] }
 0x1b7   : > { %v916_v38 = vpop.f32.mrf.mxu0 }
 0x1b8   : > { %v1278_v43 = vmax.f32 %v1074_v31, 0.0  ;;  %v917_v54 = vadd.f32 %v7495_v59, %v916_v38 }
 0x1ba   : > { %6444 = vmatmul.msk.bf16.gmra.mxu0 %vm679_vm0, %v618_v40  ;;  %6476 = vmatmul.msk.bf16.gmra.mxu3 %vm679_vm0, %v650_v41  ;;  %v1367_v39 = vpack.c.bf16 %v1278_v43, %v1277_v42  ;;  %v1215_v58 = vmax.f32 %v917_v54, 0.0  ;;  %v620_v40 = vpack.c.bf16 %v7143_v29, %v7138_v23  ;;  %v7651_v45 = vpop.trf.xlu2  ;;  %v7158_v23 = vunpack.i.h.bf16 %v7621_v62 }
 0x1bb   : > { %v7155_v29 = vunpack.i.l.bf16 %v7621_v62 }
 0x1bc   : > { %6547 = vmatmul.msk.bf16.gmra.mxu2 %vm1429_vm1, %v1367_v39 }
 0x1bd   : > { %v1076_v52 = vpop.f32.mrf.mxu3  ;;  %v654_v18 = vpack.c.bf16 %v7160_v30, %v7155_v29 }
 0x1be   : > { %v1077_v49 = vadd.f32 %v7495_v59, %v1076_v52 }
 0x1bf   : > { %v918_v57 = vpop.f32.mrf.mxu0 }
 0x1c0   : > { %v919_v48 = vadd.f32 %v7495_v59, %v918_v57  ;;  %v1279_v7 = vmax.f32 %v1077_v49, 0.0 }
 0x1c2   : > { %v1216_v60 = vmax.f32 %v919_v48, 0.0  ;;  %v7662_v2 = vpop.trf.xlu2 }
 0x1c4   : > { %v1336_v3 = vpack.c.bf16 %v1216_v60, %v1215_v58  ;;  %v7148_v58 = vunpack.i.h.bf16 %v7605_v36  ;;  %v7145_v60 = vunpack.i.l.bf16 %v7605_v36 }
 0x1c5   : > { %v1078_v4 = vpop.f32.mrf.mxu3 }
 0x1c6   : > { %v1079_v5 = vadd.f32 %v7495_v59, %v1078_v4  ;;  %6516 = vmatmul.msk.bf16.gmra.mxu1 %vm1429_vm1, %v1336_v3  ;;  %v653_v36 = vpack.c.bf16 %v7150_v0, %v7145_v60  ;;  %v6874_v60 = vld [vmem:[#allocation3 + $0x124] sm:$0xf0] }
 0x1c7   : > { %v921_v6 = vpop.f32.mrf.mxu0 }
 0x1c8   : > { %v1280_v9 = vmax.f32 %v1079_v5, 0.0  ;;  %v922_v19 = vadd.f32 %v7495_v59, %v921_v6  ;;  %v621_v6 = vpack.c.bf16 %v7153_v63, %v7148_v58  ;;  %v6711_v58 = vld [vmem:[#allocation3 + $0x108] sm:$0xf] }
 0x1c9   : > { %v6712_v63 = vor.u32 %v6874_v60, %v6711_v58  ;;  %v7178_v60 = vunpack.i.h.bf16 %v7662_v2 }
 0x1ca   : > { %6445 = vmatmul.msk.bf16.gmra.mxu0 %vm679_vm0, %v619_v47  ;;  %6477 = vmatmul.msk.bf16.gmra.mxu3 %vm679_vm0, %v651_v11  ;;  %v1368_v56 = vpack.c.bf16 %v1280_v9, %v1279_v7  ;;  %v1217_v8 = vmax.f32 %v922_v19, 0.0 }
 0x1cb   : > { %3188 = vmatpush.bf16.msrb.mxu0 %v6712_v63 }
 0x1cc   : > { %6548 = vmatmul.msk.bf16.gmra.mxu2 %vm1429_vm1, %v1368_v56  ;;  %v7671_v56 = vpop.trf.xlu2 }
 0x1cd   : > { %v1081_v17 = vpop.f32.mrf.mxu3 }
 0x1ce   : > { %v1082_v32 = vadd.f32 %v7495_v59, %v1081_v17 }
 0x1cf   : > { %v923_v20 = vpop.f32.mrf.mxu0 }
 0x1d0   : > { %v924_v55 = vadd.f32 %v7495_v59, %v923_v20  ;;  %v1281_v31 = vmax.f32 %v1082_v32, 0.0 }
 0x1d2   : > { %v1218_v22 = vmax.f32 %v924_v55, 0.0 }
 0x1d3   : > { %v1631_v26 = vpop.f32.mrf.mxu1 }
 0x1d4   : > { %v1337_v33 = vpack.c.bf16 %v1218_v22, %v1217_v8  ;;  %v1632_v41 = vadd.f32 %v7642_v35, %v1631_v26 }
 0x1d5   : > { %v1083_v34 = vpop.f32.mrf.mxu3 }
 0x1d6   : > { %v1084_v15 = vadd.f32 %v7495_v59, %v1083_v34  ;;  %6517 = vmatmul.msk.bf16.gmra.mxu1 %vm1429_vm1, %v1337_v33  ;;  %v1951_v39 = vmax.f32 %v1632_v41, 0.0 }
 0x1d7   : > { %v926_v13 = vpop.f32.mrf.mxu0 }
 0x1d8   : > { %v1282_v38 = vmax.f32 %v1084_v15, 0.0  ;;  %v927_v46 = vadd.f32 %v7495_v59, %v926_v13  ;;  %v7682_v15 = vpop.trf.xlu2 }
 0x1da   : > { %6446 = vmatmul.msk.bf16.gmra.mxu0 %vm679_vm0, %v620_v40  ;;  %6478 = vmatmul.msk.bf16.gmra.mxu3 %vm679_vm0, %v652_v21  ;;  %v1369_v42 = vpack.c.bf16 %v1282_v38, %v1281_v31  ;;  %v1219_v57 = vmax.f32 %v927_v46, 0.0  ;;  %v622_v21 = vpack.c.bf16 %v7163_v25, %v7158_v23 }
 0x1db   : > { %v1633_v43 = vpop.f32.mrf.mxu1 }
 0x1dc   : > { %v1634_v27 = vadd.f32 %v7642_v35, %v1633_v43  ;;  %6549 = vmatmul.msk.bf16.gmra.mxu2 %vm1429_vm1, %v1369_v42  ;;  %v6869_v43 = vld [vmem:[#allocation3 + $0x104] sm:$0xf] }
 0x1dd   : > { %v1086_v44 = vpop.f32.mrf.mxu3 }
 0x1de   : > { %v1952_v50 = vmax.f32 %v1634_v27, 0.0  ;;  %v1087_v28 = vadd.f32 %v7495_v59, %v1086_v44  ;;  %v6705_v27 = vld [vmem:[#allocation3 + $0x120] sm:$0xf0] }
 0x1df   : > { %v928_v51 = vpop.f32.mrf.mxu0  ;;  %v6708_v44 = vor.u32 %v6869_v43, %v6705_v27 }
 0x1e0   : > { %v7654_v52 = vpack.c.bf16 %v1952_v50, %v1951_v39  ;;  %v929_v54 = vadd.f32 %v7495_v59, %v928_v51  ;;  %v1283_v4 = vmax.f32 %v1087_v28, 0.0  ;;  %v7695_v0 = vpop.trf.xlu2 }
 0x1e1   : > { %2859 = vmatpush.bf16.msrb.mxu3 %v6708_v44 }
 0x1e2   : > { %8864 = vst [vmem:[#allocation6_spill] sm:$0xff] %v7654_v52  ;;  %v1220_v48 = vmax.f32 %v929_v54, 0.0 }
 0x1e3   : > { %v1636_v61 = vpop.f32.mrf.mxu1 }
 0x1e4   : > { %v1338_v37 = vpack.c.bf16 %v1220_v48, %v1219_v57  ;;  %v1637_v7 = vadd.f32 %v7642_v35, %v1636_v61 }
 0x1e5   : > { %v1088_v1 = vpop.f32.mrf.mxu3 }
 0x1e6   : > { %v1089_v49 = vadd.f32 %v7495_v59, %v1088_v1  ;;  %6518 = vmatmul.msk.bf16.gmra.mxu1 %vm1429_vm1, %v1338_v37  ;;  %v1953_v12 = vmax.f32 %v1637_v7, 0.0  ;;  %v7168_v7 = vunpack.i.h.bf16 %v7637_v10 }
 0x1e7   : > { %v931_v3 = vpop.f32.mrf.mxu0 }
 0x1e8   : > { %v1284_v5 = vmax.f32 %v1089_v49, 0.0  ;;  %v932_v16 = vadd.f32 %v7495_v59, %v931_v3 }
 0x1ea   : > { %6447 = vmatmul.msk.bf16.gmra.mxu0 %vm679_vm0, %v621_v6  ;;  %6479 = vmatmul.msk.bf16.gmra.mxu3 %vm679_vm0, %v653_v36  ;;  %v1370_v53 = vpack.c.bf16 %v1284_v5, %v1283_v4  ;;  %v1221_v8 = vmax.f32 %v932_v16, 0.0 }
 0x1eb   : > { %v1638_v9 = vpop.f32.mrf.mxu1 }
 0x1ec   : > { %v1639_v47 = vadd.f32 %v7642_v35, %v1638_v9  ;;  %6550 = vmatmul.msk.bf16.gmra.mxu2 %vm1429_vm1, %v1370_v53  ;;  %v7173_v53 = vunpack.i.h.bf16 %v7651_v45 }
 0x1ed   : > { %v1091_v11 = vpop.f32.mrf.mxu3 }
 0x1ee   : > { %v1954_v14 = vmax.f32 %v1639_v47, 0.0  ;;  %v1092_v32 = vadd.f32 %v7495_v59, %v1091_v11  ;;  %v7165_v47 = vunpack.i.l.bf16 %v7637_v10  ;;  %v7170_v11 = vunpack.i.l.bf16 %v7651_v45 }
 0x1ef   : > { %v933_v17 = vpop.f32.mrf.mxu0  ;;  %v1796_v19 = vpop.f32.mrf.mxu2 }
 0x1f0   : > { %v7674_v20 = vpack.c.bf16 %v1954_v14, %v1953_v12  ;;  %v934_v55 = vadd.f32 %v7495_v59, %v933_v17  ;;  %v1797_v13 = vadd.f32 %v7642_v35, %v1796_v19  ;;  %v1285_v41 = vmax.f32 %v1092_v32, 0.0  ;;  %v7706_v17 = vpop.trf.xlu2 }
 0x1f1   : > { %v655_v32 = vpack.c.bf16 %v7170_v11, %v7165_v47 }
 0x1f2   : > { %8865 = vst [vmem:[#allocation7_spill] sm:$0xff] %v7674_v20  ;;  %v1222_v22 = vmax.f32 %v934_v55, 0.0  ;;  %v2017_v39 = vmax.f32 %v1797_v13, 0.0 }
 0x1f3   : > { %v1641_v26 = vpop.f32.mrf.mxu1 }
 0x1f4   : > { %v1339_v33 = vpack.c.bf16 %v1222_v22, %v1221_v8  ;;  %v1642_v46 = vadd.f32 %v7642_v35, %v1641_v26  ;;  %v6870_v8 = vld [vmem:[#allocation3 + $0x10c] sm:$0xf]  ;;  %v623_v26 = vpack.c.bf16 %v7173_v53, %v7168_v7 }
 0x1f5   : > { %v1093_v34 = vpop.f32.mrf.mxu3  ;;  %v6713_v22 = vld [vmem:[#allocation3 + $0x128] sm:$0xf0] }
 0x1f6   : > { %v1094_v31 = vadd.f32 %v7495_v59, %v1093_v34  ;;  %6519 = vmatmul.msk.bf16.gmra.mxu1 %vm1429_vm1, %v1339_v33  ;;  %v1955_v28 = vmax.f32 %v1642_v46, 0.0  ;;  %v6716_v10 = vor.u32 %v6870_v8, %v6713_v22 }
 0x1f7   : > { %v936_v38 = vpop.f32.mrf.mxu0  ;;  %v1798_v40 = vpop.f32.mrf.mxu2 }
 0x1f8   : > { %v1286_v42 = vmax.f32 %v1094_v31, 0.0  ;;  %v1799_v62 = vadd.f32 %v7642_v35, %v1798_v40  ;;  %v937_v37 = vadd.f32 %v7495_v59, %v936_v38  ;;  %3517 = vmatpush.bf16.msrb.mxu1 %v6716_v10  ;;  %v6703_v38 = vld [vmem:[#allocation3 + $0x100] sm:$0xf]  ;;  %v7719_v43 = vpop.trf.xlu2 }
 0x1f9   : > { %v6873_v40 = vld [vmem:[#allocation3 + $0x11c] sm:$0xf0] }
 0x1fa   : > { %v2018_v50 = vmax.f32 %v1799_v62, 0.0  ;;  %6448 = vmatmul.msk.bf16.gmra.mxu0 %vm679_vm0, %v622_v21  ;;  %6480 = vmatmul.msk.bf16.gmra.mxu3 %vm679_vm0, %v654_v18  ;;  %v1371_v51 = vpack.c.bf16 %v1286_v42, %v1285_v41  ;;  %v1223_v6 = vmax.f32 %v937_v37, 0.0  ;;  %v6704_v41 = vor.u32 %v6873_v40, %v6703_v38 }
 0x1fb   : > { %v1643_v54 = vpop.f32.mrf.mxu1  ;;  %v7180_v37 = vunpack.i.l.bf16 %v7671_v56  ;;  %v7193_v38 = vunpack.i.h.bf16 %v7695_v0 }
 0x1fc   : > { %v7691_v57 = vpack.c.bf16 %v2018_v50, %v2017_v39  ;;  %v1644_v48 = vadd.f32 %v7642_v35, %v1643_v54  ;;  %6551 = vmatmul.msk.bf16.gmra.mxu2 %vm1429_vm1, %v1371_v51 }
 0x1fd   : > { %v1096_v61 = vpop.f32.mrf.mxu3  ;;  %2530 = vmatpush.bf16.msrb.mxu2 %v6704_v41  ;;  %v7190_v41 = vunpack.i.l.bf16 %v7695_v0 }
 0x1fe   : > { %v1956_v1 = vmax.f32 %v1644_v48, 0.0  ;;  %v1097_v12 = vadd.f32 %v7495_v59, %v1096_v61  ;;  %v7183_v61 = vunpack.i.h.bf16 %v7671_v56 }
 0x1ff   : > { %v938_v49 = vpop.f32.mrf.mxu0  ;;  %v1801_v3 = vpop.f32.mrf.mxu2 }
 0x200   : > { %v7698_v4 = vpack.c.bf16 %v1956_v1, %v1955_v28  ;;  %v939_v5 = vadd.f32 %v7495_v59, %v938_v49  ;;  %v1802_v19 = vadd.f32 %v7642_v35, %v1801_v3  ;;  %v1287_v29 = vmax.f32 %v1097_v12, 0.0  ;;  %v7734_v12 = vpop.trf.xlu0 }
 0x201   : > { %v7175_v28 = vunpack.i.l.bf16 %v7662_v2  ;;  %v624_v53 = vpack.c.bf16 %v7183_v61, %v7178_v60 }
 0x202   : > { %8866 = vst [vmem:[#allocation8_spill] sm:$0xff] %v7698_v4  ;;  %v1224_v36 = vmax.f32 %v939_v5, 0.0  ;;  %v2019_v33 = vmax.f32 %v1802_v19, 0.0 }
 0x203   : > { %v1646_v9 = vpop.f32.mrf.mxu1  ;;  %v656_v2 = vpack.c.bf16 %v7180_v37, %v7175_v28 }
 0x204   : > { %v1340_v16 = vpack.c.bf16 %v1224_v36, %v1223_v6  ;;  %v1647_v34 = vadd.f32 %v7642_v35, %v1646_v9 }
 0x205   : > { %v1098_v14 = vpop.f32.mrf.mxu3 }
 0x206   : > { %v1099_v55 = vadd.f32 %v7495_v59, %v1098_v14  ;;  %6520 = vmatmul.msk.bf16.gmra.mxu1 %vm1429_vm1, %v1340_v16  ;;  %v1957_v27 = vmax.f32 %v1647_v34, 0.0 }
 0x207   : > { %v941_v23 = vpop.f32.mrf.mxu0  ;;  %v1803_v25 = vpop.f32.mrf.mxu2 }
 0x208   : > { %v1288_v45 = vmax.f32 %v1099_v55, 0.0  ;;  %v1804_v30 = vadd.f32 %v7642_v35, %v1803_v25  ;;  %v942_v44 = vadd.f32 %v7495_v59, %v941_v23 }
 0x20a   : > { %v2020_v13 = vmax.f32 %v1804_v30, 0.0  ;;  %6449 = vmatmul.msk.bf16.gmra.mxu0 %vm679_vm0, %v623_v26  ;;  %6481 = vmatmul.msk.bf16.gmra.mxu3 %vm679_vm0, %v655_v32  ;;  %v1372_v31 = vpack.c.bf16 %v1288_v45, %v1287_v29  ;;  %v1225_v48 = vmax.f32 %v942_v44, 0.0 }
 0x20b   : > { %v1648_v21 = vpop.f32.mrf.mxu1 }
 0x20c   : > { %v7715_v42 = vpack.c.bf16 %v2020_v13, %v2019_v33  ;;  %v1649_v62 = vadd.f32 %v7642_v35, %v1648_v21  ;;  %6552 = vmatmul.msk.bf16.gmra.mxu2 %vm1429_vm1, %v1372_v31  ;;  %v7747_v33 = vpop.trf.xlu0  ;;  %v7188_v31 = vunpack.i.h.bf16 %v7682_v15  ;;  %v7185_v21 = vunpack.i.l.bf16 %v7682_v15 }
 0x20d   : > { %v1101_v18 = vpop.f32.mrf.mxu3 }
 0x20e   : > { %v1958_v39 = vmax.f32 %v1649_v62, 0.0  ;;  %v1102_v1 = vadd.f32 %v7495_v59, %v1101_v18  ;;  %v7756_v62 = vld [vmem:[%s8782_s2] ss:$0 sm:$0xff]  ;;  %v625_v15 = vpack.c.bf16 %v7193_v38, %v7188_v31 }
 0x20f   : > { %v943_v46 = vpop.f32.mrf.mxu0  ;;  %v1806_v50 = vpop.f32.mrf.mxu2 }
 0x210   : > { %v7722_v51 = vpack.c.bf16 %v1958_v39, %v1957_v27  ;;  %v944_v54 = vadd.f32 %v7495_v59, %v943_v46  ;;  %v1807_v5 = vadd.f32 %v7642_v35, %v1806_v50  ;;  %v1289_v9 = vmax.f32 %v1102_v1, 0.0 }
 0x212   : > { %8867 = vst [vmem:[#allocation9_spill] sm:$0xff] %v7722_v51  ;;  %v1226_v58 = vmax.f32 %v944_v54, 0.0  ;;  %v2021_v56 = vmax.f32 %v1807_v5, 0.0 }
 0x213   : > { %v1651_v63 = vpop.f32.mrf.mxu1 }
 0x214   : > { %v1341_v49 = vpack.c.bf16 %v1226_v58, %v1225_v48  ;;  %v1652_v16 = vadd.f32 %v7642_v35, %v1651_v63  ;;  %v657_v58 = vpack.c.bf16 %v7190_v41, %v7185_v21  ;;  %v7763_v60 = vpop.trf.xlu0 }
 0x215   : > { %v1103_v3 = vpop.f32.mrf.mxu3 }
 0x216   : > { %v1104_v6 = vadd.f32 %v7495_v59, %v1103_v3  ;;  %6521 = vmatmul.msk.bf16.gmra.mxu1 %vm1429_vm1, %v1341_v49  ;;  %v1959_v25 = vmax.f32 %v1652_v16, 0.0 }
 0x217   : > { %v946_v36 = vpop.f32.mrf.mxu0  ;;  %v1808_v7 = vpop.f32.mrf.mxu2 }
 0x218   : > { %v1290_v47 = vmax.f32 %v1104_v6, 0.0  ;;  %v1809_v11 = vadd.f32 %v7642_v35, %v1808_v7  ;;  %v947_v26 = vadd.f32 %v7495_v59, %v946_v36 }
 0x21a   : > { %v2022_v14 = vmax.f32 %v1809_v11, 0.0  ;;  %6450 = vmatmul.msk.bf16.gmra.mxu0 %vm679_vm0, %v624_v53  ;;  %6482 = vmatmul.msk.bf16.gmra.mxu3 %vm679_vm0, %v656_v2  ;;  %v1373_v19 = vpack.c.bf16 %v1290_v47, %v1289_v9  ;;  %v1227_v34 = vmax.f32 %v947_v26, 0.0 }
 0x21b   : > { %v1653_v55 = vpop.f32.mrf.mxu1 }
 0x21c   : > { %v7739_v8 = vpack.c.bf16 %v2022_v14, %v2021_v56  ;;  %v1654_v22 = vadd.f32 %v7642_v35, %v1653_v55  ;;  %6553 = vmatmul.msk.bf16.gmra.mxu2 %vm1429_vm1, %v1373_v19  ;;  %v7776_v2 = vpop.trf.xlu0  ;;  %v7198_v14 = vunpack.i.h.bf16 %v7706_v17  ;;  %v7203_v19 = vunpack.i.h.bf16 %v7719_v43 }
 0x21d   : > { %v1106_v23 = vpop.f32.mrf.mxu3 }
 0x21e   : > { %v1960_v10 = vmax.f32 %v1654_v22, 0.0  ;;  %v7195_v22 = vunpack.i.l.bf16 %v7706_v17 }
 0x21f   : > { %v948_v29 = vpop.f32.mrf.mxu0  ;;  %v1811_v45 = vpop.f32.mrf.mxu2 }
 0x220   : > { %v7744_v30 = vpack.c.bf16 %v1960_v10, %v1959_v25  ;;  %v949_v32 = vadd.f32 %v7495_v59, %v948_v29  ;;  %v1107_v59 = vadd.f32 %v7756_v62, %v1106_v23  ;;  %v1812_v44 = vadd.f32 %v7642_v35, %v1811_v45 }
 0x221   : > { %v7200_v23 = vunpack.i.l.bf16 %v7719_v43 }
 0x222   : > { %8868 = vst [vmem:[#allocation10_spill] sm:$0xff] %v7744_v30  ;;  %v1228_v13 = vmax.f32 %v949_v32, 0.0  ;;  %v1291_v54 = vmax.f32 %v1107_v59, 0.0  ;;  %v2023_v61 = vmax.f32 %v1812_v44, 0.0  ;;  %v6861_v32 = vld [vmem:[#allocation3 + $0xc4] sm:$0xf] }
 0x223   : > { %v1656_v40 = vpop.f32.mrf.mxu1  ;;  %v658_v21 = vpack.c.bf16 %v7200_v23, %v7195_v22 }
 0x224   : > { %v1342_v18 = vpack.c.bf16 %v1228_v13, %v1227_v34  ;;  %v1657_v63 = vadd.f32 %v7642_v35, %v1656_v40  ;;  %v6673_v34 = vld [vmem:[#allocation3 + $0xe0] sm:$0xf0]  ;;  %v626_v13 = vpack.c.bf16 %v7203_v19, %v7198_v14  ;;  %v7787_v59 = vpop.trf.xlu0 }
 0x225   : > { %v1108_v27 = vpop.f32.mrf.mxu3  ;;  %v6676_v40 = vor.u32 %v6861_v32, %v6673_v34 }
 0x226   : > { %v1109_v39 = vadd.f32 %v7756_v62, %v1108_v27  ;;  %6522 = vmatmul.msk.bf16.gmra.mxu1 %vm1429_vm1, %v1342_v18  ;;  %v1961_v6 = vmax.f32 %v1657_v63, 0.0 }
 0x227   : > { %v951_v46 = vpop.f32.mrf.mxu0  ;;  %v1813_v50 = vpop.f32.mrf.mxu2  ;;  %2860 = vmatpush.bf16.msrb.mxu3 %v6676_v40 }
 0x228   : > { %v1292_v0 = vmax.f32 %v1109_v39, 0.0  ;;  %v1814_v48 = vadd.f32 %v7642_v35, %v1813_v50  ;;  %v952_v36 = vadd.f32 %v7756_v62, %v951_v46 }
 0x22a   : > { %v1374_v28 = vpack.c.bf16 %v1292_v0, %v1291_v54  ;;  %v2024_v37 = vmax.f32 %v1814_v48, 0.0  ;;  %6451 = vmatmul.msk.bf16.gmra.mxu0 %vm679_vm0, %v625_v15  ;;  %6483 = vmatmul.msk.bf16.gmra.mxu3 %vm679_vm0, %v657_v58  ;;  %v1229_v56 = vmax.f32 %v952_v36, 0.0  ;;  %v6679_v54 = vld [vmem:[#allocation3 + $0xc8] sm:$0xf] }
 0x22b   : > { %v1658_v1 = vpop.f32.mrf.mxu1  ;;  %v6866_v0 = vld [vmem:[#allocation3 + $0xe4] sm:$0xf0] }
 0x22c   : > { %v7768_v49 = vpack.c.bf16 %v2024_v37, %v2023_v61  ;;  %v1659_v3 = vadd.f32 %v7642_v35, %v1658_v1  ;;  %6554 = vmatmul.msk.bf16.gmra.mxu2 %vm1429_vm1, %v1374_v28  ;;  %v6680_v58 = vor.u32 %v6866_v0, %v6679_v54 }
 0x22d   : > { %v1111_v5 = vpop.f32.mrf.mxu3 }
 0x22e   : > { %v1962_v7 = vmax.f32 %v1659_v3, 0.0  ;;  %v1112_v25 = vadd.f32 %v7756_v62, %v1111_v5  ;;  %3189 = vmatpush.bf16.msrb.mxu0 %v6680_v58 }
 0x22f   : > { %v953_v53 = vpop.f32.mrf.mxu0  ;;  %v1816_v9 = vpop.f32.mrf.mxu2 }
 0x230   : > { %v7773_v47 = vpack.c.bf16 %v1962_v7, %v1961_v6  ;;  %v954_v11 = vadd.f32 %v7756_v62, %v953_v53  ;;  %v1817_v29 = vadd.f32 %v7642_v35, %v1816_v9  ;;  %v1293_v17 = vmax.f32 %v1112_v25, 0.0  ;;  %v7800_v6 = vpop.trf.xlu0  ;;  %v6671_v25 = vld [vmem:[#allocation3 + $0xc0] sm:$0xf] }
 0x231   : > { %v7212_v53 = vunpack.i.h.bf16 %v7734_v12  ;;  %v7217_v9 = vunpack.i.h.bf16 %v7747_v33 }
 0x232   : > { %8869 = vst [vmem:[#allocation11_spill] sm:$0xff] %v7773_v47  ;;  %v1230_v16 = vmax.f32 %v954_v11, 0.0  ;;  %v2025_v18 = vmax.f32 %v1817_v29, 0.0 }
 0x233   : > { %v1661_v55 = vpop.f32.mrf.mxu1 }
 0x234   : > { %v1343_v26 = vpack.c.bf16 %v1230_v16, %v1229_v56  ;;  %v1662_v27 = vadd.f32 %v7642_v35, %v1661_v55  ;;  %v7209_v56 = vunpack.i.l.bf16 %v7734_v12  ;;  %v7214_v16 = vunpack.i.l.bf16 %v7747_v33 }
 0x235   : > { %v1113_v10 = vpop.f32.mrf.mxu3 }
 0x236   : > { %v1114_v45 = vadd.f32 %v7756_v62, %v1113_v10  ;;  %6523 = vmatmul.msk.bf16.gmra.mxu1 %vm1429_vm1, %v1343_v26  ;;  %v1963_v61 = vmax.f32 %v1662_v27, 0.0  ;;  %v6865_v26 = vld [vmem:[#allocation3 + $0xdc] sm:$0xf0] }
 0x237   : > { %v956_v31 = vpop.f32.mrf.mxu0  ;;  %v1818_v38 = vpop.f32.mrf.mxu2  ;;  %v6672_v32 = vor.u32 %v6865_v26, %v6671_v25 }
 0x238   : > { %v1294_v41 = vmax.f32 %v1114_v45, 0.0  ;;  %v1819_v43 = vadd.f32 %v7642_v35, %v1818_v38  ;;  %v957_v63 = vadd.f32 %v7756_v62, %v956_v31  ;;  %v627_v45 = vpack.c.bf16 %v7217_v9, %v7212_v53  ;;  %v7811_v31 = vpop.trf.xlu0 }
 0x239   : > { %2531 = vmatpush.bf16.msrb.mxu2 %v6672_v32  ;;  %v7219_v53 = vunpack.i.l.bf16 %v7763_v60  ;;  %v7224_v9 = vunpack.i.l.bf16 %v7776_v2 }
 0x23a   : > { %v1375_v44 = vpack.c.bf16 %v1294_v41, %v1293_v17  ;;  %v2026_v39 = vmax.f32 %v1819_v43, 0.0  ;;  %6452 = vmatmul.msk.bf16.gmra.mxu0 %vm679_vm0, %v626_v13  ;;  %6484 = vmatmul.msk.bf16.gmra.mxu3 %vm679_vm0, %v658_v21  ;;  %v1231_v36 = vmax.f32 %v957_v63, 0.0  ;;  %v659_v13 = vpack.c.bf16 %v7214_v16, %v7209_v56  ;;  %v6862_v41 = vld [vmem:[#allocation3 + $0xcc] sm:$0xf] }
 0x23b   : > { %v1663_v46 = vpop.f32.mrf.mxu1  ;;  %v6681_v43 = vld [vmem:[#allocation3 + $0xe8] sm:$0xf0] }
 0x23c   : > { %v7792_v50 = vpack.c.bf16 %v2026_v39, %v2025_v18  ;;  %v1664_v15 = vadd.f32 %v7642_v35, %v1663_v46  ;;  %6555 = vmatmul.msk.bf16.gmra.mxu2 %vm1429_vm1, %v1375_v44  ;;  %v6684_v27 = vor.u32 %v6862_v41, %v6681_v43 }
 0x23d   : > { %v1116_v48 = vpop.f32.mrf.mxu3 }
 0x23e   : > { %8870 = vst [vmem:[#allocation12_spill] sm:$0xff] %v7792_v50  ;;  %v1964_v28 = vmax.f32 %v1664_v15, 0.0  ;;  %v1117_v14 = vadd.f32 %v7756_v62, %v1116_v48  ;;  %3518 = vmatpush.bf16.msrb.mxu1 %v6684_v27 }
 0x23f   : > { %v958_v37 = vpop.f32.mrf.mxu0  ;;  %v1821_v1 = vpop.f32.mrf.mxu2 }
 0x240   : > { %v7797_v3 = vpack.c.bf16 %v1964_v28, %v1963_v61  ;;  %v959_v5 = vadd.f32 %v7756_v62, %v958_v37  ;;  %v1822_v22 = vadd.f32 %v7642_v35, %v1821_v1  ;;  %v1295_v34 = vmax.f32 %v1117_v14, 0.0  ;;  %v7824_v28 = vpop.trf.xlu0 }
 0x242   : > { %8871 = vst [vmem:[#allocation13_spill] sm:$0xff] %v7797_v3  ;;  %v1232_v7 = vmax.f32 %v959_v5, 0.0  ;;  %v2027_v38 = vmax.f32 %v1822_v22, 0.0  ;;  %v7222_v5 = vunpack.i.h.bf16 %v7763_v60  ;;  %v660_v60 = vpack.c.bf16 %v7224_v9, %v7219_v53 }
 0x243   : > { %v1666_v11 = vpop.f32.mrf.mxu1 }
 0x244   : > { %v1344_v19 = vpack.c.bf16 %v1232_v7, %v1231_v36  ;;  %v1667_v40 = vadd.f32 %v7642_v35, %v1666_v11  ;;  %v7227_v36 = vunpack.i.h.bf16 %v7776_v2 }
 0x245   : > { %v1118_v55 = vpop.f32.mrf.mxu3 }
 0x246   : > { %v1119_v23 = vadd.f32 %v7756_v62, %v1118_v55  ;;  %6524 = vmatmul.msk.bf16.gmra.mxu1 %vm1429_vm1, %v1344_v19  ;;  %v1965_v15 = vmax.f32 %v1667_v40, 0.0 }
 0x247   : > { %v961_v10 = vpop.f32.mrf.mxu0  ;;  %v1823_v29 = vpop.f32.mrf.mxu2 }
 0x248   : > { %v1296_v12 = vmax.f32 %v1119_v23, 0.0  ;;  %v1824_v33 = vadd.f32 %v7642_v35, %v1823_v29  ;;  %v962_v54 = vadd.f32 %v7756_v62, %v961_v10  ;;  %v628_v23 = vpack.c.bf16 %v7227_v36, %v7222_v5  ;;  %v7835_v29 = vpop.trf.xlu0 }
 0x24a   : > { %v1376_v21 = vpack.c.bf16 %v1296_v12, %v1295_v34  ;;  %v2028_v17 = vmax.f32 %v1824_v33, 0.0  ;;  %6453 = vmatmul.msk.bf16.gmra.mxu0 %vm679_vm0, %v627_v45  ;;  %6485 = vmatmul.msk.bf16.gmra.mxu3 %vm679_vm0, %v659_v13  ;;  %v1233_v37 = vmax.f32 %v962_v54, 0.0  ;;  %v7232_v54 = vunpack.i.h.bf16 %v7787_v59 }
 0x24b   : > { %v1668_v18 = vpop.f32.mrf.mxu1 }
 0x24c   : > { %v7816_v44 = vpack.c.bf16 %v2028_v17, %v2027_v38  ;;  %v1669_v39 = vadd.f32 %v7642_v35, %v1668_v18  ;;  %6556 = vmatmul.msk.bf16.gmra.mxu2 %vm1429_vm1, %v1376_v21 }
 0x24d   : > { %v1121_v46 = vpop.f32.mrf.mxu3 }
 0x24e   : > { %v1966_v0 = vmax.f32 %v1669_v39, 0.0  ;;  %v1122_v11 = vadd.f32 %v7756_v62, %v1121_v46 }
 0x24f   : > { %v963_v48 = vpop.f32.mrf.mxu0  ;;  %v1826_v58 = vpop.f32.mrf.mxu2 }
 0x250   : > { %v7821_v61 = vpack.c.bf16 %v1966_v0, %v1965_v15  ;;  %v964_v63 = vadd.f32 %v7756_v62, %v963_v48  ;;  %v1827_v14 = vadd.f32 %v7642_v35, %v1826_v58  ;;  %v1297_v25 = vmax.f32 %v1122_v11, 0.0  ;;  %v7848_v39 = vpop.trf.xlu0 }
 0x251   : > { %v7237_v0 = vunpack.i.h.bf16 %v7800_v6  ;;  %v7229_v58 = vunpack.i.l.bf16 %v7787_v59 }
 0x252   : > { %8872 = vst [vmem:[#allocation14_spill] sm:$0xff] %v7821_v61  ;;  %v1234_v1 = vmax.f32 %v964_v63, 0.0  ;;  %v2029_v2 = vmax.f32 %v1827_v14, 0.0  ;;  %v7234_v63 = vunpack.i.l.bf16 %v7800_v6 }
 0x253   : > { %v1671_v7 = vpop.f32.mrf.mxu1  ;;  %v629_v11 = vpack.c.bf16 %v7237_v0, %v7232_v54 }
 0x254   : > { %v1345_v56 = vpack.c.bf16 %v1234_v1, %v1233_v37  ;;  %v1672_v45 = vadd.f32 %v7642_v35, %v1671_v7  ;;  %v661_v59 = vpack.c.bf16 %v7234_v63, %v7229_v58  ;;  %v6641_v58 = vld [vmem:[#allocation3 + $0xa0] sm:$0xf0] }
 0x255   : > { %v1123_v16 = vpop.f32.mrf.mxu3 }
 0x256   : > { %v1124_v19 = vadd.f32 %v7756_v62, %v1123_v16  ;;  %6525 = vmatmul.msk.bf16.gmra.mxu1 %vm1429_vm1, %v1345_v56  ;;  %v1967_v40 = vmax.f32 %v1672_v45, 0.0 }
 0x257   : > { %v966_v55 = vpop.f32.mrf.mxu0  ;;  %v1828_v22 = vpop.f32.mrf.mxu2 }
 0x258   : > { %v1298_v26 = vmax.f32 %v1124_v19, 0.0  ;;  %v1829_v10 = vadd.f32 %v7642_v35, %v1828_v22  ;;  %v967_v21 = vadd.f32 %v7756_v62, %v966_v55  ;;  %v7859_v19 = vpop.trf.xlu0 }
 0x25a   : > { %v1377_v32 = vpack.c.bf16 %v1298_v26, %v1297_v25  ;;  %v2030_v34 = vmax.f32 %v1829_v10, 0.0  ;;  %6454 = vmatmul.msk.bf16.gmra.mxu0 %vm679_vm0, %v628_v23  ;;  %6486 = vmatmul.msk.bf16.gmra.mxu3 %vm679_vm0, %v660_v60  ;;  %v1235_v46 = vmax.f32 %v967_v21, 0.0 }
 0x25b   : > { %v1673_v12 = vpop.f32.mrf.mxu1 }
 0x25c   : > { %v7840_v33 = vpack.c.bf16 %v2030_v34, %v2029_v2  ;;  %v1674_v13 = vadd.f32 %v7642_v35, %v1673_v12  ;;  %6557 = vmatmul.msk.bf16.gmra.mxu2 %vm1429_vm1, %v1377_v32 }
 0x25d   : > { %v1126_v38 = vpop.f32.mrf.mxu3 }
 0x25e   : > { %v1968_v17 = vmax.f32 %v1674_v13, 0.0  ;;  %v1127_v37 = vadd.f32 %v7756_v62, %v1126_v38 }
 0x25f   : > { %v968_v41 = vpop.f32.mrf.mxu0  ;;  %v1831_v43 = vpop.f32.mrf.mxu2 }
 0x260   : > { %v7845_v18 = vpack.c.bf16 %v1968_v17, %v1967_v40  ;;  %v969_v27 = vadd.f32 %v7756_v62, %v968_v41  ;;  %v1832_v36 = vadd.f32 %v7642_v35, %v1831_v43  ;;  %v1299_v56 = vmax.f32 %v1127_v37, 0.0  ;;  %v7872_v40 = vpop.trf.xlu0 }
 0x261   : > { %v7242_v41 = vunpack.i.h.bf16 %v7811_v31  ;;  %v7247_v43 = vunpack.i.h.bf16 %v7824_v28 }
 0x262   : > { %8873 = vst [vmem:[#allocation15_spill] sm:$0xff] %v7845_v18  ;;  %v1236_v15 = vmax.f32 %v969_v27, 0.0  ;;  %v2031_v6 = vmax.f32 %v1832_v36, 0.0 }
 0x263   : > { %v1676_v48 = vpop.f32.mrf.mxu1 }
 0x264   : > { %v1346_v1 = vpack.c.bf16 %v1236_v15, %v1235_v46  ;;  %v1677_v55 = vadd.f32 %v7642_v35, %v1676_v48  ;;  %v7239_v46 = vunpack.i.l.bf16 %v7811_v31  ;;  %v7244_v15 = vunpack.i.l.bf16 %v7824_v28  ;;  %v6853_v48 = vld [vmem:[#allocation3 + $0x84] sm:$0xf] }
 0x265   : > { %v1128_v5 = vpop.f32.mrf.mxu3  ;;  %v6644_v37 = vor.u32 %v6853_v48, %v6641_v58 }
 0x266   : > { %v1129_v7 = vadd.f32 %v7756_v62, %v1128_v5  ;;  %6526 = vmatmul.msk.bf16.gmra.mxu1 %vm1429_vm1, %v1346_v1  ;;  %v1969_v2 = vmax.f32 %v1677_v55, 0.0 }
 0x267   : > { %v971_v53 = vpop.f32.mrf.mxu0  ;;  %v1833_v9 = vpop.f32.mrf.mxu2  ;;  %2861 = vmatpush.bf16.msrb.mxu3 %v6644_v37  ;;  %v6857_v37 = vld [vmem:[#allocation3 + $0x9c] sm:$0xf0] }
 0x268   : > { %v1300_v16 = vmax.f32 %v1129_v7, 0.0  ;;  %v1834_v14 = vadd.f32 %v7642_v35, %v1833_v9  ;;  %v972_v45 = vadd.f32 %v7756_v62, %v971_v53  ;;  %v630_v53 = vpack.c.bf16 %v7247_v43, %v7242_v41 }
 0x26a   : > { %v1378_v22 = vpack.c.bf16 %v1300_v16, %v1299_v56  ;;  %v2032_v23 = vmax.f32 %v1834_v14, 0.0  ;;  %6455 = vmatmul.msk.bf16.gmra.mxu0 %vm679_vm0, %v629_v11  ;;  %6487 = vmatmul.msk.bf16.gmra.mxu3 %vm679_vm0, %v661_v59  ;;  %v1237_v21 = vmax.f32 %v972_v45, 0.0  ;;  %v662_v11 = vpack.c.bf16 %v7244_v15, %v7239_v46  ;;  %v7883_v56 = vpop.trf.xlu0 }
 0x26b   : > { %v1678_v25 = vpop.f32.mrf.mxu1  ;;  %v7257_v46 = vunpack.i.h.bf16 %v7848_v39 }
 0x26c   : > { %v7864_v26 = vpack.c.bf16 %v2032_v23, %v2031_v6  ;;  %v1679_v10 = vadd.f32 %v7642_v35, %v1678_v25  ;;  %6558 = vmatmul.msk.bf16.gmra.mxu2 %vm1429_vm1, %v1378_v22 }
 0x26d   : > { %v1131_v60 = vpop.f32.mrf.mxu3 }
 0x26e   : > { %8874 = vst [vmem:[#allocation16_spill] sm:$0xff] %v7864_v26  ;;  %v1970_v32 = vmax.f32 %v1679_v10, 0.0  ;;  %v1132_v54 = vadd.f32 %v7756_v62, %v1131_v60 }
 0x26f   : > { %v973_v34 = vpop.f32.mrf.mxu0  ;;  %v1836_v12 = vpop.f32.mrf.mxu2 }
 0x270   : > { %v7869_v13 = vpack.c.bf16 %v1970_v32, %v1969_v2  ;;  %v974_v38 = vadd.f32 %v7756_v62, %v973_v34  ;;  %v1837_v1 = vadd.f32 %v7642_v35, %v1836_v12  ;;  %v1301_v31 = vmax.f32 %v1132_v54, 0.0 }
 0x271   : > { %v7249_v54 = vunpack.i.l.bf16 %v7835_v29 }
 0x272   : > { %v1238_v17 = vmax.f32 %v974_v38, 0.0  ;;  %v2033_v16 = vmax.f32 %v1837_v1, 0.0  ;;  %v6647_v38 = vld [vmem:[#allocation3 + $0x88] sm:$0xf] }
 0x273   : > { %v1681_v27 = vpop.f32.mrf.mxu1 }
 0x274   : > { %v1347_v0 = vpack.c.bf16 %v1238_v17, %v1237_v21  ;;  %v1682_v14 = vadd.f32 %v7642_v35, %v1681_v27  ;;  %v6858_v21 = vld [vmem:[#allocation3 + $0xa4] sm:$0xf0]  ;;  %v7896_v17 = vpop.trf.xlu0  ;;  %v7252_v27 = vunpack.i.h.bf16 %v7835_v29 }
 0x275   : > { %v1133_v63 = vpop.f32.mrf.mxu3  ;;  %v6648_v41 = vor.u32 %v6858_v21, %v6647_v38 }
 0x276   : > { %v1134_v5 = vadd.f32 %v7756_v62, %v1133_v63  ;;  %6527 = vmatmul.msk.bf16.gmra.mxu1 %vm1429_vm1, %v1347_v0  ;;  %v1971_v10 = vmax.f32 %v1682_v14, 0.0  ;;  %v7254_v0 = vunpack.i.l.bf16 %v7848_v39  ;;  %v6639_v63 = vld [vmem:[#allocation3 + $0x80] sm:$0xf] }
 0x277   : > { %v976_v36 = vpop.f32.mrf.mxu0  ;;  %v1838_v7 = vpop.f32.mrf.mxu2  ;;  %3190 = vmatpush.bf16.msrb.mxu0 %v6648_v41 }
 0x278   : > { %v1302_v9 = vmax.f32 %v1134_v5, 0.0  ;;  %v1839_v28 = vadd.f32 %v7642_v35, %v1838_v7  ;;  %v977_v60 = vadd.f32 %v7756_v62, %v976_v36  ;;  %v6640_v5 = vor.u32 %v6857_v37, %v6639_v63  ;;  %v7906_v36 = vld [vmem:[%s8784_s4] ss:$0 sm:$0xff] }
 0x279   : > { %v7259_v37 = vunpack.i.l.bf16 %v7859_v19 }
 0x27a   : > { %v1379_v59 = vpack.c.bf16 %v1302_v9, %v1301_v31  ;;  %v2034_v6 = vmax.f32 %v1839_v28, 0.0  ;;  %6456 = vmatmul.msk.bf16.gmra.mxu0 %vm679_vm0, %v630_v53  ;;  %6488 = vmatmul.msk.bf16.gmra.mxu3 %vm679_vm0, %v662_v11  ;;  %v1239_v43 = vmax.f32 %v977_v60, 0.0  ;;  %v631_v31 = vpack.c.bf16 %v7257_v46, %v7252_v27 }
 0x27b   : > { %v1683_v55 = vpop.f32.mrf.mxu1  ;;  %2532 = vmatpush.bf16.msrb.mxu2 %v6640_v5 }
 0x27c   : > { %v7888_v22 = vpack.c.bf16 %v2034_v6, %v2033_v16  ;;  %v1684_v23 = vadd.f32 %v7642_v35, %v1683_v55  ;;  %6559 = vmatmul.msk.bf16.gmra.mxu2 %vm1429_vm1, %v1379_v59  ;;  %v663_v16 = vpack.c.bf16 %v7254_v0, %v7249_v54  ;;  %v7912_v14 = vpop.trf.xlu0 }
 0x27d   : > { %v1136_v25 = vpop.f32.mrf.mxu3 }
 0x27e   : > { %8875 = vst [vmem:[#allocation17_spill] sm:$0xff] %v7888_v22  ;;  %v1972_v2 = vmax.f32 %v1684_v23, 0.0  ;;  %v1137_v48 = vadd.f32 %v7756_v62, %v1136_v25 }
 0x27f   : > { %v978_v45 = vpop.f32.mrf.mxu0  ;;  %v1841_v32 = vpop.f32.mrf.mxu2 }
 0x280   : > { %v7893_v34 = vpack.c.bf16 %v1972_v2, %v1971_v10  ;;  %v979_v12 = vadd.f32 %v7756_v62, %v978_v45  ;;  %v1842_v7 = vadd.f32 %v7906_v36, %v1841_v32  ;;  %v1303_v9 = vmax.f32 %v1137_v48, 0.0  ;;  %v6854_v2 = vld [vmem:[#allocation3 + $0x8c] sm:$0xf] }
 0x281   : > { %v6649_v45 = vld [vmem:[#allocation3 + $0xa8] sm:$0xf0]  ;;  %v7262_v48 = vunpack.i.h.bf16 %v7859_v19 }
 0x282   : > { %v1240_v35 = vmax.f32 %v979_v12, 0.0  ;;  %v2035_v59 = vmax.f32 %v1842_v7, 0.0  ;;  %v6652_v12 = vor.u32 %v6854_v2, %v6649_v45 }
 0x283   : > { %v1686_v15 = vpop.f32.mrf.mxu1 }
 0x284   : > { %v1348_v58 = vpack.c.bf16 %v1240_v35, %v1239_v43  ;;  %v1687_v6 = vadd.f32 %v7906_v36, %v1686_v15  ;;  %3519 = vmatpush.bf16.msrb.mxu1 %v6652_v12  ;;  %v7925_v15 = vpop.trf.xlu0 }
 0x285   : > { %v1138_v1 = vpop.f32.mrf.mxu3 }
 0x286   : > { %v1139_v53 = vadd.f32 %v7756_v62, %v1138_v1  ;;  %6528 = vmatmul.msk.bf16.gmra.mxu1 %vm1429_vm1, %v1348_v58  ;;  %v1973_v38 = vmax.f32 %v1687_v6, 0.0  ;;  %v7267_v58 = vunpack.i.h.bf16 %v7872_v40  ;;  %v7264_v1 = vunpack.i.l.bf16 %v7872_v40 }
 0x287   : > { %v981_v29 = vpop.f32.mrf.mxu0  ;;  %v1843_v39 = vpop.f32.mrf.mxu2 }
 0x288   : > { %v1304_v28 = vmax.f32 %v1139_v53, 0.0  ;;  %v1844_v11 = vadd.f32 %v7906_v36, %v1843_v39  ;;  %v982_v21 = vadd.f32 %v7756_v62, %v981_v29  ;;  %v664_v19 = vpack.c.bf16 %v7264_v1, %v7259_v37 }
 0x289   : > { %v7277_v37 = vunpack.i.h.bf16 %v7896_v17 }
 0x28a   : > { %v1380_v55 = vpack.c.bf16 %v1304_v28, %v1303_v9  ;;  %v2036_v23 = vmax.f32 %v1844_v11, 0.0  ;;  %6457 = vmatmul.msk.bf16.gmra.mxu0 %vm679_vm0, %v631_v31  ;;  %6489 = vmatmul.msk.bf16.gmra.mxu3 %vm679_vm0, %v663_v16  ;;  %v1241_v54 = vmax.f32 %v982_v21, 0.0  ;;  %v632_v28 = vpack.c.bf16 %v7267_v58, %v7262_v48 }
 0x28b   : > { %v1688_v25 = vpop.f32.mrf.mxu1 }
 0x28c   : > { %v7917_v10 = vpack.c.bf16 %v2036_v23, %v2035_v59  ;;  %v1689_v60 = vadd.f32 %v7906_v36, %v1688_v25  ;;  %6560 = vmatmul.msk.bf16.gmra.mxu2 %vm1429_vm1, %v1380_v55 }
 0x28d   : > { %v1141_v32 = vpop.f32.mrf.mxu3 }
 0x28e   : > { %8876 = vst [vmem:[#allocation18_spill] sm:$0xff] %v7917_v10  ;;  %v1974_v41 = vmax.f32 %v1689_v60, 0.0  ;;  %v1142_v5 = vadd.f32 %v7756_v62, %v1141_v32 }
 0x28f   : > { %v983_v43 = vpop.f32.mrf.mxu0  ;;  %v1846_v35 = vpop.f32.mrf.mxu2 }
 0x290   : > { %v7922_v27 = vpack.c.bf16 %v1974_v41, %v1973_v38  ;;  %v984_v46 = vadd.f32 %v7756_v62, %v983_v43  ;;  %v1847_v29 = vadd.f32 %v7906_v36, %v1846_v35  ;;  %v1305_v11 = vmax.f32 %v1142_v5, 0.0 }
 0x291   : > { %v7269_v5 = vunpack.i.l.bf16 %v7883_v56 }
 0x292   : > { %8877 = vst [vmem:[#allocation19_spill] sm:$0xff] %v7922_v27  ;;  %v1242_v0 = vmax.f32 %v984_v46, 0.0  ;;  %v2037_v6 = vmax.f32 %v1847_v29, 0.0  ;;  %v6845_v46 = vld [vmem:[#allocation3 + $0x44] sm:$0xf] }
 0x293   : > { %v1691_v63 = vpop.f32.mrf.mxu1 }
 0x294   : > { %v1349_v7 = vpack.c.bf16 %v1242_v0, %v1241_v54  ;;  %v1692_v40 = vadd.f32 %v7906_v36, %v1691_v63  ;;  %v6609_v54 = vld [vmem:[#allocation3 + $0x60] sm:$0xf0]  ;;  %v7272_v63 = vunpack.i.h.bf16 %v7883_v56 }
 0x295   : > { %v1143_v53 = vpop.f32.mrf.mxu3  ;;  %v6612_v0 = vor.u32 %v6845_v46, %v6609_v54 }
 0x296   : > { %v1144_v39 = vadd.f32 %v7756_v62, %v1143_v53  ;;  %6529 = vmatmul.msk.bf16.gmra.mxu1 %vm1429_vm1, %v1349_v7  ;;  %v1975_v32 = vmax.f32 %v1692_v40, 0.0  ;;  %v7274_v7 = vunpack.i.l.bf16 %v7896_v17 }
 0x297   : > { %v986_v31 = vpop.f32.mrf.mxu0  ;;  %v1848_v9 = vpop.f32.mrf.mxu2  ;;  %2862 = vmatpush.bf16.msrb.mxu3 %v6612_v0 }
 0x298   : > { %v1306_v16 = vmax.f32 %v1144_v39, 0.0  ;;  %v1849_v59 = vadd.f32 %v7906_v36, %v1848_v9  ;;  %v987_v12 = vadd.f32 %v7756_v62, %v986_v31  ;;  %v6837_v39 = vld [vmem:[#allocation3 + $0x4] sm:$0xf] }
 0x299   : > { %v6577_v31 = vld [vmem:[#allocation3 + $0x20] sm:$0xf0] }
 0x29a   : > { %v1381_v55 = vpack.c.bf16 %v1306_v16, %v1305_v11  ;;  %v2038_v23 = vmax.f32 %v1849_v59, 0.0  ;;  %6458 = vmatmul.msk.bf16.gmra.mxu0 %vm679_vm0, %v632_v28  ;;  %6490 = vmatmul.msk.bf16.gmra.mxu3 %vm679_vm0, %v664_v19  ;;  %v1243_v48 = vmax.f32 %v987_v12, 0.0  ;;  %v6580_v28 = vor.u32 %v6837_v39, %v6577_v31 }
 0x29b   : > { %v1693_v25 = vpop.f32.mrf.mxu1  ;;  %v7279_v31 = vunpack.i.l.bf16 %v7912_v14 }
 0x29c   : > { %v7939_v60 = vpack.c.bf16 %v2038_v23, %v2037_v6  ;;  %v1694_v2 = vadd.f32 %v7906_v36, %v1693_v25  ;;  %6561 = vmatmul.msk.bf16.gmra.mxu2 %vm1429_vm1, %v1381_v55  ;;  %v633_v6 = vpack.c.bf16 %v7277_v37, %v7272_v63  ;;  %2863 = vmatpush.bf16.msrb.mxu3 %v6580_v28  ;;  %v6615_v63 = vld [vmem:[#allocation3 + $0x48] sm:$0xf] }
 0x29d   : > { %v1146_v45 = vpop.f32.mrf.mxu3  ;;  %v665_v55 = vpack.c.bf16 %v7274_v7, %v7269_v5  ;;  %v6850_v37 = vld [vmem:[#allocation3 + $0x64] sm:$0xf0] }
 0x29e   : > { %8878 = vst [vmem:[#allocation20_spill] sm:$0xff] %v7939_v60  ;;  %v1976_v38 = vmax.f32 %v1694_v2, 0.0  ;;  %v1147_v53 = vadd.f32 %v7756_v62, %v1146_v45 }
 0x29f   : > { %v988_v21 = vpop.f32.mrf.mxu0  ;;  %v1851_v41 = vpop.f32.mrf.mxu2 }
 0x2a0   : > { %v7944_v43 = vpack.c.bf16 %v1976_v38, %v1975_v32  ;;  %v989_v35 = vadd.f32 %v7756_v62, %v988_v21  ;;  %v1852_v11 = vadd.f32 %v7906_v36, %v1851_v41  ;;  %v1307_v56 = vmax.f32 %v1147_v53, 0.0 }
 0x2a1   : > { %v7282_v53 = vunpack.i.h.bf16 %v7912_v14 }
 0x2a2   : > { %8879 = vst [vmem:[#allocation21_spill] sm:$0xff] %v7944_v43  ;;  %v1244_v58 = vmax.f32 %v989_v35, 0.0  ;;  %v2039_v23 = vmax.f32 %v1852_v11, 0.0 }
 0x2a3   : > { %v1696_v1 = vpop.f32.mrf.mxu1 }
 0x2a4   : > { %v1350_v29 = vpack.c.bf16 %v1244_v58, %v1243_v48  ;;  %v1697_v25 = vadd.f32 %v7906_v36, %v1696_v1  ;;  %v6616_v1 = vor.u32 %v6850_v37, %v6615_v63 }
 0x2a5   : > { %v1148_v9 = vpop.f32.mrf.mxu3 }
 0x2a6   : > { %v1149_v16 = vadd.f32 %v7756_v62, %v1148_v9  ;;  %6530 = vmatmul.msk.bf16.gmra.mxu1 %vm1429_vm1, %v1350_v29  ;;  %v1977_v41 = vmax.f32 %v1697_v25, 0.0  ;;  %v7287_v29 = vunpack.i.h.bf16 %v7925_v15  ;;  %3191 = vmatpush.bf16.msrb.mxu0 %v6616_v1  ;;  %v7284_v9 = vunpack.i.l.bf16 %v7925_v15 }
 0x2a7   : > { %v991_v59 = vpop.f32.mrf.mxu0  ;;  %v1853_v19 = vpop.f32.mrf.mxu2 }
 0x2a8   : > { %v1308_v40 = vmax.f32 %v1149_v16, 0.0  ;;  %v1854_v17 = vadd.f32 %v7906_v36, %v1853_v19  ;;  %v992_v35 = vadd.f32 %v7756_v62, %v991_v59  ;;  %v6583_v16 = vld [vmem:[#allocation3 + $0x8] sm:$0xf]  ;;  %v666_v14 = vpack.c.bf16 %v7284_v9, %v7279_v31 }
 0x2a9   : > { %v6842_v59 = vld [vmem:[#allocation3 + $0x24] sm:$0xf0] }
 0x2aa   : > { %v1382_v2 = vpack.c.bf16 %v1308_v40, %v1307_v56  ;;  %v2040_v45 = vmax.f32 %v1854_v17, 0.0  ;;  %6459 = vmatmul.msk.bf16.gmra.mxu0 %vm679_vm0, %v633_v6  ;;  %6491 = vmatmul.msk.bf16.gmra.mxu3 %vm679_vm0, %v665_v55  ;;  %v1245_v5 = vmax.f32 %v992_v35, 0.0  ;;  %v6584_v6 = vor.u32 %v6842_v59, %v6583_v16 }
 0x2ab   : > { %v1698_v32 = vpop.f32.mrf.mxu1  ;;  %v634_v17 = vpack.c.bf16 %v7287_v29, %v7282_v53 }
 0x2ac   : > { %v7959_v12 = vpack.c.bf16 %v2040_v45, %v2039_v23  ;;  %v1699_v38 = vadd.f32 %v7906_v36, %v1698_v32  ;;  %6562 = vmatmul.msk.bf16.gmra.mxu2 %vm1429_vm1, %v1382_v2  ;;  %3192 = vmatpush.bf16.msrb.mxu0 %v6584_v6 }
 0x2ad   : > { %v1151_v21 = vpop.f32.mrf.mxu3 }
 0x2ae   : > { %8880 = vst [vmem:[#allocation22_spill] sm:$0xff] %v7959_v12  ;;  %v1978_v46 = vmax.f32 %v1699_v38, 0.0  ;;  %v1152_v28 = vadd.f32 %v7756_v62, %v1151_v21 }
 0x2af   : > { %v993_v54 = vpop.f32.mrf.mxu0  ;;  %v1856_v0 = vpop.f32.mrf.mxu2 }
 0x2b0   : > { %v7964_v48 = vpack.c.bf16 %v1978_v46, %v1977_v41  ;;  %v994_v58 = vadd.f32 %v7756_v62, %v993_v54  ;;  %v1857_v56 = vadd.f32 %v7906_v36, %v1856_v0  ;;  %v1309_v25 = vmax.f32 %v1152_v28, 0.0  ;;  %v6607_v28 = vld [vmem:[#allocation3 + $0x40] sm:$0xf] }
 0x2b2   : > { %8881 = vst [vmem:[#allocation23_spill] sm:$0xff] %v7964_v48  ;;  %v1246_v7 = vmax.f32 %v994_v58, 0.0  ;;  %v2041_v45 = vmax.f32 %v1857_v56, 0.0 }
 0x2b3   : > { %v1701_v39 = vpop.f32.mrf.mxu1 }
 0x2b4   : > { %v1351_v11 = vpack.c.bf16 %v1246_v7, %v1245_v5  ;;  %v1702_v32 = vadd.f32 %v7906_v36, %v1701_v39 }
 0x2b5   : > { %v1153_v19 = vpop.f32.mrf.mxu3 }
 0x2b6   : > { %v1154_v40 = vadd.f32 %v7756_v62, %v1153_v19  ;;  %6531 = vmatmul.msk.bf16.gmra.mxu1 %vm1429_vm1, %v1351_v11  ;;  %v1979_v0 = vmax.f32 %v1702_v32, 0.0  ;;  %v6849_v11 = vld [vmem:[#allocation3 + $0x5c] sm:$0xf0] }
 0x2b7   : > { %v996_v55 = vpop.f32.mrf.mxu0  ;;  %v1858_v23 = vpop.f32.mrf.mxu2  ;;  %v6608_v59 = vor.u32 %v6849_v11, %v6607_v28 }
 0x2b8   : > { %v1310_v15 = vmax.f32 %v1154_v40, 0.0  ;;  %v1859_v2 = vadd.f32 %v7906_v36, %v1858_v23  ;;  %v997_v58 = vadd.f32 %v7756_v62, %v996_v55 }
 0x2b9   : > { %2533 = vmatpush.bf16.msrb.mxu2 %v6608_v59 }
 0x2ba   : > { %v1383_v38 = vpack.c.bf16 %v1310_v15, %v1309_v25  ;;  %v2042_v21 = vmax.f32 %v1859_v2, 0.0  ;;  %6460 = vmatmul.msk.bf16.gmra.mxu0 %vm679_vm0, %v634_v17  ;;  %6492 = vmatmul.msk.bf16.gmra.mxu3 %vm679_vm0, %v666_v14  ;;  %v1247_v53 = vmax.f32 %v997_v58, 0.0 }
 0x2bb   : > { %v1703_v41 = vpop.f32.mrf.mxu1 }
 0x2bc   : > { %v7979_v35 = vpack.c.bf16 %v2042_v21, %v2041_v45  ;;  %v1704_v46 = vadd.f32 %v7906_v36, %v1703_v41  ;;  %6563 = vmatmul.msk.bf16.gmra.mxu2 %vm1429_vm1, %v1383_v38  ;;  %v6846_v21 = vld [vmem:[#allocation3 + $0x4c] sm:$0xf] }
 0x2bd   : > { %v1156_v54 = vpop.f32.mrf.mxu3  ;;  %v6617_v41 = vld [vmem:[#allocation3 + $0x68] sm:$0xf0] }
 0x2be   : > { %8882 = vst [vmem:[#allocation24_spill] sm:$0xff] %v7979_v35  ;;  %v1980_v63 = vmax.f32 %v1704_v46, 0.0  ;;  %v1157_v31 = vadd.f32 %v7756_v62, %v1156_v54  ;;  %v6620_v54 = vor.u32 %v6846_v21, %v6617_v41 }
 0x2bf   : > { %v998_v37 = vpop.f32.mrf.mxu0  ;;  %v1861_v1 = vpop.f32.mrf.mxu2 }
 0x2c0   : > { %v7984_v5 = vpack.c.bf16 %v1980_v63, %v1979_v0  ;;  %v999_v7 = vadd.f32 %v7756_v62, %v998_v37  ;;  %v1862_v19 = vadd.f32 %v7906_v36, %v1861_v1  ;;  %v1311_v17 = vmax.f32 %v1157_v31, 0.0  ;;  %3520 = vmatpush.bf16.msrb.mxu1 %v6620_v54 }
 0x2c2   : > { %v1248_v29 = vmax.f32 %v999_v7, 0.0  ;;  %v2043_v14 = vmax.f32 %v1862_v19, 0.0 }
 0x2c3   : > { %v1706_v39 = vpop.f32.mrf.mxu1 }
 0x2c4   : > { %v1352_v9 = vpack.c.bf16 %v1248_v29, %v1247_v53  ;;  %v1707_v25 = vadd.f32 %v7906_v36, %v1706_v39 }
 0x2c5   : > { %v1158_v16 = vpop.f32.mrf.mxu3 }
 0x2c6   : > { %v1159_v6 = vadd.f32 %v7756_v62, %v1158_v16  ;;  %6532 = vmatmul.msk.bf16.gmra.mxu1 %vm1429_vm1, %v1352_v9  ;;  %v1981_v0 = vmax.f32 %v1707_v25, 0.0 }
 0x2c7   : > { %v1001_v56 = vpop.f32.mrf.mxu0  ;;  %v1863_v40 = vpop.f32.mrf.mxu2 }
 0x2c8   : > { %v1312_v55 = vmax.f32 %v1159_v6, 0.0  ;;  %v1864_v23 = vadd.f32 %v7906_v36, %v1863_v40  ;;  %v1002_v58 = vadd.f32 %v7756_v62, %v1001_v56 }
 0x2ca   : > { %v1384_v15 = vpack.c.bf16 %v1312_v55, %v1311_v17  ;;  %v2044_v2 = vmax.f32 %v1864_v23, 0.0  ;;  %6461 = vmatmul.msk.bf16.gmra.mxu0 %vm679_vm0, %v7433_v24  ;;  %2864 = vmatmul.bf16.vlgmr.msrb.gmra.mxu3 %v7654_v52  ;;  %v1249_v53 = vmax.f32 %v1002_v58, 0.0 }
 0x2cb   : > { %v1708_v45 = vpop.f32.mrf.mxu1 }
 0x2cc   : > { %v7996_v32 = vpack.c.bf16 %v2044_v2, %v2043_v14  ;;  %v1709_v38 = vadd.f32 %v7906_v36, %v1708_v45  ;;  %6564 = vmatmul.msk.bf16.gmra.mxu2 %vm1429_vm1, %v1384_v15 }
 0x2cd   : > { %v1161_v46 = vpop.f32.mrf.mxu3 }
 0x2ce   : > { %8883 = vst [vmem:[#allocation25_spill] sm:$0xff] %v7996_v32  ;;  %v1982_v63 = vmax.f32 %v1709_v38, 0.0  ;;  %v1162_v31 = vadd.f32 %v7756_v62, %v1161_v46  ;;  %v8019_v38 = vld [vmem:[%s8782_s2] ss:$0 sm:$0xff] }
 0x2cf   : > { %v1003_v37 = vpop.f32.mrf.mxu0  ;;  %v1866_v1 = vpop.f32.mrf.mxu2 }
 0x2d0   : > { %v8001_v24 = vpack.c.bf16 %v1982_v63, %v1981_v0  ;;  %v1004_v7 = vadd.f32 %v7756_v62, %v1003_v37  ;;  %v1867_v11 = vadd.f32 %v7906_v36, %v1866_v1  ;;  %v1313_v6 = vmax.f32 %v1162_v31, 0.0 }
 0x2d2   : > { %v1250_v29 = vmax.f32 %v1004_v7, 0.0  ;;  %v2045_v17 = vmax.f32 %v1867_v11, 0.0 }
 0x2d3   : > { %v1711_v39 = vpop.f32.mrf.mxu1 }
 0x2d4   : > { %v1353_v9 = vpack.c.bf16 %v1250_v29, %v1249_v53  ;;  %v1712_v55 = vadd.f32 %v7906_v36, %v1711_v39 }
 0x2d5   : > { %v1163_v28 = vpop.f32.mrf.mxu3 }
 0x2d6   : > { %v1164_v16 = vadd.f32 %v7756_v62, %v1163_v28  ;;  %6533 = vmatmul.msk.bf16.gmra.mxu1 %vm1429_vm1, %v1353_v9  ;;  %v1983_v45 = vmax.f32 %v1712_v55, 0.0 }
 0x2d7   : > { %v1006_v59 = vpop.f32.mrf.mxu0  ;;  %v1868_v19 = vpop.f32.mrf.mxu2 }
 0x2d8   : > { %v1314_v56 = vmax.f32 %v1164_v16, 0.0  ;;  %v1869_v40 = vadd.f32 %v7906_v36, %v1868_v19  ;;  %v1007_v21 = vadd.f32 %v8019_v38, %v1006_v59 }
 0x2da   : > { %v1385_v23 = vpack.c.bf16 %v1314_v56, %v1313_v6  ;;  %v2046_v14 = vmax.f32 %v1869_v40, 0.0  ;;  %2869 = vmatmul.bf16.gmra.mxu3 %v7674_v20  ;;  %3193 = vmatmul.bf16.vlgmr.msrb.gmra.mxu0 %v7654_v52  ;;  %v1251_v63 = vmax.f32 %v1007_v21, 0.0 }
 0x2db   : > { %v1713_v25 = vpop.f32.mrf.mxu1 }
 0x2dc   : > { %v8012_v15 = vpack.c.bf16 %v2046_v14, %v2045_v17  ;;  %v1714_v62 = vadd.f32 %v7906_v36, %v1713_v25  ;;  %6565 = vmatmul.msk.bf16.gmra.mxu2 %vm1429_vm1, %v1385_v23 }
 0x2dd   : > { %v1166_v2 = vpop.f32.mrf.mxu3 }
 0x2de   : > { %8884 = vst [vmem:[#allocation26_spill] sm:$0xff] %v8012_v15  ;;  %v1984_v41 = vmax.f32 %v1714_v62, 0.0  ;;  %v1167_v7 = vadd.f32 %v8019_v38, %v1166_v2 }
 0x2df   : > { %v1008_v46 = vpop.f32.mrf.mxu0  ;;  %v1871_v54 = vpop.f32.mrf.mxu2 }
 0x2e0   : > { %v8022_v0 = vpack.c.bf16 %v1984_v41, %v1983_v45  ;;  %v1009_v58 = vadd.f32 %v8019_v38, %v1008_v46  ;;  %v1872_v39 = vadd.f32 %v7906_v36, %v1871_v54  ;;  %v1315_v11 = vmax.f32 %v1167_v7, 0.0 }
 0x2e2   : > { %v1252_v37 = vmax.f32 %v1009_v58, 0.0  ;;  %v2047_v19 = vmax.f32 %v1872_v39, 0.0 }
 0x2e3   : > { %v1716_v1 = vpop.f32.mrf.mxu1 }
 0x2e4   : > { %v1354_v53 = vpack.c.bf16 %v1252_v37, %v1251_v63  ;;  %v1717_v6 = vadd.f32 %v7906_v36, %v1716_v1 }
 0x2e5   : > { %v1168_v29 = vpop.f32.mrf.mxu3 }
 0x2e6   : > { %v1169_v31 = vadd.f32 %v8019_v38, %v1168_v29  ;;  %6534 = vmatmul.msk.bf16.gmra.mxu1 %vm1429_vm1, %v1354_v53  ;;  %v1985_v25 = vmax.f32 %v1717_v6, 0.0 }
 0x2e7   : > { %v1011_v9 = vpop.f32.mrf.mxu0  ;;  %v1873_v28 = vpop.f32.mrf.mxu2 }
 0x2e8   : > { %v1316_v16 = vmax.f32 %v1169_v31, 0.0  ;;  %v1874_v59 = vadd.f32 %v7906_v36, %v1873_v28  ;;  %v1012_v62 = vadd.f32 %v8019_v38, %v1011_v9 }
 0x2ea   : > { %v1386_v56 = vpack.c.bf16 %v1316_v16, %v1315_v11  ;;  %v2048_v40 = vmax.f32 %v1874_v59, 0.0  ;;  %2874 = vmatmul.bf16.gmra.mxu3 %v7698_v4  ;;  %3198 = vmatmul.bf16.gmra.mxu0 %v7674_v20  ;;  %v1253_v54 = vmax.f32 %v1012_v62, 0.0 }
 0x2eb   : > { %v1718_v17 = vpop.f32.mrf.mxu1 }
 0x2ec   : > { %v8033_v55 = vpack.c.bf16 %v2048_v40, %v2047_v19  ;;  %v1719_v23 = vadd.f32 %v7906_v36, %v1718_v17  ;;  %6566 = vmatmul.msk.bf16.gmra.mxu2 %vm1429_vm1, %v1386_v56 }
 0x2ed   : > { %v1171_v14 = vpop.f32.mrf.mxu3 }
 0x2ee   : > { %8885 = vst [vmem:[#allocation27_spill] sm:$0xff] %v8033_v55  ;;  %v1986_v2 = vmax.f32 %v1719_v23, 0.0  ;;  %v1172_v37 = vadd.f32 %v8019_v38, %v1171_v14 }
 0x2ef   : > { %v1013_v45 = vpop.f32.mrf.mxu0  ;;  %v1876_v21 = vpop.f32.mrf.mxu2 }
 0x2f0   : > { %v8038_v41 = vpack.c.bf16 %v1986_v2, %v1985_v25  ;;  %v1014_v46 = vadd.f32 %v8019_v38, %v1013_v45  ;;  %v1877_v53 = vadd.f32 %v7906_v36, %v1876_v21  ;;  %v1317_v9 = vmax.f32 %v1172_v37, 0.0 }
 0x2f2   : > { %v1254_v58 = vmax.f32 %v1014_v46, 0.0  ;;  %v2049_v16 = vmax.f32 %v1877_v53, 0.0 }
 0x2f3   : > { %v1721_v63 = vpop.f32.mrf.mxu1 }
 0x2f4   : > { %v1355_v1 = vpack.c.bf16 %v1254_v58, %v1253_v54  ;;  %v1722_v59 = vadd.f32 %v7906_v36, %v1721_v63  ;;  %v6575_v54 = vld [vmem:[#allocation3] sm:$0xf] }
 0x2f5   : > { %v1173_v7 = vpop.f32.mrf.mxu3  ;;  %v6841_v58 = vld [vmem:[#allocation3 + $0x1c] sm:$0xf0] }
 0x2f6   : > { %v1174_v29 = vadd.f32 %v8019_v38, %v1173_v7  ;;  %6535 = vmatmul.msk.bf16.gmra.mxu1 %vm1429_vm1, %v1355_v1  ;;  %v1987_v14 = vmax.f32 %v1722_v59, 0.0  ;;  %v6576_v63 = vor.u32 %v6841_v58, %v6575_v54 }
 0x2f7   : > { %v1016_v39 = vpop.f32.mrf.mxu0  ;;  %v1878_v31 = vpop.f32.mrf.mxu2 }
 0x2f8   : > { %v1318_v28 = vmax.f32 %v1174_v29, 0.0  ;;  %v1879_v11 = vadd.f32 %v7906_v36, %v1878_v31  ;;  %v1017_v25 = vadd.f32 %v8019_v38, %v1016_v39  ;;  %2534 = vmatpush.bf16.msrb.mxu2 %v6576_v63 }
 0x2fa   : > { %v1387_v19 = vpack.c.bf16 %v1318_v28, %v1317_v9  ;;  %v2050_v6 = vmax.f32 %v1879_v11, 0.0  ;;  %2879 = vmatmul.bf16.gmra.mxu3 %v7722_v51  ;;  %3203 = vmatmul.bf16.gmra.mxu0 %v7698_v4  ;;  %v1255_v37 = vmax.f32 %v1017_v25, 0.0 }
 0x2fb   : > { %v1723_v56 = vpop.f32.mrf.mxu1 }
 0x2fc   : > { %v8049_v40 = vpack.c.bf16 %v2050_v6, %v2049_v16  ;;  %v1724_v17 = vadd.f32 %v7906_v36, %v1723_v56  ;;  %6567 = vmatmul.msk.bf16.gmra.mxu2 %vm1429_vm1, %v1387_v19 }
 0x2fd   : > { %v1176_v23 = vpop.f32.mrf.mxu3 }
 0x2fe   : > { %8886 = vst [vmem:[#allocation28_spill] sm:$0xff] %v8049_v40  ;;  %v1988_v62 = vmax.f32 %v1724_v17, 0.0  ;;  %v1177_v53 = vadd.f32 %v8019_v38, %v1176_v23 }
 0x2ff   : > { %v1018_v2 = vpop.f32.mrf.mxu0  ;;  %v1881_v45 = vpop.f32.mrf.mxu2 }
 0x300   : > { %v8054_v21 = vpack.c.bf16 %v1988_v62, %v1987_v14  ;;  %v1019_v46 = vadd.f32 %v8019_v38, %v1018_v2  ;;  %v1882_v39 = vadd.f32 %v7906_v36, %v1881_v45  ;;  %v1319_v16 = vmax.f32 %v1177_v53, 0.0  ;;  %v6585_v53 = vld [vmem:[#allocation3 + $0x28] sm:$0xf0] }
 0x302   : > { %v1256_v1 = vmax.f32 %v1019_v46, 0.0  ;;  %v2051_v6 = vmax.f32 %v1882_v39, 0.0 }
 0x303   : > { %v1726_v7 = vpop.f32.mrf.mxu1 }
 0x304   : > { %v1356_v29 = vpack.c.bf16 %v1256_v1, %v1255_v37  ;;  %v1727_v56 = vadd.f32 %v7906_v36, %v1726_v7  ;;  %v6838_v7 = vld [vmem:[#allocation3 + $0xc] sm:$0xf] }
 0x305   : > { %v1178_v31 = vpop.f32.mrf.mxu3 }
 0x306   : > { %v1179_v9 = vadd.f32 %v8019_v38, %v1178_v31  ;;  %6536 = vmatmul.msk.bf16.gmra.mxu1 %vm1429_vm1, %v1356_v29  ;;  %v1989_v45 = vmax.f32 %v1727_v56, 0.0  ;;  %v6588_v29 = vor.u32 %v6838_v7, %v6585_v53 }
 0x307   : > { %v1021_v28 = vpop.f32.mrf.mxu0  ;;  %v1883_v11 = vpop.f32.mrf.mxu2 }
 0x308   : > { %v1320_v59 = vmax.f32 %v1179_v9, 0.0  ;;  %v1884_v19 = vadd.f32 %v7906_v36, %v1883_v11  ;;  %v1022_v46 = vadd.f32 %v8019_v38, %v1021_v28  ;;  %3521 = vmatpush.bf16.msrb.mxu1 %v6588_v29 }
 0x30a   : > { %v1388_v17 = vpack.c.bf16 %v1320_v59, %v1319_v16  ;;  %v2052_v14 = vmax.f32 %v1884_v19, 0.0  ;;  %2884 = vmatmul.bf16.gmra.mxu3 %v7744_v30  ;;  %3208 = vmatmul.bf16.gmra.mxu0 %v7722_v51  ;;  %v1257_v31 = vmax.f32 %v1022_v46, 0.0 }
 0x30b   : > { %v1728_v23 = vpop.f32.mrf.mxu1 }
 0x30c   : > { %v8065_v25 = vpack.c.bf16 %v2052_v14, %v2051_v6  ;;  %v1729_v62 = vadd.f32 %v7906_v36, %v1728_v23  ;;  %6568 = vmatmul.msk.bf16.gmra.mxu2 %vm1429_vm1, %v1388_v17 }
 0x30d   : > { %v1181_v2 = vpop.f32.mrf.mxu3 }
 0x30e   : > { %8887 = vst [vmem:[#allocation29_spill] sm:$0xff] %v8065_v25  ;;  %v1990_v54 = vmax.f32 %v1729_v62, 0.0  ;;  %v1182_v11 = vadd.f32 %v8019_v38, %v1181_v2 }
 0x30f   : > { %v1023_v58 = vpop.f32.mrf.mxu0  ;;  %v1886_v63 = vpop.f32.mrf.mxu2 }
 0x310   : > { %v8070_v37 = vpack.c.bf16 %v1990_v54, %v1989_v45  ;;  %v1024_v1 = vadd.f32 %v8019_v38, %v1023_v58  ;;  %v1887_v28 = vadd.f32 %v7906_v36, %v1886_v63  ;;  %v1321_v17 = vmax.f32 %v1182_v11, 0.0 }
 0x312   : > { %v1258_v39 = vmax.f32 %v1024_v1, 0.0  ;;  %v2053_v62 = vmax.f32 %v1887_v28, 0.0 }
 0x313   : > { %v1731_v9 = vpop.f32.mrf.mxu1 }
 0x314   : > { %v1357_v16 = vpack.c.bf16 %v1258_v39, %v1257_v31  ;;  %v1732_v45 = vadd.f32 %v7906_v36, %v1731_v9 }
 0x315   : > { %v1183_v59 = vpop.f32.mrf.mxu3 }
 0x316   : > { %v1184_v19 = vadd.f32 %v8019_v38, %v1183_v59  ;;  %6537 = vmatmul.msk.bf16.gmra.mxu1 %vm1429_vm1, %v1357_v16  ;;  %v1991_v7 = vmax.f32 %v1732_v45, 0.0 }
 0x317   : > { %v1026_v6 = vpop.f32.mrf.mxu0  ;;  %v1888_v56 = vpop.f32.mrf.mxu2 }
 0x318   : > { %v1322_v14 = vmax.f32 %v1184_v19, 0.0  ;;  %v1889_v23 = vadd.f32 %v7906_v36, %v1888_v56  ;;  %v1027_v53 = vadd.f32 %v8019_v38, %v1026_v6 }
 0x31a   : > { %v1389_v46 = vpack.c.bf16 %v1322_v14, %v1321_v17  ;;  %v2054_v54 = vmax.f32 %v1889_v23, 0.0  ;;  %2889 = vmatmul.bf16.gmra.mxu3 %v7773_v47  ;;  %3213 = vmatmul.bf16.gmra.mxu0 %v7744_v30  ;;  %v1259_v16 = vmax.f32 %v1027_v53, 0.0 }
 0x31b   : > { %v1733_v2 = vpop.f32.mrf.mxu1 }
 0x31c   : > { %v8081_v58 = vpack.c.bf16 %v2054_v54, %v2053_v62  ;;  %v1734_v63 = vadd.f32 %v7906_v36, %v1733_v2  ;;  %6569 = vmatmul.msk.bf16.gmra.mxu2 %vm1429_vm1, %v1389_v46 }
 0x31d   : > { %v1186_v1 = vpop.f32.mrf.mxu3 }
 0x31e   : > { %8888 = vst [vmem:[#allocation30_spill] sm:$0xff] %v8081_v58  ;;  %v1992_v29 = vmax.f32 %v1734_v63, 0.0  ;;  %v1187_v19 = vadd.f32 %v8019_v38, %v1186_v1  ;;  %v6892_v58 = vld [vmem:[#allocation3 + $0x1b4] sm:$0xf0] }
 0x31f   : > { %v1028_v31 = vpop.f32.mrf.mxu0  ;;  %v1891_v39 = vpop.f32.mrf.mxu2 }
 0x320   : > { %v8086_v9 = vpack.c.bf16 %v1992_v29, %v1991_v7  ;;  %v1029_v11 = vadd.f32 %v8019_v38, %v1028_v31  ;;  %v1892_v14 = vadd.f32 %v7906_v36, %v1891_v39  ;;  %v1323_v45 = vmax.f32 %v1187_v19, 0.0 }
 0x322   : > { %v1260_v59 = vmax.f32 %v1029_v11, 0.0  ;;  %v2055_v2 = vmax.f32 %v1892_v14, 0.0  ;;  %v6895_v14 = vld [vmem:[#allocation3 + $0x1d4] sm:$0xf] }
 0x323   : > { %v1736_v28 = vpop.f32.mrf.mxu1 }
 0x324   : > { %v1358_v56 = vpack.c.bf16 %v1260_v59, %v1259_v16  ;;  %v1737_v63 = vadd.f32 %v7906_v36, %v1736_v28 }
 0x325   : > { %v1188_v17 = vpop.f32.mrf.mxu3 }
 0x326   : > { %v1189_v23 = vadd.f32 %v8019_v38, %v1188_v17  ;;  %6538 = vmatmul.msk.bf16.gmra.mxu1 %vm1429_vm1, %v1358_v56  ;;  %v1993_v11 = vmax.f32 %v1737_v63, 0.0 }
 0x327   : > { %v1031_v6 = vpop.f32.mrf.mxu0  ;;  %v1893_v62 = vpop.f32.mrf.mxu2 }
 0x328   : > { %v1324_v46 = vmax.f32 %v1189_v23, 0.0  ;;  %v1894_v54 = vadd.f32 %v7906_v36, %v1893_v62  ;;  %v1032_v16 = vadd.f32 %v8019_v38, %v1031_v6  ;;  %v6817_v23 = vld [vmem:[#allocation3 + $0x1f0] sm:$0xf0] }
 0x329   : > { %v6820_v62 = vor.u32 %v6895_v14, %v6817_v23 }
 0x32a   : > { %v1390_v7 = vpack.c.bf16 %v1324_v46, %v1323_v45  ;;  %v2056_v53 = vmax.f32 %v1894_v54, 0.0  ;;  %2894 = vmatmul.bf16.gmra.mxu3 %v7797_v3  ;;  %3218 = vmatmul.bf16.gmra.mxu0 %v7773_v47  ;;  %v1261_v45 = vmax.f32 %v1032_v16, 0.0 }
 0x32b   : > { %v1738_v1 = vpop.f32.mrf.mxu1  ;;  %4172 = vmatpush.bf16.msra.mxu3 %v6820_v62 }
 0x32c   : > { %v8097_v29 = vpack.c.bf16 %v2056_v53, %v2055_v2  ;;  %v1739_v31 = vadd.f32 %v7906_v36, %v1738_v1  ;;  %6570 = vmatmul.msk.bf16.gmra.mxu2 %vm1429_vm1, %v1390_v7 }
 0x32d   : > { %v1191_v39 = vpop.f32.mrf.mxu3 }
 0x32e   : > { %8889 = vst [vmem:[#allocation31_spill] sm:$0xff] %v8097_v29  ;;  %v1994_v59 = vmax.f32 %v1739_v31, 0.0  ;;  %v1192_v2 = vadd.f32 %v8019_v38, %v1191_v39 }
 0x32f   : > { %v1033_v19 = vpop.f32.mrf.mxu0  ;;  %v1896_v28 = vpop.f32.mrf.mxu2 }
 0x330   : > { %v8102_v56 = vpack.c.bf16 %v1994_v59, %v1993_v11  ;;  %v1034_v17 = vadd.f32 %v8019_v38, %v1033_v19  ;;  %v1897_v6 = vadd.f32 %v7906_v36, %v1896_v28  ;;  %v1325_v11 = vmax.f32 %v1192_v2, 0.0 }
 0x332   : > { %8890 = vst [vmem:[#allocation32_spill] sm:$0xff] %v8102_v56  ;;  %v1262_v46 = vmax.f32 %v1034_v17, 0.0  ;;  %v2057_v16 = vmax.f32 %v1897_v6, 0.0 }
 0x333   : > { %v1741_v54 = vpop.f32.mrf.mxu1 }
 0x334   : > { %v1359_v7 = vpack.c.bf16 %v1262_v46, %v1261_v45  ;;  %v1742_v17 = vadd.f32 %v7906_v36, %v1741_v54 }
 0x335   : > { %v1193_v63 = vpop.f32.mrf.mxu3 }
 0x336   : > { %v1194_v53 = vadd.f32 %v8019_v38, %v1193_v63  ;;  %6539 = vmatmul.msk.bf16.gmra.mxu1 %vm1429_vm1, %v1359_v7  ;;  %v1995_v46 = vmax.f32 %v1742_v17, 0.0 }
 0x337   : > { %v1036_v1 = vpop.f32.mrf.mxu0  ;;  %v1898_v31 = vpop.f32.mrf.mxu2 }
 0x338   : > { %v1326_v59 = vmax.f32 %v1194_v53, 0.0  ;;  %v1899_v19 = vadd.f32 %v7906_v36, %v1898_v31  ;;  %v1037_v2 = vadd.f32 %v8019_v38, %v1036_v1  ;;  %v6815_v31 = vld [vmem:[#allocation3 + $0x1d0] sm:$0xf] }
 0x33a   : > { %v1391_v14 = vpack.c.bf16 %v1326_v59, %v1325_v11  ;;  %v2058_v23 = vmax.f32 %v1899_v19, 0.0  ;;  %2899 = vmatmul.bf16.gmra.mxu3 %v7821_v61  ;;  %3223 = vmatmul.bf16.gmra.mxu0 %v7797_v3  ;;  %v6899_v11 = vld [vmem:[#allocation3 + $0x1ec] sm:$0xf0]  ;;  %v1263_v19 = vmax.f32 %v1037_v2, 0.0 }
 0x33b   : > { %v1743_v39 = vpop.f32.mrf.mxu1  ;;  %v6816_v59 = vor.u32 %v6899_v11, %v6815_v31 }
 0x33c   : > { %v8113_v28 = vpack.c.bf16 %v2058_v23, %v2057_v16  ;;  %v1744_v62 = vadd.f32 %v7906_v36, %v1743_v39  ;;  %6571 = vmatmul.msk.bf16.gmra.mxu2 %vm1429_vm1, %v1391_v14  ;;  %v6823_v23 = vld [vmem:[#allocation3 + $0x1d8] sm:$0xf] }
 0x33d   : > { %v1196_v45 = vpop.f32.mrf.mxu3  ;;  %v6900_v39 = vld [vmem:[#allocation3 + $0x1f4] sm:$0xf0]  ;;  %3843 = vmatpush.bf16.msra.mxu2 %v6816_v59 }
 0x33e   : > { %8891 = vst [vmem:[#allocation33_spill] sm:$0xff] %v8113_v28  ;;  %v1996_v7 = vmax.f32 %v1744_v62, 0.0  ;;  %v6824_v14 = vor.u32 %v6900_v39, %v6823_v23  ;;  %v1197_v17 = vadd.f32 %v8019_v38, %v1196_v45 }
 0x33f   : > { %v1038_v63 = vpop.f32.mrf.mxu0  ;;  %v1901_v54 = vpop.f32.mrf.mxu2 }
 0x340   : > { %v8118_v6 = vpack.c.bf16 %v1996_v7, %v1995_v46  ;;  %v1039_v53 = vadd.f32 %v8019_v38, %v1038_v63  ;;  %4501 = vmatpush.bf16.msra.mxu0 %v6824_v14  ;;  %v1902_v46 = vadd.f32 %v7906_v36, %v1901_v54  ;;  %v1327_v2 = vmax.f32 %v1197_v17, 0.0 }
 0x342   : > { %v1264_v16 = vmax.f32 %v1039_v53, 0.0  ;;  %v2059_v29 = vmax.f32 %v1902_v46, 0.0 }
 0x343   : > { %v1746_v28 = vpop.f32.mrf.mxu1 }
 0x344   : > { %v1360_v1 = vpack.c.bf16 %v1264_v16, %v1263_v19  ;;  %v1747_v59 = vadd.f32 %v7906_v36, %v1746_v28 }
 0x345   : > { %v1198_v62 = vpop.f32.mrf.mxu3 }
 0x346   : > { %v1199_v7 = vadd.f32 %v8019_v38, %v1198_v62  ;;  %6540 = vmatmul.msk.bf16.gmra.mxu1 %vm1429_vm1, %v1360_v1  ;;  %v1997_v14 = vmax.f32 %v1747_v59, 0.0 }
 0x347   : > { %v1041_v63 = vpop.f32.mrf.mxu0  ;;  %v1903_v31 = vpop.f32.mrf.mxu2 }
 0x348   : > { %v1328_v53 = vmax.f32 %v1199_v7, 0.0  ;;  %v1904_v11 = vadd.f32 %v7906_v36, %v1903_v31  ;;  %v1042_v17 = vadd.f32 %v8019_v38, %v1041_v63  ;;  %v6896_v31 = vld [vmem:[#allocation3 + $0x1dc] sm:$0xf] }
 0x34a   : > { %v1392_v23 = vpack.c.bf16 %v1328_v53, %v1327_v2  ;;  %v2060_v45 = vmax.f32 %v1904_v11, 0.0  ;;  %2904 = vmatmul.bf16.gmra.mxu3 %v7845_v18  ;;  %3228 = vmatmul.bf16.gmra.mxu0 %v7821_v61  ;;  %v6825_v2 = vld [vmem:[#allocation3 + $0x1f8] sm:$0xf0] }
 0x34b   : > { %v1748_v54 = vpop.f32.mrf.mxu1  ;;  %v8137_v53 = vor.u32 %v6896_v31, %v6825_v2 }
 0x34c   : > { %v8129_v19 = vpack.c.bf16 %v2060_v45, %v2059_v29  ;;  %v1749_v16 = vadd.f32 %v7906_v36, %v1748_v54  ;;  %6572 = vmatmul.msk.bf16.gmra.mxu2 %vm1429_vm1, %v1392_v23  ;;  %v1265_v29 = vmax.f32 %v1042_v17, 0.0 }
 0x34d   : > { %v2865_v39 = vpop.f32.mrf.mxu3  ;;  %8893 = vst [vmem:[#allocation35_spill] sm:$0xff] %v8137_v53  ;;  %4830 = vmatpush.bf16.msra.mxu1 %v8137_v53 }
 0x34e   : > { %8892 = vst [vmem:[#allocation34_spill] sm:$0xff] %v8129_v19  ;;  %v1998_v1 = vmax.f32 %v1749_v16, 0.0 }
 0x34f   : > { %v1043_v62 = vpop.f32.mrf.mxu0  ;;  %v1906_v28 = vpop.f32.mrf.mxu2 }
 0x350   : > { %v8134_v46 = vpack.c.bf16 %v1998_v1, %v1997_v14  ;;  %v1044_v7 = vadd.f32 %v8019_v38, %v1043_v62  ;;  %v1907_v63 = vadd.f32 %v7906_v36, %v1906_v28 }
 0x352   : > { %v1266_v11 = vmax.f32 %v1044_v7, 0.0  ;;  %v2061_v1 = vmax.f32 %v1907_v63, 0.0 }
 0x353   : > { %v1751_v45 = vpop.f32.mrf.mxu1 }
 0x354   : > { %v1361_v23 = vpack.c.bf16 %v1266_v11, %v1265_v29  ;;  %v1752_v62 = vadd.f32 %v7906_v36, %v1751_v45 }
 0x355   : > { %v2867_v59 = vpop.f32.mrf.mxu3 }
 0x356   : > { %v5286_v54 = vmax.f32 %v2865_v39, %v2867_v59  ;;  %6541 = vmatmul.msk.bf16.gmra.mxu1 %vm1429_vm1, %v1361_v23  ;;  %v1999_v2 = vmax.f32 %v1752_v62, 0.0 }
 0x357   : > { %v1908_v16 = vpop.f32.mrf.mxu2  ;;  %v3194_v14 = vpop.f32.mrf.mxu0 }
 0x358   : > { %v1909_v38 = vadd.f32 %v7906_v36, %v1908_v16 }
 0x35a   : > { %v2062_v31 = vmax.f32 %v1909_v38, 0.0  ;;  %2909 = vmatmul.bf16.gmra.mxu3 %v7869_v13  ;;  %3233 = vmatmul.bf16.gmra.mxu0 %v7845_v18 }
 0x35b   : > { %v1753_v17 = vpop.f32.mrf.mxu1 }
 0x35c   : > { %v8146_v7 = vpack.c.bf16 %v2062_v31, %v2061_v1  ;;  %v1754_v28 = vadd.f32 %v7906_v36, %v1753_v17  ;;  %2535 = vmatmul.bf16.vlgmr.msrb.gmra.mxu2 %v7654_v52  ;;  %v8155_v1 = vld [vmem:[%s8784_s4] ss:$0 sm:$0xff] }
 0x35d   : > { %v2870_v39 = vpop.f32.mrf.mxu3 }
 0x35e   : > { %8894 = vst [vmem:[#allocation36_spill] sm:$0xff] %v8146_v7  ;;  %v2000_v29 = vmax.f32 %v1754_v28, 0.0  ;;  %v5287_v11 = vmax.f32 %v5286_v54, %v2870_v39 }
 0x35f   : > { %v1911_v23 = vpop.f32.mrf.mxu2  ;;  %v3196_v59 = vpop.f32.mrf.mxu0 }
 0x360   : > { %v8150_v63 = vpack.c.bf16 %v2000_v29, %v1999_v2  ;;  %v5413_v45 = vmax.f32 %v3194_v14, %v3196_v59  ;;  %v1912_v36 = vadd.f32 %v8155_v1, %v1911_v23 }
 0x362   : > { %v2063_v39 = vmax.f32 %v1912_v36, 0.0 }
 0x363   : > { %v1756_v16 = vpop.f32.mrf.mxu1 }
 0x364   : > { %v1757_v14 = vadd.f32 %v8155_v1, %v1756_v16 }
 0x365   : > { %v2872_v38 = vpop.f32.mrf.mxu3 }
 0x366   : > { %v5288_v31 = vmax.f32 %v5287_v11, %v2872_v38  ;;  %3522 = vmatmul.bf16.vlgmr.msrb.gmra.mxu1 %v7654_v52  ;;  %v2001_v38 = vmax.f32 %v1757_v14, 0.0 }
 0x367   : > { %v1913_v62 = vpop.f32.mrf.mxu2  ;;  %v3199_v17 = vpop.f32.mrf.mxu0 }
 0x368   : > { %v1914_v54 = vadd.f32 %v8155_v1, %v1913_v62  ;;  %v5414_v28 = vmax.f32 %v5413_v45, %v3199_v17 }
 0x36a   : > { %v2064_v2 = vmax.f32 %v1914_v54, 0.0  ;;  %2914 = vmatmul.bf16.gmra.mxu3 %v7893_v34  ;;  %3238 = vmatmul.bf16.gmra.mxu0 %v7869_v13 }
 0x36b   : > { %v1758_v29 = vpop.f32.mrf.mxu1 }
 0x36c   : > { %v8163_v59 = vpack.c.bf16 %v2064_v2, %v2063_v39  ;;  %v1759_v11 = vadd.f32 %v8155_v1, %v1758_v29  ;;  %2540 = vmatmul.bf16.gmra.mxu2 %v7674_v20 }
 0x36d   : > { %v2875_v23 = vpop.f32.mrf.mxu3 }
 0x36e   : > { %8895 = vst [vmem:[#allocation37_spill] sm:$0xff] %v8163_v59  ;;  %v2002_v52 = vmax.f32 %v1759_v11, 0.0  ;;  %v5289_v62 = vmax.f32 %v5288_v31, %v2875_v23 }
 0x36f   : > { %v1916_v45 = vpop.f32.mrf.mxu2  ;;  %v3201_v36 = vpop.f32.mrf.mxu0 }
 0x370   : > { %v8167_v17 = vpack.c.bf16 %v2002_v52, %v2001_v38  ;;  %v5415_v16 = vmax.f32 %v5414_v28, %v3201_v36  ;;  %v1917_v7 = vadd.f32 %v8155_v1, %v1916_v45 }
 0x372   : > { %v2065_v14 = vmax.f32 %v1917_v7, 0.0 }
 0x373   : > { %v1761_v54 = vpop.f32.mrf.mxu1 }
 0x374   : > { %v1762_v31 = vadd.f32 %v8155_v1, %v1761_v54 }
 0x375   : > { %v2877_v53 = vpop.f32.mrf.mxu3 }
 0x376   : > { %v5290_v19 = vmax.f32 %v5289_v62, %v2877_v53  ;;  %3527 = vmatmul.bf16.gmra.mxu1 %v7674_v20  ;;  %v2003_v38 = vmax.f32 %v1762_v31, 0.0 }
 0x377   : > { %v1918_v39 = vpop.f32.mrf.mxu2  ;;  %v3204_v2 = vpop.f32.mrf.mxu0 }
 0x378   : > { %v1919_v29 = vadd.f32 %v8155_v1, %v1918_v39  ;;  %v5416_v59 = vmax.f32 %v5415_v16, %v3204_v2 }
 0x37a   : > { %v2066_v11 = vmax.f32 %v1919_v29, 0.0  ;;  %2919 = vmatmul.bf16.gmra.mxu3 %v7922_v27  ;;  %3243 = vmatmul.bf16.gmra.mxu0 %v7893_v34 }
 0x37b   : > { %v1763_v52 = vpop.f32.mrf.mxu1 }
 0x37c   : > { %v8175_v28 = vpack.c.bf16 %v2066_v11, %v2065_v14  ;;  %v1764_v53 = vadd.f32 %v8155_v1, %v1763_v52  ;;  %2545 = vmatmul.bf16.gmra.mxu2 %v7698_v4 }
 0x37d   : > { %v2880_v23 = vpop.f32.mrf.mxu3 }
 0x37e   : > { %8896 = vst [vmem:[#allocation38_spill] sm:$0xff] %v8175_v28  ;;  %v2004_v62 = vmax.f32 %v1764_v53, 0.0  ;;  %v5291_v45 = vmax.f32 %v5290_v19, %v2880_v23 }
 0x37f   : > { %v1921_v36 = vpop.f32.mrf.mxu2  ;;  %v3206_v7 = vpop.f32.mrf.mxu0 }
 0x380   : > { %v8179_v16 = vpack.c.bf16 %v2004_v62, %v2003_v38  ;;  %v5417_v54 = vmax.f32 %v5416_v59, %v3206_v7  ;;  %v1922_v29 = vadd.f32 %v8155_v1, %v1921_v36 }
 0x382   : > { %v2067_v31 = vmax.f32 %v1922_v29, 0.0 }
 0x383   : > { %v1766_v39 = vpop.f32.mrf.mxu1 }
 0x384   : > { %v1767_v19 = vadd.f32 %v8155_v1, %v1766_v39 }
 0x385   : > { %v2882_v2 = vpop.f32.mrf.mxu3 }
 0x386   : > { %v5292_v20 = vmax.f32 %v5291_v45, %v2882_v2  ;;  %3532 = vmatmul.bf16.gmra.mxu1 %v7698_v4  ;;  %v2005_v45 = vmax.f32 %v1767_v19, 0.0 }
 0x387   : > { %v1923_v14 = vpop.f32.mrf.mxu2  ;;  %v3209_v11 = vpop.f32.mrf.mxu0 }
 0x388   : > { %v1924_v52 = vadd.f32 %v8155_v1, %v1923_v14  ;;  %v5418_v28 = vmax.f32 %v5417_v54, %v3209_v11 }
 0x38a   : > { %v2068_v53 = vmax.f32 %v1924_v52, 0.0  ;;  %2924 = vmatmul.bf16.gmra.mxu3 %v7944_v43  ;;  %3248 = vmatmul.bf16.gmra.mxu0 %v7922_v27 }
 0x38b   : > { %v1768_v59 = vpop.f32.mrf.mxu1 }
 0x38c   : > { %v8187_v23 = vpack.c.bf16 %v2068_v53, %v2067_v31  ;;  %v1769_v38 = vadd.f32 %v8155_v1, %v1768_v59  ;;  %2550 = vmatmul.bf16.gmra.mxu2 %v7722_v51 }
 0x38d   : > { %v2885_v62 = vpop.f32.mrf.mxu3 }
 0x38e   : > { %8897 = vst [vmem:[#allocation39_spill] sm:$0xff] %v8187_v23  ;;  %v2006_v36 = vmax.f32 %v1769_v38, 0.0  ;;  %v5293_v7 = vmax.f32 %v5292_v20, %v2885_v62 }
 0x38f   : > { %v1926_v54 = vpop.f32.mrf.mxu2  ;;  %v3211_v2 = vpop.f32.mrf.mxu0 }
 0x390   : > { %v8191_v29 = vpack.c.bf16 %v2006_v36, %v2005_v45  ;;  %v5419_v39 = vmax.f32 %v5418_v28, %v3211_v2  ;;  %v1927_v52 = vadd.f32 %v8155_v1, %v1926_v54 }
 0x392   : > { %v2069_v19 = vmax.f32 %v1927_v52, 0.0 }
 0x393   : > { %v1771_v14 = vpop.f32.mrf.mxu1 }
 0x394   : > { %v1772_v20 = vadd.f32 %v8155_v1, %v1771_v14 }
 0x395   : > { %v2887_v11 = vpop.f32.mrf.mxu3 }
 0x396   : > { %v5294_v4 = vmax.f32 %v5293_v7, %v2887_v11  ;;  %3537 = vmatmul.bf16.gmra.mxu1 %v7722_v51  ;;  %v2007_v7 = vmax.f32 %v1772_v20, 0.0 }
 0x397   : > { %v1928_v31 = vpop.f32.mrf.mxu2  ;;  %v3214_v53 = vpop.f32.mrf.mxu0 }
 0x398   : > { %v1929_v59 = vadd.f32 %v8155_v1, %v1928_v31  ;;  %v5420_v23 = vmax.f32 %v5419_v39, %v3214_v53 }
 0x39a   : > { %v2070_v38 = vmax.f32 %v1929_v59, 0.0  ;;  %2929 = vmatmul.bf16.gmra.mxu3 %v7964_v48  ;;  %3253 = vmatmul.bf16.gmra.mxu0 %v7944_v43 }
 0x39b   : > { %v1773_v28 = vpop.f32.mrf.mxu1 }
 0x39c   : > { %v8199_v62 = vpack.c.bf16 %v2070_v38, %v2069_v19  ;;  %v1774_v45 = vadd.f32 %v8155_v1, %v1773_v28  ;;  %2555 = vmatmul.bf16.gmra.mxu2 %v7744_v30 }
 0x39d   : > { %v2890_v36 = vpop.f32.mrf.mxu3 }
 0x39e   : > { %8898 = vst [vmem:[#allocation40_spill] sm:$0xff] %v8199_v62  ;;  %v2008_v54 = vmax.f32 %v1774_v45, 0.0  ;;  %v5295_v2 = vmax.f32 %v5294_v4, %v2890_v36 }
 0x39f   : > { %v1931_v39 = vpop.f32.mrf.mxu2  ;;  %v3216_v11 = vpop.f32.mrf.mxu0 }
 0x3a0   : > { %v8203_v52 = vpack.c.bf16 %v2008_v54, %v2007_v7  ;;  %v5421_v14 = vmax.f32 %v5420_v23, %v3216_v11  ;;  %v1932_v59 = vadd.f32 %v8155_v1, %v1931_v39 }
 0x3a2   : > { %v2071_v20 = vmax.f32 %v1932_v59, 0.0 }
 0x3a3   : > { %v1776_v31 = vpop.f32.mrf.mxu1 }
 0x3a4   : > { %v1777_v4 = vadd.f32 %v8155_v1, %v1776_v31 }
 0x3a5   : > { %v2892_v53 = vpop.f32.mrf.mxu3 }
 0x3a6   : > { %v5296_v51 = vmax.f32 %v5295_v2, %v2892_v53  ;;  %3542 = vmatmul.bf16.gmra.mxu1 %v7744_v30  ;;  %v2009_v2 = vmax.f32 %v1777_v4, 0.0 }
 0x3a7   : > { %v1933_v19 = vpop.f32.mrf.mxu2  ;;  %v3219_v38 = vpop.f32.mrf.mxu0 }
 0x3a8   : > { %v1934_v28 = vadd.f32 %v8155_v1, %v1933_v19  ;;  %v5422_v62 = vmax.f32 %v5421_v14, %v3219_v38  ;;  %v6887_v19 = vld [vmem:[#allocation3 + $0x194] sm:$0xf] }
 0x3a9   : > { %v6785_v38 = vld [vmem:[#allocation3 + $0x1b0] sm:$0xf0] }
 0x3aa   : > { %v2072_v45 = vmax.f32 %v1934_v28, 0.0  ;;  %2934 = vmatmul.bf16.gmra.mxu3 %v7984_v5  ;;  %3258 = vmatmul.bf16.gmra.mxu0 %v7964_v48  ;;  %v6788_v28 = vor.u32 %v6887_v19, %v6785_v38 }
 0x3ab   : > { %v1778_v23 = vpop.f32.mrf.mxu1 }
 0x3ac   : > { %v8211_v36 = vpack.c.bf16 %v2072_v45, %v2071_v20  ;;  %v1779_v7 = vadd.f32 %v8155_v1, %v1778_v23  ;;  %2560 = vmatmul.bf16.gmra.mxu2 %v7773_v47  ;;  %4173 = vmatpush.bf16.msra.mxu3 %v6788_v28 }
 0x3ad   : > { %v2895_v54 = vpop.f32.mrf.mxu3 }
 0x3ae   : > { %8899 = vst [vmem:[#allocation41_spill] sm:$0xff] %v8211_v36  ;;  %v2010_v39 = vmax.f32 %v1779_v7, 0.0  ;;  %v5297_v11 = vmax.f32 %v5296_v51, %v2895_v54 }
 0x3af   : > { %v1936_v14 = vpop.f32.mrf.mxu2  ;;  %v3221_v53 = vpop.f32.mrf.mxu0 }
 0x3b0   : > { %v8215_v59 = vpack.c.bf16 %v2010_v39, %v2009_v2  ;;  %v5423_v31 = vmax.f32 %v5422_v62, %v3221_v53  ;;  %v1937_v45 = vadd.f32 %v8155_v1, %v1936_v14 }
 0x3b2   : > { %8900 = vst [vmem:[#allocation42_spill] sm:$0xff] %v8215_v59  ;;  %v2073_v54 = vmax.f32 %v1937_v45, 0.0  ;;  %v6783_v45 = vld [vmem:[#allocation3 + $0x190] sm:$0xf] }
 0x3b3   : > { %v1781_v30 = vpop.f32.mrf.mxu1 }
 0x3b4   : > { %v1782_v2 = vadd.f32 %v8155_v1, %v1781_v30 }
 0x3b5   : > { %v2897_v20 = vpop.f32.mrf.mxu3 }
 0x3b6   : > { %v5298_v23 = vmax.f32 %v5297_v11, %v2897_v20  ;;  %3547 = vmatmul.bf16.gmra.mxu1 %v7773_v47  ;;  %v2011_v19 = vmax.f32 %v1782_v2, 0.0 }
 0x3b7   : > { %v1938_v36 = vpop.f32.mrf.mxu2  ;;  %v3224_v4 = vpop.f32.mrf.mxu0 }
 0x3b8   : > { %v1939_v51 = vadd.f32 %v8155_v1, %v1938_v36  ;;  %v5424_v7 = vmax.f32 %v5423_v31, %v3224_v4  ;;  %v6891_v4 = vld [vmem:[#allocation3 + $0x1ac] sm:$0xf0] }
 0x3b9   : > { %v6784_v47 = vor.u32 %v6891_v4, %v6783_v45 }
 0x3ba   : > { %v2074_v62 = vmax.f32 %v1939_v51, 0.0  ;;  %2939 = vmatmul.bf16.gmra.mxu3 %v8001_v24  ;;  %3263 = vmatmul.bf16.gmra.mxu0 %v7984_v5  ;;  %v6791_v51 = vld [vmem:[#allocation3 + $0x198] sm:$0xf] }
 0x3bb   : > { %v1783_v39 = vpop.f32.mrf.mxu1  ;;  %3844 = vmatpush.bf16.msra.mxu2 %v6784_v47 }
 0x3bc   : > { %v8223_v53 = vpack.c.bf16 %v2074_v62, %v2073_v54  ;;  %v1784_v11 = vadd.f32 %v8155_v1, %v1783_v39  ;;  %2565 = vmatmul.bf16.gmra.mxu2 %v7797_v3  ;;  %v6792_v54 = vor.u32 %v6892_v58, %v6791_v51 }
 0x3bd   : > { %v2900_v14 = vpop.f32.mrf.mxu3 }
 0x3be   : > { %8901 = vst [vmem:[#allocation43_spill] sm:$0xff] %v8223_v53  ;;  %v2012_v38 = vmax.f32 %v1784_v11, 0.0  ;;  %v5299_v36 = vmax.f32 %v5298_v23, %v2900_v14  ;;  %4502 = vmatpush.bf16.msra.mxu0 %v6792_v54 }
 0x3bf   : > { %v1941_v31 = vpop.f32.mrf.mxu2  ;;  %v3226_v28 = vpop.f32.mrf.mxu0 }
 0x3c0   : > { %v8227_v20 = vpack.c.bf16 %v2012_v38, %v2011_v19  ;;  %v5425_v30 = vmax.f32 %v5424_v7, %v3226_v28  ;;  %v1942_v53 = vadd.f32 %v8155_v1, %v1941_v31 }
 0x3c2   : > { %v2075_v19 = vmax.f32 %v1942_v53, 0.0  ;;  %v6793_v53 = vld [vmem:[#allocation3 + $0x1b8] sm:$0xf0] }
 0x3c3   : > { %v1786_v62 = vpop.f32.mrf.mxu1 }
 0x3c4   : > { %v1787_v38 = vadd.f32 %v8155_v1, %v1786_v62 }
 0x3c5   : > { %v2902_v39 = vpop.f32.mrf.mxu3 }
 0x3c6   : > { %v5300_v2 = vmax.f32 %v5299_v36, %v2902_v39  ;;  %3552 = vmatmul.bf16.gmra.mxu1 %v7797_v3  ;;  %v2013_v45 = vmax.f32 %v1787_v38, 0.0 }
 0x3c7   : > { %v1943_v23 = vpop.f32.mrf.mxu2  ;;  %v3229_v11 = vpop.f32.mrf.mxu0 }
 0x3c8   : > { %v1944_v14 = vadd.f32 %v8155_v1, %v1943_v23  ;;  %v5426_v7 = vmax.f32 %v5425_v30, %v3229_v11  ;;  %v6888_v30 = vld [vmem:[#allocation3 + $0x19c] sm:$0xf] }
 0x3c9   : > { %v8239_v39 = vor.u32 %v6888_v30, %v6793_v53 }
 0x3ca   : > { %v2076_v28 = vmax.f32 %v1944_v14, 0.0  ;;  %2944 = vmatmul.bf16.gmra.mxu3 %v8022_v0  ;;  %3268 = vmatmul.bf16.gmra.mxu0 %v8001_v24 }
 0x3cb   : > { %v1788_v47 = vpop.f32.mrf.mxu1  ;;  %4831 = vmatpush.bf16.msra.mxu1 %v8239_v39 }
 0x3cc   : > { %v8235_v58 = vpack.c.bf16 %v2076_v28, %v2075_v19  ;;  %v1789_v36 = vadd.f32 %v8155_v1, %v1788_v47  ;;  %2570 = vmatmul.bf16.gmra.mxu2 %v7821_v61 }
 0x3cd   : > { %v2905_v31 = vpop.f32.mrf.mxu3 }
 0x3ce   : > { %8902 = vst [vmem:[#allocation44_spill] sm:$0xff] %v8235_v58  ;;  %v2014_v4 = vmax.f32 %v1789_v36, 0.0  ;;  %v5301_v51 = vmax.f32 %v5300_v2, %v2905_v31 }
 0x3cf   : > { %v1946_v54 = vpop.f32.mrf.mxu2  ;;  %v3231_v62 = vpop.f32.mrf.mxu0 }
 0x3d0   : > { %v8241_v23 = vpack.c.bf16 %v2014_v4, %v2013_v45  ;;  %v5427_v11 = vmax.f32 %v5426_v7, %v3231_v62  ;;  %v1947_v28 = vadd.f32 %v8155_v1, %v1946_v54 }
 0x3d2   : > { %v2077_v3 = vmax.f32 %v1947_v28, 0.0 }
 0x3d3   : > { %v1791_v14 = vpop.f32.mrf.mxu1 }
 0x3d4   : > { %v1792_v30 = vadd.f32 %v8155_v1, %v1791_v14 }
 0x3d5   : > { %v2907_v19 = vpop.f32.mrf.mxu3 }
 0x3d6   : > { %v5302_v47 = vmax.f32 %v5301_v51, %v2907_v19  ;;  %3557 = vmatmul.bf16.gmra.mxu1 %v7821_v61  ;;  %v2015_v54 = vmax.f32 %v1792_v30, 0.0 }
 0x3d7   : > { %v1948_v38 = vpop.f32.mrf.mxu2  ;;  %v3234_v2 = vpop.f32.mrf.mxu0 }
 0x3d8   : > { %v1949_v36 = vadd.f32 %v8155_v1, %v1948_v38  ;;  %v5428_v31 = vmax.f32 %v5427_v11, %v3234_v2 }
 0x3da   : > { %v2078_v45 = vmax.f32 %v1949_v36, 0.0  ;;  %2949 = vmatmul.bf16.gmra.mxu3 %v8038_v41  ;;  %3273 = vmatmul.bf16.gmra.mxu0 %v8022_v0 }
 0x3db   : > { %v1793_v7 = vpop.f32.mrf.mxu1 }
 0x3dc   : > { %v8250_v4 = vpack.c.bf16 %v2078_v45, %v2077_v3  ;;  %v1794_v51 = vadd.f32 %v8155_v1, %v1793_v7  ;;  %2575 = vmatmul.bf16.gmra.mxu2 %v7845_v18 }
 0x3dd   : > { %v2910_v53 = vpop.f32.mrf.mxu3 }
 0x3de   : > { %8903 = vst [vmem:[#allocation45_spill] sm:$0xff] %v8250_v4  ;;  %v2016_v62 = vmax.f32 %v1794_v51, 0.0  ;;  %v5303_v19 = vmax.f32 %v5302_v47, %v2910_v53 }
 0x3df   : > { %v2536_v11 = vpop.f32.mrf.mxu2  ;;  %v3236_v28 = vpop.f32.mrf.mxu0 }
 0x3e0   : > { %v8254_v38 = vpack.c.bf16 %v2016_v62, %v2015_v54  ;;  %v5429_v14 = vmax.f32 %v5428_v31, %v3236_v28 }
 0x3e3   : > { %v3523_v2 = vpop.f32.mrf.mxu1 }
 0x3e5   : > { %v2912_v36 = vpop.f32.mrf.mxu3 }
 0x3e6   : > { %v5304_v61 = vmax.f32 %v5303_v19, %v2912_v36  ;;  %3562 = vmatmul.bf16.gmra.mxu1 %v7845_v18 }
 0x3e7   : > { %v2538_v3 = vpop.f32.mrf.mxu2  ;;  %v3239_v45 = vpop.f32.mrf.mxu0 }
 0x3e8   : > { %v5159_v4 = vmax.f32 %v2536_v11, %v2538_v3  ;;  %v5430_v1 = vmax.f32 %v5429_v14, %v3239_v45 }
 0x3ea   : > { %2954 = vmatmul.bf16.gmra.mxu3 %v8054_v21  ;;  %3278 = vmatmul.bf16.gmra.mxu0 %v8038_v41 }
 0x3eb   : > { %v3525_v30 = vpop.f32.mrf.mxu1 }
 0x3ec   : > { %v5540_v47 = vmax.f32 %v3523_v2, %v3525_v30  ;;  %2580 = vmatmul.bf16.gmra.mxu2 %v7869_v13 }
 0x3ed   : > { %v2915_v7 = vpop.f32.mrf.mxu3 }
 0x3ee   : > { %v5305_v51 = vmax.f32 %v5304_v61, %v2915_v7 }
 0x3ef   : > { %v2541_v31 = vpop.f32.mrf.mxu2  ;;  %v3241_v53 = vpop.f32.mrf.mxu0 }
 0x3f0   : > { %v5160_v54 = vmax.f32 %v5159_v4, %v2541_v31  ;;  %v5431_v62 = vmax.f32 %v5430_v1, %v3241_v53 }
 0x3f3   : > { %v3528_v19 = vpop.f32.mrf.mxu1 }
 0x3f4   : > { %v5541_v28 = vmax.f32 %v5540_v47, %v3528_v19 }
 0x3f5   : > { %v2917_v36 = vpop.f32.mrf.mxu3 }
 0x3f6   : > { %v5306_v18 = vmax.f32 %v5305_v51, %v2917_v36  ;;  %3567 = vmatmul.bf16.gmra.mxu1 %v7869_v13 }
 0x3f7   : > { %v2543_v11 = vpop.f32.mrf.mxu2  ;;  %v3244_v14 = vpop.f32.mrf.mxu0 }
 0x3f8   : > { %v5161_v3 = vmax.f32 %v5160_v54, %v2543_v11  ;;  %v5432_v45 = vmax.f32 %v5431_v62, %v3244_v14 }
 0x3fa   : > { %2959 = vmatmul.bf16.gmra.mxu3 %v8070_v37  ;;  %3283 = vmatmul.bf16.gmra.mxu0 %v8054_v21 }
 0x3fb   : > { %v3530_v2 = vpop.f32.mrf.mxu1 }
 0x3fc   : > { %v5542_v61 = vmax.f32 %v5541_v28, %v3530_v2  ;;  %2585 = vmatmul.bf16.gmra.mxu2 %v7893_v34 }
 0x3fd   : > { %v2920_v4 = vpop.f32.mrf.mxu3 }
 0x3fe   : > { %v5307_v1 = vmax.f32 %v5306_v18, %v2920_v4 }
 0x3ff   : > { %v2546_v30 = vpop.f32.mrf.mxu2  ;;  %v3246_v47 = vpop.f32.mrf.mxu0 }
 0x400   : > { %v5162_v7 = vmax.f32 %v5161_v3, %v2546_v30  ;;  %v5433_v51 = vmax.f32 %v5432_v45, %v3246_v47 }
 0x403   : > { %v3533_v31 = vpop.f32.mrf.mxu1 }
 0x404   : > { %v5543_v53 = vmax.f32 %v5542_v61, %v3533_v31 }
 0x405   : > { %v2922_v19 = vpop.f32.mrf.mxu3 }
 0x406   : > { %v5308_v36 = vmax.f32 %v5307_v1, %v2922_v19  ;;  %3572 = vmatmul.bf16.gmra.mxu1 %v7893_v34 }
 0x407   : > { %v2548_v54 = vpop.f32.mrf.mxu2  ;;  %v3249_v62 = vpop.f32.mrf.mxu0 }
 0x408   : > { %v5163_v11 = vmax.f32 %v5162_v7, %v2548_v54  ;;  %v5434_v14 = vmax.f32 %v5433_v51, %v3249_v62 }
 0x40a   : > { %2964 = vmatmul.bf16.gmra.mxu3 %v8086_v9  ;;  %3288 = vmatmul.bf16.gmra.mxu0 %v8070_v37 }
 0x40b   : > { %v3535_v28 = vpop.f32.mrf.mxu1 }
 0x40c   : > { %v5544_v18 = vmax.f32 %v5543_v53, %v3535_v28  ;;  %2590 = vmatmul.bf16.gmra.mxu2 %v7922_v27 }
 0x40d   : > { %v2925_v3 = vpop.f32.mrf.mxu3 }
 0x40e   : > { %v5309_v45 = vmax.f32 %v5308_v36, %v2925_v3 }
 0x40f   : > { %v2551_v2 = vpop.f32.mrf.mxu2  ;;  %v3251_v61 = vpop.f32.mrf.mxu0 }
 0x410   : > { %v5164_v4 = vmax.f32 %v5163_v11, %v2551_v2  ;;  %v5435_v1 = vmax.f32 %v5434_v14, %v3251_v61 }
 0x413   : > { %v3538_v30 = vpop.f32.mrf.mxu1 }
 0x414   : > { %v5545_v47 = vmax.f32 %v5544_v18, %v3538_v30 }
 0x415   : > { %v2927_v31 = vpop.f32.mrf.mxu3 }
 0x416   : > { %v5310_v19 = vmax.f32 %v5309_v45, %v2927_v31  ;;  %3577 = vmatmul.bf16.gmra.mxu1 %v7922_v27 }
 0x417   : > { %v2553_v7 = vpop.f32.mrf.mxu2  ;;  %v3254_v51 = vpop.f32.mrf.mxu0 }
 0x418   : > { %v5165_v54 = vmax.f32 %v5164_v4, %v2553_v7  ;;  %v5436_v62 = vmax.f32 %v5435_v1, %v3254_v51 }
 0x41a   : > { %2969 = vmatmul.bf16.gmra.mxu3 %v8102_v56  ;;  %3293 = vmatmul.bf16.gmra.mxu0 %v8086_v9 }
 0x41b   : > { %v3540_v53 = vpop.f32.mrf.mxu1 }
 0x41c   : > { %v5546_v36 = vmax.f32 %v5545_v47, %v3540_v53  ;;  %2595 = vmatmul.bf16.gmra.mxu2 %v7944_v43 }
 0x41d   : > { %v2930_v11 = vpop.f32.mrf.mxu3 }
 0x41e   : > { %v5311_v14 = vmax.f32 %v5310_v19, %v2930_v11 }
 0x41f   : > { %v2556_v28 = vpop.f32.mrf.mxu2  ;;  %v3256_v18 = vpop.f32.mrf.mxu0 }
 0x420   : > { %v5166_v3 = vmax.f32 %v5165_v54, %v2556_v28  ;;  %v5437_v45 = vmax.f32 %v5436_v62, %v3256_v18  ;;  %v6879_v54 = vld [vmem:[#allocation3 + $0x154] sm:$0xf] }
 0x421   : > { %v6753_v62 = vld [vmem:[#allocation3 + $0x170] sm:$0xf0] }
 0x423   : > { %v3543_v2 = vpop.f32.mrf.mxu1 }
 0x424   : > { %v5547_v61 = vmax.f32 %v5546_v36, %v3543_v2  ;;  %v6756_v36 = vor.u32 %v6879_v54, %v6753_v62 }
 0x425   : > { %v2932_v30 = vpop.f32.mrf.mxu3 }
 0x426   : > { %v5312_v31 = vmax.f32 %v5311_v14, %v2932_v30  ;;  %3582 = vmatmul.bf16.gmra.mxu1 %v7944_v43  ;;  %4174 = vmatpush.bf16.msra.mxu3 %v6756_v36 }
 0x427   : > { %v2558_v4 = vpop.f32.mrf.mxu2  ;;  %v3259_v1 = vpop.f32.mrf.mxu0 }
 0x428   : > { %v5167_v7 = vmax.f32 %v5166_v3, %v2558_v4  ;;  %v5438_v51 = vmax.f32 %v5437_v45, %v3259_v1 }
 0x42a   : > { %2974 = vmatmul.bf16.gmra.mxu3 %v8118_v6  ;;  %3298 = vmatmul.bf16.gmra.mxu0 %v8102_v56 }
 0x42b   : > { %v3545_v47 = vpop.f32.mrf.mxu1 }
 0x42c   : > { %v5548_v19 = vmax.f32 %v5547_v61, %v3545_v47  ;;  %2600 = vmatmul.bf16.gmra.mxu2 %v7964_v48 }
 0x42d   : > { %v2935_v53 = vpop.f32.mrf.mxu3 }
 0x42e   : > { %v5313_v11 = vmax.f32 %v5312_v31, %v2935_v53 }
 0x42f   : > { %v2561_v14 = vpop.f32.mrf.mxu2  ;;  %v3261_v28 = vpop.f32.mrf.mxu0 }
 0x430   : > { %v5168_v18 = vmax.f32 %v5167_v7, %v2561_v14  ;;  %v5439_v2 = vmax.f32 %v5438_v51, %v3261_v28  ;;  %v6751_v7 = vld [vmem:[#allocation3 + $0x150] sm:$0xf] }
 0x431   : > { %v6883_v51 = vld [vmem:[#allocation3 + $0x16c] sm:$0xf0] }
 0x433   : > { %v3548_v3 = vpop.f32.mrf.mxu1 }
 0x434   : > { %v5549_v45 = vmax.f32 %v5548_v19, %v3548_v3  ;;  %v6752_v19 = vor.u32 %v6883_v51, %v6751_v7 }
 0x435   : > { %v2937_v30 = vpop.f32.mrf.mxu3 }
 0x436   : > { %v5314_v4 = vmax.f32 %v5313_v11, %v2937_v30  ;;  %3587 = vmatmul.bf16.gmra.mxu1 %v7964_v48  ;;  %3845 = vmatpush.bf16.msra.mxu2 %v6752_v19 }
 0x437   : > { %v2563_v1 = vpop.f32.mrf.mxu2  ;;  %v3264_v61 = vpop.f32.mrf.mxu0 }
 0x438   : > { %v5169_v47 = vmax.f32 %v5168_v18, %v2563_v1  ;;  %v5440_v43 = vmax.f32 %v5439_v2, %v3264_v61  ;;  %v6759_v18 = vld [vmem:[#allocation3 + $0x158] sm:$0xf] }
 0x439   : > { %v6884_v2 = vld [vmem:[#allocation3 + $0x174] sm:$0xf0] }
 0x43a   : > { %2979 = vmatmul.bf16.gmra.mxu3 %v8134_v46  ;;  %3303 = vmatmul.bf16.gmra.mxu0 %v8118_v6  ;;  %v6760_v3 = vor.u32 %v6884_v2, %v6759_v18 }
 0x43b   : > { %v3550_v31 = vpop.f32.mrf.mxu1 }
 0x43c   : > { %v5550_v54 = vmax.f32 %v5549_v45, %v3550_v31  ;;  %2605 = vmatmul.bf16.gmra.mxu2 %v7984_v5  ;;  %4503 = vmatpush.bf16.msra.mxu0 %v6760_v3 }
 0x43d   : > { %v2940_v62 = vpop.f32.mrf.mxu3 }
 0x43e   : > { %v5315_v53 = vmax.f32 %v5314_v4, %v2940_v62  ;;  %v6880_v62 = vld [vmem:[#allocation3 + $0x15c] sm:$0xf] }
 0x43f   : > { %v2566_v36 = vpop.f32.mrf.mxu2  ;;  %v3266_v11 = vpop.f32.mrf.mxu0 }
 0x440   : > { %v5170_v14 = vmax.f32 %v5169_v47, %v2566_v36  ;;  %v5441_v28 = vmax.f32 %v5440_v43, %v3266_v11 }
 0x443   : > { %v3553_v30 = vpop.f32.mrf.mxu1 }
 0x444   : > { %v5551_v1 = vmax.f32 %v5550_v54, %v3553_v30  ;;  %v6761_v54 = vld [vmem:[#allocation3 + $0x178] sm:$0xf0] }
 0x445   : > { %v2942_v61 = vpop.f32.mrf.mxu3  ;;  %v8284_v36 = vor.u32 %v6880_v62, %v6761_v54 }
 0x446   : > { %v5316_v45 = vmax.f32 %v5315_v53, %v2942_v61  ;;  %3592 = vmatmul.bf16.gmra.mxu1 %v7984_v5 }
 0x447   : > { %v2568_v31 = vpop.f32.mrf.mxu2  ;;  %v3269_v48 = vpop.f32.mrf.mxu0  ;;  %4832 = vmatpush.bf16.msra.mxu1 %v8284_v36 }
 0x448   : > { %v5171_v27 = vmax.f32 %v5170_v14, %v2568_v31  ;;  %v5442_v7 = vmax.f32 %v5441_v28, %v3269_v48 }
 0x44a   : > { %2984 = vmatmul.bf16.gmra.mxu3 %v8150_v63  ;;  %3308 = vmatmul.bf16.gmra.mxu0 %v8134_v46 }
 0x44b   : > { %v3555_v4 = vpop.f32.mrf.mxu1 }
 0x44c   : > { %v5552_v43 = vmax.f32 %v5551_v1, %v3555_v4  ;;  %2610 = vmatmul.bf16.gmra.mxu2 %v8001_v24 }
 0x44d   : > { %v2945_v47 = vpop.f32.mrf.mxu3 }
 0x44e   : > { %v5317_v51 = vmax.f32 %v5316_v45, %v2945_v47 }
 0x44f   : > { %v2571_v19 = vpop.f32.mrf.mxu2  ;;  %v3271_v53 = vpop.f32.mrf.mxu0 }
 0x450   : > { %v5172_v11 = vmax.f32 %v5171_v27, %v2571_v19  ;;  %v5443_v18 = vmax.f32 %v5442_v7, %v3271_v53 }
 0x453   : > { %v3558_v48 = vpop.f32.mrf.mxu1 }
 0x454   : > { %v5553_v14 = vmax.f32 %v5552_v43, %v3558_v48 }
 0x455   : > { %v2947_v28 = vpop.f32.mrf.mxu3 }
 0x456   : > { %v5318_v2 = vmax.f32 %v5317_v51, %v2947_v28  ;;  %3597 = vmatmul.bf16.gmra.mxu1 %v8001_v24 }
 0x457   : > { %v2573_v3 = vpop.f32.mrf.mxu2  ;;  %v3274_v30 = vpop.f32.mrf.mxu0 }
 0x458   : > { %v5173_v1 = vmax.f32 %v5172_v11, %v2573_v3  ;;  %v5444_v61 = vmax.f32 %v5443_v18, %v3274_v30 }
 0x45a   : > { %2989 = vmatmul.bf16.gmra.mxu3 %v8167_v17  ;;  %3313 = vmatmul.bf16.gmra.mxu0 %v8150_v63 }
 0x45b   : > { %v3560_v45 = vpop.f32.mrf.mxu1 }
 0x45c   : > { %v5554_v31 = vmax.f32 %v5553_v14, %v3560_v45  ;;  %2615 = vmatmul.bf16.gmra.mxu2 %v8022_v0 }
 0x45d   : > { %v2950_v27 = vpop.f32.mrf.mxu3 }
 0x45e   : > { %v5319_v7 = vmax.f32 %v5318_v2, %v2950_v27 }
 0x45f   : > { %v2576_v4 = vpop.f32.mrf.mxu2  ;;  %v3276_v43 = vpop.f32.mrf.mxu0 }
 0x460   : > { %v5174_v47 = vmax.f32 %v5173_v1, %v2576_v4  ;;  %v5445_v51 = vmax.f32 %v5444_v61, %v3276_v43 }
 0x463   : > { %v3563_v62 = vpop.f32.mrf.mxu1 }
 0x464   : > { %v5555_v54 = vmax.f32 %v5554_v31, %v3563_v62 }
 0x465   : > { %v2952_v19 = vpop.f32.mrf.mxu3 }
 0x466   : > { %v5320_v53 = vmax.f32 %v5319_v7, %v2952_v19  ;;  %3602 = vmatmul.bf16.gmra.mxu1 %v8022_v0 }
 0x467   : > { %v2578_v11 = vpop.f32.mrf.mxu2  ;;  %v3279_v18 = vpop.f32.mrf.mxu0 }
 0x468   : > { %v5175_v48 = vmax.f32 %v5174_v47, %v2578_v11  ;;  %v5446_v28 = vmax.f32 %v5445_v51, %v3279_v18 }
 0x46a   : > { %2994 = vmatmul.bf16.gmra.mxu3 %v8179_v16  ;;  %3318 = vmatmul.bf16.gmra.mxu0 %v8167_v17 }
 0x46b   : > { %v3565_v14 = vpop.f32.mrf.mxu1 }
 0x46c   : > { %v5556_v2 = vmax.f32 %v5555_v54, %v3565_v14  ;;  %2620 = vmatmul.bf16.gmra.mxu2 %v8038_v41 }
 0x46d   : > { %v2955_v3 = vpop.f32.mrf.mxu3 }
 0x46e   : > { %v5321_v30 = vmax.f32 %v5320_v53, %v2955_v3 }
 0x46f   : > { %v2581_v1 = vpop.f32.mrf.mxu2  ;;  %v3281_v61 = vpop.f32.mrf.mxu0 }
 0x470   : > { %v5176_v45 = vmax.f32 %v5175_v48, %v2581_v1  ;;  %v5447_v31 = vmax.f32 %v5446_v28, %v3281_v61 }
 0x473   : > { %v3568_v27 = vpop.f32.mrf.mxu1 }
 0x474   : > { %v5557_v7 = vmax.f32 %v5556_v2, %v3568_v27 }
 0x475   : > { %v2957_v4 = vpop.f32.mrf.mxu3 }
 0x476   : > { %v5322_v43 = vmax.f32 %v5321_v30, %v2957_v4  ;;  %3607 = vmatmul.bf16.gmra.mxu1 %v8038_v41 }
 0x477   : > { %v2583_v47 = vpop.f32.mrf.mxu2  ;;  %v3284_v51 = vpop.f32.mrf.mxu0 }
 0x478   : > { %v5177_v62 = vmax.f32 %v5176_v45, %v2583_v47  ;;  %v5448_v19 = vmax.f32 %v5447_v31, %v3284_v51 }
 0x47a   : > { %2999 = vmatmul.bf16.gmra.mxu3 %v8191_v29  ;;  %3323 = vmatmul.bf16.gmra.mxu0 %v8179_v16 }
 0x47b   : > { %v3570_v54 = vpop.f32.mrf.mxu1 }
 0x47c   : > { %v5558_v53 = vmax.f32 %v5557_v7, %v3570_v54  ;;  %2625 = vmatmul.bf16.gmra.mxu2 %v8054_v21 }
 0x47d   : > { %v2960_v11 = vpop.f32.mrf.mxu3 }
 0x47e   : > { %v5323_v18 = vmax.f32 %v5322_v43, %v2960_v11 }
 0x47f   : > { %v2586_v48 = vpop.f32.mrf.mxu2  ;;  %v3286_v28 = vpop.f32.mrf.mxu0 }
 0x480   : > { %v5178_v14 = vmax.f32 %v5177_v62, %v2586_v48  ;;  %v5449_v2 = vmax.f32 %v5448_v19, %v3286_v28 }
 0x483   : > { %v3573_v3 = vpop.f32.mrf.mxu1 }
 0x484   : > { %v5559_v30 = vmax.f32 %v5558_v53, %v3573_v3 }
 0x485   : > { %v2962_v1 = vpop.f32.mrf.mxu3 }
 0x486   : > { %v5324_v61 = vmax.f32 %v5323_v18, %v2962_v1  ;;  %3612 = vmatmul.bf16.gmra.mxu1 %v8054_v21 }
 0x487   : > { %v2588_v45 = vpop.f32.mrf.mxu2  ;;  %v3289_v31 = vpop.f32.mrf.mxu0 }
 0x488   : > { %v5179_v27 = vmax.f32 %v5178_v14, %v2588_v45  ;;  %v5450_v4 = vmax.f32 %v5449_v2, %v3289_v31 }
 0x48a   : > { %3004 = vmatmul.bf16.gmra.mxu3 %v8203_v52  ;;  %3328 = vmatmul.bf16.gmra.mxu0 %v8191_v29 }
 0x48b   : > { %v3575_v7 = vpop.f32.mrf.mxu1 }
 0x48c   : > { %v5560_v43 = vmax.f32 %v5559_v30, %v3575_v7  ;;  %2630 = vmatmul.bf16.gmra.mxu2 %v8070_v37 }
 0x48d   : > { %v2965_v47 = vpop.f32.mrf.mxu3 }
 0x48e   : > { %v5325_v51 = vmax.f32 %v5324_v61, %v2965_v47 }
 0x48f   : > { %v2591_v62 = vpop.f32.mrf.mxu2  ;;  %v3291_v19 = vpop.f32.mrf.mxu0 }
 0x490   : > { %v5180_v54 = vmax.f32 %v5179_v27, %v2591_v62  ;;  %v5451_v53 = vmax.f32 %v5450_v4, %v3291_v19 }
 0x493   : > { %v3578_v11 = vpop.f32.mrf.mxu1 }
 0x494   : > { %v5561_v18 = vmax.f32 %v5560_v43, %v3578_v11 }
 0x495   : > { %v2967_v48 = vpop.f32.mrf.mxu3 }
 0x496   : > { %v5326_v28 = vmax.f32 %v5325_v51, %v2967_v48  ;;  %3617 = vmatmul.bf16.gmra.mxu1 %v8070_v37 }
 0x497   : > { %v2593_v14 = vpop.f32.mrf.mxu2  ;;  %v3294_v2 = vpop.f32.mrf.mxu0 }
 0x498   : > { %v5181_v3 = vmax.f32 %v5180_v54, %v2593_v14  ;;  %v5452_v1 = vmax.f32 %v5451_v53, %v3294_v2  ;;  %v6871_v14 = vld [vmem:[#allocation3 + $0x114] sm:$0xf] }
 0x499   : > { %v6721_v2 = vld [vmem:[#allocation3 + $0x130] sm:$0xf0] }
 0x49a   : > { %3009 = vmatmul.bf16.gmra.mxu3 %v8215_v59  ;;  %3333 = vmatmul.bf16.gmra.mxu0 %v8203_v52 }
 0x49b   : > { %v3580_v30 = vpop.f32.mrf.mxu1 }
 0x49c   : > { %v5562_v61 = vmax.f32 %v5561_v18, %v3580_v30  ;;  %2635 = vmatmul.bf16.gmra.mxu2 %v8086_v9 }
 0x49d   : > { %v2970_v45 = vpop.f32.mrf.mxu3 }
 0x49e   : > { %v5327_v31 = vmax.f32 %v5326_v28, %v2970_v45 }
 0x49f   : > { %v2596_v27 = vpop.f32.mrf.mxu2  ;;  %v3296_v4 = vpop.f32.mrf.mxu0 }
 0x4a0   : > { %v5182_v7 = vmax.f32 %v5181_v3, %v2596_v27  ;;  %v5453_v43 = vmax.f32 %v5452_v1, %v3296_v4  ;;  %v6724_v1 = vor.u32 %v6871_v14, %v6721_v2 }
 0x4a2   : > { %4175 = vmatpush.bf16.msra.mxu3 %v6724_v1 }
 0x4a3   : > { %v3583_v47 = vpop.f32.mrf.mxu1 }
 0x4a4   : > { %v5563_v51 = vmax.f32 %v5562_v61, %v3583_v47 }
 0x4a5   : > { %v2972_v62 = vpop.f32.mrf.mxu3 }
 0x4a6   : > { %v5328_v19 = vmax.f32 %v5327_v31, %v2972_v62  ;;  %3622 = vmatmul.bf16.gmra.mxu1 %v8086_v9 }
 0x4a7   : > { %v2598_v54 = vpop.f32.mrf.mxu2  ;;  %v3299_v53 = vpop.f32.mrf.mxu0 }
 0x4a8   : > { %v5183_v11 = vmax.f32 %v5182_v7, %v2598_v54  ;;  %v5454_v48 = vmax.f32 %v5453_v43, %v3299_v53 }
 0x4aa   : > { %3014 = vmatmul.bf16.gmra.mxu3 %v8227_v20  ;;  %3338 = vmatmul.bf16.gmra.mxu0 %v8215_v59 }
 0x4ab   : > { %v3585_v18 = vpop.f32.mrf.mxu1 }
 0x4ac   : > { %v5564_v28 = vmax.f32 %v5563_v51, %v3585_v18  ;;  %2640 = vmatmul.bf16.gmra.mxu2 %v8102_v56 }
 0x4ad   : > { %v2975_v3 = vpop.f32.mrf.mxu3 }
 0x4ae   : > { %v5329_v30 = vmax.f32 %v5328_v19, %v2975_v3 }
 0x4af   : > { %v2601_v61 = vpop.f32.mrf.mxu2  ;;  %v3301_v45 = vpop.f32.mrf.mxu0 }
 0x4b0   : > { %v5184_v31 = vmax.f32 %v5183_v11, %v2601_v61  ;;  %v5455_v27 = vmax.f32 %v5454_v48, %v3301_v45  ;;  %v6719_v11 = vld [vmem:[#allocation3 + $0x110] sm:$0xf]  ;;  %v6727_v45 = vld [vmem:[#allocation3 + $0x118] sm:$0xf] }
 0x4b1   : > { %v6875_v48 = vld [vmem:[#allocation3 + $0x12c] sm:$0xf0] }
 0x4b3   : > { %v3588_v4 = vpop.f32.mrf.mxu1 }
 0x4b4   : > { %v5565_v7 = vmax.f32 %v5564_v28, %v3588_v4  ;;  %v6720_v28 = vor.u32 %v6875_v48, %v6719_v11 }
 0x4b5   : > { %v2977_v43 = vpop.f32.mrf.mxu3 }
 0x4b6   : > { %v5330_v47 = vmax.f32 %v5329_v30, %v2977_v43  ;;  %3627 = vmatmul.bf16.gmra.mxu1 %v8102_v56  ;;  %3846 = vmatpush.bf16.msra.mxu2 %v6720_v28 }
 0x4b7   : > { %v2603_v62 = vpop.f32.mrf.mxu2  ;;  %v3304_v51 = vpop.f32.mrf.mxu0 }
 0x4b8   : > { %v5185_v54 = vmax.f32 %v5184_v31, %v2603_v62  ;;  %v5456_v53 = vmax.f32 %v5455_v27, %v3304_v51  ;;  %v6876_v31 = vld [vmem:[#allocation3 + $0x134] sm:$0xf0] }
 0x4b9   : > { %v6728_v27 = vor.u32 %v6876_v31, %v6727_v45 }
 0x4ba   : > { %3019 = vmatmul.bf16.gmra.mxu3 %v8241_v23  ;;  %3343 = vmatmul.bf16.gmra.mxu0 %v8227_v20 }
 0x4bb   : > { %v3590_v19 = vpop.f32.mrf.mxu1  ;;  %4504 = vmatpush.bf16.msra.mxu0 %v6728_v27 }
 0x4bc   : > { %v5566_v18 = vmax.f32 %v5565_v7, %v3590_v19  ;;  %2645 = vmatmul.bf16.gmra.mxu2 %v8118_v6 }
 0x4bd   : > { %v2980_v14 = vpop.f32.mrf.mxu3 }
 0x4be   : > { %v5331_v2 = vmax.f32 %v5330_v47, %v2980_v14  ;;  %v6872_v14 = vld [vmem:[#allocation3 + $0x11c] sm:$0xf] }
 0x4bf   : > { %v2606_v3 = vpop.f32.mrf.mxu2  ;;  %v3306_v1 = vpop.f32.mrf.mxu0 }
 0x4c0   : > { %v5186_v30 = vmax.f32 %v5185_v54, %v2606_v3  ;;  %v5457_v61 = vmax.f32 %v5456_v53, %v3306_v1 }
 0x4c3   : > { %v3593_v4 = vpop.f32.mrf.mxu1 }
 0x4c4   : > { %v5567_v43 = vmax.f32 %v5566_v18, %v3593_v4  ;;  %v6729_v18 = vld [vmem:[#allocation3 + $0x138] sm:$0xf0] }
 0x4c5   : > { %v2982_v62 = vpop.f32.mrf.mxu3  ;;  %v8319_v3 = vor.u32 %v6872_v14, %v6729_v18 }
 0x4c6   : > { %v5332_v7 = vmax.f32 %v5331_v2, %v2982_v62  ;;  %3632 = vmatmul.bf16.gmra.mxu1 %v8118_v6 }
 0x4c7   : > { %v2608_v51 = vpop.f32.mrf.mxu2  ;;  %v3309_v19 = vpop.f32.mrf.mxu0  ;;  %4833 = vmatpush.bf16.msra.mxu1 %v8319_v3 }
 0x4c8   : > { %v5187_v56 = vmax.f32 %v5186_v30, %v2608_v51  ;;  %v5458_v11 = vmax.f32 %v5457_v61, %v3309_v19 }
 0x4ca   : > { %3024 = vmatmul.bf16.gmra.mxu3 %v8254_v38  ;;  %3348 = vmatmul.bf16.gmra.mxu0 %v8241_v23 }
 0x4cb   : > { %v3595_v47 = vpop.f32.mrf.mxu1 }
 0x4cc   : > { %v5568_v54 = vmax.f32 %v5567_v43, %v3595_v47  ;;  %2650 = vmatmul.bf16.gmra.mxu2 %v8134_v46 }
 0x4cd   : > { %v2985_v53 = vpop.f32.mrf.mxu3 }
 0x4ce   : > { %v5333_v48 = vmax.f32 %v5332_v7, %v2985_v53 }
 0x4cf   : > { %v2611_v28 = vpop.f32.mrf.mxu2  ;;  %v3311_v2 = vpop.f32.mrf.mxu0 }
 0x4d0   : > { %v5188_v1 = vmax.f32 %v5187_v56, %v2611_v28  ;;  %v5459_v45 = vmax.f32 %v5458_v11, %v3311_v2 }
 0x4d3   : > { %v3598_v30 = vpop.f32.mrf.mxu1 }
 0x4d4   : > { %v5569_v61 = vmax.f32 %v5568_v54, %v3598_v30 }
 0x4d5   : > { %v2987_v31 = vpop.f32.mrf.mxu3 }
 0x4d6   : > { %v5334_v27 = vmax.f32 %v5333_v48, %v2987_v31  ;;  %3637 = vmatmul.bf16.gmra.mxu1 %v8134_v46 }
 0x4d7   : > { %v2613_v4 = vpop.f32.mrf.mxu2  ;;  %v3314_v43 = vpop.f32.mrf.mxu0 }
 0x4d8   : > { %v5189_v62 = vmax.f32 %v5188_v1, %v2613_v4  ;;  %v5460_v7 = vmax.f32 %v5459_v45, %v3314_v43 }
 0x4da   : > { %3029 = vmatmul.bf16.gmra.mxu3 %v7691_v57  ;;  %3353 = vmatmul.bf16.gmra.mxu0 %v8254_v38 }
 0x4db   : > { %v3600_v51 = vpop.f32.mrf.mxu1 }
 0x4dc   : > { %v5570_v19 = vmax.f32 %v5569_v61, %v3600_v51  ;;  %2655 = vmatmul.bf16.gmra.mxu2 %v8150_v63 }
 0x4dd   : > { %v2990_v56 = vpop.f32.mrf.mxu3 }
 0x4de   : > { %v5335_v11 = vmax.f32 %v5334_v27, %v2990_v56 }
 0x4df   : > { %v2616_v47 = vpop.f32.mrf.mxu2  ;;  %v3316_v54 = vpop.f32.mrf.mxu0 }
 0x4e0   : > { %v5190_v53 = vmax.f32 %v5189_v62, %v2616_v47  ;;  %v5461_v48 = vmax.f32 %v5460_v7, %v3316_v54 }
 0x4e3   : > { %v3603_v14 = vpop.f32.mrf.mxu1 }
 0x4e4   : > { %v5571_v18 = vmax.f32 %v5570_v19, %v3603_v14 }
 0x4e5   : > { %v2992_v28 = vpop.f32.mrf.mxu3 }
 0x4e6   : > { %v5336_v2 = vmax.f32 %v5335_v11, %v2992_v28  ;;  %3642 = vmatmul.bf16.gmra.mxu1 %v8150_v63 }
 0x4e7   : > { %v2618_v1 = vpop.f32.mrf.mxu2  ;;  %v3319_v45 = vpop.f32.mrf.mxu0 }
 0x4e8   : > { %v5191_v30 = vmax.f32 %v5190_v53, %v2618_v1  ;;  %v5462_v31 = vmax.f32 %v5461_v48, %v3319_v45 }
 0x4ea   : > { %3034 = vmatmul.bf16.gmra.mxu3 %v7715_v42  ;;  %3358 = vmatmul.bf16.gmra.mxu0 %v7691_v57 }
 0x4eb   : > { %v3605_v61 = vpop.f32.mrf.mxu1 }
 0x4ec   : > { %v5572_v27 = vmax.f32 %v5571_v18, %v3605_v61  ;;  %2660 = vmatmul.bf16.gmra.mxu2 %v8167_v17 }
 0x4ed   : > { %v2995_v4 = vpop.f32.mrf.mxu3 }
 0x4ee   : > { %v5337_v43 = vmax.f32 %v5336_v2, %v2995_v4 }
 0x4ef   : > { %v2621_v62 = vpop.f32.mrf.mxu2  ;;  %v3321_v7 = vpop.f32.mrf.mxu0 }
 0x4f0   : > { %v5192_v51 = vmax.f32 %v5191_v30, %v2621_v62  ;;  %v5463_v19 = vmax.f32 %v5462_v31, %v3321_v7 }
 0x4f3   : > { %v3608_v56 = vpop.f32.mrf.mxu1 }
 0x4f4   : > { %v5573_v11 = vmax.f32 %v5572_v27, %v3608_v56 }
 0x4f5   : > { %v2997_v47 = vpop.f32.mrf.mxu3 }
 0x4f6   : > { %v5338_v54 = vmax.f32 %v5337_v43, %v2997_v47  ;;  %3647 = vmatmul.bf16.gmra.mxu1 %v8167_v17 }
 0x4f7   : > { %v2623_v53 = vpop.f32.mrf.mxu2  ;;  %v3324_v48 = vpop.f32.mrf.mxu0 }
 0x4f8   : > { %v5193_v14 = vmax.f32 %v5192_v51, %v2623_v53  ;;  %v5464_v28 = vmax.f32 %v5463_v19, %v3324_v48 }
 0x4fa   : > { %3039 = vmatmul.bf16.gmra.mxu3 %v7739_v8  ;;  %3363 = vmatmul.bf16.gmra.mxu0 %v7715_v42 }
 0x4fb   : > { %v3610_v18 = vpop.f32.mrf.mxu1 }
 0x4fc   : > { %v5574_v2 = vmax.f32 %v5573_v11, %v3610_v18  ;;  %2665 = vmatmul.bf16.gmra.mxu2 %v8179_v16 }
 0x4fd   : > { %v3000_v1 = vpop.f32.mrf.mxu3 }
 0x4fe   : > { %v5339_v45 = vmax.f32 %v5338_v54, %v3000_v1 }
 0x4ff   : > { %v2626_v30 = vpop.f32.mrf.mxu2  ;;  %v3326_v31 = vpop.f32.mrf.mxu0 }
 0x500   : > { %v5194_v61 = vmax.f32 %v5193_v14, %v2626_v30  ;;  %v5465_v27 = vmax.f32 %v5464_v28, %v3326_v31 }
 0x503   : > { %v3613_v4 = vpop.f32.mrf.mxu1 }
 0x504   : > { %v5575_v43 = vmax.f32 %v5574_v2, %v3613_v4 }
 0x505   : > { %v3002_v62 = vpop.f32.mrf.mxu3 }
 0x506   : > { %v5340_v7 = vmax.f32 %v5339_v45, %v3002_v62  ;;  %3652 = vmatmul.bf16.gmra.mxu1 %v8179_v16 }
 0x507   : > { %v2628_v51 = vpop.f32.mrf.mxu2  ;;  %v3329_v19 = vpop.f32.mrf.mxu0 }
 0x508   : > { %v5195_v56 = vmax.f32 %v5194_v61, %v2628_v51  ;;  %v5466_v47 = vmax.f32 %v5465_v27, %v3329_v19 }
 0x50a   : > { %3044 = vmatmul.bf16.gmra.mxu3 %v7768_v49  ;;  %3368 = vmatmul.bf16.gmra.mxu0 %v7739_v8 }
 0x50b   : > { %v3615_v11 = vpop.f32.mrf.mxu1 }
 0x50c   : > { %v5576_v54 = vmax.f32 %v5575_v43, %v3615_v11  ;;  %2670 = vmatmul.bf16.gmra.mxu2 %v8191_v29 }
 0x50d   : > { %v3005_v53 = vpop.f32.mrf.mxu3 }
 0x50e   : > { %v5341_v48 = vmax.f32 %v5340_v7, %v3005_v53 }
 0x50f   : > { %v2631_v14 = vpop.f32.mrf.mxu2  ;;  %v3331_v28 = vpop.f32.mrf.mxu0 }
 0x510   : > { %v5196_v18 = vmax.f32 %v5195_v56, %v2631_v14  ;;  %v5467_v2 = vmax.f32 %v5466_v47, %v3331_v28 }
 0x513   : > { %v3618_v1 = vpop.f32.mrf.mxu1 }
 0x514   : > { %v5577_v45 = vmax.f32 %v5576_v54, %v3618_v1 }
 0x515   : > { %v3007_v30 = vpop.f32.mrf.mxu3 }
 0x516   : > { %v5342_v31 = vmax.f32 %v5341_v48, %v3007_v30  ;;  %3657 = vmatmul.bf16.gmra.mxu1 %v8191_v29 }
 0x517   : > { %v2633_v61 = vpop.f32.mrf.mxu2  ;;  %v3334_v27 = vpop.f32.mrf.mxu0 }
 0x518   : > { %v5197_v4 = vmax.f32 %v5196_v18, %v2633_v61  ;;  %v5468_v62 = vmax.f32 %v5467_v2, %v3334_v27  ;;  %v6863_v61 = vld [vmem:[#allocation3 + $0xd4] sm:$0xf] }
 0x519   : > { %v6689_v27 = vld [vmem:[#allocation3 + $0xf0] sm:$0xf0] }
 0x51a   : > { %3049 = vmatmul.bf16.gmra.mxu3 %v7792_v50  ;;  %3373 = vmatmul.bf16.gmra.mxu0 %v7768_v49 }
 0x51b   : > { %v3620_v43 = vpop.f32.mrf.mxu1 }
 0x51c   : > { %v5578_v7 = vmax.f32 %v5577_v45, %v3620_v43  ;;  %2675 = vmatmul.bf16.gmra.mxu2 %v8203_v52 }
 0x51d   : > { %v3010_v51 = vpop.f32.mrf.mxu3 }
 0x51e   : > { %v5343_v19 = vmax.f32 %v5342_v31, %v3010_v51 }
 0x51f   : > { %v2636_v56 = vpop.f32.mrf.mxu2  ;;  %v3336_v47 = vpop.f32.mrf.mxu0 }
 0x520   : > { %v5198_v11 = vmax.f32 %v5197_v4, %v2636_v56  ;;  %v5469_v54 = vmax.f32 %v5468_v62, %v3336_v47  ;;  %v6692_v62 = vor.u32 %v6863_v61, %v6689_v27 }
 0x522   : > { %4176 = vmatpush.bf16.msra.mxu3 %v6692_v62 }
 0x523   : > { %v3623_v53 = vpop.f32.mrf.mxu1 }
 0x524   : > { %v5579_v48 = vmax.f32 %v5578_v7, %v3623_v53 }
 0x525   : > { %v3012_v14 = vpop.f32.mrf.mxu3 }
 0x526   : > { %v5344_v28 = vmax.f32 %v5343_v19, %v3012_v14  ;;  %3662 = vmatmul.bf16.gmra.mxu1 %v8203_v52 }
 0x527   : > { %v2638_v18 = vpop.f32.mrf.mxu2  ;;  %v3339_v2 = vpop.f32.mrf.mxu0 }
 0x528   : > { %v5199_v1 = vmax.f32 %v5198_v11, %v2638_v18  ;;  %v5470_v30 = vmax.f32 %v5469_v54, %v3339_v2 }
 0x52a   : > { %3054 = vmatmul.bf16.gmra.mxu3 %v7816_v44  ;;  %3378 = vmatmul.bf16.gmra.mxu0 %v7792_v50 }
 0x52b   : > { %v3625_v45 = vpop.f32.mrf.mxu1 }
 0x52c   : > { %v5580_v31 = vmax.f32 %v5579_v48, %v3625_v45  ;;  %2680 = vmatmul.bf16.gmra.mxu2 %v8215_v59 }
 0x52d   : > { %v3015_v4 = vpop.f32.mrf.mxu3 }
 0x52e   : > { %v5345_v43 = vmax.f32 %v5344_v28, %v3015_v4 }
 0x52f   : > { %v2641_v7 = vpop.f32.mrf.mxu2  ;;  %v3341_v51 = vpop.f32.mrf.mxu0 }
 0x530   : > { %v5200_v19 = vmax.f32 %v5199_v1, %v2641_v7  ;;  %v5471_v56 = vmax.f32 %v5470_v30, %v3341_v51  ;;  %v6687_v1 = vld [vmem:[#allocation3 + $0xd0] sm:$0xf]  ;;  %v6695_v51 = vld [vmem:[#allocation3 + $0xd8] sm:$0xf] }
 0x531   : > { %v6867_v30 = vld [vmem:[#allocation3 + $0xec] sm:$0xf0] }
 0x533   : > { %v3628_v47 = vpop.f32.mrf.mxu1 }
 0x534   : > { %v5581_v11 = vmax.f32 %v5580_v31, %v3628_v47  ;;  %v6688_v31 = vor.u32 %v6867_v30, %v6687_v1 }
 0x535   : > { %v3017_v54 = vpop.f32.mrf.mxu3 }
 0x536   : > { %v5346_v53 = vmax.f32 %v5345_v43, %v3017_v54  ;;  %3667 = vmatmul.bf16.gmra.mxu1 %v8215_v59  ;;  %3847 = vmatpush.bf16.msra.mxu2 %v6688_v31 }
 0x537   : > { %v2643_v14 = vpop.f32.mrf.mxu2  ;;  %v3344_v48 = vpop.f32.mrf.mxu0 }
 0x538   : > { %v5201_v18 = vmax.f32 %v5200_v19, %v2643_v14  ;;  %v5472_v2 = vmax.f32 %v5471_v56, %v3344_v48  ;;  %v6868_v19 = vld [vmem:[#allocation3 + $0xf4] sm:$0xf0] }
 0x539   : > { %v6696_v56 = vor.u32 %v6868_v19, %v6695_v51 }
 0x53a   : > { %3059 = vmatmul.bf16.gmra.mxu3 %v7840_v33  ;;  %3383 = vmatmul.bf16.gmra.mxu0 %v7816_v44 }
 0x53b   : > { %v3630_v28 = vpop.f32.mrf.mxu1  ;;  %4505 = vmatpush.bf16.msra.mxu0 %v6696_v56 }
 0x53c   : > { %v5582_v45 = vmax.f32 %v5581_v11, %v3630_v28  ;;  %2685 = vmatmul.bf16.gmra.mxu2 %v8227_v20 }
 0x53d   : > { %v3020_v61 = vpop.f32.mrf.mxu3 }
 0x53e   : > { %v5347_v27 = vmax.f32 %v5346_v53, %v3020_v61  ;;  %v6864_v61 = vld [vmem:[#allocation3 + $0xdc] sm:$0xf] }
 0x53f   : > { %v2646_v4 = vpop.f32.mrf.mxu2  ;;  %v3346_v62 = vpop.f32.mrf.mxu0 }
 0x540   : > { %v5202_v43 = vmax.f32 %v5201_v18, %v2646_v4  ;;  %v5473_v7 = vmax.f32 %v5472_v2, %v3346_v62 }
 0x543   : > { %v3633_v47 = vpop.f32.mrf.mxu1 }
 0x544   : > { %v5583_v54 = vmax.f32 %v5582_v45, %v3633_v47  ;;  %v6697_v45 = vld [vmem:[#allocation3 + $0xf8] sm:$0xf0] }
 0x545   : > { %v3022_v14 = vpop.f32.mrf.mxu3  ;;  %v8354_v4 = vor.u32 %v6864_v61, %v6697_v45 }
 0x546   : > { %v5348_v11 = vmax.f32 %v5347_v27, %v3022_v14  ;;  %3672 = vmatmul.bf16.gmra.mxu1 %v8227_v20 }
 0x547   : > { %v2648_v48 = vpop.f32.mrf.mxu2  ;;  %v3349_v28 = vpop.f32.mrf.mxu0  ;;  %4834 = vmatpush.bf16.msra.mxu1 %v8354_v4 }
 0x548   : > { %v5203_v59 = vmax.f32 %v5202_v43, %v2648_v48  ;;  %v5474_v1 = vmax.f32 %v5473_v7, %v3349_v28 }
 0x54a   : > { %3064 = vmatmul.bf16.gmra.mxu3 %v7864_v26  ;;  %3388 = vmatmul.bf16.gmra.mxu0 %v7840_v33 }
 0x54b   : > { %v3635_v53 = vpop.f32.mrf.mxu1 }
 0x54c   : > { %v5584_v18 = vmax.f32 %v5583_v54, %v3635_v53  ;;  %2690 = vmatmul.bf16.gmra.mxu2 %v8241_v23 }
 0x54d   : > { %v3025_v2 = vpop.f32.mrf.mxu3 }
 0x54e   : > { %v5349_v30 = vmax.f32 %v5348_v11, %v3025_v2 }
 0x54f   : > { %v2651_v31 = vpop.f32.mrf.mxu2  ;;  %v3351_v27 = vpop.f32.mrf.mxu0 }
 0x550   : > { %v5204_v62 = vmax.f32 %v5203_v59, %v2651_v31  ;;  %v5475_v51 = vmax.f32 %v5474_v1, %v3351_v27 }
 0x553   : > { %v3638_v43 = vpop.f32.mrf.mxu1 }
 0x554   : > { %v5585_v7 = vmax.f32 %v5584_v18, %v3638_v43 }
 0x555   : > { %v3027_v19 = vpop.f32.mrf.mxu3 }
 0x556   : > { %v5350_v56 = vmax.f32 %v5349_v30, %v3027_v19  ;;  %3677 = vmatmul.bf16.gmra.mxu1 %v8241_v23 }
 0x557   : > { %v2653_v47 = vpop.f32.mrf.mxu2  ;;  %v3354_v54 = vpop.f32.mrf.mxu0 }
 0x558   : > { %v5205_v14 = vmax.f32 %v5204_v62, %v2653_v47  ;;  %v5476_v11 = vmax.f32 %v5475_v51, %v3354_v54 }
 0x55a   : > { %3069 = vmatmul.bf16.gmra.mxu3 %v7888_v22  ;;  %3393 = vmatmul.bf16.gmra.mxu0 %v7864_v26 }
 0x55b   : > { %v3640_v48 = vpop.f32.mrf.mxu1 }
 0x55c   : > { %v5586_v28 = vmax.f32 %v5585_v7, %v3640_v48  ;;  %2695 = vmatmul.bf16.gmra.mxu2 %v8254_v38 }
 0x55d   : > { %v3030_v59 = vpop.f32.mrf.mxu3 }
 0x55e   : > { %v5351_v1 = vmax.f32 %v5350_v56, %v3030_v59 }
 0x55f   : > { %v2656_v53 = vpop.f32.mrf.mxu2  ;;  %v3356_v18 = vpop.f32.mrf.mxu0 }
 0x560   : > { %v5206_v2 = vmax.f32 %v5205_v14, %v2656_v53  ;;  %v5477_v30 = vmax.f32 %v5476_v11, %v3356_v18 }
 0x563   : > { %v3643_v61 = vpop.f32.mrf.mxu1 }
 0x564   : > { %v5587_v45 = vmax.f32 %v5586_v28, %v3643_v61 }
 0x565   : > { %v3032_v31 = vpop.f32.mrf.mxu3 }
 0x566   : > { %v5352_v27 = vmax.f32 %v5351_v1, %v3032_v31  ;;  %3682 = vmatmul.bf16.gmra.mxu1 %v8254_v38 }
 0x567   : > { %v2658_v62 = vpop.f32.mrf.mxu2  ;;  %v3359_v51 = vpop.f32.mrf.mxu0 }
 0x568   : > { %v5207_v43 = vmax.f32 %v5206_v2, %v2658_v62  ;;  %v5478_v19 = vmax.f32 %v5477_v30, %v3359_v51 }
 0x56a   : > { %3074 = vmatmul.bf16.gmra.mxu3 %v7917_v10  ;;  %3398 = vmatmul.bf16.gmra.mxu0 %v7888_v22 }
 0x56b   : > { %v3645_v7 = vpop.f32.mrf.mxu1 }
 0x56c   : > { %v5588_v56 = vmax.f32 %v5587_v45, %v3645_v7  ;;  %2700 = vmatmul.bf16.gmra.mxu2 %v7691_v57 }
 0x56d   : > { %v3035_v47 = vpop.f32.mrf.mxu3 }
 0x56e   : > { %v5353_v54 = vmax.f32 %v5352_v27, %v3035_v47 }
 0x56f   : > { %v2661_v14 = vpop.f32.mrf.mxu2  ;;  %v3361_v11 = vpop.f32.mrf.mxu0 }
 0x570   : > { %v5208_v48 = vmax.f32 %v5207_v43, %v2661_v14  ;;  %v5479_v28 = vmax.f32 %v5478_v19, %v3361_v11 }
 0x573   : > { %v3648_v59 = vpop.f32.mrf.mxu1 }
 0x574   : > { %v5589_v1 = vmax.f32 %v5588_v56, %v3648_v59 }
 0x575   : > { %v3037_v53 = vpop.f32.mrf.mxu3 }
 0x576   : > { %v5354_v18 = vmax.f32 %v5353_v54, %v3037_v53  ;;  %3687 = vmatmul.bf16.gmra.mxu1 %v7691_v57 }
 0x577   : > { %v2663_v2 = vpop.f32.mrf.mxu2  ;;  %v3364_v30 = vpop.f32.mrf.mxu0 }
 0x578   : > { %v5209_v61 = vmax.f32 %v5208_v48, %v2663_v2  ;;  %v5480_v31 = vmax.f32 %v5479_v28, %v3364_v30 }
 0x57a   : > { %3079 = vmatmul.bf16.gmra.mxu3 %v7939_v60  ;;  %3403 = vmatmul.bf16.gmra.mxu0 %v7917_v10 }
 0x57b   : > { %v3650_v45 = vpop.f32.mrf.mxu1 }
 0x57c   : > { %v5590_v27 = vmax.f32 %v5589_v1, %v3650_v45  ;;  %2705 = vmatmul.bf16.gmra.mxu2 %v7715_v42 }
 0x57d   : > { %v3040_v62 = vpop.f32.mrf.mxu3 }
 0x57e   : > { %v5355_v51 = vmax.f32 %v5354_v18, %v3040_v62 }
 0x57f   : > { %v2666_v43 = vpop.f32.mrf.mxu2  ;;  %v3366_v19 = vpop.f32.mrf.mxu0 }
 0x580   : > { %v5210_v7 = vmax.f32 %v5209_v61, %v2666_v43  ;;  %v5481_v56 = vmax.f32 %v5480_v31, %v3366_v19 }
 0x583   : > { %v3653_v47 = vpop.f32.mrf.mxu1 }
 0x584   : > { %v5591_v54 = vmax.f32 %v5590_v27, %v3653_v47 }
 0x585   : > { %v3042_v14 = vpop.f32.mrf.mxu3 }
 0x586   : > { %v5356_v11 = vmax.f32 %v5355_v51, %v3042_v14  ;;  %3692 = vmatmul.bf16.gmra.mxu1 %v7715_v42 }
 0x587   : > { %v2668_v48 = vpop.f32.mrf.mxu2  ;;  %v3369_v28 = vpop.f32.mrf.mxu0 }
 0x588   : > { %v5211_v59 = vmax.f32 %v5210_v7, %v2668_v48  ;;  %v5482_v53 = vmax.f32 %v5481_v56, %v3369_v28 }
 0x58a   : > { %3084 = vmatmul.bf16.gmra.mxu3 %v7959_v12  ;;  %3408 = vmatmul.bf16.gmra.mxu0 %v7939_v60 }
 0x58b   : > { %v3655_v1 = vpop.f32.mrf.mxu1 }
 0x58c   : > { %v5592_v18 = vmax.f32 %v5591_v54, %v3655_v1  ;;  %2710 = vmatmul.bf16.gmra.mxu2 %v7739_v8 }
 0x58d   : > { %v3045_v2 = vpop.f32.mrf.mxu3 }
 0x58e   : > { %v5357_v30 = vmax.f32 %v5356_v11, %v3045_v2 }
 0x58f   : > { %v2671_v61 = vpop.f32.mrf.mxu2  ;;  %v3371_v31 = vpop.f32.mrf.mxu0 }
 0x590   : > { %v5212_v45 = vmax.f32 %v5211_v59, %v2671_v61  ;;  %v5483_v27 = vmax.f32 %v5482_v53, %v3371_v31 }
 0x593   : > { %v3658_v62 = vpop.f32.mrf.mxu1 }
 0x594   : > { %v5593_v51 = vmax.f32 %v5592_v18, %v3658_v62 }
 0x595   : > { %v3047_v43 = vpop.f32.mrf.mxu3 }
 0x596   : > { %v5358_v19 = vmax.f32 %v5357_v30, %v3047_v43  ;;  %3697 = vmatmul.bf16.gmra.mxu1 %v7739_v8 }
 0x597   : > { %v2673_v7 = vpop.f32.mrf.mxu2  ;;  %v3374_v56 = vpop.f32.mrf.mxu0 }
 0x598   : > { %v5213_v47 = vmax.f32 %v5212_v45, %v2673_v7  ;;  %v5484_v14 = vmax.f32 %v5483_v27, %v3374_v56  ;;  %v6855_v7 = vld [vmem:[#allocation3 + $0x94] sm:$0xf] }
 0x599   : > { %v6657_v56 = vld [vmem:[#allocation3 + $0xb0] sm:$0xf0] }
 0x59a   : > { %3089 = vmatmul.bf16.gmra.mxu3 %v7979_v35  ;;  %3413 = vmatmul.bf16.gmra.mxu0 %v7959_v12 }
 0x59b   : > { %v3660_v54 = vpop.f32.mrf.mxu1 }
 0x59c   : > { %v5594_v11 = vmax.f32 %v5593_v51, %v3660_v54  ;;  %2715 = vmatmul.bf16.gmra.mxu2 %v7768_v49 }
 0x59d   : > { %v3050_v48 = vpop.f32.mrf.mxu3 }
 0x59e   : > { %v5359_v28 = vmax.f32 %v5358_v19, %v3050_v48 }
 0x59f   : > { %v2676_v59 = vpop.f32.mrf.mxu2  ;;  %v3376_v53 = vpop.f32.mrf.mxu0 }
 0x5a0   : > { %v5214_v1 = vmax.f32 %v5213_v47, %v2676_v59  ;;  %v5485_v18 = vmax.f32 %v5484_v14, %v3376_v53  ;;  %v6660_v14 = vor.u32 %v6855_v7, %v6657_v56 }
 0x5a2   : > { %4177 = vmatpush.bf16.msra.mxu3 %v6660_v14 }
 0x5a3   : > { %v3663_v2 = vpop.f32.mrf.mxu1 }
 0x5a4   : > { %v5595_v30 = vmax.f32 %v5594_v11, %v3663_v2 }
 0x5a5   : > { %v3052_v61 = vpop.f32.mrf.mxu3 }
 0x5a6   : > { %v5360_v31 = vmax.f32 %v5359_v28, %v3052_v61  ;;  %3702 = vmatmul.bf16.gmra.mxu1 %v7768_v49 }
 0x5a7   : > { %v2678_v45 = vpop.f32.mrf.mxu2  ;;  %v3379_v27 = vpop.f32.mrf.mxu0 }
 0x5a8   : > { %v5215_v62 = vmax.f32 %v5214_v1, %v2678_v45  ;;  %v5486_v43 = vmax.f32 %v5485_v18, %v3379_v27 }
 0x5aa   : > { %3094 = vmatmul.bf16.gmra.mxu3 %v7996_v32  ;;  %3418 = vmatmul.bf16.gmra.mxu0 %v7979_v35 }
 0x5ab   : > { %v3665_v51 = vpop.f32.mrf.mxu1 }
 0x5ac   : > { %v5596_v19 = vmax.f32 %v5595_v30, %v3665_v51  ;;  %2720 = vmatmul.bf16.gmra.mxu2 %v7792_v50 }
 0x5ad   : > { %v3055_v47 = vpop.f32.mrf.mxu3 }
 0x5ae   : > { %v5361_v54 = vmax.f32 %v5360_v31, %v3055_v47 }
 0x5af   : > { %v2681_v11 = vpop.f32.mrf.mxu2  ;;  %v3381_v48 = vpop.f32.mrf.mxu0 }
 0x5b0   : > { %v5216_v28 = vmax.f32 %v5215_v62, %v2681_v11  ;;  %v5487_v59 = vmax.f32 %v5486_v43, %v3381_v48  ;;  %v6655_v62 = vld [vmem:[#allocation3 + $0x90] sm:$0xf]  ;;  %v6663_v48 = vld [vmem:[#allocation3 + $0x98] sm:$0xf] }
 0x5b1   : > { %v6859_v43 = vld [vmem:[#allocation3 + $0xac] sm:$0xf0] }
 0x5b3   : > { %v3668_v53 = vpop.f32.mrf.mxu1 }
 0x5b4   : > { %v5597_v1 = vmax.f32 %v5596_v19, %v3668_v53  ;;  %v6656_v19 = vor.u32 %v6859_v43, %v6655_v62 }
 0x5b5   : > { %v3057_v18 = vpop.f32.mrf.mxu3 }
 0x5b6   : > { %v5362_v2 = vmax.f32 %v5361_v54, %v3057_v18  ;;  %3707 = vmatmul.bf16.gmra.mxu1 %v7792_v50  ;;  %3848 = vmatpush.bf16.msra.mxu2 %v6656_v19 }
 0x5b7   : > { %v2683_v61 = vpop.f32.mrf.mxu2  ;;  %v3384_v30 = vpop.f32.mrf.mxu0 }
 0x5b8   : > { %v5217_v45 = vmax.f32 %v5216_v28, %v2683_v61  ;;  %v5488_v27 = vmax.f32 %v5487_v59, %v3384_v30  ;;  %v6860_v28 = vld [vmem:[#allocation3 + $0xb4] sm:$0xf0] }
 0x5b9   : > { %v6664_v59 = vor.u32 %v6860_v28, %v6663_v48 }
 0x5ba   : > { %3099 = vmatmul.bf16.gmra.mxu3 %v8012_v15  ;;  %3423 = vmatmul.bf16.gmra.mxu0 %v7996_v32 }
 0x5bb   : > { %v3670_v31 = vpop.f32.mrf.mxu1  ;;  %4506 = vmatpush.bf16.msra.mxu0 %v6664_v59 }
 0x5bc   : > { %v5598_v51 = vmax.f32 %v5597_v1, %v3670_v31  ;;  %2725 = vmatmul.bf16.gmra.mxu2 %v7816_v44 }
 0x5bd   : > { %v3060_v7 = vpop.f32.mrf.mxu3 }
 0x5be   : > { %v5363_v56 = vmax.f32 %v5362_v2, %v3060_v7  ;;  %v6856_v7 = vld [vmem:[#allocation3 + $0x9c] sm:$0xf] }
 0x5bf   : > { %v2686_v47 = vpop.f32.mrf.mxu2  ;;  %v3386_v14 = vpop.f32.mrf.mxu0 }
 0x5c0   : > { %v5218_v54 = vmax.f32 %v5217_v45, %v2686_v47  ;;  %v5489_v11 = vmax.f32 %v5488_v27, %v3386_v14 }
 0x5c3   : > { %v3673_v53 = vpop.f32.mrf.mxu1 }
 0x5c4   : > { %v5599_v18 = vmax.f32 %v5598_v51, %v3673_v53  ;;  %v6665_v51 = vld [vmem:[#allocation3 + $0xb8] sm:$0xf0] }
 0x5c5   : > { %v3062_v61 = vpop.f32.mrf.mxu3  ;;  %v8389_v47 = vor.u32 %v6856_v7, %v6665_v51 }
 0x5c6   : > { %v5364_v1 = vmax.f32 %v5363_v56, %v3062_v61  ;;  %3712 = vmatmul.bf16.gmra.mxu1 %v7816_v44 }
 0x5c7   : > { %v2688_v30 = vpop.f32.mrf.mxu2  ;;  %v3389_v31 = vpop.f32.mrf.mxu0  ;;  %4835 = vmatpush.bf16.msra.mxu1 %v8389_v47 }
 0x5c8   : > { %v5219_v50 = vmax.f32 %v5218_v54, %v2688_v30  ;;  %v5490_v62 = vmax.f32 %v5489_v11, %v3389_v31 }
 0x5ca   : > { %3104 = vmatmul.bf16.gmra.mxu3 %v8033_v55  ;;  %3428 = vmatmul.bf16.gmra.mxu0 %v8012_v15 }
 0x5cb   : > { %v3675_v2 = vpop.f32.mrf.mxu1 }
 0x5cc   : > { %v5600_v45 = vmax.f32 %v5599_v18, %v3675_v2  ;;  %2730 = vmatmul.bf16.gmra.mxu2 %v7840_v33 }
 0x5cd   : > { %v3065_v27 = vpop.f32.mrf.mxu3 }
 0x5ce   : > { %v5365_v43 = vmax.f32 %v5364_v1, %v3065_v27 }
 0x5cf   : > { %v2691_v19 = vpop.f32.mrf.mxu2  ;;  %v3391_v56 = vpop.f32.mrf.mxu0 }
 0x5d0   : > { %v5220_v14 = vmax.f32 %v5219_v50, %v2691_v19  ;;  %v5491_v48 = vmax.f32 %v5490_v62, %v3391_v56 }
 0x5d3   : > { %v3678_v54 = vpop.f32.mrf.mxu1 }
 0x5d4   : > { %v5601_v11 = vmax.f32 %v5600_v45, %v3678_v54 }
 0x5d5   : > { %v3067_v28 = vpop.f32.mrf.mxu3 }
 0x5d6   : > { %v5366_v59 = vmax.f32 %v5365_v43, %v3067_v28  ;;  %3717 = vmatmul.bf16.gmra.mxu1 %v7840_v33 }
 0x5d7   : > { %v2693_v53 = vpop.f32.mrf.mxu2  ;;  %v3394_v18 = vpop.f32.mrf.mxu0 }
 0x5d8   : > { %v5221_v61 = vmax.f32 %v5220_v14, %v2693_v53  ;;  %v5492_v1 = vmax.f32 %v5491_v48, %v3394_v18 }
 0x5da   : > { %3109 = vmatmul.bf16.gmra.mxu3 %v8049_v40  ;;  %3433 = vmatmul.bf16.gmra.mxu0 %v8033_v55 }
 0x5db   : > { %v3680_v30 = vpop.f32.mrf.mxu1 }
 0x5dc   : > { %v5602_v31 = vmax.f32 %v5601_v11, %v3680_v30  ;;  %2735 = vmatmul.bf16.gmra.mxu2 %v7864_v26 }
 0x5dd   : > { %v3070_v50 = vpop.f32.mrf.mxu3 }
 0x5de   : > { %v5367_v62 = vmax.f32 %v5366_v59, %v3070_v50 }
 0x5df   : > { %v2696_v2 = vpop.f32.mrf.mxu2  ;;  %v3396_v45 = vpop.f32.mrf.mxu0 }
 0x5e0   : > { %v5222_v27 = vmax.f32 %v5221_v61, %v2696_v2  ;;  %v5493_v43 = vmax.f32 %v5492_v1, %v3396_v45 }
 0x5e3   : > { %v3683_v7 = vpop.f32.mrf.mxu1 }
 0x5e4   : > { %v5603_v51 = vmax.f32 %v5602_v31, %v3683_v7 }
 0x5e5   : > { %v3072_v19 = vpop.f32.mrf.mxu3 }
 0x5e6   : > { %v5368_v56 = vmax.f32 %v5367_v62, %v3072_v19  ;;  %3722 = vmatmul.bf16.gmra.mxu1 %v7864_v26 }
 0x5e7   : > { %v2698_v14 = vpop.f32.mrf.mxu2  ;;  %v3399_v48 = vpop.f32.mrf.mxu0 }
 0x5e8   : > { %v5223_v54 = vmax.f32 %v5222_v27, %v2698_v14  ;;  %v5494_v28 = vmax.f32 %v5493_v43, %v3399_v48  ;;  %v8904_v14 = vld [vmem:[#allocation30_spill] sm:$0xff] }
 0x5ea   : > { %3114 = vmatmul.bf16.gmra.mxu3 %v8065_v25  ;;  %3438 = vmatmul.bf16.gmra.mxu0 %v8049_v40 }
 0x5eb   : > { %v3685_v11 = vpop.f32.mrf.mxu1 }
 0x5ec   : > { %v5604_v59 = vmax.f32 %v5603_v51, %v3685_v11  ;;  %2740 = vmatmul.bf16.gmra.mxu2 %v7888_v22 }
 0x5ed   : > { %v3075_v53 = vpop.f32.mrf.mxu3 }
 0x5ee   : > { %v5369_v18 = vmax.f32 %v5368_v56, %v3075_v53 }
 0x5ef   : > { %v2701_v61 = vpop.f32.mrf.mxu2  ;;  %v3401_v1 = vpop.f32.mrf.mxu0 }
 0x5f0   : > { %v5224_v30 = vmax.f32 %v5223_v54, %v2701_v61  ;;  %v5495_v31 = vmax.f32 %v5494_v28, %v3401_v1 }
 0x5f3   : > { %v3688_v50 = vpop.f32.mrf.mxu1 }
 0x5f4   : > { %v5605_v62 = vmax.f32 %v5604_v59, %v3688_v50 }
 0x5f5   : > { %v3077_v2 = vpop.f32.mrf.mxu3 }
 0x5f6   : > { %v5370_v45 = vmax.f32 %v5369_v18, %v3077_v2  ;;  %3727 = vmatmul.bf16.gmra.mxu1 %v7888_v22  ;;  %v8908_v22 = vld [vmem:[#allocation36_spill] sm:$0xff] }
 0x5f7   : > { %v2703_v27 = vpop.f32.mrf.mxu2  ;;  %v3404_v43 = vpop.f32.mrf.mxu0 }
 0x5f8   : > { %v5225_v7 = vmax.f32 %v5224_v30, %v2703_v27  ;;  %v5496_v19 = vmax.f32 %v5495_v31, %v3404_v43  ;;  %v8905_v43 = vld [vmem:[#allocation31_spill] sm:$0xff] }
 0x5fa   : > { %3119 = vmatmul.bf16.gmra.mxu3 %v8904_v14  ;;  %3443 = vmatmul.bf16.gmra.mxu0 %v8065_v25 }
 0x5fb   : > { %v3690_v51 = vpop.f32.mrf.mxu1 }
 0x5fc   : > { %v5606_v56 = vmax.f32 %v5605_v62, %v3690_v51  ;;  %2745 = vmatmul.bf16.gmra.mxu2 %v7917_v10 }
 0x5fd   : > { %v3080_v48 = vpop.f32.mrf.mxu3 }
 0x5fe   : > { %v5371_v54 = vmax.f32 %v5370_v45, %v3080_v48 }
 0x5ff   : > { %v2706_v28 = vpop.f32.mrf.mxu2  ;;  %v3406_v11 = vpop.f32.mrf.mxu0 }
 0x600   : > { %v5226_v59 = vmax.f32 %v5225_v7, %v2706_v28  ;;  %v5497_v53 = vmax.f32 %v5496_v19, %v3406_v11 }
 0x603   : > { %v3693_v18 = vpop.f32.mrf.mxu1 }
 0x604   : > { %v5607_v61 = vmax.f32 %v5606_v56, %v3693_v18 }
 0x605   : > { %v3082_v1 = vpop.f32.mrf.mxu3 }
 0x606   : > { %v5372_v50 = vmax.f32 %v5371_v54, %v3082_v1  ;;  %3732 = vmatmul.bf16.gmra.mxu1 %v7917_v10  ;;  %v8906_v10 = vld [vmem:[#allocation33_spill] sm:$0xff] }
 0x607   : > { %v2708_v30 = vpop.f32.mrf.mxu2  ;;  %v3409_v31 = vpop.f32.mrf.mxu0 }
 0x608   : > { %v5227_v2 = vmax.f32 %v5226_v59, %v2708_v30  ;;  %v5498_v27 = vmax.f32 %v5497_v53, %v3409_v31 }
 0x60a   : > { %3124 = vmatmul.bf16.gmra.mxu3 %v8905_v43  ;;  %3448 = vmatmul.bf16.gmra.mxu0 %v8904_v14 }
 0x60b   : > { %v3695_v62 = vpop.f32.mrf.mxu1 }
 0x60c   : > { %v5608_v45 = vmax.f32 %v5607_v61, %v3695_v62  ;;  %2750 = vmatmul.bf16.gmra.mxu2 %v7939_v60 }
 0x60d   : > { %v3085_v7 = vpop.f32.mrf.mxu3 }
 0x60e   : > { %v5373_v19 = vmax.f32 %v5372_v50, %v3085_v7 }
 0x60f   : > { %v2711_v51 = vpop.f32.mrf.mxu2  ;;  %v3411_v56 = vpop.f32.mrf.mxu0 }
 0x610   : > { %v5228_v48 = vmax.f32 %v5227_v2, %v2711_v51  ;;  %v5499_v54 = vmax.f32 %v5498_v27, %v3411_v56 }
 0x613   : > { %v3698_v28 = vpop.f32.mrf.mxu1 }
 0x614   : > { %v5609_v11 = vmax.f32 %v5608_v45, %v3698_v28 }
 0x615   : > { %v3087_v18 = vpop.f32.mrf.mxu3 }
 0x616   : > { %v5374_v1 = vmax.f32 %v5373_v19, %v3087_v18  ;;  %3737 = vmatmul.bf16.gmra.mxu1 %v7939_v60  ;;  %v8907_v60 = vld [vmem:[#allocation34_spill] sm:$0xff] }
 0x617   : > { %v2713_v59 = vpop.f32.mrf.mxu2  ;;  %v3414_v53 = vpop.f32.mrf.mxu0 }
 0x618   : > { %v5229_v30 = vmax.f32 %v5228_v48, %v2713_v59  ;;  %v5500_v31 = vmax.f32 %v5499_v54, %v3414_v53 }
 0x61a   : > { %3129 = vmatmul.bf16.gmra.mxu3 %v8906_v10  ;;  %3453 = vmatmul.bf16.gmra.mxu0 %v8905_v43 }
 0x61b   : > { %v3700_v61 = vpop.f32.mrf.mxu1 }
 0x61c   : > { %v5610_v50 = vmax.f32 %v5609_v11, %v3700_v61  ;;  %2755 = vmatmul.bf16.gmra.mxu2 %v7959_v12 }
 0x61d   : > { %v3090_v2 = vpop.f32.mrf.mxu3 }
 0x61e   : > { %v5375_v27 = vmax.f32 %v5374_v1, %v3090_v2 }
 0x61f   : > { %v2716_v62 = vpop.f32.mrf.mxu2  ;;  %v3416_v45 = vpop.f32.mrf.mxu0 }
 0x620   : > { %v5230_v7 = vmax.f32 %v5229_v30, %v2716_v62  ;;  %v5501_v19 = vmax.f32 %v5500_v31, %v3416_v45  ;;  %v6847_v30 = vld [vmem:[#allocation3 + $0x54] sm:$0xf] }
 0x621   : > { %v6625_v31 = vld [vmem:[#allocation3 + $0x70] sm:$0xf0] }
 0x623   : > { %v3703_v51 = vpop.f32.mrf.mxu1 }
 0x624   : > { %v5611_v56 = vmax.f32 %v5610_v50, %v3703_v51  ;;  %v6628_v50 = vor.u32 %v6847_v30, %v6625_v31 }
 0x625   : > { %v3092_v28 = vpop.f32.mrf.mxu3 }
 0x626   : > { %v5376_v18 = vmax.f32 %v5375_v27, %v3092_v28  ;;  %3742 = vmatmul.bf16.gmra.mxu1 %v7959_v12  ;;  %4178 = vmatpush.bf16.msra.mxu3 %v6628_v50 }
 0x627   : > { %v2718_v48 = vpop.f32.mrf.mxu2  ;;  %v3419_v54 = vpop.f32.mrf.mxu0 }
 0x628   : > { %v5231_v59 = vmax.f32 %v5230_v7, %v2718_v48  ;;  %v5502_v53 = vmax.f32 %v5501_v19, %v3419_v54 }
 0x62a   : > { %3134 = vmatmul.bf16.gmra.mxu3 %v8907_v60  ;;  %3458 = vmatmul.bf16.gmra.mxu0 %v8906_v10 }
 0x62b   : > { %v3705_v11 = vpop.f32.mrf.mxu1 }
 0x62c   : > { %v5612_v1 = vmax.f32 %v5611_v56, %v3705_v11  ;;  %2760 = vmatmul.bf16.gmra.mxu2 %v7979_v35 }
 0x62d   : > { %v3095_v61 = vpop.f32.mrf.mxu3 }
 0x62e   : > { %v5377_v2 = vmax.f32 %v5376_v18, %v3095_v61 }
 0x62f   : > { %v2721_v27 = vpop.f32.mrf.mxu2  ;;  %v3421_v62 = vpop.f32.mrf.mxu0 }
 0x630   : > { %v5232_v45 = vmax.f32 %v5231_v59, %v2721_v27  ;;  %v5503_v51 = vmax.f32 %v5502_v53, %v3421_v62  ;;  %v6623_v59 = vld [vmem:[#allocation3 + $0x50] sm:$0xf] }
 0x631   : > { %v6851_v53 = vld [vmem:[#allocation3 + $0x6c] sm:$0xf0] }
 0x633   : > { %v3708_v7 = vpop.f32.mrf.mxu1 }
 0x634   : > { %v5613_v19 = vmax.f32 %v5612_v1, %v3708_v7  ;;  %v6624_v1 = vor.u32 %v6851_v53, %v6623_v59 }
 0x635   : > { %v3097_v28 = vpop.f32.mrf.mxu3 }
 0x636   : > { %v5378_v48 = vmax.f32 %v5377_v2, %v3097_v28  ;;  %3747 = vmatmul.bf16.gmra.mxu1 %v7979_v35  ;;  %3849 = vmatpush.bf16.msra.mxu2 %v6624_v1  ;;  %v6848_v1 = vld [vmem:[#allocation3 + $0x5c] sm:$0xf] }
 0x637   : > { %v2723_v54 = vpop.f32.mrf.mxu2  ;;  %v3424_v56 = vpop.f32.mrf.mxu0 }
 0x638   : > { %v5233_v11 = vmax.f32 %v5232_v45, %v2723_v54  ;;  %v5504_v12 = vmax.f32 %v5503_v51, %v3424_v56  ;;  %v6631_v45 = vld [vmem:[#allocation3 + $0x58] sm:$0xf] }
 0x639   : > { %v6852_v51 = vld [vmem:[#allocation3 + $0x74] sm:$0xf0] }
 0x63a   : > { %3139 = vmatmul.bf16.gmra.mxu3 %v8908_v22  ;;  %3463 = vmatmul.bf16.gmra.mxu0 %v8907_v60  ;;  %v6632_v7 = vor.u32 %v6852_v51, %v6631_v45 }
 0x63b   : > { %v3710_v18 = vpop.f32.mrf.mxu1 }
 0x63c   : > { %v5614_v30 = vmax.f32 %v5613_v19, %v3710_v18  ;;  %2765 = vmatmul.bf16.gmra.mxu2 %v7996_v32  ;;  %4507 = vmatpush.bf16.msra.mxu0 %v6632_v7 }
 0x63d   : > { %v3100_v31 = vpop.f32.mrf.mxu3 }
 0x63e   : > { %v5379_v61 = vmax.f32 %v5378_v48, %v3100_v31  ;;  %v8909_v48 = vld [vmem:[#allocation37_spill] sm:$0xff] }
 0x63f   : > { %v2726_v50 = vpop.f32.mrf.mxu2  ;;  %v3426_v2 = vpop.f32.mrf.mxu0 }
 0x640   : > { %v5234_v27 = vmax.f32 %v5233_v11, %v2726_v50  ;;  %v5505_v62 = vmax.f32 %v5504_v12, %v3426_v2 }
 0x643   : > { %v3713_v28 = vpop.f32.mrf.mxu1 }
 0x644   : > { %v5615_v54 = vmax.f32 %v5614_v30, %v3713_v28  ;;  %v6633_v30 = vld [vmem:[#allocation3 + $0x78] sm:$0xf0] }
 0x645   : > { %v3102_v56 = vpop.f32.mrf.mxu3  ;;  %v8424_v2 = vor.u32 %v6848_v1, %v6633_v30 }
 0x646   : > { %v5380_v19 = vmax.f32 %v5379_v61, %v3102_v56  ;;  %3752 = vmatmul.bf16.gmra.mxu1 %v7996_v32  ;;  %v8915_v32 = vld [vmem:[#allocation35_spill] sm:$0xff] }
 0x647   : > { %v2728_v18 = vpop.f32.mrf.mxu2  ;;  %v3429_v35 = vpop.f32.mrf.mxu0  ;;  %4836 = vmatpush.bf16.msra.mxu1 %v8424_v2 }
 0x648   : > { %v5235_v26 = vmax.f32 %v5234_v27, %v2728_v18  ;;  %v5506_v59 = vmax.f32 %v5505_v62, %v3429_v35  ;;  %v8910_v18 = vld [vmem:[#allocation38_spill] sm:$0xff] }
 0x64a   : > { %3144 = vmatmul.bf16.gmra.mxu3 %v8909_v48  ;;  %3468 = vmatmul.bf16.gmra.mxu0 %v8908_v22 }
 0x64b   : > { %v3715_v11 = vpop.f32.mrf.mxu1 }
 0x64c   : > { %v5616_v12 = vmax.f32 %v5615_v54, %v3715_v11  ;;  %2770 = vmatmul.bf16.gmra.mxu2 %v8012_v15 }
 0x64d   : > { %v3105_v53 = vpop.f32.mrf.mxu3 }
 0x64e   : > { %v5381_v31 = vmax.f32 %v5380_v19, %v3105_v53 }
 0x64f   : > { %v2731_v50 = vpop.f32.mrf.mxu2  ;;  %v3431_v61 = vpop.f32.mrf.mxu0 }
 0x650   : > { %v5236_v45 = vmax.f32 %v5235_v26, %v2731_v50  ;;  %v5507_v51 = vmax.f32 %v5506_v59, %v3431_v61 }
 0x653   : > { %v3718_v35 = vpop.f32.mrf.mxu1 }
 0x654   : > { %v5617_v27 = vmax.f32 %v5616_v12, %v3718_v35 }
 0x655   : > { %v3107_v62 = vpop.f32.mrf.mxu3 }
 0x656   : > { %v5382_v7 = vmax.f32 %v5381_v31, %v3107_v62  ;;  %3757 = vmatmul.bf16.gmra.mxu1 %v8012_v15  ;;  %v8911_v15 = vld [vmem:[#allocation39_spill] sm:$0xff] }
 0x657   : > { %v2733_v28 = vpop.f32.mrf.mxu2  ;;  %v3434_v54 = vpop.f32.mrf.mxu0 }
 0x658   : > { %v5237_v56 = vmax.f32 %v5236_v45, %v2733_v28  ;;  %v5508_v19 = vmax.f32 %v5507_v51, %v3434_v54 }
 0x65a   : > { %3149 = vmatmul.bf16.gmra.mxu3 %v8910_v18  ;;  %3473 = vmatmul.bf16.gmra.mxu0 %v8909_v48 }
 0x65b   : > { %v3720_v11 = vpop.f32.mrf.mxu1 }
 0x65c   : > { %v5618_v53 = vmax.f32 %v5617_v27, %v3720_v11  ;;  %2775 = vmatmul.bf16.gmra.mxu2 %v8033_v55 }
 0x65d   : > { %v3110_v26 = vpop.f32.mrf.mxu3 }
 0x65e   : > { %v5383_v59 = vmax.f32 %v5382_v7, %v3110_v26 }
 0x65f   : > { %v2736_v1 = vpop.f32.mrf.mxu2  ;;  %v3436_v12 = vpop.f32.mrf.mxu0 }
 0x660   : > { %v5238_v30 = vmax.f32 %v5237_v56, %v2736_v1  ;;  %v5509_v31 = vmax.f32 %v5508_v19, %v3436_v12 }
 0x663   : > { %v3723_v50 = vpop.f32.mrf.mxu1 }
 0x664   : > { %v5619_v61 = vmax.f32 %v5618_v53, %v3723_v50 }
 0x665   : > { %v3112_v35 = vpop.f32.mrf.mxu3 }
 0x666   : > { %v5384_v62 = vmax.f32 %v5383_v59, %v3112_v35  ;;  %3762 = vmatmul.bf16.gmra.mxu1 %v8033_v55  ;;  %v8912_v55 = vld [vmem:[#allocation40_spill] sm:$0xff] }
 0x667   : > { %v2738_v45 = vpop.f32.mrf.mxu2  ;;  %v3439_v51 = vpop.f32.mrf.mxu0 }
 0x668   : > { %v5239_v28 = vmax.f32 %v5238_v30, %v2738_v45  ;;  %v5510_v54 = vmax.f32 %v5509_v31, %v3439_v51 }
 0x66a   : > { %3154 = vmatmul.bf16.gmra.mxu3 %v8911_v15  ;;  %3478 = vmatmul.bf16.gmra.mxu0 %v8910_v18 }
 0x66b   : > { %v3725_v27 = vpop.f32.mrf.mxu1 }
 0x66c   : > { %v5620_v7 = vmax.f32 %v5619_v61, %v3725_v27  ;;  %2780 = vmatmul.bf16.gmra.mxu2 %v8049_v40 }
 0x66d   : > { %v3115_v56 = vpop.f32.mrf.mxu3 }
 0x66e   : > { %v5385_v19 = vmax.f32 %v5384_v62, %v3115_v56 }
 0x66f   : > { %v2741_v11 = vpop.f32.mrf.mxu2  ;;  %v3441_v53 = vpop.f32.mrf.mxu0 }
 0x670   : > { %v5240_v26 = vmax.f32 %v5239_v28, %v2741_v11  ;;  %v5511_v59 = vmax.f32 %v5510_v54, %v3441_v53 }
 0x673   : > { %v3728_v1 = vpop.f32.mrf.mxu1 }
 0x674   : > { %v5621_v12 = vmax.f32 %v5620_v7, %v3728_v1 }
 0x675   : > { %v3117_v50 = vpop.f32.mrf.mxu3 }
 0x676   : > { %v5386_v35 = vmax.f32 %v5385_v19, %v3117_v50  ;;  %3767 = vmatmul.bf16.gmra.mxu1 %v8049_v40  ;;  %v8913_v40 = vld [vmem:[#allocation41_spill] sm:$0xff] }
 0x677   : > { %v2743_v30 = vpop.f32.mrf.mxu2  ;;  %v3444_v31 = vpop.f32.mrf.mxu0 }
 0x678   : > { %v5241_v45 = vmax.f32 %v5240_v26, %v2743_v30  ;;  %v5512_v51 = vmax.f32 %v5511_v59, %v3444_v31 }
 0x67a   : > { %3159 = vmatmul.bf16.gmra.mxu3 %v8912_v55  ;;  %3483 = vmatmul.bf16.gmra.mxu0 %v8911_v15 }
 0x67b   : > { %v3730_v61 = vpop.f32.mrf.mxu1 }
 0x67c   : > { %v5622_v62 = vmax.f32 %v5621_v12, %v3730_v61  ;;  %2785 = vmatmul.bf16.gmra.mxu2 %v8065_v25 }
 0x67d   : > { %v3120_v28 = vpop.f32.mrf.mxu3 }
 0x67e   : > { %v5387_v54 = vmax.f32 %v5386_v35, %v3120_v28 }
 0x67f   : > { %v2746_v27 = vpop.f32.mrf.mxu2  ;;  %v3446_v7 = vpop.f32.mrf.mxu0 }
 0x680   : > { %v5242_v56 = vmax.f32 %v5241_v45, %v2746_v27  ;;  %v5513_v19 = vmax.f32 %v5512_v51, %v3446_v7 }
 0x683   : > { %v3733_v11 = vpop.f32.mrf.mxu1 }
 0x684   : > { %v5623_v53 = vmax.f32 %v5622_v62, %v3733_v11 }
 0x685   : > { %v3122_v1 = vpop.f32.mrf.mxu3 }
 0x686   : > { %v5388_v50 = vmax.f32 %v5387_v54, %v3122_v1  ;;  %3772 = vmatmul.bf16.gmra.mxu1 %v8065_v25  ;;  %v8914_v25 = vld [vmem:[#allocation43_spill] sm:$0xff] }
 0x687   : > { %v2748_v26 = vpop.f32.mrf.mxu2  ;;  %v3449_v59 = vpop.f32.mrf.mxu0 }
 0x688   : > { %v5243_v30 = vmax.f32 %v5242_v56, %v2748_v26  ;;  %v5514_v31 = vmax.f32 %v5513_v19, %v3449_v59 }
 0x68a   : > { %3164 = vmatmul.bf16.gmra.mxu3 %v8913_v40  ;;  %3488 = vmatmul.bf16.gmra.mxu0 %v8912_v55 }
 0x68b   : > { %v3735_v12 = vpop.f32.mrf.mxu1 }
 0x68c   : > { %v5624_v35 = vmax.f32 %v5623_v53, %v3735_v12  ;;  %2790 = vmatmul.bf16.gmra.mxu2 %v8904_v14 }
 0x68d   : > { %v3125_v45 = vpop.f32.mrf.mxu3 }
 0x68e   : > { %v5389_v51 = vmax.f32 %v5388_v50, %v3125_v45 }
 0x68f   : > { %v2751_v61 = vpop.f32.mrf.mxu2  ;;  %v3451_v62 = vpop.f32.mrf.mxu0 }
 0x690   : > { %v5244_v28 = vmax.f32 %v5243_v30, %v2751_v61  ;;  %v5515_v54 = vmax.f32 %v5514_v31, %v3451_v62 }
 0x693   : > { %v3738_v27 = vpop.f32.mrf.mxu1 }
 0x694   : > { %v5625_v7 = vmax.f32 %v5624_v35, %v3738_v27  ;;  %v6839_v27 = vld [vmem:[#allocation3 + $0x14] sm:$0xf] }
 0x695   : > { %v3127_v11 = vpop.f32.mrf.mxu3 }
 0x696   : > { %v5390_v1 = vmax.f32 %v5389_v51, %v3127_v11  ;;  %3777 = vmatmul.bf16.gmra.mxu1 %v8904_v14  ;;  %v6593_v11 = vld [vmem:[#allocation3 + $0x30] sm:$0xf0] }
 0x697   : > { %v2753_v56 = vpop.f32.mrf.mxu2  ;;  %v3454_v19 = vpop.f32.mrf.mxu0 }
 0x698   : > { %v5245_v26 = vmax.f32 %v5244_v28, %v2753_v56  ;;  %v5516_v59 = vmax.f32 %v5515_v54, %v3454_v19  ;;  %v6596_v54 = vor.u32 %v6839_v27, %v6593_v11 }
 0x69a   : > { %3169 = vmatmul.bf16.gmra.mxu3 %v8914_v25  ;;  %3493 = vmatmul.bf16.gmra.mxu0 %v8913_v40 }
 0x69b   : > { %v3740_v53 = vpop.f32.mrf.mxu1  ;;  %4179 = vmatpush.bf16.msra.mxu3 %v6596_v54 }
 0x69c   : > { %v5626_v50 = vmax.f32 %v5625_v7, %v3740_v53  ;;  %2795 = vmatmul.bf16.gmra.mxu2 %v8905_v43 }
 0x69d   : > { %v3130_v30 = vpop.f32.mrf.mxu3 }
 0x69e   : > { %v5391_v31 = vmax.f32 %v5390_v1, %v3130_v30 }
 0x69f   : > { %v2756_v12 = vpop.f32.mrf.mxu2  ;;  %v3456_v35 = vpop.f32.mrf.mxu0  ;;  %6906 = vmatpush.bf16.msrb.mxu3 %v8915_v32 }
 0x6a0   : > { %v5246_v45 = vmax.f32 %v5245_v26, %v2756_v12  ;;  %v5517_v51 = vmax.f32 %v5516_v59, %v3456_v35 }
 0x6a3   : > { %v3743_v61 = vpop.f32.mrf.mxu1  ;;  %6907 = vmatpush.bf16.msrb.mxu3 %v8239_v39 }
 0x6a4   : > { %v5627_v62 = vmax.f32 %v5626_v50, %v3743_v61 }
 0x6a5   : > { %v3132_v28 = vpop.f32.mrf.mxu3 }
 0x6a6   : > { %v5392_v56 = vmax.f32 %v5391_v31, %v3132_v28  ;;  %3782 = vmatmul.bf16.gmra.mxu1 %v8905_v43 }
 0x6a7   : > { %v2758_v19 = vpop.f32.mrf.mxu2  ;;  %v3459_v14 = vpop.f32.mrf.mxu0  ;;  %6908 = vmatpush.bf16.msrb.mxu3 %v8284_v36 }
 0x6a8   : > { %v5247_v7 = vmax.f32 %v5246_v45, %v2758_v19  ;;  %v5518_v53 = vmax.f32 %v5517_v51, %v3459_v14  ;;  %v6599_v45 = vld [vmem:[#allocation3 + $0x18] sm:$0xf] }
 0x6a9   : > { %v6844_v51 = vld [vmem:[#allocation3 + $0x34] sm:$0xf0] }
 0x6aa   : > { %3174 = vmatmul.bf16.gmra.mxu3 %v8235_v58  ;;  %3498 = vmatmul.bf16.gmra.mxu0 %v8914_v25 }
 0x6ab   : > { %v3745_v1 = vpop.f32.mrf.mxu1  ;;  %6909 = vmatpush.bf16.msrb.mxu3 %v8319_v3  ;;  %v6591_v3 = vld [vmem:[#allocation3 + $0x10] sm:$0xf] }
 0x6ac   : > { %v5628_v26 = vmax.f32 %v5627_v62, %v3745_v1  ;;  %2800 = vmatmul.bf16.gmra.mxu2 %v8906_v10  ;;  %v6600_v62 = vor.u32 %v6844_v51, %v6599_v45 }
 0x6ad   : > { %v3135_v59 = vpop.f32.mrf.mxu3 }
 0x6ae   : > { %v5393_v50 = vmax.f32 %v5392_v56, %v3135_v59  ;;  %4508 = vmatpush.bf16.msra.mxu0 %v6600_v62  ;;  %v8916_v56 = vld [vmem:[#allocation45_spill] sm:$0xff] }
 0x6af   : > { %v2761_v30 = vpop.f32.mrf.mxu2  ;;  %v3461_v31 = vpop.f32.mrf.mxu0  ;;  %6910 = vmatpush.bf16.msrb.mxu3 %v8354_v4 }
 0x6b0   : > { %v5248_v12 = vmax.f32 %v5247_v7, %v2761_v30  ;;  %v5519_v35 = vmax.f32 %v5518_v53, %v3461_v31  ;;  %v6843_v7 = vld [vmem:[#allocation3 + $0x2c] sm:$0xf0] }
 0x6b1   : > { %v6592_v1 = vor.u32 %v6843_v7, %v6591_v3 }
 0x6b3   : > { %v3748_v14 = vpop.f32.mrf.mxu1  ;;  %6911 = vmatpush.bf16.msrb.mxu3 %v8389_v47  ;;  %3850 = vmatpush.bf16.msra.mxu2 %v6592_v1 }
 0x6b4   : > { %v5629_v32 = vmax.f32 %v5628_v26, %v3748_v14 }
 0x6b5   : > { %v3137_v61 = vpop.f32.mrf.mxu3 }
 0x6b6   : > { %v5394_v27 = vmax.f32 %v5393_v50, %v3137_v61  ;;  %3787 = vmatmul.bf16.gmra.mxu1 %v8906_v10  ;;  %v8917_v61 = vld [vmem:[#allocation6_spill] sm:$0xff] }
 0x6b7   : > { %v2763_v39 = vpop.f32.mrf.mxu2  ;;  %v3464_v11 = vpop.f32.mrf.mxu0  ;;  %6912 = vmatpush.bf16.msrb.mxu3 %v8424_v2 }
 0x6b8   : > { %v5249_v28 = vmax.f32 %v5248_v12, %v2763_v39  ;;  %v5520_v54 = vmax.f32 %v5519_v35, %v3464_v11  ;;  %v6840_v11 = vld [vmem:[#allocation3 + $0x1c] sm:$0xf] }
 0x6ba   : > { %3179 = vmatmul.bf16.gmra.mxu3 %v8916_v56  ;;  %3503 = vmatmul.bf16.gmra.mxu0 %v8235_v58 }
 0x6bb   : > { %v3750_v36 = vpop.f32.mrf.mxu1 }
 0x6bc   : > { %v5630_v19 = vmax.f32 %v5629_v32, %v3750_v36  ;;  %2805 = vmatmul.bf16.gmra.mxu2 %v8907_v60 }
 0x6bd   : > { %v3140_v53 = vpop.f32.mrf.mxu3 }
 0x6be   : > { %v5395_v26 = vmax.f32 %v5394_v27, %v3140_v53 }
 0x6bf   : > { %v2766_v59 = vpop.f32.mrf.mxu2  ;;  %v3466_v50 = vpop.f32.mrf.mxu0 }
 0x6c0   : > { %v5250_v30 = vmax.f32 %v5249_v28, %v2766_v59  ;;  %v5521_v4 = vmax.f32 %v5520_v54, %v3466_v50  ;;  %v6601_v28 = vld [vmem:[#allocation3 + $0x38] sm:$0xf0] }
 0x6c3   : > { %v3753_v31 = vpop.f32.mrf.mxu1 }
 0x6c4   : > { %v5631_v12 = vmax.f32 %v5630_v19, %v3753_v31  ;;  %v6604_v19 = vor.u32 %v6840_v11, %v6601_v28 }
 0x6c5   : > { %v3142_v35 = vpop.f32.mrf.mxu3 }
 0x6c6   : > { %v5396_v14 = vmax.f32 %v5395_v26, %v3142_v35  ;;  %3792 = vmatmul.bf16.gmra.mxu1 %v8907_v60  ;;  %6913 = vmatpush.bf16.msrb.mxu3 %v6604_v19 }
 0x6c7   : > { %v2768_v32 = vpop.f32.mrf.mxu2  ;;  %v3469_v45 = vpop.f32.mrf.mxu0  ;;  %4837 = vmatpush.bf16.msra.mxu1 %v6604_v19 }
 0x6c8   : > { %v5251_v51 = vmax.f32 %v5250_v30, %v2768_v32  ;;  %v5522_v47 = vmax.f32 %v5521_v4, %v3469_v45 }
 0x6ca   : > { %3508 = vmatmul.bf16.gmra.mxu0 %v8916_v56  ;;  %4180 = vmatmul.bf16.vlgmr.msra.gmra.mxu3 %v8917_v61 }
 0x6cb   : > { %v3755_v62 = vpop.f32.mrf.mxu1 }
 0x6cc   : > { %v5632_v27 = vmax.f32 %v5631_v12, %v3755_v62  ;;  %2810 = vmatmul.bf16.gmra.mxu2 %v8908_v22  ;;  %v8918_v12 = vld [vmem:[#allocation7_spill] sm:$0xff] }
 0x6cd   : > { %v3145_v39 = vpop.f32.mrf.mxu3 }
 0x6ce   : > { %v5397_v2 = vmax.f32 %v5396_v14, %v3145_v39 }
 0x6cf   : > { %v2771_v54 = vpop.f32.mrf.mxu2  ;;  %v3471_v36 = vpop.f32.mrf.mxu0 }
 0x6d0   : > { %v5252_v3 = vmax.f32 %v5251_v51, %v2771_v54  ;;  %v5523_v7 = vmax.f32 %v5522_v47, %v3471_v36 }
 0x6d3   : > { %v3758_v53 = vpop.f32.mrf.mxu1 }
 0x6d4   : > { %v5633_v1 = vmax.f32 %v5632_v27, %v3758_v53 }
 0x6d5   : > { %v3147_v26 = vpop.f32.mrf.mxu3 }
 0x6d6   : > { %v5398_v59 = vmax.f32 %v5397_v2, %v3147_v26  ;;  %3797 = vmatmul.bf16.gmra.mxu1 %v8908_v22 }
 0x6d7   : > { %v2773_v50 = vpop.f32.mrf.mxu2  ;;  %v3474_v30 = vpop.f32.mrf.mxu0 }
 0x6d8   : > { %v5253_v4 = vmax.f32 %v5252_v3, %v2773_v50  ;;  %v5524_v31 = vmax.f32 %v5523_v7, %v3474_v30  ;;  %v8919_v7 = vld [vmem:[#allocation8_spill] sm:$0xff] }
 0x6da   : > { %4185 = vmatmul.bf16.gmra.mxu3 %v8918_v12  ;;  %4509 = vmatmul.bf16.vlgmr.msra.gmra.mxu0 %v8917_v61 }
 0x6db   : > { %v3760_v35 = vpop.f32.mrf.mxu1 }
 0x6dc   : > { %v5634_v14 = vmax.f32 %v5633_v1, %v3760_v35  ;;  %2815 = vmatmul.bf16.gmra.mxu2 %v8909_v48 }
 0x6dd   : > { %v3150_v32 = vpop.f32.mrf.mxu3 }
 0x6de   : > { %v5399_v45 = vmax.f32 %v5398_v59, %v3150_v32 }
 0x6df   : > { %v2776_v51 = vpop.f32.mrf.mxu2  ;;  %v3476_v47 = vpop.f32.mrf.mxu0 }
 0x6e0   : > { %v5254_v62 = vmax.f32 %v5253_v4, %v2776_v51  ;;  %v5525_v27 = vmax.f32 %v5524_v31, %v3476_v47 }
 0x6e3   : > { %v3763_v39 = vpop.f32.mrf.mxu1 }
 0x6e4   : > { %v5635_v2 = vmax.f32 %v5634_v14, %v3763_v39  ;;  %v8920_v39 = vld [vmem:[#allocation9_spill] sm:$0xff] }
 0x6e5   : > { %v3152_v11 = vpop.f32.mrf.mxu3 }
 0x6e6   : > { %v5400_v28 = vmax.f32 %v5399_v45, %v3152_v11  ;;  %3802 = vmatmul.bf16.gmra.mxu1 %v8909_v48 }
 0x6e7   : > { %v2778_v54 = vpop.f32.mrf.mxu2  ;;  %v3479_v36 = vpop.f32.mrf.mxu0 }
 0x6e8   : > { %v5255_v19 = vmax.f32 %v5254_v62, %v2778_v54  ;;  %v5526_v3 = vmax.f32 %v5525_v27, %v3479_v36 }
 0x6ea   : > { %4190 = vmatmul.bf16.gmra.mxu3 %v8919_v7  ;;  %4514 = vmatmul.bf16.gmra.mxu0 %v8918_v12 }
 0x6eb   : > { %v3765_v53 = vpop.f32.mrf.mxu1 }
 0x6ec   : > { %v5636_v1 = vmax.f32 %v5635_v2, %v3765_v53  ;;  %2820 = vmatmul.bf16.gmra.mxu2 %v8910_v18 }
 0x6ed   : > { %v3155_v26 = vpop.f32.mrf.mxu3 }
 0x6ee   : > { %v5401_v59 = vmax.f32 %v5400_v28, %v3155_v26 }
 0x6ef   : > { %v2781_v50 = vpop.f32.mrf.mxu2  ;;  %v3481_v30 = vpop.f32.mrf.mxu0 }
 0x6f0   : > { %v5256_v4 = vmax.f32 %v5255_v19, %v2781_v50  ;;  %v5527_v31 = vmax.f32 %v5526_v3, %v3481_v30 }
 0x6f3   : > { %v3768_v35 = vpop.f32.mrf.mxu1 }
 0x6f4   : > { %v5637_v14 = vmax.f32 %v5636_v1, %v3768_v35 }
 0x6f5   : > { %v3157_v32 = vpop.f32.mrf.mxu3 }
 0x6f6   : > { %v5402_v45 = vmax.f32 %v5401_v59, %v3157_v32  ;;  %3807 = vmatmul.bf16.gmra.mxu1 %v8910_v18  ;;  %v8921_v32 = vld [vmem:[#allocation10_spill] sm:$0xff] }
 0x6f7   : > { %v2783_v51 = vpop.f32.mrf.mxu2  ;;  %v3484_v47 = vpop.f32.mrf.mxu0 }
 0x6f8   : > { %v5257_v62 = vmax.f32 %v5256_v4, %v2783_v51  ;;  %v5528_v27 = vmax.f32 %v5527_v31, %v3484_v47 }
 0x6fa   : > { %4195 = vmatmul.bf16.gmra.mxu3 %v8920_v39  ;;  %4519 = vmatmul.bf16.gmra.mxu0 %v8919_v7 }
 0x6fb   : > { %v3770_v2 = vpop.f32.mrf.mxu1 }
 0x6fc   : > { %v5638_v11 = vmax.f32 %v5637_v14, %v3770_v2  ;;  %2825 = vmatmul.bf16.gmra.mxu2 %v8911_v15 }
 0x6fd   : > { %v3160_v28 = vpop.f32.mrf.mxu3 }
 0x6fe   : > { %v5403_v54 = vmax.f32 %v5402_v45, %v3160_v28 }
 0x6ff   : > { %v2786_v36 = vpop.f32.mrf.mxu2  ;;  %v3486_v19 = vpop.f32.mrf.mxu0 }
 0x700   : > { %v5258_v3 = vmax.f32 %v5257_v62, %v2786_v36  ;;  %v5529_v53 = vmax.f32 %v5528_v27, %v3486_v19 }
 0x703   : > { %v3773_v1 = vpop.f32.mrf.mxu1 }
 0x704   : > { %v5639_v26 = vmax.f32 %v5638_v11, %v3773_v1 }
 0x705   : > { %v3162_v59 = vpop.f32.mrf.mxu3 }
 0x706   : > { %v5404_v50 = vmax.f32 %v5403_v54, %v3162_v59  ;;  %3812 = vmatmul.bf16.gmra.mxu1 %v8911_v15 }
 0x707   : > { %v2788_v30 = vpop.f32.mrf.mxu2  ;;  %v3489_v4 = vpop.f32.mrf.mxu0 }
 0x708   : > { %v5259_v31 = vmax.f32 %v5258_v3, %v2788_v30  ;;  %v5530_v35 = vmax.f32 %v5529_v53, %v3489_v4  ;;  %v8922_v30 = vld [vmem:[#allocation11_spill] sm:$0xff] }
 0x70a   : > { %4200 = vmatmul.bf16.gmra.mxu3 %v8921_v32  ;;  %4524 = vmatmul.bf16.gmra.mxu0 %v8920_v39 }
 0x70b   : > { %v3775_v14 = vpop.f32.mrf.mxu1 }
 0x70c   : > { %v5640_v45 = vmax.f32 %v5639_v26, %v3775_v14  ;;  %2830 = vmatmul.bf16.gmra.mxu2 %v8912_v55 }
 0x70d   : > { %v3165_v51 = vpop.f32.mrf.mxu3 }
 0x70e   : > { %v5405_v47 = vmax.f32 %v5404_v50, %v3165_v51 }
 0x70f   : > { %v2791_v62 = vpop.f32.mrf.mxu2  ;;  %v3491_v27 = vpop.f32.mrf.mxu0 }
 0x710   : > { %v5260_v2 = vmax.f32 %v5259_v31, %v2791_v62  ;;  %v5531_v11 = vmax.f32 %v5530_v35, %v3491_v27 }
 0x713   : > { %v3778_v28 = vpop.f32.mrf.mxu1 }
 0x714   : > { %v5641_v54 = vmax.f32 %v5640_v45, %v3778_v28 }
 0x715   : > { %v3167_v36 = vpop.f32.mrf.mxu3 }
 0x716   : > { %v5406_v19 = vmax.f32 %v5405_v47, %v3167_v36  ;;  %3817 = vmatmul.bf16.gmra.mxu1 %v8912_v55 }
 0x717   : > { %v2793_v3 = vpop.f32.mrf.mxu2  ;;  %v3494_v53 = vpop.f32.mrf.mxu0 }
 0x718   : > { %v5261_v1 = vmax.f32 %v5260_v2, %v2793_v3  ;;  %v5532_v59 = vmax.f32 %v5531_v11, %v3494_v53  ;;  %v8923_v53 = vld [vmem:[#allocation13_spill] sm:$0xff] }
 0x71a   : > { %4205 = vmatmul.bf16.gmra.mxu3 %v8922_v30  ;;  %4529 = vmatmul.bf16.gmra.mxu0 %v8921_v32 }
 0x71b   : > { %v3780_v26 = vpop.f32.mrf.mxu1 }
 0x71c   : > { %v5642_v50 = vmax.f32 %v5641_v54, %v3780_v26  ;;  %2835 = vmatmul.bf16.gmra.mxu2 %v8913_v40 }
 0x71d   : > { %v3170_v4 = vpop.f32.mrf.mxu3 }
 0x71e   : > { %v5407_v31 = vmax.f32 %v5406_v19, %v3170_v4 }
 0x71f   : > { %v2796_v35 = vpop.f32.mrf.mxu2  ;;  %v3496_v14 = vpop.f32.mrf.mxu0 }
 0x720   : > { %v5262_v45 = vmax.f32 %v5261_v1, %v2796_v35  ;;  %v5533_v51 = vmax.f32 %v5532_v59, %v3496_v14 }
 0x723   : > { %v3783_v47 = vpop.f32.mrf.mxu1 }
 0x724   : > { %v5643_v62 = vmax.f32 %v5642_v50, %v3783_v47 }
 0x725   : > { %v3172_v27 = vpop.f32.mrf.mxu3 }
 0x726   : > { %v5408_v28 = vmax.f32 %v5407_v31, %v3172_v27  ;;  %3822 = vmatmul.bf16.gmra.mxu1 %v8913_v40  ;;  %v8924_v40 = vld [vmem:[#allocation14_spill] sm:$0xff] }
 0x727   : > { %v2798_v2 = vpop.f32.mrf.mxu2  ;;  %v3499_v11 = vpop.f32.mrf.mxu0 }
 0x728   : > { %v5263_v36 = vmax.f32 %v5262_v45, %v2798_v2  ;;  %v5534_v3 = vmax.f32 %v5533_v51, %v3499_v11 }
 0x72a   : > { %4210 = vmatmul.bf16.gmra.mxu3 %v8923_v53  ;;  %4534 = vmatmul.bf16.gmra.mxu0 %v8922_v30 }
 0x72b   : > { %v3785_v54 = vpop.f32.mrf.mxu1 }
 0x72c   : > { %v5644_v19 = vmax.f32 %v5643_v62, %v3785_v54  ;;  %2840 = vmatmul.bf16.gmra.mxu2 %v8914_v25 }
 0x72d   : > { %v3175_v1 = vpop.f32.mrf.mxu3 }
 0x72e   : > { %v5409_v59 = vmax.f32 %v5408_v28, %v3175_v1 }
 0x72f   : > { %v2801_v26 = vpop.f32.mrf.mxu2  ;;  %v3501_v50 = vpop.f32.mrf.mxu0 }
 0x730   : > { %v5264_v4 = vmax.f32 %v5263_v36, %v2801_v26  ;;  %v5535_v31 = vmax.f32 %v5534_v3, %v3501_v50 }
 0x733   : > { %v3788_v35 = vpop.f32.mrf.mxu1 }
 0x734   : > { %v5645_v14 = vmax.f32 %v5644_v19, %v3788_v35 }
 0x735   : > { %v3177_v47 = vpop.f32.mrf.mxu3 }
 0x736   : > { %v5410_v27 = vmax.f32 %v5409_v59, %v3177_v47  ;;  %3827 = vmatmul.bf16.gmra.mxu1 %v8914_v25 }
 0x737   : > { %v2803_v45 = vpop.f32.mrf.mxu2  ;;  %v3504_v51 = vpop.f32.mrf.mxu0 }
 0x738   : > { %v5265_v2 = vmax.f32 %v5264_v4, %v2803_v45  ;;  %v5536_v11 = vmax.f32 %v5535_v31, %v3504_v51 }
 0x73a   : > { %4215 = vmatmul.bf16.gmra.mxu3 %v8924_v40  ;;  %4539 = vmatmul.bf16.gmra.mxu0 %v8923_v53 }
 0x73b   : > { %v3790_v62 = vpop.f32.mrf.mxu1 }
 0x73c   : > { %v5646_v28 = vmax.f32 %v5645_v14, %v3790_v62  ;;  %2845 = vmatmul.bf16.gmra.mxu2 %v8235_v58  ;;  %v8925_v14 = vld [vmem:[#allocation15_spill] sm:$0xff] }
 0x73d   : > { %v3180_v36 = vpop.f32.mrf.mxu3 }
 0x73e   : > { %v5411_v3 = vmax.f32 %v5410_v27, %v3180_v36 }
 0x73f   : > { %v2806_v54 = vpop.f32.mrf.mxu2  ;;  %v3506_v19 = vpop.f32.mrf.mxu0 }
 0x740   : > { %v5266_v1 = vmax.f32 %v5265_v2, %v2806_v54  ;;  %v5537_v59 = vmax.f32 %v5536_v11, %v3506_v19 }
 0x743   : > { %v3793_v26 = vpop.f32.mrf.mxu1 }
 0x744   : > { %v5647_v50 = vmax.f32 %v5646_v28, %v3793_v26 }
 0x745   : > { %v3182_v35 = vpop.f32.mrf.mxu3 }
 0x746   : > { %v8494_v47 = vmax.f32 %v5411_v3, %v3182_v35  ;;  %3832 = vmatmul.bf16.gmra.mxu1 %v8235_v58 }
 0x747   : > { %v2808_v4 = vpop.f32.mrf.mxu2  ;;  %v3509_v31 = vpop.f32.mrf.mxu0 }
 0x748   : > { %v5267_v45 = vmax.f32 %v5266_v1, %v2808_v4  ;;  %v5538_v51 = vmax.f32 %v5537_v59, %v3509_v31 }
 0x74a   : > { %4220 = vmatmul.bf16.gmra.mxu3 %v8925_v14  ;;  %4544 = vmatmul.bf16.gmra.mxu0 %v8924_v40 }
 0x74b   : > { %v3795_v27 = vpop.f32.mrf.mxu1 }
 0x74c   : > { %v5648_v62 = vmax.f32 %v5647_v50, %v3795_v27  ;;  %2850 = vmatmul.bf16.gmra.mxu2 %v8916_v56 }
 0x74d   : > { %v4181_v2 = vpop.f32.mrf.mxu3 }
 0x74f   : > { %v2811_v11 = vpop.f32.mrf.mxu2  ;;  %v3511_v28 = vpop.f32.mrf.mxu0 }
 0x750   : > { %v5268_v36 = vmax.f32 %v5267_v45, %v2811_v11  ;;  %v8500_v3 = vmax.f32 %v5538_v51, %v3511_v28 }
 0x753   : > { %v3798_v54 = vpop.f32.mrf.mxu1 }
 0x754   : > { %v5649_v19 = vmax.f32 %v5648_v62, %v3798_v54 }
 0x755   : > { %v4183_v26 = vpop.f32.mrf.mxu3 }
 0x756   : > { %v5794_v35 = vmax.f32 %v4181_v2, %v4183_v26  ;;  %3837 = vmatmul.bf16.gmra.mxu1 %v8916_v56 }
 0x757   : > { %v2813_v1 = vpop.f32.mrf.mxu2  ;;  %v4510_v59 = vpop.f32.mrf.mxu0 }
 0x758   : > { %v5269_v4 = vmax.f32 %v5268_v36, %v2813_v1 }
 0x75a   : > { %4225 = vmatmul.bf16.gmra.mxu3 %v7869_v13  ;;  %4549 = vmatmul.bf16.gmra.mxu0 %v8925_v14 }
 0x75b   : > { %v3800_v50 = vpop.f32.mrf.mxu1 }
 0x75c   : > { %v5650_v31 = vmax.f32 %v5649_v19, %v3800_v50  ;;  %3851 = vmatmul.bf16.vlgmr.msra.gmra.mxu2 %v8917_v61 }
 0x75d   : > { %v4186_v45 = vpop.f32.mrf.mxu3 }
 0x75e   : > { %v5795_v51 = vmax.f32 %v5794_v35, %v4186_v45 }
 0x75f   : > { %v2816_v27 = vpop.f32.mrf.mxu2  ;;  %v4512_v11 = vpop.f32.mrf.mxu0 }
 0x760   : > { %v5270_v62 = vmax.f32 %v5269_v4, %v2816_v27  ;;  %v5921_v28 = vmax.f32 %v4510_v59, %v4512_v11 }
 0x763   : > { %v3803_v2 = vpop.f32.mrf.mxu1 }
 0x764   : > { %v5651_v54 = vmax.f32 %v5650_v31, %v3803_v2 }
 0x765   : > { %v4188_v26 = vpop.f32.mrf.mxu3 }
 0x766   : > { %v5796_v56 = vmax.f32 %v5795_v51, %v4188_v26  ;;  %4838 = vmatmul.bf16.vlgmr.msra.gmra.mxu1 %v8917_v61 }
 0x767   : > { %v2818_v36 = vpop.f32.mrf.mxu2  ;;  %v4515_v1 = vpop.f32.mrf.mxu0 }
 0x768   : > { %v5271_v58 = vmax.f32 %v5270_v62, %v2818_v36  ;;  %v5922_v25 = vmax.f32 %v5921_v28, %v4515_v1  ;;  %v8926_v1 = vld [vmem:[#allocation19_spill] sm:$0xff] }
 0x76a   : > { %4230 = vmatmul.bf16.gmra.mxu3 %v7893_v34  ;;  %4554 = vmatmul.bf16.gmra.mxu0 %v7869_v13 }
 0x76b   : > { %v3805_v19 = vpop.f32.mrf.mxu1 }
 0x76c   : > { %v5652_v35 = vmax.f32 %v5651_v54, %v3805_v19  ;;  %3856 = vmatmul.bf16.gmra.mxu2 %v8918_v12 }
 0x76d   : > { %v4191_v4 = vpop.f32.mrf.mxu3 }
 0x76e   : > { %v5797_v59 = vmax.f32 %v5796_v56, %v4191_v4 }
 0x76f   : > { %v2821_v50 = vpop.f32.mrf.mxu2  ;;  %v4517_v31 = vpop.f32.mrf.mxu0 }
 0x770   : > { %v5272_v45 = vmax.f32 %v5271_v58, %v2821_v50  ;;  %v5923_v51 = vmax.f32 %v5922_v25, %v4517_v31 }
 0x773   : > { %v3808_v27 = vpop.f32.mrf.mxu1 }
 0x774   : > { %v5653_v61 = vmax.f32 %v5652_v35, %v3808_v27 }
 0x775   : > { %v4193_v11 = vpop.f32.mrf.mxu3 }
 0x776   : > { %v5798_v2 = vmax.f32 %v5797_v59, %v4193_v11  ;;  %4843 = vmatmul.bf16.gmra.mxu1 %v8918_v12 }
 0x777   : > { %v2823_v62 = vpop.f32.mrf.mxu2  ;;  %v4520_v28 = vpop.f32.mrf.mxu0 }
 0x778   : > { %v5273_v26 = vmax.f32 %v5272_v45, %v2823_v62  ;;  %v5924_v36 = vmax.f32 %v5923_v51, %v4520_v28  ;;  %v8927_v28 = vld [vmem:[#allocation21_spill] sm:$0xff] }
 0x77a   : > { %4235 = vmatmul.bf16.gmra.mxu3 %v8926_v1  ;;  %4559 = vmatmul.bf16.gmra.mxu0 %v7893_v34 }
 0x77b   : > { %v3810_v54 = vpop.f32.mrf.mxu1 }
 0x77c   : > { %v5654_v56 = vmax.f32 %v5653_v61, %v3810_v54  ;;  %3861 = vmatmul.bf16.gmra.mxu2 %v8919_v7 }
 0x77d   : > { %v4196_v58 = vpop.f32.mrf.mxu3 }
 0x77e   : > { %v5799_v25 = vmax.f32 %v5798_v2, %v4196_v58 }
 0x77f   : > { %v2826_v19 = vpop.f32.mrf.mxu2  ;;  %v4522_v35 = vpop.f32.mrf.mxu0 }
 0x780   : > { %v5274_v4 = vmax.f32 %v5273_v26, %v2826_v19  ;;  %v5925_v59 = vmax.f32 %v5924_v36, %v4522_v35 }
 0x783   : > { %v3813_v50 = vpop.f32.mrf.mxu1 }
 0x784   : > { %v5655_v12 = vmax.f32 %v5654_v56, %v3813_v50 }
 0x785   : > { %v4198_v31 = vpop.f32.mrf.mxu3 }
 0x786   : > { %v5800_v27 = vmax.f32 %v5799_v25, %v4198_v31  ;;  %4848 = vmatmul.bf16.gmra.mxu1 %v8919_v7 }
 0x787   : > { %v2828_v45 = vpop.f32.mrf.mxu2  ;;  %v4525_v51 = vpop.f32.mrf.mxu0 }
 0x788   : > { %v5275_v11 = vmax.f32 %v5274_v4, %v2828_v45  ;;  %v5926_v62 = vmax.f32 %v5925_v59, %v4525_v51  ;;  %v8928_v51 = vld [vmem:[#allocation23_spill] sm:$0xff] }
 0x78a   : > { %4240 = vmatmul.bf16.gmra.mxu3 %v8927_v28  ;;  %4564 = vmatmul.bf16.gmra.mxu0 %v8926_v1 }
 0x78b   : > { %v3815_v61 = vpop.f32.mrf.mxu1 }
 0x78c   : > { %v5656_v2 = vmax.f32 %v5655_v12, %v3815_v61  ;;  %3866 = vmatmul.bf16.gmra.mxu2 %v8920_v39 }
 0x78d   : > { %v4201_v26 = vpop.f32.mrf.mxu3 }
 0x78e   : > { %v5801_v36 = vmax.f32 %v5800_v27, %v4201_v26 }
 0x78f   : > { %v2831_v54 = vpop.f32.mrf.mxu2  ;;  %v4527_v56 = vpop.f32.mrf.mxu0 }
 0x790   : > { %v5276_v58 = vmax.f32 %v5275_v11, %v2831_v54  ;;  %v5927_v25 = vmax.f32 %v5926_v62, %v4527_v56 }
 0x793   : > { %v3818_v19 = vpop.f32.mrf.mxu1 }
 0x794   : > { %v5657_v7 = vmax.f32 %v5656_v2, %v3818_v19 }
 0x795   : > { %v4203_v35 = vpop.f32.mrf.mxu3 }
 0x796   : > { %v5802_v50 = vmax.f32 %v5801_v36, %v4203_v35  ;;  %4853 = vmatmul.bf16.gmra.mxu1 %v8920_v39 }
 0x797   : > { %v2833_v4 = vpop.f32.mrf.mxu2  ;;  %v4530_v59 = vpop.f32.mrf.mxu0 }
 0x798   : > { %v5277_v31 = vmax.f32 %v5276_v58, %v2833_v4  ;;  %v5928_v45 = vmax.f32 %v5927_v25, %v4530_v59 }
 0x79a   : > { %4245 = vmatmul.bf16.gmra.mxu3 %v8928_v51  ;;  %4569 = vmatmul.bf16.gmra.mxu0 %v8927_v28 }
 0x79b   : > { %v3820_v12 = vpop.f32.mrf.mxu1 }
 0x79c   : > { %v5658_v27 = vmax.f32 %v5657_v7, %v3820_v12  ;;  %3871 = vmatmul.bf16.gmra.mxu2 %v8921_v32 }
 0x79d   : > { %v4206_v11 = vpop.f32.mrf.mxu3 }
 0x79e   : > { %v5803_v62 = vmax.f32 %v5802_v50, %v4206_v11 }
 0x79f   : > { %v2836_v61 = vpop.f32.mrf.mxu2  ;;  %v4532_v2 = vpop.f32.mrf.mxu0 }
 0x7a0   : > { %v5278_v26 = vmax.f32 %v5277_v31, %v2836_v61  ;;  %v5929_v36 = vmax.f32 %v5928_v45, %v4532_v2 }
 0x7a3   : > { %v3823_v54 = vpop.f32.mrf.mxu1 }
 0x7a4   : > { %v5659_v39 = vmax.f32 %v5658_v27, %v3823_v54 }
 0x7a5   : > { %v4208_v56 = vpop.f32.mrf.mxu3 }
 0x7a6   : > { %v5804_v19 = vmax.f32 %v5803_v62, %v4208_v56  ;;  %4858 = vmatmul.bf16.gmra.mxu1 %v8921_v32 }
 0x7a7   : > { %v2838_v58 = vpop.f32.mrf.mxu2  ;;  %v4535_v25 = vpop.f32.mrf.mxu0 }
 0x7a8   : > { %v5279_v35 = vmax.f32 %v5278_v26, %v2838_v58  ;;  %v5930_v4 = vmax.f32 %v5929_v36, %v4535_v25 }
 0x7aa   : > { %4250 = vmatmul.bf16.gmra.mxu3 %v7984_v5  ;;  %4574 = vmatmul.bf16.gmra.mxu0 %v8928_v51 }
 0x7ab   : > { %v3825_v7 = vpop.f32.mrf.mxu1 }
 0x7ac   : > { %v5660_v50 = vmax.f32 %v5659_v39, %v3825_v7  ;;  %3876 = vmatmul.bf16.gmra.mxu2 %v8922_v30 }
 0x7ad   : > { %v4211_v59 = vpop.f32.mrf.mxu3 }
 0x7ae   : > { %v5805_v31 = vmax.f32 %v5804_v19, %v4211_v59 }
 0x7af   : > { %v2841_v45 = vpop.f32.mrf.mxu2  ;;  %v4537_v12 = vpop.f32.mrf.mxu0 }
 0x7b0   : > { %v5280_v27 = vmax.f32 %v5279_v35, %v2841_v45  ;;  %v5931_v11 = vmax.f32 %v5930_v4, %v4537_v12  ;;  %v6228_v12 = vrot.slane %v8494_v47, 4 }
 0x7b3   : > { %v3828_v62 = vpop.f32.mrf.mxu1 }
 0x7b4   : > { %v5661_v32 = vmax.f32 %v5660_v50, %v3828_v62 }
 0x7b5   : > { %v4213_v61 = vpop.f32.mrf.mxu3 }
 0x7b6   : > { %v5806_v2 = vmax.f32 %v5805_v31, %v4213_v61  ;;  %4863 = vmatmul.bf16.gmra.mxu1 %v8922_v30  ;;  %v6229_v61 = vmax.f32 %v8494_v47, %v6228_v12 }
 0x7b7   : > { %v2843_v26 = vpop.f32.mrf.mxu2  ;;  %v4540_v36 = vpop.f32.mrf.mxu0 }
 0x7b8   : > { %v5281_v54 = vmax.f32 %v5280_v27, %v2843_v26  ;;  %v5932_v56 = vmax.f32 %v5931_v11, %v4540_v36  ;;  %v6234_v36 = vrot.slane %v8500_v3, 4 }
 0x7ba   : > { %4255 = vmatmul.bf16.gmra.mxu3 %v8001_v24  ;;  %4579 = vmatmul.bf16.gmra.mxu0 %v7984_v5 }
 0x7bb   : > { %v3830_v39 = vpop.f32.mrf.mxu1 }
 0x7bc   : > { %v5662_v19 = vmax.f32 %v5661_v32, %v3830_v39  ;;  %3881 = vmatmul.bf16.gmra.mxu2 %v8923_v53 }
 0x7bd   : > { %v4216_v58 = vpop.f32.mrf.mxu3 }
 0x7be   : > { %v5807_v25 = vmax.f32 %v5806_v2, %v4216_v58 }
 0x7bf   : > { %v2846_v35 = vpop.f32.mrf.mxu2  ;;  %v4542_v4 = vpop.f32.mrf.mxu0 }
 0x7c0   : > { %v5282_v7 = vmax.f32 %v5281_v54, %v2846_v35  ;;  %v5933_v50 = vmax.f32 %v5932_v56, %v4542_v4  ;;  %v6230_v56 = vrot.slane %v6229_v61, 2  ;;  %v6235_v35 = vmax.f32 %v8500_v3, %v6234_v36 }
 0x7c2   : > { %v6231_v4 = vmax.f32 %v6229_v61, %v6230_v56 }
 0x7c3   : > { %v3833_v59 = vpop.f32.mrf.mxu1 }
 0x7c4   : > { %v5663_v30 = vmax.f32 %v5662_v19, %v3833_v59  ;;  %v6236_v59 = vrot.slane %v6235_v35, 2 }
 0x7c5   : > { %v4218_v31 = vpop.f32.mrf.mxu3 }
 0x7c6   : > { %v5808_v45 = vmax.f32 %v5807_v25, %v4218_v31  ;;  %4868 = vmatmul.bf16.gmra.mxu1 %v8923_v53 }
 0x7c7   : > { %v2848_v27 = vpop.f32.mrf.mxu2  ;;  %v4545_v11 = vpop.f32.mrf.mxu0 }
 0x7c8   : > { %v5283_v62 = vmax.f32 %v5282_v7, %v2848_v27  ;;  %v5934_v32 = vmax.f32 %v5933_v50, %v4545_v11 }
 0x7ca   : > { %4260 = vmatmul.bf16.gmra.mxu3 %v8022_v0  ;;  %4584 = vmatmul.bf16.gmra.mxu0 %v8001_v24 }
 0x7cb   : > { %v3835_v2 = vpop.f32.mrf.mxu1 }
 0x7cc   : > { %v5664_v26 = vmax.f32 %v5663_v30, %v3835_v2  ;;  %3886 = vmatmul.bf16.gmra.mxu2 %v8924_v40  ;;  %v6232_v30 = vrot.slane %v6231_v4, 1 }
 0x7cd   : > { %v4221_v54 = vpop.f32.mrf.mxu3 }
 0x7ce   : > { %v5809_v53 = vmax.f32 %v5808_v45, %v4221_v54  ;;  %v6270_v45 = vld [vmem:[%s8786_s6] sm:$0xff]  ;;  %v6233_v3 = vmax.f32 %v6231_v4, %v6232_v30 }
 0x7cf   : > { %v2851_v39 = vpop.f32.mrf.mxu2  ;;  %v4547_v19 = vpop.f32.mrf.mxu0  ;;  %v6273_v61 = vperm.slane %v6270_v45, 1  ;;  %v6272_v30 = vperm.slane %v6270_v45, 0 }
 0x7d0   : > { %v5284_v58 = vmax.f32 %v5283_v62, %v2851_v39  ;;  %v5935_v25 = vmax.f32 %v5934_v32, %v4547_v19  ;;  %v6237_v32 = vmax.f32 %v6235_v35, %v6236_v59 }
 0x7d2   : > { %v6238_v54 = vrot.slane %v6237_v32, 1 }
 0x7d3   : > { %v3838_v7 = vpop.f32.mrf.mxu1 }
 0x7d4   : > { %v5665_v50 = vmax.f32 %v5664_v26, %v3838_v7 }
 0x7d5   : > { %v4223_v47 = vpop.f32.mrf.mxu3 }
 0x7d6   : > { %v5810_v31 = vmax.f32 %v5809_v53, %v4223_v47  ;;  %4873 = vmatmul.bf16.gmra.mxu1 %v8924_v40 }
 0x7d7   : > { %v2853_v12 = vpop.f32.mrf.mxu2  ;;  %v4550_v27 = vpop.f32.mrf.mxu0 }
 0x7d8   : > { %v5285_v11 = vmax.f32 %v5284_v58, %v2853_v12  ;;  %v5936_v62 = vmax.f32 %v5935_v25, %v4550_v27  ;;  %v6289_v58 = vadd.f32 %v6273_v61, %v6233_v3  ;;  %v6239_v12 = vmax.f32 %v6237_v32, %v6238_v54 }
 0x7d9   : > { %v6274_v27 = vperm.slane %v6270_v45, 2 }
 0x7da   : > { %v6222_v2 = vrot.slane %v5285_v11, 4  ;;  %4265 = vmatmul.bf16.gmra.mxu3 %v8038_v41  ;;  %4589 = vmatmul.bf16.gmra.mxu0 %v8022_v0 }
 0x7db   : > { %v3840_v26 = vpop.f32.mrf.mxu1  ;;  %v6290_v15 = vadd.f32 %v6274_v27, %v6239_v12 }
 0x7dc   : > { %v6223_v36 = vmax.f32 %v5285_v11, %v6222_v2  ;;  %v5666_v40 = vmax.f32 %v5665_v50, %v3840_v26  ;;  %3891 = vmatmul.bf16.gmra.mxu2 %v8925_v14  ;;  %v6297_v11 = vmax.f32 %v6289_v58, 0.0 }
 0x7dd   : > { %v4226_v53 = vpop.f32.mrf.mxu3 }
 0x7de   : > { %v6224_v56 = vrot.slane %v6223_v36, 2  ;;  %v6240_v39 = vrot.slane %v5666_v40, 4  ;;  %v5811_v19 = vmax.f32 %v5810_v31, %v4226_v53  ;;  %v6275_v31 = vperm.slane %v6270_v45, 3 }
 0x7df   : > { %v3852_v25 = vpop.f32.mrf.mxu2  ;;  %v4552_v35 = vpop.f32.mrf.mxu0  ;;  %v6312_v61 = vrot.slane %v6297_v11, 7 }
 0x7e0   : > { %v6225_v7 = vmax.f32 %v6223_v36, %v6224_v56  ;;  %v6241_v59 = vmax.f32 %v5666_v40, %v6240_v39  ;;  %v5937_v47 = vmax.f32 %v5936_v62, %v4552_v35  ;;  %v6298_v56 = vmax.f32 %v6290_v15, 0.0 }
 0x7e2   : > { %v6226_v4 = vrot.slane %v6225_v7, 1  ;;  %v6242_v55 = vrot.slane %v6241_v59, 2 }
 0x7e3   : > { %v4839_v50 = vpop.f32.mrf.mxu1 }
 0x7e4   : > { %v6227_v2 = vmax.f32 %v6225_v7, %v6226_v4  ;;  %v6243_v26 = vmax.f32 %v6241_v59, %v6242_v55 }
 0x7e5   : > { %v4228_v18 = vpop.f32.mrf.mxu3 }
 0x7e6   : > { %v6288_v48 = vadd.f32 %v6272_v30, %v6227_v2  ;;  %v6244_v22 = vrot.slane %v6243_v26, 1  ;;  %v5812_v3 = vmax.f32 %v5811_v19, %v4228_v18  ;;  %4878 = vmatmul.bf16.gmra.mxu1 %v8925_v14  ;;  %v6313_v19 = vrot.slane %v6298_v56, 6 }
 0x7e7   : > { %v3854_v62 = vpop.f32.mrf.mxu2  ;;  %v4555_v32 = vpop.f32.mrf.mxu0 }
 0x7e8   : > { %v6296_v36 = vmax.f32 %v6288_v48, 0.0  ;;  %v6245_v40 = vmax.f32 %v6243_v26, %v6244_v22  ;;  %v5667_v54 = vmax.f32 %v3852_v25, %v3854_v62  ;;  %v5938_v53 = vmax.f32 %v5937_v47, %v4555_v32 }
 0x7ea   : > { %v6320_v39 = vsel %vm6319_vm2, %v6296_v36, %v6312_v61  ;;  %v6291_v58 = vadd.f32 %v6275_v31, %v6245_v40  ;;  %4270 = vmatmul.bf16.gmra.mxu3 %v8054_v21  ;;  %4594 = vmatmul.bf16.gmra.mxu0 %v8038_v41 }
 0x7eb   : > { %v4841_v55 = vpop.f32.mrf.mxu1 }
 0x7ec   : > { %v6299_v45 = vmax.f32 %v6291_v58, 0.0  ;;  %v6048_v18 = vmax.f32 %v4839_v50, %v4841_v55  ;;  %3896 = vmatmul.bf16.gmra.mxu2 %v7869_v13 }
 0x7ed   : > { %v4231_v14 = vpop.f32.mrf.mxu3 }
 0x7ee   : > { %v6314_v35 = vrot.slane %v6299_v45, 5  ;;  %v5813_v22 = vmax.f32 %v5812_v3, %v4231_v14 }
 0x7ef   : > { %v3857_v48 = vpop.f32.mrf.mxu2  ;;  %v4557_v25 = vpop.f32.mrf.mxu0 }
 0x7f0   : > { %v6322_v15 = vsel %vm6321_vm3, %v6313_v19, %v6314_v35  ;;  %v5668_v7 = vmax.f32 %v5667_v54, %v3857_v48  ;;  %v5939_v59 = vmax.f32 %v5938_v53, %v4557_v25 }
 0x7f1   : > { %v8549_v47 = vsel %vm6323_vm4, %v6320_v39, %v6322_v15 }
 0x7f3   : > { %v4844_v12 = vpop.f32.mrf.mxu1 }
 0x7f4   : > { %v6049_v27 = vmax.f32 %v6048_v18, %v4844_v12 }
 0x7f5   : > { %v4233_v4 = vpop.f32.mrf.mxu3 }
 0x7f6   : > { %v5814_v30 = vmax.f32 %v5813_v22, %v4233_v4  ;;  %4883 = vmatmul.bf16.gmra.mxu1 %v7869_v13 }
 0x7f7   : > { %v3859_v11 = vpop.f32.mrf.mxu2  ;;  %v4560_v50 = vpop.f32.mrf.mxu0 }
 0x7f8   : > { %v5669_v2 = vmax.f32 %v5668_v7, %v3859_v11  ;;  %v5940_v26 = vmax.f32 %v5939_v59, %v4560_v50 }
 0x7fa   : > { %4275 = vmatmul.bf16.gmra.mxu3 %v8070_v37  ;;  %4599 = vmatmul.bf16.gmra.mxu0 %v8054_v21 }
 0x7fb   : > { %v4846_v31 = vpop.f32.mrf.mxu1 }
 0x7fc   : > { %v6050_v3 = vmax.f32 %v6049_v27, %v4846_v31  ;;  %3901 = vmatmul.bf16.gmra.mxu2 %v7893_v34 }
 0x7fd   : > { %v4236_v61 = vpop.f32.mrf.mxu3 }
 0x7fe   : > { %v5815_v62 = vmax.f32 %v5814_v30, %v4236_v61 }
 0x7ff   : > { %v3862_v32 = vpop.f32.mrf.mxu2  ;;  %v4562_v36 = vpop.f32.mrf.mxu0 }
 0x800   : > { %v5670_v40 = vmax.f32 %v5669_v2, %v3862_v32  ;;  %v5941_v54 = vmax.f32 %v5940_v26, %v4562_v36  ;;  %v8929_v2 = vld [vmem:[#allocation32_spill] sm:$0xff] }
 0x803   : > { %v4849_v53 = vpop.f32.mrf.mxu1 }
 0x804   : > { %v6051_v13 = vmax.f32 %v6050_v3, %v4849_v53 }
 0x805   : > { %v4238_v56 = vpop.f32.mrf.mxu3 }
 0x806   : > { %v5816_v39 = vmax.f32 %v5815_v62, %v4238_v56  ;;  %4888 = vmatmul.bf16.gmra.mxu1 %v7893_v34 }
 0x807   : > { %v3864_v58 = vpop.f32.mrf.mxu2  ;;  %v4565_v55 = vpop.f32.mrf.mxu0 }
 0x808   : > { %v5671_v45 = vmax.f32 %v5670_v40, %v3864_v58  ;;  %v5942_v18 = vmax.f32 %v5941_v54, %v4565_v55 }
 0x80a   : > { %4280 = vmatmul.bf16.gmra.mxu3 %v8086_v9  ;;  %4604 = vmatmul.bf16.gmra.mxu0 %v8070_v37 }
 0x80b   : > { %v4851_v14 = vpop.f32.mrf.mxu1 }
 0x80c   : > { %v6052_v19 = vmax.f32 %v6051_v13, %v4851_v14  ;;  %3906 = vmatmul.bf16.gmra.mxu2 %v8926_v1 }
 0x80d   : > { %v4241_v35 = vpop.f32.mrf.mxu3 }
 0x80e   : > { %v5817_v22 = vmax.f32 %v5816_v39, %v4241_v35 }
 0x80f   : > { %v3867_v48 = vpop.f32.mrf.mxu2  ;;  %v4567_v25 = vpop.f32.mrf.mxu0 }
 0x810   : > { %v5672_v15 = vmax.f32 %v5671_v45, %v3867_v48  ;;  %v5943_v7 = vmax.f32 %v5942_v18, %v4567_v25 }
 0x813   : > { %v4854_v59 = vpop.f32.mrf.mxu1 }
 0x814   : > { %v6053_v34 = vmax.f32 %v6052_v19, %v4854_v59 }
 0x815   : > { %v4243_v12 = vpop.f32.mrf.mxu3 }
 0x816   : > { %v5818_v27 = vmax.f32 %v5817_v22, %v4243_v12  ;;  %4893 = vmatmul.bf16.gmra.mxu1 %v8926_v1 }
 0x817   : > { %v3869_v4 = vpop.f32.mrf.mxu2  ;;  %v4570_v30 = vpop.f32.mrf.mxu0 }
 0x818   : > { %v5673_v11 = vmax.f32 %v5672_v15, %v3869_v4  ;;  %v5944_v50 = vmax.f32 %v5943_v7, %v4570_v30 }
 0x81a   : > { %4285 = vmatmul.bf16.gmra.mxu3 %v8929_v2  ;;  %4609 = vmatmul.bf16.gmra.mxu0 %v8086_v9 }
 0x81b   : > { %v4856_v26 = vpop.f32.mrf.mxu1 }
 0x81c   : > { %v6054_v31 = vmax.f32 %v6053_v34, %v4856_v26  ;;  %3911 = vmatmul.bf16.gmra.mxu2 %v8927_v28 }
 0x81d   : > { %v4246_v3 = vpop.f32.mrf.mxu3 }
 0x81e   : > { %v5819_v61 = vmax.f32 %v5818_v27, %v4246_v3 }
 0x81f   : > { %v3872_v62 = vpop.f32.mrf.mxu2  ;;  %v4572_v32 = vpop.f32.mrf.mxu0 }
 0x820   : > { %v5674_v36 = vmax.f32 %v5673_v11, %v3872_v62  ;;  %v5945_v40 = vmax.f32 %v5944_v50, %v4572_v32 }
 0x823   : > { %v4859_v54 = vpop.f32.mrf.mxu1 }
 0x824   : > { %v6055_v1 = vmax.f32 %v6054_v31, %v4859_v54 }
 0x825   : > { %v4248_v53 = vpop.f32.mrf.mxu3 }
 0x826   : > { %v5820_v13 = vmax.f32 %v5819_v61, %v4248_v53  ;;  %4898 = vmatmul.bf16.gmra.mxu1 %v8927_v28 }
 0x827   : > { %v3874_v56 = vpop.f32.mrf.mxu2  ;;  %v4575_v39 = vpop.f32.mrf.mxu0 }
 0x828   : > { %v5675_v58 = vmax.f32 %v5674_v36, %v3874_v56  ;;  %v5946_v55 = vmax.f32 %v5945_v40, %v4575_v39 }
 0x82a   : > { %4290 = vmatmul.bf16.gmra.mxu3 %v8118_v6  ;;  %4614 = vmatmul.bf16.gmra.mxu0 %v8929_v2 }
 0x82b   : > { %v4861_v45 = vpop.f32.mrf.mxu1 }
 0x82c   : > { %v6056_v18 = vmax.f32 %v6055_v1, %v4861_v45  ;;  %3916 = vmatmul.bf16.gmra.mxu2 %v8928_v51 }
 0x82d   : > { %v4251_v14 = vpop.f32.mrf.mxu3 }
 0x82e   : > { %v5821_v19 = vmax.f32 %v5820_v13, %v4251_v14 }
 0x82f   : > { %v3877_v35 = vpop.f32.mrf.mxu2  ;;  %v4577_v22 = vpop.f32.mrf.mxu0 }
 0x830   : > { %v5676_v48 = vmax.f32 %v5675_v58, %v3877_v35  ;;  %v5947_v25 = vmax.f32 %v5946_v55, %v4577_v22 }
 0x833   : > { %v4864_v15 = vpop.f32.mrf.mxu1 }
 0x834   : > { %v6057_v28 = vmax.f32 %v6056_v18, %v4864_v15 }
 0x835   : > { %v4253_v7 = vpop.f32.mrf.mxu3 }
 0x836   : > { %v5822_v59 = vmax.f32 %v5821_v19, %v4253_v7  ;;  %4903 = vmatmul.bf16.gmra.mxu1 %v8928_v51 }
 0x837   : > { %v3879_v34 = vpop.f32.mrf.mxu2  ;;  %v4580_v12 = vpop.f32.mrf.mxu0 }
 0x838   : > { %v5677_v27 = vmax.f32 %v5676_v48, %v3879_v34  ;;  %v5948_v4 = vmax.f32 %v5947_v25, %v4580_v12 }
 0x83a   : > { %4295 = vmatmul.bf16.gmra.mxu3 %v8134_v46  ;;  %4619 = vmatmul.bf16.gmra.mxu0 %v8118_v6 }
 0x83b   : > { %v4866_v30 = vpop.f32.mrf.mxu1 }
 0x83c   : > { %v6058_v11 = vmax.f32 %v6057_v28, %v4866_v30  ;;  %3921 = vmatmul.bf16.gmra.mxu2 %v7984_v5 }
 0x83d   : > { %v4256_v50 = vpop.f32.mrf.mxu3 }
 0x83e   : > { %v5823_v26 = vmax.f32 %v5822_v59, %v4256_v50 }
 0x83f   : > { %v3882_v31 = vpop.f32.mrf.mxu2  ;;  %v4582_v3 = vpop.f32.mrf.mxu0 }
 0x840   : > { %v5678_v61 = vmax.f32 %v5677_v27, %v3882_v31  ;;  %v5949_v62 = vmax.f32 %v5948_v4, %v4582_v3 }
 0x843   : > { %v4869_v32 = vpop.f32.mrf.mxu1 }
 0x844   : > { %v6059_v51 = vmax.f32 %v6058_v11, %v4869_v32 }
 0x845   : > { %v4258_v36 = vpop.f32.mrf.mxu3 }
 0x846   : > { %v5824_v40 = vmax.f32 %v5823_v26, %v4258_v36  ;;  %4908 = vmatmul.bf16.gmra.mxu1 %v7984_v5 }
 0x847   : > { %v3884_v54 = vpop.f32.mrf.mxu2  ;;  %v4585_v1 = vpop.f32.mrf.mxu0 }
 0x848   : > { %v5679_v53 = vmax.f32 %v5678_v61, %v3884_v54  ;;  %v5950_v13 = vmax.f32 %v5949_v62, %v4585_v1 }
 0x84a   : > { %4300 = vmatmul.bf16.gmra.mxu3 %v8150_v63  ;;  %4624 = vmatmul.bf16.gmra.mxu0 %v8134_v46 }
 0x84b   : > { %v4871_v56 = vpop.f32.mrf.mxu1 }
 0x84c   : > { %v6060_v39 = vmax.f32 %v6059_v51, %v4871_v56  ;;  %3926 = vmatmul.bf16.gmra.mxu2 %v8001_v24 }
 0x84d   : > { %v4261_v58 = vpop.f32.mrf.mxu3 }
 0x84e   : > { %v5825_v55 = vmax.f32 %v5824_v40, %v4261_v58 }
 0x84f   : > { %v3887_v45 = vpop.f32.mrf.mxu2  ;;  %v4587_v18 = vpop.f32.mrf.mxu0 }
 0x850   : > { %v5680_v14 = vmax.f32 %v5679_v53, %v3887_v45  ;;  %v5951_v19 = vmax.f32 %v5950_v13, %v4587_v18 }
 0x853   : > { %v4874_v35 = vpop.f32.mrf.mxu1 }
 0x854   : > { %v6061_v5 = vmax.f32 %v6060_v39, %v4874_v35 }
 0x855   : > { %v4263_v22 = vpop.f32.mrf.mxu3 }
 0x856   : > { %v5826_v48 = vmax.f32 %v5825_v55, %v4263_v22  ;;  %4913 = vmatmul.bf16.gmra.mxu1 %v8001_v24 }
 0x857   : > { %v3889_v25 = vpop.f32.mrf.mxu2  ;;  %v4590_v15 = vpop.f32.mrf.mxu0 }
 0x858   : > { %v5681_v28 = vmax.f32 %v5680_v14, %v3889_v25  ;;  %v5952_v7 = vmax.f32 %v5951_v19, %v4590_v15 }
 0x85a   : > { %4305 = vmatmul.bf16.gmra.mxu3 %v8167_v17  ;;  %4629 = vmatmul.bf16.gmra.mxu0 %v8150_v63 }
 0x85b   : > { %v4876_v59 = vpop.f32.mrf.mxu1 }
 0x85c   : > { %v6062_v34 = vmax.f32 %v6061_v5, %v4876_v59  ;;  %3931 = vmatmul.bf16.gmra.mxu2 %v8022_v0 }
 0x85d   : > { %v4266_v12 = vpop.f32.mrf.mxu3 }
 0x85e   : > { %v5827_v27 = vmax.f32 %v5826_v48, %v4266_v12 }
 0x85f   : > { %v3892_v4 = vpop.f32.mrf.mxu2  ;;  %v4592_v30 = vpop.f32.mrf.mxu0 }
 0x860   : > { %v5682_v11 = vmax.f32 %v5681_v28, %v3892_v4  ;;  %v5953_v50 = vmax.f32 %v5952_v7, %v4592_v30 }
 0x863   : > { %v4879_v26 = vpop.f32.mrf.mxu1 }
 0x864   : > { %v6063_v24 = vmax.f32 %v6062_v34, %v4879_v26 }
 0x865   : > { %v4268_v31 = vpop.f32.mrf.mxu3 }
 0x866   : > { %v5828_v3 = vmax.f32 %v5827_v27, %v4268_v31  ;;  %4918 = vmatmul.bf16.gmra.mxu1 %v8022_v0 }
 0x867   : > { %v3894_v61 = vpop.f32.mrf.mxu2  ;;  %v4595_v62 = vpop.f32.mrf.mxu0 }
 0x868   : > { %v5683_v32 = vmax.f32 %v5682_v11, %v3894_v61  ;;  %v5954_v51 = vmax.f32 %v5953_v50, %v4595_v62 }
 0x86a   : > { %4310 = vmatmul.bf16.gmra.mxu3 %v8179_v16  ;;  %4634 = vmatmul.bf16.gmra.mxu0 %v8167_v17 }
 0x86b   : > { %v4881_v36 = vpop.f32.mrf.mxu1 }
 0x86c   : > { %v6064_v40 = vmax.f32 %v6063_v24, %v4881_v36  ;;  %3936 = vmatmul.bf16.gmra.mxu2 %v8038_v41 }
 0x86d   : > { %v4271_v54 = vpop.f32.mrf.mxu3 }
 0x86e   : > { %v5829_v1 = vmax.f32 %v5828_v3, %v4271_v54 }
 0x86f   : > { %v3897_v53 = vpop.f32.mrf.mxu2  ;;  %v4597_v13 = vpop.f32.mrf.mxu0 }
 0x870   : > { %v5684_v56 = vmax.f32 %v5683_v32, %v3897_v53  ;;  %v5955_v39 = vmax.f32 %v5954_v51, %v4597_v13 }
 0x873   : > { %v4884_v58 = vpop.f32.mrf.mxu1 }
 0x874   : > { %v6065_v0 = vmax.f32 %v6064_v40, %v4884_v58 }
 0x875   : > { %v4273_v55 = vpop.f32.mrf.mxu3 }
 0x876   : > { %v5830_v45 = vmax.f32 %v5829_v1, %v4273_v55  ;;  %4923 = vmatmul.bf16.gmra.mxu1 %v8038_v41 }
 0x877   : > { %v3899_v18 = vpop.f32.mrf.mxu2  ;;  %v4600_v14 = vpop.f32.mrf.mxu0 }
 0x878   : > { %v5685_v19 = vmax.f32 %v5684_v56, %v3899_v18  ;;  %v5956_v35 = vmax.f32 %v5955_v39, %v4600_v14  ;;  %v8930_v39 = vld [vmem:[#allocation42_spill] sm:$0xff] }
 0x87a   : > { %4315 = vmatmul.bf16.gmra.mxu3 %v8191_v29  ;;  %4639 = vmatmul.bf16.gmra.mxu0 %v8179_v16 }
 0x87b   : > { %v4886_v5 = vpop.f32.mrf.mxu1 }
 0x87c   : > { %v6066_v22 = vmax.f32 %v6065_v0, %v4886_v5  ;;  %3941 = vmatmul.bf16.gmra.mxu2 %v8054_v21 }
 0x87d   : > { %v4276_v48 = vpop.f32.mrf.mxu3 }
 0x87e   : > { %v5831_v25 = vmax.f32 %v5830_v45, %v4276_v48 }
 0x87f   : > { %v3902_v15 = vpop.f32.mrf.mxu2  ;;  %v4602_v28 = vpop.f32.mrf.mxu0 }
 0x880   : > { %v5686_v7 = vmax.f32 %v5685_v19, %v3902_v15  ;;  %v5957_v59 = vmax.f32 %v5956_v35, %v4602_v28 }
 0x883   : > { %v4889_v34 = vpop.f32.mrf.mxu1 }
 0x884   : > { %v6067_v41 = vmax.f32 %v6066_v22, %v4889_v34 }
 0x885   : > { %v4278_v12 = vpop.f32.mrf.mxu3 }
 0x886   : > { %v5832_v27 = vmax.f32 %v5831_v25, %v4278_v12  ;;  %4928 = vmatmul.bf16.gmra.mxu1 %v8054_v21 }
 0x887   : > { %v3904_v4 = vpop.f32.mrf.mxu2  ;;  %v4605_v30 = vpop.f32.mrf.mxu0 }
 0x888   : > { %v5687_v11 = vmax.f32 %v5686_v7, %v3904_v4  ;;  %v5958_v50 = vmax.f32 %v5957_v59, %v4605_v30 }
 0x88a   : > { %4320 = vmatmul.bf16.gmra.mxu3 %v8203_v52  ;;  %4644 = vmatmul.bf16.gmra.mxu0 %v8191_v29 }
 0x88b   : > { %v4891_v26 = vpop.f32.mrf.mxu1 }
 0x88c   : > { %v6068_v24 = vmax.f32 %v6067_v41, %v4891_v26  ;;  %3946 = vmatmul.bf16.gmra.mxu2 %v8070_v37 }
 0x88d   : > { %v4281_v31 = vpop.f32.mrf.mxu3 }
 0x88e   : > { %v5833_v3 = vmax.f32 %v5832_v27, %v4281_v31 }
 0x88f   : > { %v3907_v61 = vpop.f32.mrf.mxu2  ;;  %v4607_v62 = vpop.f32.mrf.mxu0 }
 0x890   : > { %v5688_v32 = vmax.f32 %v5687_v11, %v3907_v61  ;;  %v5959_v51 = vmax.f32 %v5958_v50, %v4607_v62 }
 0x893   : > { %v4894_v36 = vpop.f32.mrf.mxu1 }
 0x894   : > { %v6069_v21 = vmax.f32 %v6068_v24, %v4894_v36 }
 0x895   : > { %v4283_v40 = vpop.f32.mrf.mxu3 }
 0x896   : > { %v5834_v54 = vmax.f32 %v5833_v3, %v4283_v40  ;;  %4933 = vmatmul.bf16.gmra.mxu1 %v8070_v37 }
 0x897   : > { %v3909_v1 = vpop.f32.mrf.mxu2  ;;  %v4610_v53 = vpop.f32.mrf.mxu0 }
 0x898   : > { %v5689_v13 = vmax.f32 %v5688_v32, %v3909_v1  ;;  %v5960_v56 = vmax.f32 %v5959_v51, %v4610_v53 }
 0x89a   : > { %4325 = vmatmul.bf16.gmra.mxu3 %v8930_v39  ;;  %4649 = vmatmul.bf16.gmra.mxu0 %v8203_v52 }
 0x89b   : > { %v4896_v58 = vpop.f32.mrf.mxu1 }
 0x89c   : > { %v6070_v0 = vmax.f32 %v6069_v21, %v4896_v58  ;;  %3951 = vmatmul.bf16.gmra.mxu2 %v8086_v9 }
 0x89d   : > { %v4286_v55 = vpop.f32.mrf.mxu3 }
 0x89e   : > { %v5835_v45 = vmax.f32 %v5834_v54, %v4286_v55 }
 0x89f   : > { %v3912_v18 = vpop.f32.mrf.mxu2  ;;  %v4612_v14 = vpop.f32.mrf.mxu0 }
 0x8a0   : > { %v5690_v19 = vmax.f32 %v5689_v13, %v3912_v18  ;;  %v5961_v35 = vmax.f32 %v5960_v56, %v4612_v14 }
 0x8a3   : > { %v4899_v5 = vpop.f32.mrf.mxu1 }
 0x8a4   : > { %v6071_v37 = vmax.f32 %v6070_v0, %v4899_v5 }
 0x8a5   : > { %v4288_v22 = vpop.f32.mrf.mxu3 }
 0x8a6   : > { %v5836_v48 = vmax.f32 %v5835_v45, %v4288_v22  ;;  %4938 = vmatmul.bf16.gmra.mxu1 %v8086_v9 }
 0x8a7   : > { %v3914_v25 = vpop.f32.mrf.mxu2  ;;  %v4615_v15 = vpop.f32.mrf.mxu0 }
 0x8a8   : > { %v5691_v28 = vmax.f32 %v5690_v19, %v3914_v25  ;;  %v5962_v7 = vmax.f32 %v5961_v35, %v4615_v15 }
 0x8aa   : > { %4330 = vmatmul.bf16.gmra.mxu3 %v8227_v20  ;;  %4654 = vmatmul.bf16.gmra.mxu0 %v8930_v39 }
 0x8ab   : > { %v4901_v59 = vpop.f32.mrf.mxu1 }
 0x8ac   : > { %v6072_v34 = vmax.f32 %v6071_v37, %v4901_v59  ;;  %3956 = vmatmul.bf16.gmra.mxu2 %v8929_v2 }
 0x8ad   : > { %v4291_v41 = vpop.f32.mrf.mxu3 }
 0x8ae   : > { %v5837_v12 = vmax.f32 %v5836_v48, %v4291_v41 }
 0x8af   : > { %v3917_v27 = vpop.f32.mrf.mxu2  ;;  %v4617_v4 = vpop.f32.mrf.mxu0 }
 0x8b0   : > { %v5692_v30 = vmax.f32 %v5691_v28, %v3917_v27  ;;  %v5963_v11 = vmax.f32 %v5962_v7, %v4617_v4 }
 0x8b3   : > { %v4904_v50 = vpop.f32.mrf.mxu1 }
 0x8b4   : > { %v6073_v9 = vmax.f32 %v6072_v34, %v4904_v50 }
 0x8b5   : > { %v4293_v26 = vpop.f32.mrf.mxu3 }
 0x8b6   : > { %v5838_v24 = vmax.f32 %v5837_v12, %v4293_v26  ;;  %4943 = vmatmul.bf16.gmra.mxu1 %v8929_v2 }
 0x8b7   : > { %v3919_v31 = vpop.f32.mrf.mxu2  ;;  %v4620_v3 = vpop.f32.mrf.mxu0 }
 0x8b8   : > { %v5693_v61 = vmax.f32 %v5692_v30, %v3919_v31  ;;  %v5964_v62 = vmax.f32 %v5963_v11, %v4620_v3 }
 0x8ba   : > { %4335 = vmatmul.bf16.gmra.mxu3 %v8241_v23  ;;  %4659 = vmatmul.bf16.gmra.mxu0 %v8227_v20 }
 0x8bb   : > { %v4906_v32 = vpop.f32.mrf.mxu1 }
 0x8bc   : > { %v6074_v51 = vmax.f32 %v6073_v9, %v4906_v32  ;;  %3961 = vmatmul.bf16.gmra.mxu2 %v8118_v6 }
 0x8bd   : > { %v4296_v36 = vpop.f32.mrf.mxu3 }
 0x8be   : > { %v5839_v21 = vmax.f32 %v5838_v24, %v4296_v36 }
 0x8bf   : > { %v3922_v40 = vpop.f32.mrf.mxu2  ;;  %v4622_v54 = vpop.f32.mrf.mxu0 }
 0x8c0   : > { %v5694_v1 = vmax.f32 %v5693_v61, %v3922_v40  ;;  %v5965_v53 = vmax.f32 %v5964_v62, %v4622_v54 }
 0x8c3   : > { %v4909_v13 = vpop.f32.mrf.mxu1 }
 0x8c4   : > { %v6075_v2 = vmax.f32 %v6074_v51, %v4909_v13 }
 0x8c5   : > { %v4298_v56 = vpop.f32.mrf.mxu3 }
 0x8c6   : > { %v5840_v58 = vmax.f32 %v5839_v21, %v4298_v56  ;;  %4948 = vmatmul.bf16.gmra.mxu1 %v8118_v6 }
 0x8c7   : > { %v3924_v0 = vpop.f32.mrf.mxu2  ;;  %v4625_v55 = vpop.f32.mrf.mxu0 }
 0x8c8   : > { %v5695_v45 = vmax.f32 %v5694_v1, %v3924_v0  ;;  %v5966_v18 = vmax.f32 %v5965_v53, %v4625_v55 }
 0x8ca   : > { %4340 = vmatmul.bf16.gmra.mxu3 %v8254_v38  ;;  %4664 = vmatmul.bf16.gmra.mxu0 %v8241_v23 }
 0x8cb   : > { %v4911_v14 = vpop.f32.mrf.mxu1 }
 0x8cc   : > { %v6076_v19 = vmax.f32 %v6075_v2, %v4911_v14  ;;  %3966 = vmatmul.bf16.gmra.mxu2 %v8134_v46 }
 0x8cd   : > { %v4301_v35 = vpop.f32.mrf.mxu3 }
 0x8ce   : > { %v5841_v5 = vmax.f32 %v5840_v58, %v4301_v35 }
 0x8cf   : > { %v3927_v37 = vpop.f32.mrf.mxu2  ;;  %v4627_v22 = vpop.f32.mrf.mxu0 }
 0x8d0   : > { %v5696_v48 = vmax.f32 %v5695_v45, %v3927_v37  ;;  %v5967_v25 = vmax.f32 %v5966_v18, %v4627_v22 }
 0x8d3   : > { %v4914_v15 = vpop.f32.mrf.mxu1 }
 0x8d4   : > { %v6077_v6 = vmax.f32 %v6076_v19, %v4914_v15 }
 0x8d5   : > { %v4303_v28 = vpop.f32.mrf.mxu3 }
 0x8d6   : > { %v5842_v7 = vmax.f32 %v5841_v5, %v4303_v28  ;;  %4953 = vmatmul.bf16.gmra.mxu1 %v8134_v46 }
 0x8d7   : > { %v3929_v59 = vpop.f32.mrf.mxu2  ;;  %v4630_v34 = vpop.f32.mrf.mxu0 }
 0x8d8   : > { %v5697_v41 = vmax.f32 %v5696_v48, %v3929_v59  ;;  %v5968_v12 = vmax.f32 %v5967_v25, %v4630_v34 }
 0x8da   : > { %4345 = vmatmul.bf16.gmra.mxu3 %v7691_v57  ;;  %4669 = vmatmul.bf16.gmra.mxu0 %v8254_v38 }
 0x8db   : > { %v4916_v27 = vpop.f32.mrf.mxu1 }
 0x8dc   : > { %v6078_v4 = vmax.f32 %v6077_v6, %v4916_v27  ;;  %3971 = vmatmul.bf16.gmra.mxu2 %v8150_v63 }
 0x8dd   : > { %v4306_v30 = vpop.f32.mrf.mxu3 }
 0x8de   : > { %v5843_v11 = vmax.f32 %v5842_v7, %v4306_v30 }
 0x8df   : > { %v3932_v50 = vpop.f32.mrf.mxu2  ;;  %v4632_v9 = vpop.f32.mrf.mxu0 }
 0x8e0   : > { %v5698_v26 = vmax.f32 %v5697_v41, %v3932_v50  ;;  %v5969_v24 = vmax.f32 %v5968_v12, %v4632_v9 }
 0x8e3   : > { %v4919_v31 = vpop.f32.mrf.mxu1 }
 0x8e4   : > { %v6079_v46 = vmax.f32 %v6078_v4, %v4919_v31 }
 0x8e5   : > { %v4308_v3 = vpop.f32.mrf.mxu3 }
 0x8e6   : > { %v5844_v61 = vmax.f32 %v5843_v11, %v4308_v3  ;;  %4958 = vmatmul.bf16.gmra.mxu1 %v8150_v63 }
 0x8e7   : > { %v3934_v62 = vpop.f32.mrf.mxu2  ;;  %v4635_v32 = vpop.f32.mrf.mxu0 }
 0x8e8   : > { %v5699_v51 = vmax.f32 %v5698_v26, %v3934_v62  ;;  %v5970_v36 = vmax.f32 %v5969_v24, %v4635_v32 }
 0x8ea   : > { %4350 = vmatmul.bf16.gmra.mxu3 %v7715_v42  ;;  %4674 = vmatmul.bf16.gmra.mxu0 %v7691_v57 }
 0x8eb   : > { %v4921_v21 = vpop.f32.mrf.mxu1 }
 0x8ec   : > { %v6080_v40 = vmax.f32 %v6079_v46, %v4921_v21  ;;  %3976 = vmatmul.bf16.gmra.mxu2 %v8167_v17  ;;  %v8931_v21 = vld [vmem:[#allocation12_spill] sm:$0xff] }
 0x8ed   : > { %v4311_v54 = vpop.f32.mrf.mxu3 }
 0x8ee   : > { %v5845_v1 = vmax.f32 %v5844_v61, %v4311_v54 }
 0x8ef   : > { %v3937_v53 = vpop.f32.mrf.mxu2  ;;  %v4637_v13 = vpop.f32.mrf.mxu0 }
 0x8f0   : > { %v5700_v2 = vmax.f32 %v5699_v51, %v3937_v53  ;;  %v5971_v56 = vmax.f32 %v5970_v36, %v4637_v13 }
 0x8f3   : > { %v4924_v58 = vpop.f32.mrf.mxu1 }
 0x8f4   : > { %v6081_v63 = vmax.f32 %v6080_v40, %v4924_v58 }
 0x8f5   : > { %v4313_v0 = vpop.f32.mrf.mxu3 }
 0x8f6   : > { %v5846_v55 = vmax.f32 %v5845_v1, %v4313_v0  ;;  %4963 = vmatmul.bf16.gmra.mxu1 %v8167_v17 }
 0x8f7   : > { %v3939_v45 = vpop.f32.mrf.mxu2  ;;  %v4640_v18 = vpop.f32.mrf.mxu0 }
 0x8f8   : > { %v5701_v14 = vmax.f32 %v5700_v2, %v3939_v45  ;;  %v5972_v19 = vmax.f32 %v5971_v56, %v4640_v18 }
 0x8fa   : > { %4355 = vmatmul.bf16.gmra.mxu3 %v7739_v8  ;;  %4679 = vmatmul.bf16.gmra.mxu0 %v7715_v42 }
 0x8fb   : > { %v4926_v35 = vpop.f32.mrf.mxu1 }
 0x8fc   : > { %v6082_v5 = vmax.f32 %v6081_v63, %v4926_v35  ;;  %3981 = vmatmul.bf16.gmra.mxu2 %v8179_v16 }
 0x8fd   : > { %v4316_v37 = vpop.f32.mrf.mxu3 }
 0x8fe   : > { %v5847_v22 = vmax.f32 %v5846_v55, %v4316_v37 }
 0x8ff   : > { %v3942_v48 = vpop.f32.mrf.mxu2  ;;  %v4642_v25 = vpop.f32.mrf.mxu0 }
 0x900   : > { %v5702_v15 = vmax.f32 %v5701_v14, %v3942_v48  ;;  %v5973_v6 = vmax.f32 %v5972_v19, %v4642_v25 }
 0x903   : > { %v4929_v28 = vpop.f32.mrf.mxu1 }
 0x904   : > { %v6083_v17 = vmax.f32 %v6082_v5, %v4929_v28 }
 0x905   : > { %v4318_v7 = vpop.f32.mrf.mxu3 }
 0x906   : > { %v5848_v59 = vmax.f32 %v5847_v22, %v4318_v7  ;;  %4968 = vmatmul.bf16.gmra.mxu1 %v8179_v16 }
 0x907   : > { %v3944_v34 = vpop.f32.mrf.mxu2  ;;  %v4645_v41 = vpop.f32.mrf.mxu0 }
 0x908   : > { %v5703_v12 = vmax.f32 %v5702_v15, %v3944_v34  ;;  %v5974_v27 = vmax.f32 %v5973_v6, %v4645_v41 }
 0x90a   : > { %4360 = vmatmul.bf16.gmra.mxu3 %v7768_v49  ;;  %4684 = vmatmul.bf16.gmra.mxu0 %v7739_v8 }
 0x90b   : > { %v4931_v4 = vpop.f32.mrf.mxu1 }
 0x90c   : > { %v6084_v30 = vmax.f32 %v6083_v17, %v4931_v4  ;;  %3986 = vmatmul.bf16.gmra.mxu2 %v8191_v29 }
 0x90d   : > { %v4321_v11 = vpop.f32.mrf.mxu3 }
 0x90e   : > { %v5849_v50 = vmax.f32 %v5848_v59, %v4321_v11 }
 0x90f   : > { %v3947_v9 = vpop.f32.mrf.mxu2  ;;  %v4647_v26 = vpop.f32.mrf.mxu0 }
 0x910   : > { %v5704_v24 = vmax.f32 %v5703_v12, %v3947_v9  ;;  %v5975_v31 = vmax.f32 %v5974_v27, %v4647_v26 }
 0x913   : > { %v4934_v46 = vpop.f32.mrf.mxu1 }
 0x914   : > { %v6085_v16 = vmax.f32 %v6084_v30, %v4934_v46 }
 0x915   : > { %v4323_v3 = vpop.f32.mrf.mxu3 }
 0x916   : > { %v5850_v61 = vmax.f32 %v5849_v50, %v4323_v3  ;;  %4973 = vmatmul.bf16.gmra.mxu1 %v8191_v29 }
 0x917   : > { %v3949_v62 = vpop.f32.mrf.mxu2  ;;  %v4650_v32 = vpop.f32.mrf.mxu0 }
 0x918   : > { %v5705_v51 = vmax.f32 %v5704_v24, %v3949_v62  ;;  %v5976_v36 = vmax.f32 %v5975_v31, %v4650_v32 }
 0x91a   : > { %4365 = vmatmul.bf16.gmra.mxu3 %v8931_v21  ;;  %4689 = vmatmul.bf16.gmra.mxu0 %v7768_v49 }
 0x91b   : > { %v4936_v40 = vpop.f32.mrf.mxu1 }
 0x91c   : > { %v6086_v54 = vmax.f32 %v6085_v16, %v4936_v40  ;;  %3991 = vmatmul.bf16.gmra.mxu2 %v8203_v52 }
 0x91d   : > { %v4326_v1 = vpop.f32.mrf.mxu3 }
 0x91e   : > { %v5851_v53 = vmax.f32 %v5850_v61, %v4326_v1 }
 0x91f   : > { %v3952_v13 = vpop.f32.mrf.mxu2  ;;  %v4652_v2 = vpop.f32.mrf.mxu0 }
 0x920   : > { %v5706_v56 = vmax.f32 %v5705_v51, %v3952_v13  ;;  %v5977_v58 = vmax.f32 %v5976_v36, %v4652_v2  ;;  %v8932_v51 = vld [vmem:[#allocation16_spill] sm:$0xff] }
 0x923   : > { %v4939_v63 = vpop.f32.mrf.mxu1 }
 0x924   : > { %v6087_v29 = vmax.f32 %v6086_v54, %v4939_v63 }
 0x925   : > { %v4328_v0 = vpop.f32.mrf.mxu3 }
 0x926   : > { %v5852_v55 = vmax.f32 %v5851_v53, %v4328_v0  ;;  %4978 = vmatmul.bf16.gmra.mxu1 %v8203_v52 }
 0x927   : > { %v3954_v45 = vpop.f32.mrf.mxu2  ;;  %v4655_v18 = vpop.f32.mrf.mxu0 }
 0x928   : > { %v5707_v14 = vmax.f32 %v5706_v56, %v3954_v45  ;;  %v5978_v19 = vmax.f32 %v5977_v58, %v4655_v18 }
 0x92a   : > { %4370 = vmatmul.bf16.gmra.mxu3 %v7816_v44  ;;  %4694 = vmatmul.bf16.gmra.mxu0 %v8931_v21 }
 0x92b   : > { %v4941_v35 = vpop.f32.mrf.mxu1 }
 0x92c   : > { %v6088_v5 = vmax.f32 %v6087_v29, %v4941_v35  ;;  %3996 = vmatmul.bf16.gmra.mxu2 %v8930_v39 }
 0x92d   : > { %v4331_v37 = vpop.f32.mrf.mxu3 }
 0x92e   : > { %v5853_v22 = vmax.f32 %v5852_v55, %v4331_v37 }
 0x92f   : > { %v3957_v48 = vpop.f32.mrf.mxu2  ;;  %v4657_v25 = vpop.f32.mrf.mxu0 }
 0x930   : > { %v5708_v15 = vmax.f32 %v5707_v14, %v3957_v48  ;;  %v5979_v6 = vmax.f32 %v5978_v19, %v4657_v25  ;;  %v8933_v14 = vld [vmem:[#allocation17_spill] sm:$0xff] }
 0x933   : > { %v4944_v28 = vpop.f32.mrf.mxu1 }
 0x934   : > { %v6089_v52 = vmax.f32 %v6088_v5, %v4944_v28 }
 0x935   : > { %v4333_v17 = vpop.f32.mrf.mxu3 }
 0x936   : > { %v5854_v7 = vmax.f32 %v5853_v22, %v4333_v17  ;;  %4983 = vmatmul.bf16.gmra.mxu1 %v8930_v39 }
 0x937   : > { %v3959_v59 = vpop.f32.mrf.mxu2  ;;  %v4660_v34 = vpop.f32.mrf.mxu0 }
 0x938   : > { %v5709_v41 = vmax.f32 %v5708_v15, %v3959_v59  ;;  %v5980_v12 = vmax.f32 %v5979_v6, %v4660_v34 }
 0x93a   : > { %4375 = vmatmul.bf16.gmra.mxu3 %v7840_v33  ;;  %4699 = vmatmul.bf16.gmra.mxu0 %v7816_v44 }
 0x93b   : > { %v4946_v27 = vpop.f32.mrf.mxu1 }
 0x93c   : > { %v6090_v4 = vmax.f32 %v6089_v52, %v4946_v27  ;;  %4001 = vmatmul.bf16.gmra.mxu2 %v8227_v20 }
 0x93d   : > { %v4336_v30 = vpop.f32.mrf.mxu3 }
 0x93e   : > { %v5855_v11 = vmax.f32 %v5854_v7, %v4336_v30 }
 0x93f   : > { %v3962_v50 = vpop.f32.mrf.mxu2  ;;  %v4662_v9 = vpop.f32.mrf.mxu0 }
 0x940   : > { %v5710_v26 = vmax.f32 %v5709_v41, %v3962_v50  ;;  %v5981_v24 = vmax.f32 %v5980_v12, %v4662_v9  ;;  %v8934_v41 = vld [vmem:[#allocation18_spill] sm:$0xff] }
 0x943   : > { %v4949_v31 = vpop.f32.mrf.mxu1 }
 0x944   : > { %v6091_v39 = vmax.f32 %v6090_v4, %v4949_v31 }
 0x945   : > { %v4338_v46 = vpop.f32.mrf.mxu3 }
 0x946   : > { %v5856_v16 = vmax.f32 %v5855_v11, %v4338_v46  ;;  %4988 = vmatmul.bf16.gmra.mxu1 %v8227_v20 }
 0x947   : > { %v3964_v3 = vpop.f32.mrf.mxu2  ;;  %v4665_v61 = vpop.f32.mrf.mxu0 }
 0x948   : > { %v5711_v62 = vmax.f32 %v5710_v26, %v3964_v3  ;;  %v5982_v32 = vmax.f32 %v5981_v24, %v4665_v61 }
 0x94a   : > { %4380 = vmatmul.bf16.gmra.mxu3 %v8932_v51  ;;  %4704 = vmatmul.bf16.gmra.mxu0 %v7840_v33 }
 0x94b   : > { %v4951_v36 = vpop.f32.mrf.mxu1 }
 0x94c   : > { %v6092_v40 = vmax.f32 %v6091_v39, %v4951_v36  ;;  %4006 = vmatmul.bf16.gmra.mxu2 %v8241_v23 }
 0x94d   : > { %v4341_v54 = vpop.f32.mrf.mxu3 }
 0x94e   : > { %v5857_v1 = vmax.f32 %v5856_v16, %v4341_v54 }
 0x94f   : > { %v3967_v53 = vpop.f32.mrf.mxu2  ;;  %v4667_v13 = vpop.f32.mrf.mxu0 }
 0x950   : > { %v5712_v2 = vmax.f32 %v5711_v62, %v3967_v53  ;;  %v5983_v56 = vmax.f32 %v5982_v32, %v4667_v13  ;;  %v8935_v62 = vld [vmem:[#allocation20_spill] sm:$0xff] }
 0x953   : > { %v4954_v58 = vpop.f32.mrf.mxu1 }
 0x954   : > { %v6093_v20 = vmax.f32 %v6092_v40, %v4954_v58 }
 0x955   : > { %v4343_v63 = vpop.f32.mrf.mxu3 }
 0x956   : > { %v5858_v29 = vmax.f32 %v5857_v1, %v4343_v63  ;;  %4993 = vmatmul.bf16.gmra.mxu1 %v8241_v23 }
 0x957   : > { %v3969_v0 = vpop.f32.mrf.mxu2  ;;  %v4670_v55 = vpop.f32.mrf.mxu0 }
 0x958   : > { %v5713_v45 = vmax.f32 %v5712_v2, %v3969_v0  ;;  %v5984_v18 = vmax.f32 %v5983_v56, %v4670_v55 }
 0x95a   : > { %4385 = vmatmul.bf16.gmra.mxu3 %v8933_v14  ;;  %4709 = vmatmul.bf16.gmra.mxu0 %v8932_v51 }
 0x95b   : > { %v4956_v19 = vpop.f32.mrf.mxu1 }
 0x95c   : > { %v6094_v35 = vmax.f32 %v6093_v20, %v4956_v19  ;;  %4011 = vmatmul.bf16.gmra.mxu2 %v8254_v38 }
 0x95d   : > { %v4346_v5 = vpop.f32.mrf.mxu3 }
 0x95e   : > { %v5859_v37 = vmax.f32 %v5858_v29, %v4346_v5 }
 0x95f   : > { %v3972_v22 = vpop.f32.mrf.mxu2  ;;  %v4672_v48 = vpop.f32.mrf.mxu0 }
 0x960   : > { %v5714_v25 = vmax.f32 %v5713_v45, %v3972_v22  ;;  %v5985_v15 = vmax.f32 %v5984_v18, %v4672_v48  ;;  %v8936_v45 = vld [vmem:[#allocation22_spill] sm:$0xff] }
 0x963   : > { %v4959_v6 = vpop.f32.mrf.mxu1 }
 0x964   : > { %v6095_v23 = vmax.f32 %v6094_v35, %v4959_v6 }
 0x965   : > { %v4348_v28 = vpop.f32.mrf.mxu3 }
 0x966   : > { %v5860_v52 = vmax.f32 %v5859_v37, %v4348_v28  ;;  %4998 = vmatmul.bf16.gmra.mxu1 %v8254_v38 }
 0x967   : > { %v3974_v17 = vpop.f32.mrf.mxu2  ;;  %v4675_v7 = vpop.f32.mrf.mxu0 }
 0x968   : > { %v5715_v59 = vmax.f32 %v5714_v25, %v3974_v17  ;;  %v5986_v34 = vmax.f32 %v5985_v15, %v4675_v7 }
 0x96a   : > { %4390 = vmatmul.bf16.gmra.mxu3 %v8934_v41  ;;  %4714 = vmatmul.bf16.gmra.mxu0 %v8933_v14 }
 0x96b   : > { %v4961_v12 = vpop.f32.mrf.mxu1 }
 0x96c   : > { %v6096_v27 = vmax.f32 %v6095_v23, %v4961_v12  ;;  %4016 = vmatmul.bf16.gmra.mxu2 %v7691_v57 }
 0x96d   : > { %v4351_v4 = vpop.f32.mrf.mxu3 }
 0x96e   : > { %v5861_v30 = vmax.f32 %v5860_v52, %v4351_v4 }
 0x96f   : > { %v3977_v11 = vpop.f32.mrf.mxu2  ;;  %v4677_v50 = vpop.f32.mrf.mxu0 }
 0x970   : > { %v5716_v9 = vmax.f32 %v5715_v59, %v3977_v11  ;;  %v5987_v26 = vmax.f32 %v5986_v34, %v4677_v50  ;;  %v8937_v59 = vld [vmem:[#allocation24_spill] sm:$0xff] }
 0x973   : > { %v4964_v24 = vpop.f32.mrf.mxu1 }
 0x974   : > { %v6097_v38 = vmax.f32 %v6096_v27, %v4964_v24 }
 0x975   : > { %v4353_v31 = vpop.f32.mrf.mxu3 }
 0x976   : > { %v5862_v39 = vmax.f32 %v5861_v30, %v4353_v31  ;;  %5003 = vmatmul.bf16.gmra.mxu1 %v7691_v57 }
 0x977   : > { %v3979_v46 = vpop.f32.mrf.mxu2  ;;  %v4680_v16 = vpop.f32.mrf.mxu0 }
 0x978   : > { %v5717_v3 = vmax.f32 %v5716_v9, %v3979_v46  ;;  %v5988_v61 = vmax.f32 %v5987_v26, %v4680_v16 }
 0x97a   : > { %4395 = vmatmul.bf16.gmra.mxu3 %v8935_v62  ;;  %4719 = vmatmul.bf16.gmra.mxu0 %v8934_v41 }
 0x97b   : > { %v4966_v32 = vpop.f32.mrf.mxu1 }
 0x97c   : > { %v6098_v36 = vmax.f32 %v6097_v38, %v4966_v32  ;;  %4021 = vmatmul.bf16.gmra.mxu2 %v7715_v42 }
 0x97d   : > { %v4356_v40 = vpop.f32.mrf.mxu3 }
 0x97e   : > { %v5863_v54 = vmax.f32 %v5862_v39, %v4356_v40 }
 0x97f   : > { %v3982_v1 = vpop.f32.mrf.mxu2  ;;  %v4682_v53 = vpop.f32.mrf.mxu0 }
 0x980   : > { %v5718_v13 = vmax.f32 %v5717_v3, %v3982_v1  ;;  %v5989_v2 = vmax.f32 %v5988_v61, %v4682_v53  ;;  %v8938_v3 = vld [vmem:[#allocation25_spill] sm:$0xff] }
 0x983   : > { %v4969_v56 = vpop.f32.mrf.mxu1 }
 0x984   : > { %v6099_v57 = vmax.f32 %v6098_v36, %v4969_v56 }
 0x985   : > { %v4358_v58 = vpop.f32.mrf.mxu3 }
 0x986   : > { %v5864_v20 = vmax.f32 %v5863_v54, %v4358_v58  ;;  %5008 = vmatmul.bf16.gmra.mxu1 %v7715_v42 }
 0x987   : > { %v3984_v63 = vpop.f32.mrf.mxu2  ;;  %v4685_v29 = vpop.f32.mrf.mxu0 }
 0x988   : > { %v5719_v0 = vmax.f32 %v5718_v13, %v3984_v63  ;;  %v5990_v55 = vmax.f32 %v5989_v2, %v4685_v29 }
 0x98a   : > { %4400 = vmatmul.bf16.gmra.mxu3 %v8936_v45  ;;  %4724 = vmatmul.bf16.gmra.mxu0 %v8935_v62 }
 0x98b   : > { %v4971_v18 = vpop.f32.mrf.mxu1 }
 0x98c   : > { %v6100_v19 = vmax.f32 %v6099_v57, %v4971_v18  ;;  %4026 = vmatmul.bf16.gmra.mxu2 %v7739_v8 }
 0x98d   : > { %v4361_v35 = vpop.f32.mrf.mxu3 }
 0x98e   : > { %v5865_v5 = vmax.f32 %v5864_v20, %v4361_v35 }
 0x98f   : > { %v3987_v37 = vpop.f32.mrf.mxu2  ;;  %v4687_v22 = vpop.f32.mrf.mxu0 }
 0x990   : > { %v5720_v48 = vmax.f32 %v5719_v0, %v3987_v37  ;;  %v5991_v25 = vmax.f32 %v5990_v55, %v4687_v22  ;;  %v8939_v0 = vld [vmem:[#allocation26_spill] sm:$0xff] }
 0x993   : > { %v4974_v15 = vpop.f32.mrf.mxu1 }
 0x994   : > { %v6101_v42 = vmax.f32 %v6100_v19, %v4974_v15 }
 0x995   : > { %v4363_v6 = vpop.f32.mrf.mxu3 }
 0x996   : > { %v5866_v23 = vmax.f32 %v5865_v5, %v4363_v6  ;;  %5013 = vmatmul.bf16.gmra.mxu1 %v7739_v8 }
 0x997   : > { %v3989_v28 = vpop.f32.mrf.mxu2  ;;  %v4690_v52 = vpop.f32.mrf.mxu0 }
 0x998   : > { %v5721_v17 = vmax.f32 %v5720_v48, %v3989_v28  ;;  %v5992_v7 = vmax.f32 %v5991_v25, %v4690_v52 }
 0x99a   : > { %4405 = vmatmul.bf16.gmra.mxu3 %v8937_v59  ;;  %4729 = vmatmul.bf16.gmra.mxu0 %v8936_v45 }
 0x99b   : > { %v4976_v34 = vpop.f32.mrf.mxu1 }
 0x99c   : > { %v6102_v12 = vmax.f32 %v6101_v42, %v4976_v34  ;;  %4031 = vmatmul.bf16.gmra.mxu2 %v7768_v49 }
 0x99d   : > { %v4366_v27 = vpop.f32.mrf.mxu3 }
 0x99e   : > { %v5867_v4 = vmax.f32 %v5866_v23, %v4366_v27 }
 0x99f   : > { %v3992_v30 = vpop.f32.mrf.mxu2  ;;  %v4692_v11 = vpop.f32.mrf.mxu0 }
 0x9a0   : > { %v5722_v50 = vmax.f32 %v5721_v17, %v3992_v30  ;;  %v5993_v9 = vmax.f32 %v5992_v7, %v4692_v11  ;;  %v8940_v17 = vld [vmem:[#allocation27_spill] sm:$0xff] }
 0x9a3   : > { %v4979_v26 = vpop.f32.mrf.mxu1 }
 0x9a4   : > { %v6103_v8 = vmax.f32 %v6102_v12, %v4979_v26 }
 0x9a5   : > { %v4368_v24 = vpop.f32.mrf.mxu3 }
 0x9a6   : > { %v5868_v38 = vmax.f32 %v5867_v4, %v4368_v24  ;;  %5018 = vmatmul.bf16.gmra.mxu1 %v7768_v49 }
 0x9a7   : > { %v3994_v31 = vpop.f32.mrf.mxu2  ;;  %v4695_v39 = vpop.f32.mrf.mxu0 }
 0x9a8   : > { %v5723_v46 = vmax.f32 %v5722_v50, %v3994_v31  ;;  %v5994_v16 = vmax.f32 %v5993_v9, %v4695_v39 }
 0x9aa   : > { %4410 = vmatmul.bf16.gmra.mxu3 %v8938_v3  ;;  %4734 = vmatmul.bf16.gmra.mxu0 %v8937_v59 }
 0x9ab   : > { %v4981_v61 = vpop.f32.mrf.mxu1 }
 0x9ac   : > { %v6104_v32 = vmax.f32 %v6103_v8, %v4981_v61  ;;  %4036 = vmatmul.bf16.gmra.mxu2 %v8931_v21 }
 0x9ad   : > { %v4371_v36 = vpop.f32.mrf.mxu3 }
 0x9ae   : > { %v5869_v40 = vmax.f32 %v5868_v38, %v4371_v36 }
 0x9af   : > { %v3997_v54 = vpop.f32.mrf.mxu2  ;;  %v4697_v1 = vpop.f32.mrf.mxu0 }
 0x9b0   : > { %v5724_v53 = vmax.f32 %v5723_v46, %v3997_v54  ;;  %v5995_v13 = vmax.f32 %v5994_v16, %v4697_v1  ;;  %v8941_v46 = vld [vmem:[#allocation28_spill] sm:$0xff] }
 0x9b3   : > { %v4984_v2 = vpop.f32.mrf.mxu1 }
 0x9b4   : > { %v6105_v49 = vmax.f32 %v6104_v32, %v4984_v2 }
 0x9b5   : > { %v4373_v56 = vpop.f32.mrf.mxu3 }
 0x9b6   : > { %v5870_v57 = vmax.f32 %v5869_v40, %v4373_v56  ;;  %5023 = vmatmul.bf16.gmra.mxu1 %v8931_v21 }
 0x9b7   : > { %v3999_v58 = vpop.f32.mrf.mxu2  ;;  %v4700_v20 = vpop.f32.mrf.mxu0 }
 0x9b8   : > { %v5725_v63 = vmax.f32 %v5724_v53, %v3999_v58  ;;  %v5996_v29 = vmax.f32 %v5995_v13, %v4700_v20 }
 0x9ba   : > { %4415 = vmatmul.bf16.gmra.mxu3 %v8939_v0  ;;  %4739 = vmatmul.bf16.gmra.mxu0 %v8938_v3 }
 0x9bb   : > { %v4986_v55 = vpop.f32.mrf.mxu1 }
 0x9bc   : > { %v6106_v18 = vmax.f32 %v6105_v49, %v4986_v55  ;;  %4041 = vmatmul.bf16.gmra.mxu2 %v7816_v44 }
 0x9bd   : > { %v4376_v19 = vpop.f32.mrf.mxu3 }
 0x9be   : > { %v5871_v35 = vmax.f32 %v5870_v57, %v4376_v19 }
 0x9bf   : > { %v4002_v5 = vpop.f32.mrf.mxu2  ;;  %v4702_v37 = vpop.f32.mrf.mxu0 }
 0x9c0   : > { %v5726_v22 = vmax.f32 %v5725_v63, %v4002_v5  ;;  %v5997_v48 = vmax.f32 %v5996_v29, %v4702_v37  ;;  %v8942_v63 = vld [vmem:[#allocation29_spill] sm:$0xff] }
 0x9c3   : > { %v4989_v25 = vpop.f32.mrf.mxu1 }
 0x9c4   : > { %v6107_v21 = vmax.f32 %v6106_v18, %v4989_v25 }
 0x9c5   : > { %v4378_v15 = vpop.f32.mrf.mxu3 }
 0x9c6   : > { %v5872_v42 = vmax.f32 %v5871_v35, %v4378_v15  ;;  %5028 = vmatmul.bf16.gmra.mxu1 %v7816_v44 }
 0x9c7   : > { %v4004_v6 = vpop.f32.mrf.mxu2  ;;  %v4705_v23 = vpop.f32.mrf.mxu0 }
 0x9c8   : > { %v5727_v28 = vmax.f32 %v5726_v22, %v4004_v6  ;;  %v5998_v52 = vmax.f32 %v5997_v48, %v4705_v23 }
 0x9ca   : > { %4420 = vmatmul.bf16.gmra.mxu3 %v8940_v17  ;;  %4744 = vmatmul.bf16.gmra.mxu0 %v8939_v0 }
 0x9cb   : > { %v4991_v7 = vpop.f32.mrf.mxu1 }
 0x9cc   : > { %v6108_v34 = vmax.f32 %v6107_v21, %v4991_v7  ;;  %4046 = vmatmul.bf16.gmra.mxu2 %v7840_v33 }
 0x9cd   : > { %v4381_v12 = vpop.f32.mrf.mxu3 }
 0x9ce   : > { %v5873_v27 = vmax.f32 %v5872_v42, %v4381_v12 }
 0x9cf   : > { %v4007_v4 = vpop.f32.mrf.mxu2  ;;  %v4707_v30 = vpop.f32.mrf.mxu0 }
 0x9d0   : > { %v5728_v11 = vmax.f32 %v5727_v28, %v4007_v4  ;;  %v5999_v50 = vmax.f32 %v5998_v52, %v4707_v30  ;;  %v8943_v28 = vld [vmem:[#allocation30_spill] sm:$0xff] }
 0x9d3   : > { %v4994_v9 = vpop.f32.mrf.mxu1 }
 0x9d4   : > { %v6109_v44 = vmax.f32 %v6108_v34, %v4994_v9 }
 0x9d5   : > { %v4383_v26 = vpop.f32.mrf.mxu3 }
 0x9d6   : > { %v5874_v8 = vmax.f32 %v5873_v27, %v4383_v26  ;;  %5033 = vmatmul.bf16.gmra.mxu1 %v7840_v33 }
 0x9d7   : > { %v4009_v24 = vpop.f32.mrf.mxu2  ;;  %v4710_v38 = vpop.f32.mrf.mxu0 }
 0x9d8   : > { %v5729_v31 = vmax.f32 %v5728_v11, %v4009_v24  ;;  %v6000_v39 = vmax.f32 %v5999_v50, %v4710_v38 }
 0x9da   : > { %4425 = vmatmul.bf16.gmra.mxu3 %v8941_v46  ;;  %4749 = vmatmul.bf16.gmra.mxu0 %v8940_v17 }
 0x9db   : > { %v4996_v16 = vpop.f32.mrf.mxu1 }
 0x9dc   : > { %v6110_v61 = vmax.f32 %v6109_v44, %v4996_v16  ;;  %4051 = vmatmul.bf16.gmra.mxu2 %v8932_v51 }
 0x9dd   : > { %v4386_v32 = vpop.f32.mrf.mxu3 }
 0x9de   : > { %v5875_v36 = vmax.f32 %v5874_v8, %v4386_v32 }
 0x9df   : > { %v4012_v40 = vpop.f32.mrf.mxu2  ;;  %v4712_v54 = vpop.f32.mrf.mxu0 }
 0x9e0   : > { %v5730_v1 = vmax.f32 %v5729_v31, %v4012_v40  ;;  %v6001_v53 = vmax.f32 %v6000_v39, %v4712_v54 }
 0x9e3   : > { %v4999_v13 = vpop.f32.mrf.mxu1 }
 0x9e4   : > { %v6111_v33 = vmax.f32 %v6110_v61, %v4999_v13 }
 0x9e5   : > { %v4388_v2 = vpop.f32.mrf.mxu3 }
 0x9e6   : > { %v5876_v49 = vmax.f32 %v5875_v36, %v4388_v2  ;;  %5038 = vmatmul.bf16.gmra.mxu1 %v8932_v51 }
 0x9e7   : > { %v4014_v56 = vpop.f32.mrf.mxu2  ;;  %v4715_v57 = vpop.f32.mrf.mxu0 }
 0x9e8   : > { %v5731_v58 = vmax.f32 %v5730_v1, %v4014_v56  ;;  %v6002_v20 = vmax.f32 %v6001_v53, %v4715_v57 }
 0x9ea   : > { %4430 = vmatmul.bf16.gmra.mxu3 %v8942_v63  ;;  %4754 = vmatmul.bf16.gmra.mxu0 %v8941_v46 }
 0x9eb   : > { %v5001_v29 = vpop.f32.mrf.mxu1 }
 0x9ec   : > { %v6112_v55 = vmax.f32 %v6111_v33, %v5001_v29  ;;  %4056 = vmatmul.bf16.gmra.mxu2 %v8933_v14 }
 0x9ed   : > { %v4391_v18 = vpop.f32.mrf.mxu3 }
 0x9ee   : > { %v5877_v19 = vmax.f32 %v5876_v49, %v4391_v18 }
 0x9ef   : > { %v4017_v35 = vpop.f32.mrf.mxu2  ;;  %v4717_v5 = vpop.f32.mrf.mxu0 }
 0x9f0   : > { %v5732_v37 = vmax.f32 %v5731_v58, %v4017_v35  ;;  %v6003_v22 = vmax.f32 %v6002_v20, %v4717_v5 }
 0x9f3   : > { %v5004_v48 = vpop.f32.mrf.mxu1 }
 0x9f4   : > { %v6113_v51 = vmax.f32 %v6112_v55, %v5004_v48 }
 0x9f5   : > { %v4393_v25 = vpop.f32.mrf.mxu3 }
 0x9f6   : > { %v5878_v21 = vmax.f32 %v5877_v19, %v4393_v25  ;;  %5043 = vmatmul.bf16.gmra.mxu1 %v8933_v14 }
 0x9f7   : > { %v4019_v15 = vpop.f32.mrf.mxu2  ;;  %v4720_v42 = vpop.f32.mrf.mxu0 }
 0x9f8   : > { %v5733_v6 = vmax.f32 %v5732_v37, %v4019_v15  ;;  %v6004_v23 = vmax.f32 %v6003_v22, %v4720_v42 }
 0x9fa   : > { %4435 = vmatmul.bf16.gmra.mxu3 %v8943_v28  ;;  %4759 = vmatmul.bf16.gmra.mxu0 %v8942_v63 }
 0x9fb   : > { %v5006_v52 = vpop.f32.mrf.mxu1 }
 0x9fc   : > { %v6114_v7 = vmax.f32 %v6113_v51, %v5006_v52  ;;  %4061 = vmatmul.bf16.gmra.mxu2 %v8934_v41 }
 0x9fd   : > { %v4396_v34 = vpop.f32.mrf.mxu3 }
 0x9fe   : > { %v5879_v12 = vmax.f32 %v5878_v21, %v4396_v34 }
 0x9ff   : > { %v4022_v27 = vpop.f32.mrf.mxu2  ;;  %v4722_v4 = vpop.f32.mrf.mxu0 }
 0xa00   : > { %v5734_v30 = vmax.f32 %v5733_v6, %v4022_v27  ;;  %v6005_v11 = vmax.f32 %v6004_v23, %v4722_v4 }
 0xa03   : > { %v5009_v50 = vpop.f32.mrf.mxu1 }
 0xa04   : > { %v6115_v14 = vmax.f32 %v6114_v7, %v5009_v50 }
 0xa05   : > { %v4398_v9 = vpop.f32.mrf.mxu3 }
 0xa06   : > { %v5880_v44 = vmax.f32 %v5879_v12, %v4398_v9  ;;  %5048 = vmatmul.bf16.gmra.mxu1 %v8934_v41 }
 0xa07   : > { %v4024_v26 = vpop.f32.mrf.mxu2  ;;  %v4725_v8 = vpop.f32.mrf.mxu0 }
 0xa08   : > { %v5735_v24 = vmax.f32 %v5734_v30, %v4024_v26  ;;  %v6006_v38 = vmax.f32 %v6005_v11, %v4725_v8 }
 0xa0a   : > { %4440 = vmatmul.bf16.gmra.mxu3 %v8905_v43  ;;  %4764 = vmatmul.bf16.gmra.mxu0 %v8943_v28 }
 0xa0b   : > { %v5011_v31 = vpop.f32.mrf.mxu1 }
 0xa0c   : > { %v6116_v39 = vmax.f32 %v6115_v14, %v5011_v31  ;;  %4066 = vmatmul.bf16.gmra.mxu2 %v8935_v62 }
 0xa0d   : > { %v4401_v16 = vpop.f32.mrf.mxu3 }
 0xa0e   : > { %v5881_v61 = vmax.f32 %v5880_v44, %v4401_v16  ;;  %v8944_v44 = vld [vmem:[#allocation36_spill] sm:$0xff] }
 0xa0f   : > { %v4027_v32 = vpop.f32.mrf.mxu2  ;;  %v4727_v36 = vpop.f32.mrf.mxu0 }
 0xa10   : > { %v5736_v40 = vmax.f32 %v5735_v24, %v4027_v32  ;;  %v6007_v54 = vmax.f32 %v6006_v38, %v4727_v36 }
 0xa13   : > { %v5014_v1 = vpop.f32.mrf.mxu1 }
 0xa14   : > { %v6117_v41 = vmax.f32 %v6116_v39, %v5014_v1 }
 0xa15   : > { %v4403_v53 = vpop.f32.mrf.mxu3 }
 0xa16   : > { %v5882_v13 = vmax.f32 %v5881_v61, %v4403_v53  ;;  %5053 = vmatmul.bf16.gmra.mxu1 %v8935_v62 }
 0xa17   : > { %v4029_v33 = vpop.f32.mrf.mxu2  ;;  %v4730_v2 = vpop.f32.mrf.mxu0 }
 0xa18   : > { %v5737_v49 = vmax.f32 %v5736_v40, %v4029_v33  ;;  %v6008_v56 = vmax.f32 %v6007_v54, %v4730_v2 }
 0xa1a   : > { %4445 = vmatmul.bf16.gmra.mxu3 %v8906_v10  ;;  %4769 = vmatmul.bf16.gmra.mxu0 %v8905_v43 }
 0xa1b   : > { %v5016_v57 = vpop.f32.mrf.mxu1 }
 0xa1c   : > { %v6118_v58 = vmax.f32 %v6117_v41, %v5016_v57  ;;  %4071 = vmatmul.bf16.gmra.mxu2 %v8936_v45 }
 0xa1d   : > { %v4406_v20 = vpop.f32.mrf.mxu3 }
 0xa1e   : > { %v5883_v29 = vmax.f32 %v5882_v13, %v4406_v20  ;;  %v8945_v13 = vld [vmem:[#allocation37_spill] sm:$0xff] }
 0xa1f   : > { %v4032_v55 = vpop.f32.mrf.mxu2  ;;  %v4732_v18 = vpop.f32.mrf.mxu0 }
 0xa20   : > { %v5738_v19 = vmax.f32 %v5737_v49, %v4032_v55  ;;  %v6009_v35 = vmax.f32 %v6008_v56, %v4732_v18 }
 0xa23   : > { %v5019_v5 = vpop.f32.mrf.mxu1 }
 0xa24   : > { %v6119_v62 = vmax.f32 %v6118_v58, %v5019_v5 }
 0xa25   : > { %v4408_v37 = vpop.f32.mrf.mxu3 }
 0xa26   : > { %v5884_v22 = vmax.f32 %v5883_v29, %v4408_v37  ;;  %5058 = vmatmul.bf16.gmra.mxu1 %v8936_v45 }
 0xa27   : > { %v4034_v48 = vpop.f32.mrf.mxu2  ;;  %v4735_v51 = vpop.f32.mrf.mxu0 }
 0xa28   : > { %v5739_v25 = vmax.f32 %v5738_v19, %v4034_v48  ;;  %v6010_v21 = vmax.f32 %v6009_v35, %v4735_v51 }
 0xa2a   : > { %4450 = vmatmul.bf16.gmra.mxu3 %v8907_v60  ;;  %4774 = vmatmul.bf16.gmra.mxu0 %v8906_v10 }
 0xa2b   : > { %v5021_v15 = vpop.f32.mrf.mxu1 }
 0xa2c   : > { %v6120_v42 = vmax.f32 %v6119_v62, %v5021_v15  ;;  %4076 = vmatmul.bf16.gmra.mxu2 %v8937_v59 }
 0xa2d   : > { %v4411_v6 = vpop.f32.mrf.mxu3 }
 0xa2e   : > { %v5885_v23 = vmax.f32 %v5884_v22, %v4411_v6  ;;  %v8946_v22 = vld [vmem:[#allocation38_spill] sm:$0xff] }
 0xa2f   : > { %v4037_v52 = vpop.f32.mrf.mxu2  ;;  %v4737_v7 = vpop.f32.mrf.mxu0 }
 0xa30   : > { %v5740_v34 = vmax.f32 %v5739_v25, %v4037_v52  ;;  %v6011_v12 = vmax.f32 %v6010_v21, %v4737_v7 }
 0xa33   : > { %v5024_v27 = vpop.f32.mrf.mxu1 }
 0xa34   : > { %v6121_v45 = vmax.f32 %v6120_v42, %v5024_v27 }
 0xa35   : > { %v4413_v4 = vpop.f32.mrf.mxu3 }
 0xa36   : > { %v5886_v30 = vmax.f32 %v5885_v23, %v4413_v4  ;;  %5063 = vmatmul.bf16.gmra.mxu1 %v8937_v59 }
 0xa37   : > { %v4039_v11 = vpop.f32.mrf.mxu2  ;;  %v4740_v50 = vpop.f32.mrf.mxu0 }
 0xa38   : > { %v5741_v14 = vmax.f32 %v5740_v34, %v4039_v11  ;;  %v6012_v9 = vmax.f32 %v6011_v12, %v4740_v50 }
 0xa3a   : > { %4455 = vmatmul.bf16.gmra.mxu3 %v8944_v44  ;;  %4779 = vmatmul.bf16.gmra.mxu0 %v8907_v60 }
 0xa3b   : > { %v5026_v26 = vpop.f32.mrf.mxu1 }
 0xa3c   : > { %v6122_v8 = vmax.f32 %v6121_v45, %v5026_v26  ;;  %4081 = vmatmul.bf16.gmra.mxu2 %v8938_v3 }
 0xa3d   : > { %v4416_v24 = vpop.f32.mrf.mxu3 }
 0xa3e   : > { %v5887_v38 = vmax.f32 %v5886_v30, %v4416_v24  ;;  %v8947_v30 = vld [vmem:[#allocation39_spill] sm:$0xff] }
 0xa3f   : > { %v4042_v31 = vpop.f32.mrf.mxu2  ;;  %v4742_v39 = vpop.f32.mrf.mxu0 }
 0xa40   : > { %v5742_v16 = vmax.f32 %v5741_v14, %v4042_v31  ;;  %v6013_v61 = vmax.f32 %v6012_v9, %v4742_v39 }
 0xa43   : > { %v5029_v32 = vpop.f32.mrf.mxu1 }
 0xa44   : > { %v6123_v59 = vmax.f32 %v6122_v8, %v5029_v32 }
 0xa45   : > { %v4418_v36 = vpop.f32.mrf.mxu3 }
 0xa46   : > { %v5888_v40 = vmax.f32 %v5887_v38, %v4418_v36  ;;  %5068 = vmatmul.bf16.gmra.mxu1 %v8938_v3 }
 0xa47   : > { %v4044_v54 = vpop.f32.mrf.mxu2  ;;  %v4745_v1 = vpop.f32.mrf.mxu0 }
 0xa48   : > { %v5743_v41 = vmax.f32 %v5742_v16, %v4044_v54  ;;  %v6014_v53 = vmax.f32 %v6013_v61, %v4745_v1 }
 0xa4a   : > { %4460 = vmatmul.bf16.gmra.mxu3 %v8945_v13  ;;  %4784 = vmatmul.bf16.gmra.mxu0 %v8944_v44 }
 0xa4b   : > { %v5031_v33 = vpop.f32.mrf.mxu1 }
 0xa4c   : > { %v6124_v2 = vmax.f32 %v6123_v59, %v5031_v33  ;;  %4086 = vmatmul.bf16.gmra.mxu2 %v8939_v0 }
 0xa4d   : > { %v4421_v49 = vpop.f32.mrf.mxu3 }
 0xa4e   : > { %v5889_v56 = vmax.f32 %v5888_v40, %v4421_v49  ;;  %v8948_v40 = vld [vmem:[#allocation40_spill] sm:$0xff] }
 0xa4f   : > { %v4047_v57 = vpop.f32.mrf.mxu2  ;;  %v4747_v58 = vpop.f32.mrf.mxu0 }
 0xa50   : > { %v5744_v20 = vmax.f32 %v5743_v41, %v4047_v57  ;;  %v6015_v29 = vmax.f32 %v6014_v53, %v4747_v58 }
 0xa53   : > { %v5034_v55 = vpop.f32.mrf.mxu1 }
 0xa54   : > { %v6125_v3 = vmax.f32 %v6124_v2, %v5034_v55 }
 0xa55   : > { %v4423_v18 = vpop.f32.mrf.mxu3 }
 0xa56   : > { %v5890_v19 = vmax.f32 %v5889_v56, %v4423_v18  ;;  %5073 = vmatmul.bf16.gmra.mxu1 %v8939_v0 }
 0xa57   : > { %v4049_v35 = vpop.f32.mrf.mxu2  ;;  %v4750_v5 = vpop.f32.mrf.mxu0 }
 0xa58   : > { %v5745_v62 = vmax.f32 %v5744_v20, %v4049_v35  ;;  %v6016_v37 = vmax.f32 %v6015_v29, %v4750_v5 }
 0xa5a   : > { %4465 = vmatmul.bf16.gmra.mxu3 %v8946_v22  ;;  %4789 = vmatmul.bf16.gmra.mxu0 %v8945_v13 }
 0xa5b   : > { %v5036_v48 = vpop.f32.mrf.mxu1 }
 0xa5c   : > { %v6126_v51 = vmax.f32 %v6125_v3, %v5036_v48  ;;  %4091 = vmatmul.bf16.gmra.mxu2 %v8940_v17 }
 0xa5d   : > { %v4426_v25 = vpop.f32.mrf.mxu3 }
 0xa5e   : > { %v5891_v21 = vmax.f32 %v5890_v19, %v4426_v25  ;;  %v8949_v19 = vld [vmem:[#allocation41_spill] sm:$0xff] }
 0xa5f   : > { %v4052_v15 = vpop.f32.mrf.mxu2  ;;  %v4752_v42 = vpop.f32.mrf.mxu0 }
 0xa60   : > { %v5746_v6 = vmax.f32 %v5745_v62, %v4052_v15  ;;  %v6017_v23 = vmax.f32 %v6016_v37, %v4752_v42 }
 0xa63   : > { %v5039_v52 = vpop.f32.mrf.mxu1 }
 0xa64   : > { %v6127_v0 = vmax.f32 %v6126_v51, %v5039_v52 }
 0xa65   : > { %v4428_v7 = vpop.f32.mrf.mxu3 }
 0xa66   : > { %v5892_v34 = vmax.f32 %v5891_v21, %v4428_v7  ;;  %5078 = vmatmul.bf16.gmra.mxu1 %v8940_v17 }
 0xa67   : > { %v4054_v12 = vpop.f32.mrf.mxu2  ;;  %v4755_v27 = vpop.f32.mrf.mxu0 }
 0xa68   : > { %v5747_v45 = vmax.f32 %v5746_v6, %v4054_v12  ;;  %v6018_v4 = vmax.f32 %v6017_v23, %v4755_v27 }
 0xa6a   : > { %4470 = vmatmul.bf16.gmra.mxu3 %v8947_v30  ;;  %4794 = vmatmul.bf16.gmra.mxu0 %v8946_v22 }
 0xa6b   : > { %v5041_v11 = vpop.f32.mrf.mxu1 }
 0xa6c   : > { %v6128_v50 = vmax.f32 %v6127_v0, %v5041_v11  ;;  %4096 = vmatmul.bf16.gmra.mxu2 %v8941_v46 }
 0xa6d   : > { %v4431_v14 = vpop.f32.mrf.mxu3 }
 0xa6e   : > { %v5893_v9 = vmax.f32 %v5892_v34, %v4431_v14  ;;  %v8950_v34 = vld [vmem:[#allocation43_spill] sm:$0xff] }
 0xa6f   : > { %v4057_v26 = vpop.f32.mrf.mxu2  ;;  %v4757_v8 = vpop.f32.mrf.mxu0 }
 0xa70   : > { %v5748_v24 = vmax.f32 %v5747_v45, %v4057_v26  ;;  %v6019_v38 = vmax.f32 %v6018_v4, %v4757_v8 }
 0xa73   : > { %v5044_v31 = vpop.f32.mrf.mxu1 }
 0xa74   : > { %v6129_v17 = vmax.f32 %v6128_v50, %v5044_v31 }
 0xa75   : > { %v4433_v39 = vpop.f32.mrf.mxu3 }
 0xa76   : > { %v5894_v16 = vmax.f32 %v5893_v9, %v4433_v39  ;;  %5083 = vmatmul.bf16.gmra.mxu1 %v8941_v46 }
 0xa77   : > { %v4059_v61 = vpop.f32.mrf.mxu2  ;;  %v4760_v32 = vpop.f32.mrf.mxu0 }
 0xa78   : > { %v5749_v59 = vmax.f32 %v5748_v24, %v4059_v61  ;;  %v6020_v36 = vmax.f32 %v6019_v38, %v4760_v32 }
 0xa7a   : > { %4475 = vmatmul.bf16.gmra.mxu3 %v8948_v40  ;;  %4799 = vmatmul.bf16.gmra.mxu0 %v8947_v30 }
 0xa7b   : > { %v5046_v54 = vpop.f32.mrf.mxu1 }
 0xa7c   : > { %v6130_v1 = vmax.f32 %v6129_v17, %v5046_v54  ;;  %4101 = vmatmul.bf16.gmra.mxu2 %v8942_v63 }
 0xa7d   : > { %v4436_v41 = vpop.f32.mrf.mxu3 }
 0xa7e   : > { %v5895_v53 = vmax.f32 %v5894_v16, %v4436_v41  ;;  %v8951_v16 = vld [vmem:[#allocation44_spill] sm:$0xff] }
 0xa7f   : > { %v4062_v33 = vpop.f32.mrf.mxu2  ;;  %v4762_v2 = vpop.f32.mrf.mxu0 }
 0xa80   : > { %v5750_v49 = vmax.f32 %v5749_v59, %v4062_v33  ;;  %v6021_v56 = vmax.f32 %v6020_v36, %v4762_v2 }
 0xa83   : > { %v5049_v57 = vpop.f32.mrf.mxu1 }
 0xa84   : > { %v6131_v46 = vmax.f32 %v6130_v1, %v5049_v57 }
 0xa85   : > { %v4438_v58 = vpop.f32.mrf.mxu3 }
 0xa86   : > { %v5896_v20 = vmax.f32 %v5895_v53, %v4438_v58  ;;  %5088 = vmatmul.bf16.gmra.mxu1 %v8942_v63 }
 0xa87   : > { %v4064_v29 = vpop.f32.mrf.mxu2  ;;  %v4765_v55 = vpop.f32.mrf.mxu0 }
 0xa88   : > { %v5751_v3 = vmax.f32 %v5750_v49, %v4064_v29  ;;  %v6022_v18 = vmax.f32 %v6021_v56, %v4765_v55 }
 0xa8a   : > { %4480 = vmatmul.bf16.gmra.mxu3 %v8949_v19  ;;  %4804 = vmatmul.bf16.gmra.mxu0 %v8948_v40 }
 0xa8b   : > { %v5051_v35 = vpop.f32.mrf.mxu1 }
 0xa8c   : > { %v6132_v5 = vmax.f32 %v6131_v46, %v5051_v35  ;;  %4106 = vmatmul.bf16.gmra.mxu2 %v8943_v28 }
 0xa8d   : > { %v4441_v62 = vpop.f32.mrf.mxu3 }
 0xa8e   : > { %v5897_v37 = vmax.f32 %v5896_v20, %v4441_v62  ;;  %v8952_v20 = vld [vmem:[#allocation45_spill] sm:$0xff] }
 0xa8f   : > { %v4067_v48 = vpop.f32.mrf.mxu2  ;;  %v4767_v51 = vpop.f32.mrf.mxu0 }
 0xa90   : > { %v5752_v25 = vmax.f32 %v5751_v3, %v4067_v48  ;;  %v6023_v21 = vmax.f32 %v6022_v18, %v4767_v51 }
 0xa93   : > { %v5054_v15 = vpop.f32.mrf.mxu1 }
 0xa94   : > { %v6133_v63 = vmax.f32 %v6132_v5, %v5054_v15 }
 0xa95   : > { %v4443_v42 = vpop.f32.mrf.mxu3 }
 0xa96   : > { %v5898_v6 = vmax.f32 %v5897_v37, %v4443_v42  ;;  %5093 = vmatmul.bf16.gmra.mxu1 %v8943_v28 }
 0xa97   : > { %v4069_v23 = vpop.f32.mrf.mxu2  ;;  %v4770_v52 = vpop.f32.mrf.mxu0 }
 0xa98   : > { %v5753_v0 = vmax.f32 %v5752_v25, %v4069_v23  ;;  %v6024_v7 = vmax.f32 %v6023_v21, %v4770_v52 }
 0xa9a   : > { %4485 = vmatmul.bf16.gmra.mxu3 %v8950_v34  ;;  %4809 = vmatmul.bf16.gmra.mxu0 %v8949_v19 }
 0xa9b   : > { %v5056_v12 = vpop.f32.mrf.mxu1 }
 0xa9c   : > { %v6134_v27 = vmax.f32 %v6133_v63, %v5056_v12  ;;  %4111 = vmatmul.bf16.gmra.mxu2 %v8905_v43 }
 0xa9d   : > { %v4446_v45 = vpop.f32.mrf.mxu3 }
 0xa9e   : > { %v5899_v4 = vmax.f32 %v5898_v6, %v4446_v45 }
 0xa9f   : > { %v4072_v11 = vpop.f32.mrf.mxu2  ;;  %v4772_v50 = vpop.f32.mrf.mxu0 }
 0xaa0   : > { %v5754_v14 = vmax.f32 %v5753_v0, %v4072_v11  ;;  %v6025_v9 = vmax.f32 %v6024_v7, %v4772_v50 }
 0xaa3   : > { %v5059_v26 = vpop.f32.mrf.mxu1 }
 0xaa4   : > { %v6135_v28 = vmax.f32 %v6134_v27, %v5059_v26 }
 0xaa5   : > { %v4448_v8 = vpop.f32.mrf.mxu3 }
 0xaa6   : > { %v5900_v24 = vmax.f32 %v5899_v4, %v4448_v8  ;;  %5098 = vmatmul.bf16.gmra.mxu1 %v8905_v43 }
 0xaa7   : > { %v4074_v38 = vpop.f32.mrf.mxu2  ;;  %v4775_v31 = vpop.f32.mrf.mxu0 }
 0xaa8   : > { %v5755_v17 = vmax.f32 %v5754_v14, %v4074_v38  ;;  %v6026_v39 = vmax.f32 %v6025_v9, %v4775_v31 }
 0xaaa   : > { %4490 = vmatmul.bf16.gmra.mxu3 %v8951_v16  ;;  %4814 = vmatmul.bf16.gmra.mxu0 %v8950_v34 }
 0xaab   : > { %v5061_v61 = vpop.f32.mrf.mxu1 }
 0xaac   : > { %v6136_v32 = vmax.f32 %v6135_v28, %v5061_v61  ;;  %4116 = vmatmul.bf16.gmra.mxu2 %v8906_v10 }
 0xaad   : > { %v4451_v59 = vpop.f32.mrf.mxu3 }
 0xaae   : > { %v5901_v36 = vmax.f32 %v5900_v24, %v4451_v59 }
 0xaaf   : > { %v4077_v54 = vpop.f32.mrf.mxu2  ;;  %v4777_v1 = vpop.f32.mrf.mxu0 }
 0xab0   : > { %v5756_v41 = vmax.f32 %v5755_v17, %v4077_v54  ;;  %v6027_v53 = vmax.f32 %v6026_v39, %v4777_v1 }
 0xab3   : > { %v5064_v33 = vpop.f32.mrf.mxu1 }
 0xab4   : > { %v6137_v43 = vmax.f32 %v6136_v32, %v5064_v33 }
 0xab5   : > { %v4453_v2 = vpop.f32.mrf.mxu3 }
 0xab6   : > { %v5902_v49 = vmax.f32 %v5901_v36, %v4453_v2  ;;  %5103 = vmatmul.bf16.gmra.mxu1 %v8906_v10 }
 0xab7   : > { %v4079_v56 = vpop.f32.mrf.mxu2  ;;  %v4780_v57 = vpop.f32.mrf.mxu0 }
 0xab8   : > { %v5757_v46 = vmax.f32 %v5756_v41, %v4079_v56  ;;  %v6028_v58 = vmax.f32 %v6027_v53, %v4780_v57 }
 0xaba   : > { %4495 = vmatmul.bf16.gmra.mxu3 %v8952_v20  ;;  %4819 = vmatmul.bf16.gmra.mxu0 %v8951_v16 }
 0xabb   : > { %v5066_v29 = vpop.f32.mrf.mxu1 }
 0xabc   : > { %v6138_v55 = vmax.f32 %v6137_v43, %v5066_v29  ;;  %4121 = vmatmul.bf16.gmra.mxu2 %v8907_v60 }
 0xabd   : > { %v4456_v3 = vpop.f32.mrf.mxu3 }
 0xabe   : > { %v5903_v18 = vmax.f32 %v5902_v49, %v4456_v3 }
 0xabf   : > { %v4082_v35 = vpop.f32.mrf.mxu2  ;;  %v4782_v5 = vpop.f32.mrf.mxu0 }
 0xac0   : > { %v5758_v62 = vmax.f32 %v5757_v46, %v4082_v35  ;;  %v6029_v37 = vmax.f32 %v6028_v58, %v4782_v5 }
 0xac3   : > { %v5069_v48 = vpop.f32.mrf.mxu1 }
 0xac4   : > { %v6139_v10 = vmax.f32 %v6138_v55, %v5069_v48 }
 0xac5   : > { %v4458_v51 = vpop.f32.mrf.mxu3 }
 0xac6   : > { %v5904_v25 = vmax.f32 %v5903_v18, %v4458_v51  ;;  %5108 = vmatmul.bf16.gmra.mxu1 %v8907_v60 }
 0xac7   : > { %v4084_v21 = vpop.f32.mrf.mxu2  ;;  %v4785_v15 = vpop.f32.mrf.mxu0 }
 0xac8   : > { %v5759_v63 = vmax.f32 %v5758_v62, %v4084_v21  ;;  %v6030_v42 = vmax.f32 %v6029_v37, %v4785_v15 }
 0xaca   : > { %4824 = vmatmul.bf16.gmra.mxu0 %v8952_v20  ;;  %5153 = vmatmul.bf16.vlgmr.msrb.gmra.mxu3 %v8952_v20 }
 0xacb   : > { %v5071_v6 = vpop.f32.mrf.mxu1 }
 0xacc   : > { %v6140_v23 = vmax.f32 %v6139_v10, %v5071_v6  ;;  %4126 = vmatmul.bf16.gmra.mxu2 %v8944_v44 }
 0xacd   : > { %v4461_v52 = vpop.f32.mrf.mxu3 }
 0xace   : > { %v5905_v0 = vmax.f32 %v5904_v25, %v4461_v52 }
 0xacf   : > { %v4087_v7 = vpop.f32.mrf.mxu2  ;;  %v4787_v12 = vpop.f32.mrf.mxu0 }
 0xad0   : > { %v5760_v27 = vmax.f32 %v5759_v63, %v4087_v7  ;;  %v6031_v45 = vmax.f32 %v6030_v42, %v4787_v12 }
 0xad3   : > { %v5074_v4 = vpop.f32.mrf.mxu1 }
 0xad4   : > { %v6141_v60 = vmax.f32 %v6140_v23, %v5074_v4 }
 0xad5   : > { %v4463_v11 = vpop.f32.mrf.mxu3 }
 0xad6   : > { %v5906_v50 = vmax.f32 %v5905_v0, %v4463_v11  ;;  %5113 = vmatmul.bf16.gmra.mxu1 %v8944_v44 }
 0xad7   : > { %v4089_v14 = vpop.f32.mrf.mxu2  ;;  %v4790_v9 = vpop.f32.mrf.mxu0 }
 0xad8   : > { %v5761_v26 = vmax.f32 %v5760_v27, %v4089_v14  ;;  %v6032_v28 = vmax.f32 %v6031_v45, %v4790_v9 }
 0xadb   : > { %v5076_v8 = vpop.f32.mrf.mxu1 }
 0xadc   : > { %v6142_v24 = vmax.f32 %v6141_v60, %v5076_v8  ;;  %4131 = vmatmul.bf16.gmra.mxu2 %v8945_v13 }
 0xadd   : > { %v4466_v38 = vpop.f32.mrf.mxu3 }
 0xade   : > { %v5907_v31 = vmax.f32 %v5906_v50, %v4466_v38 }
 0xadf   : > { %v4092_v17 = vpop.f32.mrf.mxu2  ;;  %v4792_v39 = vpop.f32.mrf.mxu0 }
 0xae0   : > { %v5762_v61 = vmax.f32 %v5761_v26, %v4092_v17  ;;  %v6033_v32 = vmax.f32 %v6032_v28, %v4792_v39 }
 0xae3   : > { %v5079_v59 = vpop.f32.mrf.mxu1 }
 0xae4   : > { %v6143_v36 = vmax.f32 %v6142_v24, %v5079_v59 }
 0xae5   : > { %v4468_v54 = vpop.f32.mrf.mxu3 }
 0xae6   : > { %v5908_v1 = vmax.f32 %v5907_v31, %v4468_v54  ;;  %5118 = vmatmul.bf16.gmra.mxu1 %v8945_v13 }
 0xae7   : > { %v4094_v44 = vpop.f32.mrf.mxu2  ;;  %v4795_v41 = vpop.f32.mrf.mxu0 }
 0xae8   : > { %v5763_v53 = vmax.f32 %v5762_v61, %v4094_v44  ;;  %v6034_v33 = vmax.f32 %v6033_v32, %v4795_v41 }
 0xaeb   : > { %v5081_v43 = vpop.f32.mrf.mxu1 }
 0xaec   : > { %v6144_v2 = vmax.f32 %v6143_v36, %v5081_v43  ;;  %4136 = vmatmul.bf16.gmra.mxu2 %v8946_v22 }
 0xaed   : > { %v4471_v49 = vpop.f32.mrf.mxu3 }
 0xaee   : > { %v5909_v56 = vmax.f32 %v5908_v1, %v4471_v49 }
 0xaef   : > { %v4097_v57 = vpop.f32.mrf.mxu2  ;;  %v4797_v46 = vpop.f32.mrf.mxu0 }
 0xaf0   : > { %v5764_v58 = vmax.f32 %v5763_v53, %v4097_v57  ;;  %v6035_v29 = vmax.f32 %v6034_v33, %v4797_v46 }
 0xaf3   : > { %v5084_v55 = vpop.f32.mrf.mxu1 }
 0xaf4   : > { %v6145_v3 = vmax.f32 %v6144_v2, %v5084_v55 }
 0xaf5   : > { %v4473_v18 = vpop.f32.mrf.mxu3 }
 0xaf6   : > { %v5910_v35 = vmax.f32 %v5909_v56, %v4473_v18  ;;  %5123 = vmatmul.bf16.gmra.mxu1 %v8946_v22 }
 0xaf7   : > { %v4099_v13 = vpop.f32.mrf.mxu2  ;;  %v4800_v5 = vpop.f32.mrf.mxu0 }
 0xaf8   : > { %v5765_v62 = vmax.f32 %v5764_v58, %v4099_v13  ;;  %v8740_v37 = vmax.f32 %v6035_v29, %v4800_v5 }
 0xafb   : > { %v5086_v48 = vpop.f32.mrf.mxu1 }
 0xafc   : > { %v6146_v10 = vmax.f32 %v6145_v3, %v5086_v48  ;;  %4141 = vmatmul.bf16.gmra.mxu2 %v8947_v30 }
 0xafd   : > { %v4476_v51 = vpop.f32.mrf.mxu3 }
 0xafe   : > { %v8743_v25 = vmax.f32 %v5910_v35, %v4476_v51 }
 0xaff   : > { %v4102_v21 = vpop.f32.mrf.mxu2  ;;  %v4802_v46 = vpop.f32.mrf.mxu0 }
 0xb00   : > { %v5766_v15 = vmax.f32 %v5765_v62, %v4102_v21 }
 0xb03   : > { %v5089_v63 = vpop.f32.mrf.mxu1 }
 0xb04   : > { %v6147_v42 = vmax.f32 %v6146_v10, %v5089_v63 }
 0xb05   : > { %v8745_v6 = vpop.f32.mrf.mxu3 }
 0xb06   : > { %v5912_v22 = vmax.f32 %v8743_v25, %v8745_v6  ;;  %5128 = vmatmul.bf16.gmra.mxu1 %v8947_v30 }
 0xb07   : > { %v4104_v23 = vpop.f32.mrf.mxu2  ;;  %v4805_v13 = vpop.f32.mrf.mxu0 }
 0xb08   : > { %v5767_v52 = vmax.f32 %v5766_v15, %v4104_v23 }
 0xb0b   : > { %v5091_v0 = vpop.f32.mrf.mxu1 }
 0xb0c   : > { %v6148_v7 = vmax.f32 %v6147_v42, %v5091_v0  ;;  %4146 = vmatmul.bf16.gmra.mxu2 %v8948_v40 }
 0xb0d   : > { %v4481_v42 = vpop.f32.mrf.mxu3 }
 0xb0f   : > { %v4107_v12 = vpop.f32.mrf.mxu2  ;;  %v4807_v10 = vpop.f32.mrf.mxu0 }
 0xb10   : > { %v5768_v27 = vmax.f32 %v5767_v52, %v4107_v12 }
 0xb13   : > { %v5094_v45 = vpop.f32.mrf.mxu1 }
 0xb14   : > { %v6149_v4 = vmax.f32 %v6148_v7, %v5094_v45 }
 0xb16   : > { %5133 = vmatmul.bf16.gmra.mxu1 %v8948_v40 }
 0xb17   : > { %v4109_v60 = vpop.f32.mrf.mxu2  ;;  %v4810_v52 = vpop.f32.mrf.mxu0 }
 0xb18   : > { %v5769_v11 = vmax.f32 %v5768_v27, %v4109_v60  ;;  %v4483_v27 = vpop.f32.mrf.mxu3 }
 0xb1b   : > { %v5096_v50 = vpop.f32.mrf.mxu1 }
 0xb1c   : > { %v6150_v14 = vmax.f32 %v6149_v4, %v5096_v50  ;;  %4151 = vmatmul.bf16.gmra.mxu2 %v8949_v19 }
 0xb1f   : > { %v4112_v9 = vpop.f32.mrf.mxu2  ;;  %v4812_v45 = vpop.f32.mrf.mxu0 }
 0xb20   : > { %v5770_v30 = vmax.f32 %v5769_v11, %v4112_v9 }
 0xb23   : > { %v5099_v26 = vpop.f32.mrf.mxu1 }
 0xb24   : > { %v6151_v28 = vmax.f32 %v6150_v14, %v5099_v26  ;;  %v4486_v14 = vpop.f32.mrf.mxu3 }
 0xb26   : > { %5138 = vmatmul.bf16.gmra.mxu1 %v8949_v19 }
 0xb27   : > { %v4114_v8 = vpop.f32.mrf.mxu2  ;;  %v4815_v9 = vpop.f32.mrf.mxu0 }
 0xb28   : > { %v5771_v24 = vmax.f32 %v5770_v30, %v4114_v8 }
 0xb2b   : > { %v5101_v38 = vpop.f32.mrf.mxu1 }
 0xb2c   : > { %v6152_v31 = vmax.f32 %v6151_v28, %v5101_v38  ;;  %4156 = vmatmul.bf16.gmra.mxu2 %v8950_v34  ;;  %v4488_v28 = vpop.f32.mrf.mxu3 }
 0xb2f   : > { %v4117_v17 = vpop.f32.mrf.mxu2  ;;  %v4817_v8 = vpop.f32.mrf.mxu0 }
 0xb30   : > { %v5772_v40 = vmax.f32 %v5771_v24, %v4117_v17 }
 0xb33   : > { %v5104_v39 = vpop.f32.mrf.mxu1 }
 0xb34   : > { %v6153_v61 = vmax.f32 %v6152_v31, %v5104_v39  ;;  %v4491_v17 = vpop.f32.mrf.mxu3 }
 0xb36   : > { %5143 = vmatmul.bf16.gmra.mxu1 %v8950_v34 }
 0xb37   : > { %v4119_v32 = vpop.f32.mrf.mxu2 }
 0xb38   : > { %v5773_v59 = vmax.f32 %v5772_v40, %v4119_v32  ;;  %v4820_v40 = vpop.f32.mrf.mxu0 }
 0xb3b   : > { %v5106_v36 = vpop.f32.mrf.mxu1 }
 0xb3c   : > { %v6154_v54 = vmax.f32 %v6153_v61, %v5106_v36  ;;  %4161 = vmatmul.bf16.gmra.mxu2 %v8951_v16  ;;  %v4493_v32 = vpop.f32.mrf.mxu3 }
 0xb3f   : > { %v4122_v1 = vpop.f32.mrf.mxu2 }
 0xb40   : > { %v5774_v19 = vmax.f32 %v5773_v59, %v4122_v1  ;;  %v4822_v59 = vpop.f32.mrf.mxu0 }
 0xb43   : > { %v5109_v44 = vpop.f32.mrf.mxu1 }
 0xb44   : > { %v6155_v41 = vmax.f32 %v6154_v54, %v5109_v44  ;;  %v6037_v54 = vmax.f32 %v8740_v37, %v4802_v46 }
 0xb46   : > { %5148 = vmatmul.bf16.gmra.mxu1 %v8951_v16 }
 0xb47   : > { %v4124_v53 = vpop.f32.mrf.mxu2 }
 0xb48   : > { %v5775_v33 = vmax.f32 %v5774_v19, %v4124_v53  ;;  %v6038_v19 = vmax.f32 %v6037_v54, %v4805_v13 }
 0xb4a   : > { %v6039_v44 = vmax.f32 %v6038_v19, %v4807_v10 }
 0xb4b   : > { %v5111_v43 = vpop.f32.mrf.mxu1 }
 0xb4c   : > { %v6156_v2 = vmax.f32 %v6155_v41, %v5111_v43  ;;  %4166 = vmatmul.bf16.gmra.mxu2 %v8952_v20  ;;  %v6040_v53 = vmax.f32 %v6039_v44, %v4810_v52  ;;  %v4825_v43 = vpop.f32.mrf.mxu0 }
 0xb4f   : > { %v4127_v49 = vpop.f32.mrf.mxu2 }
 0xb50   : > { %v5776_v34 = vmax.f32 %v5775_v33, %v4127_v49  ;;  %v4496_v33 = vpop.f32.mrf.mxu3 }
 0xb53   : > { %v5114_v56 = vpop.f32.mrf.mxu1 }
 0xb54   : > { %v6157_v57 = vmax.f32 %v6156_v2, %v5114_v56  ;;  %v6041_v2 = vmax.f32 %v6040_v53, %v4812_v45  ;;  %v4827_v13 = vpop.f32.mrf.mxu0 }
 0xb57   : > { %v4129_v58 = vpop.f32.mrf.mxu2 }
 0xb58   : > { %v5777_v29 = vmax.f32 %v5776_v34, %v4129_v58  ;;  %v6042_v34 = vmax.f32 %v6041_v2, %v4815_v9  ;;  %v4498_v46 = vpop.f32.mrf.mxu3 }
 0xb5a   : > { %v6043_v56 = vmax.f32 %v6042_v34, %v4817_v8 }
 0xb5b   : > { %v5116_v55 = vpop.f32.mrf.mxu1 }
 0xb5c   : > { %v6158_v3 = vmax.f32 %v6157_v57, %v5116_v55  ;;  %v5913_v57 = vmax.f32 %v5912_v22, %v4481_v42 }
 0xb5f   : > { %v4132_v18 = vpop.f32.mrf.mxu2 }
 0xb60   : > { %v5778_v35 = vmax.f32 %v5777_v29, %v4132_v18  ;;  %v6044_v29 = vmax.f32 %v6043_v56, %v4820_v40 }
 0xb62   : > { %v6045_v37 = vmax.f32 %v6044_v29, %v4822_v59 }
 0xb63   : > { %v5119_v5 = vpop.f32.mrf.mxu1 }
 0xb64   : > { %v6159_v16 = vmax.f32 %v6158_v3, %v5119_v5  ;;  %v5914_v3 = vmax.f32 %v5913_v57, %v4483_v27 }
 0xb67   : > { %v4134_v62 = vpop.f32.mrf.mxu2 }
 0xb68   : > { %v5779_v48 = vmax.f32 %v5778_v35, %v4134_v62  ;;  %v5915_v35 = vmax.f32 %v5914_v3, %v4486_v14 }
 0xb6b   : > { %v5121_v51 = vpop.f32.mrf.mxu1 }
 0xb6c   : > { %v6160_v21 = vmax.f32 %v6159_v16, %v5121_v51  ;;  %v6046_v16 = vmax.f32 %v6045_v37, %v4825_v43 }
 0xb6e   : > { %v6047_v10 = vmax.f32 %v6046_v16, %v4827_v13 }
 0xb6f   : > { %v4137_v20 = vpop.f32.mrf.mxu2 }
 0xb70   : > { %v5780_v15 = vmax.f32 %v5779_v48, %v4137_v20  ;;  %v5916_v48 = vmax.f32 %v5915_v35, %v4488_v28  ;;  %v6258_v6 = vrot.slane %v6047_v10, 4 }
 0xb73   : > { %v5124_v63 = vpop.f32.mrf.mxu1 }
 0xb74   : > { %v6161_v23 = vmax.f32 %v6160_v21, %v5124_v63  ;;  %v5917_v21 = vmax.f32 %v5916_v48, %v4491_v17 }
 0xb76   : > { %v5918_v25 = vmax.f32 %v5917_v21, %v4493_v32 }
 0xb77   : > { %v4139_v0 = vpop.f32.mrf.mxu2 }
 0xb78   : > { %v5781_v7 = vmax.f32 %v5780_v15, %v4139_v0  ;;  %v5919_v63 = vmax.f32 %v5918_v25, %v4496_v33 }
 0xb7a   : > { %v5920_v0 = vmax.f32 %v5919_v63, %v4498_v46 }
 0xb7b   : > { %v5126_v12 = vpop.f32.mrf.mxu1 }
 0xb7c   : > { %v6162_v55 = vmax.f32 %v6161_v23, %v5126_v12  ;;  %v6259_v12 = vmax.f32 %v6047_v10, %v6258_v6  ;;  %v6252_v9 = vrot.slane %v5920_v0, 4 }
 0xb7e   : > { %v6253_v40 = vmax.f32 %v5920_v0, %v6252_v9 }
 0xb7f   : > { %v4142_v4 = vpop.f32.mrf.mxu2 }
 0xb80   : > { %v5782_v60 = vmax.f32 %v5781_v7, %v4142_v4  ;;  %v5154_v7 = vpop.f32.mrf.mxu3 }
 0xb83   : > { %v5129_v11 = vpop.f32.mrf.mxu1 }
 0xb84   : > { %v6163_v18 = vmax.f32 %v6162_v55, %v5129_v11 }
 0xb87   : > { %v4144_v50 = vpop.f32.mrf.mxu2 }
 0xb88   : > { %v5783_v23 = vmax.f32 %v5782_v60, %v4144_v50  ;;  %v5156_v50 = vpop.f32.mrf.mxu3 }
 0xb8b   : > { %v5131_v30 = vpop.f32.mrf.mxu1 }
 0xb8c   : > { %v6164_v62 = vmax.f32 %v6163_v18, %v5131_v30  ;;  %v6260_v30 = vrot.slane %v6259_v12, 2 }
 0xb8f   : > { %v4147_v26 = vpop.f32.mrf.mxu2 }
 0xb90   : > { %v5784_v27 = vmax.f32 %v5783_v23, %v4147_v26  ;;  %v6254_v26 = vrot.slane %v6253_v40, 2 }
 0xb92   : > { %v6255_v43 = vmax.f32 %v6253_v40, %v6254_v26 }
 0xb93   : > { %v5134_v24 = vpop.f32.mrf.mxu1 }
 0xb94   : > { %v6165_v51 = vmax.f32 %v6164_v62, %v5134_v24 }
 0xb97   : > { %v4149_v38 = vpop.f32.mrf.mxu2 }
 0xb98   : > { %v5785_v11 = vmax.f32 %v5784_v27, %v4149_v38 }
 0xb9b   : > { %v5136_v31 = vpop.f32.mrf.mxu1 }
 0xb9c   : > { %v6166_v15 = vmax.f32 %v6165_v51, %v5136_v31 }
 0xb9f   : > { %v4152_v39 = vpop.f32.mrf.mxu2 }
 0xba0   : > { %v5786_v28 = vmax.f32 %v5785_v11, %v4152_v39 }
 0xba3   : > { %v5139_v61 = vpop.f32.mrf.mxu1 }
 0xba4   : > { %v6167_v22 = vmax.f32 %v6166_v15, %v5139_v61  ;;  %v6261_v61 = vmax.f32 %v6259_v12, %v6260_v30 }
 0xba6   : > { %v6262_v19 = vrot.slane %v6261_v61, 1 }
 0xba7   : > { %v4154_v36 = vpop.f32.mrf.mxu2 }
 0xba8   : > { %v5787_v31 = vmax.f32 %v5786_v28, %v4154_v36  ;;  %v6263_v39 = vmax.f32 %v6261_v61, %v6262_v19  ;;  %v7294_v36 = vld [vmem:[%s8786_s6] sm:$0xff] }
 0xba9   : > { %v6278_v2 = vperm.slane %v7294_v36, 6  ;;  %v6279_v3 = vperm.slane %v7294_v36, 7  ;;  %v6277_v13 = vperm.slane %v7294_v36, 5  ;;  %v6276_v25 = vperm.slane %v7294_v36, 4 }
 0xbab   : > { %v5141_v1 = vpop.f32.mrf.mxu1  ;;  %v6294_v29 = vadd.f32 %v6278_v2, %v6263_v39 }
 0xbac   : > { %v6168_v52 = vmax.f32 %v6167_v22, %v5141_v1 }
 0xbaf   : > { %v4157_v41 = vpop.f32.mrf.mxu2 }
 0xbb0   : > { %v5788_v32 = vmax.f32 %v5787_v31, %v4157_v41 }
 0xbb3   : > { %v5144_v49 = vpop.f32.mrf.mxu1 }
 0xbb4   : > { %v6169_v45 = vmax.f32 %v6168_v52, %v5144_v49 }
 0xbb7   : > { %v4159_v58 = vpop.f32.mrf.mxu2 }
 0xbb8   : > { %v5789_v54 = vmax.f32 %v5788_v32, %v4159_v58  ;;  %v6256_v58 = vrot.slane %v6255_v43, 1 }
 0xbba   : > { %v6257_v35 = vmax.f32 %v6255_v43, %v6256_v58 }
 0xbbb   : > { %v5146_v5 = vpop.f32.mrf.mxu1 }
 0xbbc   : > { %v6170_v14 = vmax.f32 %v6169_v45, %v5146_v5  ;;  %v6302_v5 = vmax.f32 %v6294_v29, 0.0  ;;  %v6293_v51 = vadd.f32 %v6277_v13, %v6257_v35 }
 0xbbe   : > { %v6317_v21 = vrot.slane %v6302_v5, 2  ;;  %v6301_v63 = vmax.f32 %v6293_v51, 0.0 }
 0xbbf   : > { %v4162_v20 = vpop.f32.mrf.mxu2 }
 0xbc0   : > { %v5790_v44 = vmax.f32 %v5789_v54, %v4162_v20  ;;  %v6316_v52 = vrot.slane %v6301_v63, 3 }
 0xbc3   : > { %v5149_v42 = vpop.f32.mrf.mxu1 }
 0xbc4   : > { %v6171_v8 = vmax.f32 %v6170_v14, %v5149_v42 }
 0xbc7   : > { %v4164_v4 = vpop.f32.mrf.mxu2 }
 0xbc8   : > { %v5791_v53 = vmax.f32 %v5790_v44, %v4164_v4 }
 0xbcb   : > { %v5151_v24 = vpop.f32.mrf.mxu1 }
 0xbcc   : > { %v6172_v17 = vmax.f32 %v6171_v8, %v5151_v24 }
 0xbce   : > { %v6173_v60 = vmax.f32 %v6172_v17, %v5154_v7 }
 0xbcf   : > { %v4167_v59 = vpop.f32.mrf.mxu2 }
 0xbd0   : > { %v6174_v1 = vmax.f32 %v6173_v60, %v5156_v50  ;;  %v5792_v41 = vmax.f32 %v5791_v53, %v4167_v59 }
 0xbd2   : > { %v6264_v38 = vrot.slane %v6174_v1, 4 }
 0xbd4   : > { %v6265_v33 = vmax.f32 %v6174_v1, %v6264_v38 }
 0xbd6   : > { %v6266_v49 = vrot.slane %v6265_v33, 2 }
 0xbd7   : > { %v4169_v34 = vpop.f32.mrf.mxu2 }
 0xbd8   : > { %v6267_v56 = vmax.f32 %v6265_v33, %v6266_v49  ;;  %v5793_v57 = vmax.f32 %v5792_v41, %v4169_v34 }
 0xbda   : > { %v6268_v55 = vrot.slane %v6267_v56, 1  ;;  %v6246_v37 = vrot.slane %v5793_v57, 4 }
 0xbdc   : > { %v6269_v46 = vmax.f32 %v6267_v56, %v6268_v55  ;;  %v6247_v18 = vmax.f32 %v5793_v57, %v6246_v37 }
 0xbde   : > { %v6295_v16 = vadd.f32 %v6279_v3, %v6269_v46  ;;  %v6248_v62 = vrot.slane %v6247_v18, 2 }
 0xbe0   : > { %v6303_v48 = vmax.f32 %v6295_v16, 0.0  ;;  %v6249_v10 = vmax.f32 %v6247_v18, %v6248_v62 }
 0xbe2   : > { %v6318_v20 = vrot.slane %v6303_v48, 1  ;;  %v6250_v15 = vrot.slane %v6249_v10, 1 }
 0xbe4   : > { %v6328_v6 = vsel %vm6327_vm5, %v6317_v21, %v6318_v20  ;;  %v6251_v22 = vmax.f32 %v6249_v10, %v6250_v15 }
 0xbe6   : > { %v6292_v42 = vadd.f32 %v6276_v25, %v6251_v22 }
 0xbe8   : > { %v6300_v23 = vmax.f32 %v6292_v42, 0.0 }
 0xbea   : > { %v6315_v0 = vrot.slane %v6300_v23, 4 }
 0xbec   : > { %v6326_v7 = vsel %vm6325_vm6, %v6315_v0, %v6316_v52 }
 0xbed   : > { %v6330_v12 = vsel %vm6329_vm7, %v6326_v7, %v6328_v6 }
 0xbee   : > { %v6332_v27 = vsel %vm6331_vm8, %v8549_v47, %v6330_v12 }
 0xbef   : > { %6334 = vst [vmem:[%s321_s8] sm:$0xff] %v6332_v27 }
 0xbf0 PF: > { %s18_s26 = sadd.s32 1, %s7351_s26   ;;  %s8953_s24 = smov %s7347_s25 }
 0xbf1   : > { %p15_p8 = scmp.ge.s32.totalorder %s18_s26, 4   ;;  %s8954_s25 = smov %s8956_s28 }
 0xbf3   :  { %17 = sbr.rel (!%p15_p8) target bundleno = 2 (0x2), region = 91 }
 0xbf8   :  { %6354 = vsyncpa [#allocation4], 1 }
 0xbf9   :  { %6356 = vsyncpa [#allocation4 + $0x1], 1 }

// kernel: stnkd_forward.3
= control target key start
LH: loop header
LB: loop body
LE: loop exit
PB: predicated region body
PF: predicated region fallthrough
CT: control target
= control target key end

     0   :  { %12 = vsyncpa [#allocation3], 0  ;;  %s4998_s0 = inlined_call_operand.vmem [shape: f32[2,1024], index: 0, kind: input, shape index: {}]   ;;  %s4999_s1 = inlined_call_operand.hbm [shape: bf16[1024,512], index: 1, kind: input, shape index: {}]   ;;  %s5000_s2 = inlined_call_operand.vmem [shape: f32[1,512], index: 2, kind: input, shape index: {}]   ;;  %s5001_s3 = inlined_call_operand.hbm [shape: bf16[512,256], index: 3, kind: input, shape index: {}]   ;;  %s5002_s4 = inlined_call_operand.vmem [shape: f32[1,256], index: 4, kind: input, shape index: {}]   ;;  %s5003_s5 = inlined_call_operand.vmem [shape: bf16[256,256], index: 5, kind: input, shape index: {}]   ;;  %s5004_s6 = inlined_call_operand.vmem [shape: f32[1,256], index: 6, kind: input, shape index: {}]   ;;  %s5005_s7 = inlined_call_operand.vmem [shape: f32[2,256], index: 7, kind: output, shape index: {}]  }
   0x1   :  { %s20_s26 = sshll.u32 %s4999_s1, 4  ;;  %s21_s26 = int_to_ptr.hbm [resolvable:$true] %s20_s26 }
   0x2   :  { %13 = vsyncpa [#allocation5], 0  ;;  %s4639_s27 = smov [#allocation2]   ;;  %s35_s8 = sshll.u32 %s5001_s3, 4  ;;  %s36_s8 = int_to_ptr.hbm [resolvable:$true] %s35_s8 }
   0x3   :  { %s22_s28 = sshll.u32 %s4639_s27, 4  ;;  %s4640_s9 = smov 256   ;;  %s23_s28 = int_to_ptr.vmem [resolvable:$true] %s22_s28 }
   0x4   :  { %s4641_s10 = smov 16   ;;  %s4642_s11 = smov [#allocation4]  }
   0x5   :  { %28 = dma.hbm_to_vmem [thread:$0]  %s21_s26, 32768, %s23_s28, [#allocation3], %s4640_s9, %s4640_s9, %s4641_s10  }
   0x6   :  { %s37_s12 = sshll.u32 %s4642_s11, 4  ;;  %s4643_s13 = smov 128   ;;  %s38_s12 = int_to_ptr.vmem [resolvable:$true] %s37_s12 }
   0x7   :  { %s4644_s14 = smov 8  }
   0x8   :  { %43 = dma.hbm_to_vmem [thread:$0]  %s36_s8, 8192, %s38_s12, [#allocation5], %s4643_s13, %s4643_s13, %s4644_s14  }
   0x9   :  { %4635 = dma.done.wait [#allocation3], 32768  }
   0xa   :  { %4636 = vsyncadd [#allocation3], 4294934528 }
   0xb   :  { %4637 = dma.done.wait [#allocation5], 8192  }
   0xc   :  { %4638 = vsyncadd [#allocation5], 4294959104  ;;  %v2934_v0 = vld [vmem:[#allocation2 + $0xe0] sm:$0xf]  ;;  %v4258_v1 = vld [vmem:[#allocation2 + $0xec] sm:$0xf0] }
   0xd   :  { %v3062_v2 = vld [vmem:[#allocation2 + $0x1e0] sm:$0xf]  ;;  %v2935_v3 = vor.u32 %v4258_v1, %v2934_v0  ;;  %v4290_v4 = vld [vmem:[#allocation2 + $0x1ec] sm:$0xf0]  ;;  %vm2810_vm0 = vcmask 1041408  }
   0xe   :  { %v3190_v5 = vld [vmem:[#allocation2 + $0x2e0] sm:$0xf]  ;;  %v4322_v6 = vld [vmem:[#allocation2 + $0x2ec] sm:$0xf0]  ;;  %v3063_v7 = vor.u32 %v4290_v4, %v3062_v2 }
   0xf   :  { %v3191_v8 = vor.u32 %v4322_v6, %v3190_v5  ;;  %v3318_v9 = vld [vmem:[#allocation2 + $0x3e0] sm:$0xf]  ;;  %v4354_v10 = vld [vmem:[#allocation2 + $0x3ec] sm:$0xf0]  ;;  %1635 = vmatpush.bf16.msra.mxu0 %v2935_v3 }
  0x10   :  { %v2918_v11 = vld [vmem:[#allocation2 + $0xc0] sm:$0xf]  ;;  %v3319_v12 = vor.u32 %v4354_v10, %v3318_v9  ;;  %v4254_v13 = vld [vmem:[#allocation2 + $0xcc] sm:$0xf0]  ;;  %1648 = vmatpush.bf16.msra.mxu1 %v3063_v7 }
  0x11   :  { %v3046_v14 = vld [vmem:[#allocation2 + $0x1c0] sm:$0xf]  ;;  %v4286_v15 = vld [vmem:[#allocation2 + $0x1cc] sm:$0xf0]  ;;  %1661 = vmatpush.bf16.msra.mxu2 %v3191_v8  ;;  %v2919_v16 = vor.u32 %v4254_v13, %v2918_v11 }
  0x12   :  { %v3047_v17 = vor.u32 %v4286_v15, %v3046_v14  ;;  %v3174_v18 = vld [vmem:[#allocation2 + $0x2c0] sm:$0xf]  ;;  %v4318_v19 = vld [vmem:[#allocation2 + $0x2cc] sm:$0xf0]  ;;  %1674 = vmatpush.bf16.msra.mxu3 %v3319_v12 }
  0x13   :  { %v3302_v20 = vld [vmem:[#allocation2 + $0x3c0] sm:$0xf]  ;;  %v3175_v21 = vor.u32 %v4318_v19, %v3174_v18  ;;  %v4350_v22 = vld [vmem:[#allocation2 + $0x3cc] sm:$0xf0]  ;;  %1636 = vmatpush.bf16.msra.mxu0 %v2919_v16 }
  0x14   :  { %v2902_v23 = vld [vmem:[#allocation2 + $0xa0] sm:$0xf]  ;;  %v4250_v24 = vld [vmem:[#allocation2 + $0xac] sm:$0xf0]  ;;  %v3303_v25 = vor.u32 %v4350_v22, %v3302_v20  ;;  %1649 = vmatpush.bf16.msra.mxu1 %v3047_v17 }
  0x15   :  { %v3030_v26 = vld [vmem:[#allocation2 + $0x1a0] sm:$0xf]  ;;  %v4282_v27 = vld [vmem:[#allocation2 + $0x1ac] sm:$0xf0]  ;;  %v2903_v29 = vor.u32 %v4250_v24, %v2902_v23  ;;  %1662 = vmatpush.bf16.msra.mxu2 %v3175_v21 }
  0x16   :  { %v3158_v28 = vld [vmem:[#allocation2 + $0x2a0] sm:$0xf]  ;;  %v4314_v30 = vld [vmem:[#allocation2 + $0x2ac] sm:$0xf0]  ;;  %v3031_v33 = vor.u32 %v4282_v27, %v3030_v26  ;;  %1675 = vmatpush.bf16.msra.mxu3 %v3303_v25 }
  0x17   :  { %v3286_v31 = vld [vmem:[#allocation2 + $0x3a0] sm:$0xf]  ;;  %v4346_v32 = vld [vmem:[#allocation2 + $0x3ac] sm:$0xf0]  ;;  %v3159_v34 = vor.u32 %v4314_v30, %v3158_v28  ;;  %1637 = vmatpush.bf16.msra.mxu0 %v2903_v29 }
  0x18   :  { %v2886_v35 = vld [vmem:[#allocation2 + $0x80] sm:$0xf]  ;;  %v4246_v36 = vld [vmem:[#allocation2 + $0x8c] sm:$0xf0]  ;;  %v3287_v38 = vor.u32 %v4346_v32, %v3286_v31  ;;  %1650 = vmatpush.bf16.msra.mxu1 %v3031_v33 }
  0x19   :  { %v3014_v37 = vld [vmem:[#allocation2 + $0x180] sm:$0xf]  ;;  %v4278_v39 = vld [vmem:[#allocation2 + $0x18c] sm:$0xf0]  ;;  %v2887_v44 = vor.u32 %v4246_v36, %v2886_v35  ;;  %1663 = vmatpush.bf16.msra.mxu2 %v3159_v34 }
  0x1a   :  { %v3142_v40 = vld [vmem:[#allocation2 + $0x280] sm:$0xf]  ;;  %v4310_v41 = vld [vmem:[#allocation2 + $0x28c] sm:$0xf0]  ;;  %v3015_v45 = vor.u32 %v4278_v39, %v3014_v37  ;;  %1676 = vmatpush.bf16.msra.mxu3 %v3287_v38 }
  0x1b   :  { %v3270_v42 = vld [vmem:[#allocation2 + $0x380] sm:$0xf]  ;;  %v4342_v43 = vld [vmem:[#allocation2 + $0x38c] sm:$0xf0]  ;;  %v3143_v46 = vor.u32 %v4310_v41, %v3142_v40  ;;  %1638 = vmatpush.bf16.msra.mxu0 %v2887_v44 }
  0x1c   :  { %v2870_v47 = vld [vmem:[#allocation2 + $0x60] sm:$0xf]  ;;  %v4242_v48 = vld [vmem:[#allocation2 + $0x6c] sm:$0xf0]  ;;  %v3271_v50 = vor.u32 %v4342_v43, %v3270_v42  ;;  %1651 = vmatpush.bf16.msra.mxu1 %v3015_v45 }
  0x1d   :  { %v2998_v49 = vld [vmem:[#allocation2 + $0x160] sm:$0xf]  ;;  %v4274_v51 = vld [vmem:[#allocation2 + $0x16c] sm:$0xf0]  ;;  %v2871_v56 = vor.u32 %v4242_v48, %v2870_v47  ;;  %1664 = vmatpush.bf16.msra.mxu2 %v3143_v46 }
  0x1e   :  { %v3126_v52 = vld [vmem:[#allocation2 + $0x260] sm:$0xf]  ;;  %v4306_v53 = vld [vmem:[#allocation2 + $0x26c] sm:$0xf0]  ;;  %v2999_v57 = vor.u32 %v4274_v51, %v2998_v49  ;;  %1677 = vmatpush.bf16.msra.mxu3 %v3271_v50 }
  0x1f   :  { %v3254_v54 = vld [vmem:[#allocation2 + $0x360] sm:$0xf]  ;;  %v4338_v55 = vld [vmem:[#allocation2 + $0x36c] sm:$0xf0]  ;;  %v3127_v58 = vor.u32 %v4306_v53, %v3126_v52  ;;  %1639 = vmatpush.bf16.msra.mxu0 %v2871_v56 }
  0x20   :  { %v2854_v59 = vld [vmem:[#allocation2 + $0x40] sm:$0xf]  ;;  %v4238_v60 = vld [vmem:[#allocation2 + $0x4c] sm:$0xf0]  ;;  %v3255_v62 = vor.u32 %v4338_v55, %v3254_v54  ;;  %1652 = vmatpush.bf16.msra.mxu1 %v2999_v57 }
  0x21   :  { %v2982_v61 = vld [vmem:[#allocation2 + $0x140] sm:$0xf]  ;;  %v4270_v63 = vld [vmem:[#allocation2 + $0x14c] sm:$0xf0]  ;;  %v2855_v4 = vor.u32 %v4238_v60, %v2854_v59  ;;  %1665 = vmatpush.bf16.msra.mxu2 %v3127_v58 }
  0x22   :  { %v3110_v0 = vld [vmem:[#allocation2 + $0x240] sm:$0xf]  ;;  %v4302_v1 = vld [vmem:[#allocation2 + $0x24c] sm:$0xf0]  ;;  %v2983_v5 = vor.u32 %v4270_v63, %v2982_v61  ;;  %1678 = vmatpush.bf16.msra.mxu3 %v3255_v62 }
  0x23   :  { %v3238_v2 = vld [vmem:[#allocation2 + $0x340] sm:$0xf]  ;;  %v4334_v3 = vld [vmem:[#allocation2 + $0x34c] sm:$0xf0]  ;;  %v3111_v6 = vor.u32 %v4302_v1, %v3110_v0  ;;  %1640 = vmatpush.bf16.msra.mxu0 %v2855_v4 }
  0x24   :  { %v2838_v7 = vld [vmem:[#allocation2 + $0x20] sm:$0xf]  ;;  %v4234_v8 = vld [vmem:[#allocation2 + $0x2c] sm:$0xf0]  ;;  %v3239_v10 = vor.u32 %v4334_v3, %v3238_v2  ;;  %1653 = vmatpush.bf16.msra.mxu1 %v2983_v5  ;;  %v58_v2 = vld [vmem:[%s4998_s0] sm:$0xff] }
  0x25   :  { %v2966_v9 = vld [vmem:[#allocation2 + $0x120] sm:$0xf]  ;;  %v4266_v11 = vld [vmem:[#allocation2 + $0x12c] sm:$0xf0]  ;;  %v2839_v16 = vor.u32 %v4234_v8, %v2838_v7  ;;  %1666 = vmatpush.bf16.msra.mxu2 %v3111_v6  ;;  %62 = vst [vmem:[#allocation1] ss:$4 sm:$0xff] %v58_v2 }
  0x26   :  { %v3094_v12 = vld [vmem:[#allocation2 + $0x220] sm:$0xf]  ;;  %v4298_v13 = vld [vmem:[#allocation2 + $0x22c] sm:$0xf0]  ;;  %v2967_v19 = vor.u32 %v4266_v11, %v2966_v9  ;;  %1679 = vmatpush.bf16.msra.mxu3 %v3239_v10 }
  0x27   :  { %v3222_v14 = vld [vmem:[#allocation2 + $0x320] sm:$0xf]  ;;  %v4330_v15 = vld [vmem:[#allocation2 + $0x32c] sm:$0xf0]  ;;  %v3095_v20 = vor.u32 %v4298_v13, %v3094_v12  ;;  %1641 = vmatpush.bf16.msra.mxu0 %v2839_v16 }
  0x28   :  { %v2822_v17 = vld [vmem:[#allocation2] sm:$0xf]  ;;  %v4230_v18 = vld [vmem:[#allocation2 + $0xc] sm:$0xf0]  ;;  %v3223_v24 = vor.u32 %v4330_v15, %v3222_v14  ;;  %1654 = vmatpush.bf16.msra.mxu1 %v2967_v19 }
  0x29   :  { %v2950_v21 = vld [vmem:[#allocation2 + $0x100] sm:$0xf]  ;;  %v4262_v22 = vld [vmem:[#allocation2 + $0x10c] sm:$0xf0]  ;;  %v2823_v31 = vor.u32 %v4230_v18, %v2822_v17  ;;  %1667 = vmatpush.bf16.msra.mxu2 %v3095_v20 }
  0x2a   :  { %v3078_v23 = vld [vmem:[#allocation2 + $0x200] sm:$0xf]  ;;  %v4294_v25 = vld [vmem:[#allocation2 + $0x20c] sm:$0xf0]  ;;  %v2951_v35 = vor.u32 %v4262_v22, %v2950_v21  ;;  %1680 = vmatpush.bf16.msra.mxu3 %v3223_v24 }
  0x2b   :  { %v3206_v26 = vld [vmem:[#allocation2 + $0x300] sm:$0xf]  ;;  %v4326_v27 = vld [vmem:[#allocation2 + $0x30c] sm:$0xf0]  ;;  %v3079_v36 = vor.u32 %v4294_v25, %v3078_v23  ;;  %1642 = vmatpush.bf16.msra.mxu0 %v2823_v31 }
  0x2c   :  { %v3446_v28 = vld [vmem:[#allocation2 + $0x4e0] sm:$0xf]  ;;  %v4386_v29 = vld [vmem:[#allocation2 + $0x4ec] sm:$0xf0]  ;;  %v3207_v39 = vor.u32 %v4326_v27, %v3206_v26  ;;  %1655 = vmatpush.bf16.msra.mxu1 %v2951_v35 }
  0x2d   :  { %v3574_v30 = vld [vmem:[#allocation2 + $0x5e0] sm:$0xf]  ;;  %v4418_v32 = vld [vmem:[#allocation2 + $0x5ec] sm:$0xf0]  ;;  %v3447_v40 = vor.u32 %v4386_v29, %v3446_v28  ;;  %1668 = vmatpush.bf16.msra.mxu2 %v3079_v36 }
  0x2e   :  { %v3702_v33 = vld [vmem:[#allocation2 + $0x6e0] sm:$0xf]  ;;  %v4450_v34 = vld [vmem:[#allocation2 + $0x6ec] sm:$0xf0]  ;;  %v3575_v41 = vor.u32 %v4418_v32, %v3574_v30  ;;  %1681 = vmatpush.bf16.msra.mxu3 %v3207_v39 }
  0x2f   :  { %v3830_v37 = vld [vmem:[#allocation2 + $0x7e0] sm:$0xf]  ;;  %v4482_v38 = vld [vmem:[#allocation2 + $0x7ec] sm:$0xf0]  ;;  %v3703_v42 = vor.u32 %v4450_v34, %v3702_v33  ;;  %1687 = vmatpush.bf16.msrb.mxu0 %v3447_v40 }
  0x30   :  { %v3430_v43 = vld [vmem:[#allocation2 + $0x4c0] sm:$0xf]  ;;  %v4382_v44 = vld [vmem:[#allocation2 + $0x4cc] sm:$0xf0]  ;;  %v3831_v46 = vor.u32 %v4482_v38, %v3830_v37  ;;  %1700 = vmatpush.bf16.msrb.mxu1 %v3575_v41 }
  0x31   :  { %v3558_v45 = vld [vmem:[#allocation2 + $0x5c0] sm:$0xf]  ;;  %v4414_v47 = vld [vmem:[#allocation2 + $0x5cc] sm:$0xf0]  ;;  %v3431_v52 = vor.u32 %v4382_v44, %v3430_v43  ;;  %1713 = vmatpush.bf16.msrb.mxu2 %v3703_v42 }
  0x32   :  { %v3686_v48 = vld [vmem:[#allocation2 + $0x6c0] sm:$0xf]  ;;  %v4446_v49 = vld [vmem:[#allocation2 + $0x6cc] sm:$0xf0]  ;;  %v3559_v53 = vor.u32 %v4414_v47, %v3558_v45  ;;  %1726 = vmatpush.bf16.msrb.mxu3 %v3831_v46 }
  0x33   :  { %v3814_v50 = vld [vmem:[#allocation2 + $0x7c0] sm:$0xf]  ;;  %v4478_v51 = vld [vmem:[#allocation2 + $0x7cc] sm:$0xf0]  ;;  %v3687_v54 = vor.u32 %v4446_v49, %v3686_v48  ;;  %1688 = vmatpush.bf16.msrb.mxu0 %v3431_v52 }
  0x34   :  { %v3414_v55 = vld [vmem:[#allocation2 + $0x4a0] sm:$0xf]  ;;  %v4378_v56 = vld [vmem:[#allocation2 + $0x4ac] sm:$0xf0]  ;;  %v3815_v58 = vor.u32 %v4478_v51, %v3814_v50  ;;  %1701 = vmatpush.bf16.msrb.mxu1 %v3559_v53 }
  0x35   :  { %v3542_v57 = vld [vmem:[#allocation2 + $0x5a0] sm:$0xf]  ;;  %v4410_v59 = vld [vmem:[#allocation2 + $0x5ac] sm:$0xf0]  ;;  %v3415_v0 = vor.u32 %v4378_v56, %v3414_v55  ;;  %1714 = vmatpush.bf16.msrb.mxu2 %v3687_v54 }
  0x36   :  { %v3670_v60 = vld [vmem:[#allocation2 + $0x6a0] sm:$0xf]  ;;  %v4442_v61 = vld [vmem:[#allocation2 + $0x6ac] sm:$0xf0]  ;;  %v3543_v3 = vor.u32 %v4410_v59, %v3542_v57  ;;  %1727 = vmatpush.bf16.msrb.mxu3 %v3815_v58 }
  0x37   :  { %v3798_v62 = vld [vmem:[#allocation2 + $0x7a0] sm:$0xf]  ;;  %v4474_v63 = vld [vmem:[#allocation2 + $0x7ac] sm:$0xf0]  ;;  %v3671_v4 = vor.u32 %v4442_v61, %v3670_v60  ;;  %1689 = vmatpush.bf16.msrb.mxu0 %v3415_v0 }
  0x38   :  { %v3398_v1 = vld [vmem:[#allocation2 + $0x480] sm:$0xf]  ;;  %v4374_v5 = vld [vmem:[#allocation2 + $0x48c] sm:$0xf0]  ;;  %v3799_v7 = vor.u32 %v4474_v63, %v3798_v62  ;;  %1702 = vmatpush.bf16.msrb.mxu1 %v3543_v3 }
  0x39   :  { %v3526_v6 = vld [vmem:[#allocation2 + $0x580] sm:$0xf]  ;;  %v4406_v8 = vld [vmem:[#allocation2 + $0x58c] sm:$0xf0]  ;;  %v3399_v13 = vor.u32 %v4374_v5, %v3398_v1  ;;  %1715 = vmatpush.bf16.msrb.mxu2 %v3671_v4 }
  0x3a   :  { %v3654_v9 = vld [vmem:[#allocation2 + $0x680] sm:$0xf]  ;;  %v4438_v10 = vld [vmem:[#allocation2 + $0x68c] sm:$0xf0]  ;;  %v3527_v15 = vor.u32 %v4406_v8, %v3526_v6  ;;  %1728 = vmatpush.bf16.msrb.mxu3 %v3799_v7  ;;  %v4256_v6 = vld [vmem:[#allocation2 + $0xe4] sm:$0xf] }
  0x3b   :  { %v3782_v11 = vld [vmem:[#allocation2 + $0x780] sm:$0xf]  ;;  %v4470_v12 = vld [vmem:[#allocation2 + $0x78c] sm:$0xf0]  ;;  %v3655_v16 = vor.u32 %v4438_v10, %v3654_v9  ;;  %1690 = vmatpush.bf16.msrb.mxu0 %v3399_v13  ;;  %v2936_v7 = vld [vmem:[#allocation2 + $0xf0] sm:$0xf0] }
  0x3c   :  { %v3382_v14 = vld [vmem:[#allocation2 + $0x460] sm:$0xf]  ;;  %v4370_v17 = vld [vmem:[#allocation2 + $0x46c] sm:$0xf0]  ;;  %v3783_v20 = vor.u32 %v4470_v12, %v3782_v11  ;;  %1703 = vmatpush.bf16.msrb.mxu1 %v3527_v15  ;;  %v4288_v8 = vld [vmem:[#allocation2 + $0x1e4] sm:$0xf] }
  0x3d   :  { %v3510_v18 = vld [vmem:[#allocation2 + $0x560] sm:$0xf]  ;;  %v4402_v19 = vld [vmem:[#allocation2 + $0x56c] sm:$0xf0]  ;;  %v3383_v27 = vor.u32 %v4370_v17, %v3382_v14  ;;  %1716 = vmatpush.bf16.msrb.mxu2 %v3655_v16  ;;  %v3064_v9 = vld [vmem:[#allocation2 + $0x1f0] sm:$0xf0] }
  0x3e   :  { %v3638_v21 = vld [vmem:[#allocation2 + $0x660] sm:$0xf]  ;;  %v4434_v22 = vld [vmem:[#allocation2 + $0x66c] sm:$0xf0]  ;;  %v3511_v28 = vor.u32 %v4402_v19, %v3510_v18  ;;  %1729 = vmatpush.bf16.msrb.mxu3 %v3783_v20  ;;  %v4320_v10 = vld [vmem:[#allocation2 + $0x2e4] sm:$0xf] }
  0x3f   :  { %v3766_v23 = vld [vmem:[#allocation2 + $0x760] sm:$0xf]  ;;  %v4466_v24 = vld [vmem:[#allocation2 + $0x76c] sm:$0xf0]  ;;  %v3639_v32 = vor.u32 %v4434_v22, %v3638_v21  ;;  %1691 = vmatpush.bf16.msrb.mxu0 %v3383_v27  ;;  %v3192_v12 = vld [vmem:[#allocation2 + $0x2f0] sm:$0xf0]  ;;  %v2939_v21 = vor.u32 %v4256_v6, %v2936_v7 }
  0x40   :  { %v3366_v25 = vld [vmem:[#allocation2 + $0x440] sm:$0xf]  ;;  %v4366_v26 = vld [vmem:[#allocation2 + $0x44c] sm:$0xf0]  ;;  %v3767_v37 = vor.u32 %v4466_v24, %v3766_v23  ;;  %1704 = vmatpush.bf16.msrb.mxu1 %v3511_v28  ;;  %v4352_v13 = vld [vmem:[#allocation2 + $0x3e4] sm:$0xf]  ;;  %v3067_v24 = vor.u32 %v4288_v8, %v3064_v9 }
  0x41   :  { %v3494_v29 = vld [vmem:[#allocation2 + $0x540] sm:$0xf]  ;;  %v67_v30 = vld.sshfl [vmem:[#allocation1 + $0x10] sm:$0xff pattern:$0x73625140]  ;;  %v3367_v45 = vor.u32 %v4366_v26, %v3366_v25  ;;  %1717 = vmatpush.bf16.msrb.mxu2 %v3639_v32  ;;  %v3195_v25 = vor.u32 %v4320_v10, %v3192_v12 }
  0x42   :  { %v65_v31 = vld.sshfl [vmem:[#allocation1] sm:$0xff pattern:$0x73625140]  ;;  %v4694_v33 = vpack.c.bf16 %v67_v30, %v67_v30  ;;  %v68_v35 = vld.sshfl [vmem:[#allocation1 + $0x18] sm:$0xff pattern:$0x73625140]  ;;  %1730 = vmatpush.bf16.msrb.mxu3 %v3767_v37 }
  0x43   :  { %v4696_v34 = vpack.c.bf16 %v65_v31, %v65_v31  ;;  %v66_v36 = vld.sshfl [vmem:[#allocation1 + $0x8] sm:$0xff pattern:$0x73625140]  ;;  %v4398_v38 = vld [vmem:[#allocation2 + $0x54c] sm:$0xf0]  ;;  %v4698_v41 = vpack.c.bf16 %v68_v35, %v68_v35  ;;  %1692 = vmatpush.bf16.msrb.mxu0 %v3367_v45 }
  0x44   :  { %v3622_v39 = vld [vmem:[#allocation2 + $0x640] sm:$0xf]  ;;  %v4430_v40 = vld [vmem:[#allocation2 + $0x64c] sm:$0xf0]  ;;  %v4700_v42 = vpack.c.bf16 %v66_v36, %v66_v36  ;;  %1669 = vmatmul.bf16.vlgmr.msra.gmra.mxu2 %v4694_v33  ;;  %v3495_v48 = vor.u32 %v4398_v38, %v3494_v29  ;;  %v3320_v14 = vld [vmem:[#allocation2 + $0x3f0] sm:$0xf0] }
  0x45   :  { %v3750_v43 = vld [vmem:[#allocation2 + $0x740] sm:$0xf]  ;;  %v4462_v44 = vld [vmem:[#allocation2 + $0x74c] sm:$0xf0]  ;;  %1643 = vmatmul.bf16.vlgmr.msra.gmra.mxu0 %v4696_v34  ;;  %1682 = vmatmul.bf16.vlgmr.msra.gmra.mxu3 %v4698_v41  ;;  %v3623_v49 = vor.u32 %v4430_v40, %v3622_v39  ;;  %v4252_v17 = vld [vmem:[#allocation2 + $0xc4] sm:$0xf]  ;;  %v3323_v28 = vor.u32 %v4352_v13, %v3320_v14 }
  0x46   :  { %v3350_v46 = vld [vmem:[#allocation2 + $0x420] sm:$0xf]  ;;  %v4362_v47 = vld [vmem:[#allocation2 + $0x42c] sm:$0xf0]  ;;  %v3751_v53 = vor.u32 %v4462_v44, %v3750_v43  ;;  %1656 = vmatmul.bf16.vlgmr.msra.gmra.mxu1 %v4700_v42  ;;  %v2920_v18 = vld [vmem:[#allocation2 + $0xd0] sm:$0xf0] }
  0x47   :  { %v3478_v50 = vld [vmem:[#allocation2 + $0x520] sm:$0xf]  ;;  %v4394_v51 = vld [vmem:[#allocation2 + $0x52c] sm:$0xf0]  ;;  %v3351_v59 = vor.u32 %v4362_v47, %v3350_v46  ;;  %1705 = vmatpush.bf16.msrb.mxu1 %v3495_v48  ;;  %1718 = vmatpush.bf16.msrb.mxu2 %v3623_v49  ;;  %v4284_v26 = vld [vmem:[#allocation2 + $0x1c4] sm:$0xf]  ;;  %v2923_v39 = vor.u32 %v4252_v17, %v2920_v18 }
  0x48   :  { %v59_v52 = vld [vmem:[%s4998_s0 + $0x8] sm:$0xff]  ;;  %v4426_v55 = vld [vmem:[#allocation2 + $0x62c] sm:$0xf0]  ;;  %v3479_v63 = vor.u32 %v4394_v51, %v3478_v50  ;;  %1731 = vmatpush.bf16.msrb.mxu3 %v3751_v53  ;;  %v3048_v29 = vld [vmem:[#allocation2 + $0x1d0] sm:$0xf0] }
  0x49   :  { %v3606_v54 = vld [vmem:[#allocation2 + $0x620] sm:$0xf]  ;;  %64 = vst [vmem:[#allocation1 + $0x20] ss:$4 sm:$0xff] %v59_v52  ;;  %v4458_v57 = vld [vmem:[#allocation2 + $0x72c] sm:$0xf0]  ;;  %1693 = vmatpush.bf16.msrb.mxu0 %v3351_v59  ;;  %v3051_v43 = vor.u32 %v4284_v26, %v3048_v29 }
  0x4a   :  { %v3734_v56 = vld [vmem:[#allocation2 + $0x720] sm:$0xf]  ;;  %v4358_v60 = vld [vmem:[#allocation2 + $0x40c] sm:$0xf0]  ;;  %v3607_v0 = vor.u32 %v4426_v55, %v3606_v54  ;;  %v4316_v30 = vld [vmem:[#allocation2 + $0x2c4] sm:$0xf] }
  0x4b   :  { %v3334_v58 = vld [vmem:[#allocation2 + $0x400] sm:$0xf]  ;;  %v4390_v62 = vld [vmem:[#allocation2 + $0x50c] sm:$0xf0]  ;;  %v3735_v4 = vor.u32 %v4458_v57, %v3734_v56  ;;  %1706 = vmatpush.bf16.msrb.mxu1 %v3479_v63  ;;  %v3176_v31 = vld [vmem:[#allocation2 + $0x2d0] sm:$0xf0] }
  0x4c   :  { %v3462_v61 = vld [vmem:[#allocation2 + $0x500] sm:$0xf]  ;;  %v4422_v2 = vld [vmem:[#allocation2 + $0x60c] sm:$0xf0]  ;;  %v3335_v11 = vor.u32 %v4358_v60, %v3334_v58  ;;  %1719 = vmatpush.bf16.msrb.mxu2 %v3607_v0  ;;  %v4348_v35 = vld [vmem:[#allocation2 + $0x3c4] sm:$0xf]  ;;  %v3179_v44 = vor.u32 %v4316_v30, %v3176_v31 }
  0x4d   :  { %v3590_v1 = vld [vmem:[#allocation2 + $0x600] sm:$0xf]  ;;  %v4454_v5 = vld [vmem:[#allocation2 + $0x70c] sm:$0xf0]  ;;  %v3463_v15 = vor.u32 %v4390_v62, %v3462_v61  ;;  %1732 = vmatpush.bf16.msrb.mxu3 %v3735_v4  ;;  %v3304_v36 = vld [vmem:[#allocation2 + $0x3d0] sm:$0xf0] }
  0x4e   :  { %v3718_v3 = vld [vmem:[#allocation2 + $0x700] sm:$0xf]  ;;  %v3591_v16 = vor.u32 %v4422_v2, %v3590_v1  ;;  %1694 = vmatpush.bf16.msrb.mxu0 %v3335_v11  ;;  %v4248_v45 = vld [vmem:[#allocation2 + $0xa4] sm:$0xf]  ;;  %v2904_v46 = vld [vmem:[#allocation2 + $0xb0] sm:$0xf0]  ;;  %v3307_v48 = vor.u32 %v4348_v35, %v3304_v36 }
  0x4f   :  { %v3719_v20 = vor.u32 %v4454_v5, %v3718_v3  ;;  %1707 = vmatpush.bf16.msrb.mxu1 %v3463_v15  ;;  %v4280_v47 = vld [vmem:[#allocation2 + $0x1a4] sm:$0xf]  ;;  %v3032_v49 = vld [vmem:[#allocation2 + $0x1b0] sm:$0xf0]  ;;  %v2907_v54 = vor.u32 %v4248_v45, %v2904_v46 }
  0x50   :  { %v71_v19 = vld.sshfl [vmem:[#allocation1 + $0x30] sm:$0xff pattern:$0x73625140]  ;;  %v69_v22 = vld.sshfl [vmem:[#allocation1 + $0x20] sm:$0xff pattern:$0x73625140]  ;;  %1720 = vmatpush.bf16.msrb.mxu2 %v3591_v16  ;;  %v3035_v55 = vor.u32 %v4280_v47, %v3032_v49 }
  0x51   :  { %v72_v23 = vld.sshfl [vmem:[#allocation1 + $0x38] sm:$0xff pattern:$0x73625140]  ;;  %v70_v27 = vld.sshfl [vmem:[#allocation1 + $0x28] sm:$0xff pattern:$0x73625140]  ;;  %v4709_v32 = vpack.c.bf16 %v71_v19, %v71_v19  ;;  %v4711_v37 = vpack.c.bf16 %v69_v22, %v69_v22  ;;  %1733 = vmatpush.bf16.msrb.mxu3 %v3719_v20 }
  0x52   :  { %v4713_v38 = vpack.c.bf16 %v72_v23, %v72_v23  ;;  %1739 = vmatpush.bf16.msra.mxu0 %v2939_v21  ;;  %v4715_v40 = vpack.c.bf16 %v70_v27, %v70_v27  ;;  %v4312_v50 = vld [vmem:[#allocation2 + $0x2a4] sm:$0xf]  ;;  %v3160_v51 = vld [vmem:[#allocation2 + $0x2b0] sm:$0xf0] }
  0x53   :  { %1752 = vmatpush.bf16.msra.mxu1 %v3067_v24  ;;  %v4344_v52 = vld [vmem:[#allocation2 + $0x3a4] sm:$0xf]  ;;  %v3288_v53 = vld [vmem:[#allocation2 + $0x3b0] sm:$0xf0]  ;;  %v3163_v56 = vor.u32 %v4312_v50, %v3160_v51 }
  0x54   :  { %1765 = vmatpush.bf16.msra.mxu2 %v3195_v25  ;;  %v4244_v57 = vld [vmem:[#allocation2 + $0x84] sm:$0xf]  ;;  %v2888_v58 = vld [vmem:[#allocation2 + $0x90] sm:$0xf0]  ;;  %v3291_v60 = vor.u32 %v4344_v52, %v3288_v53 }
  0x55   :  { %1778 = vmatpush.bf16.msra.mxu3 %v3323_v28  ;;  %1721 = vmatmul.bf16.vlgmr.msrb.gmra.mxu2 %v4709_v32  ;;  %v4276_v59 = vld [vmem:[#allocation2 + $0x184] sm:$0xf]  ;;  %v3016_v61 = vld [vmem:[#allocation2 + $0x190] sm:$0xf0]  ;;  %v2891_v2 = vor.u32 %v4244_v57, %v2888_v58 }
  0x56   :  { %1695 = vmatmul.bf16.vlgmr.msrb.gmra.mxu0 %v4711_v37  ;;  %1734 = vmatmul.bf16.vlgmr.msrb.gmra.mxu3 %v4713_v38  ;;  %v4308_v62 = vld [vmem:[#allocation2 + $0x284] sm:$0xf]  ;;  %v3144_v63 = vld [vmem:[#allocation2 + $0x290] sm:$0xf0]  ;;  %v3019_v3 = vor.u32 %v4276_v59, %v3016_v61 }
  0x57   :  { %1740 = vmatpush.bf16.msra.mxu0 %v2923_v39  ;;  %1708 = vmatmul.bf16.vlgmr.msrb.gmra.mxu1 %v4715_v40  ;;  %v4340_v0 = vld [vmem:[#allocation2 + $0x384] sm:$0xf]  ;;  %v3272_v1 = vld [vmem:[#allocation2 + $0x390] sm:$0xf0]  ;;  %v3147_v4 = vor.u32 %v4308_v62, %v3144_v63 }
  0x58   :  { %1753 = vmatpush.bf16.msra.mxu1 %v3051_v43  ;;  %1766 = vmatpush.bf16.msra.mxu2 %v3179_v44  ;;  %v4240_v5 = vld [vmem:[#allocation2 + $0x64] sm:$0xf]  ;;  %v2872_v6 = vld [vmem:[#allocation2 + $0x70] sm:$0xf0]  ;;  %v3275_v8 = vor.u32 %v4340_v0, %v3272_v1 }
  0x59   :  { %1779 = vmatpush.bf16.msra.mxu3 %v3307_v48  ;;  %v4272_v7 = vld [vmem:[#allocation2 + $0x164] sm:$0xf]  ;;  %v3000_v9 = vld [vmem:[#allocation2 + $0x170] sm:$0xf0]  ;;  %v2875_v14 = vor.u32 %v4240_v5, %v2872_v6 }
  0x5a   :  { %v4304_v10 = vld [vmem:[#allocation2 + $0x264] sm:$0xf]  ;;  %v3128_v11 = vld [vmem:[#allocation2 + $0x270] sm:$0xf0]  ;;  %v3003_v15 = vor.u32 %v4272_v7, %v3000_v9 }
  0x5b   :  { %1741 = vmatpush.bf16.msra.mxu0 %v2907_v54  ;;  %v4336_v12 = vld [vmem:[#allocation2 + $0x364] sm:$0xf]  ;;  %v3256_v13 = vld [vmem:[#allocation2 + $0x370] sm:$0xf0]  ;;  %v3131_v16 = vor.u32 %v4304_v10, %v3128_v11 }
  0x5c   :  { %1754 = vmatpush.bf16.msra.mxu1 %v3035_v55  ;;  %1767 = vmatpush.bf16.msra.mxu2 %v3163_v56  ;;  %v4236_v17 = vld [vmem:[#allocation2 + $0x44] sm:$0xf]  ;;  %v2856_v18 = vld [vmem:[#allocation2 + $0x50] sm:$0xf0]  ;;  %v3259_v20 = vor.u32 %v4336_v12, %v3256_v13 }
  0x5d   :  { %1780 = vmatpush.bf16.msra.mxu3 %v3291_v60  ;;  %v4268_v19 = vld [vmem:[#allocation2 + $0x144] sm:$0xf]  ;;  %v2984_v21 = vld [vmem:[#allocation2 + $0x150] sm:$0xf0]  ;;  %v2859_v26 = vor.u32 %v4236_v17, %v2856_v18 }
  0x5e   :  { %v4300_v22 = vld [vmem:[#allocation2 + $0x244] sm:$0xf]  ;;  %v3112_v23 = vld [vmem:[#allocation2 + $0x250] sm:$0xf0]  ;;  %v2987_v27 = vor.u32 %v4268_v19, %v2984_v21 }
  0x5f   :  { %1742 = vmatpush.bf16.msra.mxu0 %v2891_v2  ;;  %v4332_v24 = vld [vmem:[#allocation2 + $0x344] sm:$0xf]  ;;  %v3240_v25 = vld [vmem:[#allocation2 + $0x350] sm:$0xf0]  ;;  %v3115_v28 = vor.u32 %v4300_v22, %v3112_v23 }
  0x60   :  { %1755 = vmatpush.bf16.msra.mxu1 %v3019_v3  ;;  %1768 = vmatpush.bf16.msra.mxu2 %v3147_v4  ;;  %v4232_v29 = vld [vmem:[#allocation2 + $0x24] sm:$0xf]  ;;  %v2840_v30 = vld [vmem:[#allocation2 + $0x30] sm:$0xf0]  ;;  %v3243_v35 = vor.u32 %v4332_v24, %v3240_v25 }
  0x61   :  { %1781 = vmatpush.bf16.msra.mxu3 %v3275_v8  ;;  %v4264_v31 = vld [vmem:[#allocation2 + $0x124] sm:$0xf]  ;;  %v2968_v36 = vld [vmem:[#allocation2 + $0x130] sm:$0xf0]  ;;  %v2843_v46 = vor.u32 %v4232_v29, %v2840_v30 }
  0x62   :  { %v4296_v39 = vld [vmem:[#allocation2 + $0x224] sm:$0xf]  ;;  %v3096_v43 = vld [vmem:[#allocation2 + $0x230] sm:$0xf0]  ;;  %v2971_v49 = vor.u32 %v4264_v31, %v2968_v36 }
  0x63   :  { %1743 = vmatpush.bf16.msra.mxu0 %v2875_v14  ;;  %v4328_v44 = vld [vmem:[#allocation2 + $0x324] sm:$0xf]  ;;  %v3224_v45 = vld [vmem:[#allocation2 + $0x330] sm:$0xf0]  ;;  %v3099_v50 = vor.u32 %v4296_v39, %v3096_v43 }
  0x64   :  { %1756 = vmatpush.bf16.msra.mxu1 %v3003_v15  ;;  %1769 = vmatpush.bf16.msra.mxu2 %v3131_v16  ;;  %v4228_v47 = vld [vmem:[#allocation2 + $0x4] sm:$0xf]  ;;  %v2824_v48 = vld [vmem:[#allocation2 + $0x10] sm:$0xf0]  ;;  %v3227_v54 = vor.u32 %v4328_v44, %v3224_v45 }
  0x65   :  { %1782 = vmatpush.bf16.msra.mxu3 %v3259_v20  ;;  %v4260_v51 = vld [vmem:[#allocation2 + $0x104] sm:$0xf]  ;;  %v2952_v52 = vld [vmem:[#allocation2 + $0x110] sm:$0xf0]  ;;  %v2827_v61 = vor.u32 %v4228_v47, %v2824_v48 }
  0x66   :  { %v4292_v53 = vld [vmem:[#allocation2 + $0x204] sm:$0xf]  ;;  %v3080_v55 = vld [vmem:[#allocation2 + $0x210] sm:$0xf0]  ;;  %v2955_v1 = vor.u32 %v4260_v51, %v2952_v52 }
  0x67   :  { %1744 = vmatpush.bf16.msra.mxu0 %v2859_v26  ;;  %v4324_v56 = vld [vmem:[#allocation2 + $0x304] sm:$0xf]  ;;  %v3208_v57 = vld [vmem:[#allocation2 + $0x310] sm:$0xf0]  ;;  %v3083_v2 = vor.u32 %v4292_v53, %v3080_v55 }
  0x68   :  { %1757 = vmatpush.bf16.msra.mxu1 %v2987_v27  ;;  %1770 = vmatpush.bf16.msra.mxu2 %v3115_v28  ;;  %v4384_v58 = vld [vmem:[#allocation2 + $0x4e4] sm:$0xf]  ;;  %v3448_v59 = vld [vmem:[#allocation2 + $0x4f0] sm:$0xf0]  ;;  %v3211_v5 = vor.u32 %v4324_v56, %v3208_v57 }
  0x69   :  { %1783 = vmatpush.bf16.msra.mxu3 %v3243_v35  ;;  %v4416_v60 = vld [vmem:[#allocation2 + $0x5e4] sm:$0xf]  ;;  %v3576_v62 = vld [vmem:[#allocation2 + $0x5f0] sm:$0xf0]  ;;  %v3451_v6 = vor.u32 %v4384_v58, %v3448_v59 }
  0x6a   :  { %v4448_v63 = vld [vmem:[#allocation2 + $0x6e4] sm:$0xf]  ;;  %v3704_v0 = vld [vmem:[#allocation2 + $0x6f0] sm:$0xf0]  ;;  %v3579_v7 = vor.u32 %v4416_v60, %v3576_v62 }
  0x6b   :  { %1745 = vmatpush.bf16.msra.mxu0 %v2843_v46  ;;  %v4480_v3 = vld [vmem:[#allocation2 + $0x7e4] sm:$0xf]  ;;  %v3832_v4 = vld [vmem:[#allocation2 + $0x7f0] sm:$0xf0]  ;;  %v3707_v8 = vor.u32 %v4448_v63, %v3704_v0 }
  0x6c   :  { %1758 = vmatpush.bf16.msra.mxu1 %v2971_v49  ;;  %1771 = vmatpush.bf16.msra.mxu2 %v3099_v50  ;;  %v4380_v9 = vld [vmem:[#allocation2 + $0x4c4] sm:$0xf]  ;;  %v3432_v10 = vld [vmem:[#allocation2 + $0x4d0] sm:$0xf0]  ;;  %v3835_v12 = vor.u32 %v4480_v3, %v3832_v4 }
  0x6d   :  { %1784 = vmatpush.bf16.msra.mxu3 %v3227_v54  ;;  %v4412_v11 = vld [vmem:[#allocation2 + $0x5c4] sm:$0xf]  ;;  %v3560_v13 = vld [vmem:[#allocation2 + $0x5d0] sm:$0xf0]  ;;  %v3435_v18 = vor.u32 %v4380_v9, %v3432_v10 }
  0x6e   :  { %v4444_v14 = vld [vmem:[#allocation2 + $0x6c4] sm:$0xf]  ;;  %v3688_v15 = vld [vmem:[#allocation2 + $0x6d0] sm:$0xf0]  ;;  %v3563_v19 = vor.u32 %v4412_v11, %v3560_v13 }
  0x6f   :  { %1746 = vmatpush.bf16.msra.mxu0 %v2827_v61  ;;  %v4476_v16 = vld [vmem:[#allocation2 + $0x7c4] sm:$0xf]  ;;  %v3816_v17 = vld [vmem:[#allocation2 + $0x7d0] sm:$0xf0]  ;;  %v3691_v20 = vor.u32 %v4444_v14, %v3688_v15 }
  0x70   :  { %1759 = vmatpush.bf16.msra.mxu1 %v2955_v1  ;;  %1772 = vmatpush.bf16.msra.mxu2 %v3083_v2  ;;  %v4376_v21 = vld [vmem:[#allocation2 + $0x4a4] sm:$0xf]  ;;  %v3416_v22 = vld [vmem:[#allocation2 + $0x4b0] sm:$0xf0]  ;;  %v3819_v24 = vor.u32 %v4476_v16, %v3816_v17 }
  0x71   :  { %1785 = vmatpush.bf16.msra.mxu3 %v3211_v5  ;;  %v4408_v23 = vld [vmem:[#allocation2 + $0x5a4] sm:$0xf]  ;;  %v3544_v25 = vld [vmem:[#allocation2 + $0x5b0] sm:$0xf0]  ;;  %v3419_v30 = vor.u32 %v4376_v21, %v3416_v22 }
  0x72   :  { %v4440_v26 = vld [vmem:[#allocation2 + $0x6a4] sm:$0xf]  ;;  %v3672_v27 = vld [vmem:[#allocation2 + $0x6b0] sm:$0xf0]  ;;  %1747 = vmatmul.bf16.vlgmr.msra.gmra.mxu0 %v4696_v34  ;;  %v3547_v31 = vor.u32 %v4408_v23, %v3544_v25 }
  0x73   :  { %1791 = vmatpush.bf16.msrb.mxu0 %v3451_v6  ;;  %1773 = vmatmul.bf16.vlgmr.msra.gmra.mxu2 %v4694_v33  ;;  %v4472_v28 = vld [vmem:[#allocation2 + $0x7a4] sm:$0xf]  ;;  %v3800_v29 = vld [vmem:[#allocation2 + $0x7b0] sm:$0xf0]  ;;  %v3675_v35 = vor.u32 %v4440_v26, %v3672_v27 }
  0x74   :  { %1804 = vmatpush.bf16.msrb.mxu1 %v3579_v7  ;;  %1817 = vmatpush.bf16.msrb.mxu2 %v3707_v8  ;;  %v4372_v36 = vld [vmem:[#allocation2 + $0x484] sm:$0xf]  ;;  %v3400_v39 = vld [vmem:[#allocation2 + $0x490] sm:$0xf0]  ;;  %v3803_v44 = vor.u32 %v4472_v28, %v3800_v29 }
  0x75   :  { %1830 = vmatpush.bf16.msrb.mxu3 %v3835_v12  ;;  %1760 = vmatmul.bf16.vlgmr.msra.gmra.mxu1 %v4700_v42  ;;  %v4404_v43 = vld [vmem:[#allocation2 + $0x584] sm:$0xf]  ;;  %v3528_v45 = vld [vmem:[#allocation2 + $0x590] sm:$0xf0]  ;;  %v3403_v50 = vor.u32 %v4372_v36, %v3400_v39  ;;  %v2942_v39 = vld [vmem:[#allocation2 + $0xe8] sm:$0xf] }
  0x76   :  { %1786 = vmatmul.bf16.vlgmr.msra.gmra.mxu3 %v4698_v41  ;;  %v4436_v46 = vld [vmem:[#allocation2 + $0x684] sm:$0xf]  ;;  %v3656_v47 = vld [vmem:[#allocation2 + $0x690] sm:$0xf0]  ;;  %v3531_v51 = vor.u32 %v4404_v43, %v3528_v45  ;;  %v4259_v43 = vld [vmem:[#allocation2 + $0xf4] sm:$0xf0] }
  0x77   :  { %1792 = vmatpush.bf16.msrb.mxu0 %v3435_v18  ;;  %v4468_v48 = vld [vmem:[#allocation2 + $0x784] sm:$0xf]  ;;  %v3784_v49 = vld [vmem:[#allocation2 + $0x790] sm:$0xf0]  ;;  %v3659_v52 = vor.u32 %v4436_v46, %v3656_v47  ;;  %v4291_v46 = vld [vmem:[#allocation2 + $0x1f4] sm:$0xf0] }
  0x78   :  { %1805 = vmatpush.bf16.msrb.mxu1 %v3563_v19  ;;  %1818 = vmatpush.bf16.msrb.mxu2 %v3691_v20  ;;  %v4368_v53 = vld [vmem:[#allocation2 + $0x464] sm:$0xf]  ;;  %v3384_v54 = vld [vmem:[#allocation2 + $0x470] sm:$0xf0]  ;;  %v3787_v56 = vor.u32 %v4468_v48, %v3784_v49  ;;  %v3198_v47 = vld [vmem:[#allocation2 + $0x2e8] sm:$0xf] }
  0x79   :  { %1831 = vmatpush.bf16.msrb.mxu3 %v3819_v24  ;;  %v4400_v55 = vld [vmem:[#allocation2 + $0x564] sm:$0xf]  ;;  %v3512_v57 = vld [vmem:[#allocation2 + $0x570] sm:$0xf0]  ;;  %v3387_v62 = vor.u32 %v4368_v53, %v3384_v54  ;;  %v4323_v48 = vld [vmem:[#allocation2 + $0x2f4] sm:$0xf0]  ;;  %v2943_v54 = vor.u32 %v4259_v43, %v2942_v39 }
  0x7a   :  { %v4432_v58 = vld [vmem:[#allocation2 + $0x664] sm:$0xf]  ;;  %v3640_v59 = vld [vmem:[#allocation2 + $0x670] sm:$0xf0]  ;;  %v3515_v63 = vor.u32 %v4400_v55, %v3512_v57  ;;  %v2926_v57 = vld [vmem:[#allocation2 + $0xc8] sm:$0xf] }
  0x7b   :  { %1793 = vmatpush.bf16.msrb.mxu0 %v3419_v30  ;;  %v4464_v60 = vld [vmem:[#allocation2 + $0x764] sm:$0xf]  ;;  %v3768_v61 = vld [vmem:[#allocation2 + $0x770] sm:$0xf0]  ;;  %v3643_v0 = vor.u32 %v4432_v58, %v3640_v59  ;;  %v4255_v58 = vld [vmem:[#allocation2 + $0xd4] sm:$0xf0] }
  0x7c   :  { %1806 = vmatpush.bf16.msrb.mxu1 %v3547_v31  ;;  %1819 = vmatpush.bf16.msrb.mxu2 %v3675_v35  ;;  %v4364_v1 = vld [vmem:[#allocation2 + $0x444] sm:$0xf]  ;;  %v3368_v2 = vld [vmem:[#allocation2 + $0x450] sm:$0xf0]  ;;  %v3771_v4 = vor.u32 %v4464_v60, %v3768_v61  ;;  %v3054_v59 = vld [vmem:[#allocation2 + $0x1c8] sm:$0xf] }
  0x7d   :  { %1832 = vmatpush.bf16.msrb.mxu3 %v3803_v44  ;;  %v4396_v3 = vld [vmem:[#allocation2 + $0x544] sm:$0xf]  ;;  %v3496_v5 = vld [vmem:[#allocation2 + $0x550] sm:$0xf0]  ;;  %v3371_v10 = vor.u32 %v4364_v1, %v3368_v2  ;;  %v3070_v44 = vld [vmem:[#allocation2 + $0x1e8] sm:$0xf]  ;;  %v2927_v2 = vor.u32 %v4255_v58, %v2926_v57 }
  0x7e   :  { %v4428_v6 = vld [vmem:[#allocation2 + $0x644] sm:$0xf]  ;;  %v3624_v7 = vld [vmem:[#allocation2 + $0x650] sm:$0xf0]  ;;  %v3499_v11 = vor.u32 %v4396_v3, %v3496_v5  ;;  %v3071_v55 = vor.u32 %v4291_v46, %v3070_v44  ;;  %v4287_v61 = vld [vmem:[#allocation2 + $0x1d4] sm:$0xf0] }
  0x7f   :  { %1794 = vmatpush.bf16.msrb.mxu0 %v3403_v50  ;;  %v4460_v8 = vld [vmem:[#allocation2 + $0x744] sm:$0xf]  ;;  %v3752_v9 = vld [vmem:[#allocation2 + $0x750] sm:$0xf0]  ;;  %v3627_v12 = vor.u32 %v4428_v6, %v3624_v7  ;;  %v4351_v1 = vld [vmem:[#allocation2 + $0x3d4] sm:$0xf0]  ;;  %v3055_v3 = vor.u32 %v4287_v61, %v3054_v59 }
  0x80   :  { %1807 = vmatpush.bf16.msrb.mxu1 %v3531_v51  ;;  %1820 = vmatpush.bf16.msrb.mxu2 %v3659_v52  ;;  %v4360_v13 = vld [vmem:[#allocation2 + $0x424] sm:$0xf]  ;;  %v3352_v14 = vld [vmem:[#allocation2 + $0x430] sm:$0xf0]  ;;  %v3755_v16 = vor.u32 %v4460_v8, %v3752_v9  ;;  %v3326_v51 = vld [vmem:[#allocation2 + $0x3e8] sm:$0xf] }
  0x81   :  { %1833 = vmatpush.bf16.msrb.mxu3 %v3787_v56  ;;  %v4392_v15 = vld [vmem:[#allocation2 + $0x524] sm:$0xf]  ;;  %v3480_v17 = vld [vmem:[#allocation2 + $0x530] sm:$0xf0]  ;;  %v3355_v22 = vor.u32 %v4360_v13, %v3352_v14  ;;  %v4355_v52 = vld [vmem:[#allocation2 + $0x3f4] sm:$0xf0]  ;;  %v3199_v56 = vor.u32 %v4323_v48, %v3198_v47 }
  0x82   :  { %v4424_v18 = vld [vmem:[#allocation2 + $0x624] sm:$0xf]  ;;  %v3608_v19 = vld [vmem:[#allocation2 + $0x630] sm:$0xf0]  ;;  %v3483_v25 = vor.u32 %v4392_v15, %v3480_v17  ;;  %v3327_v60 = vor.u32 %v4355_v52, %v3326_v51  ;;  %v2910_v5 = vld [vmem:[#allocation2 + $0xa8] sm:$0xf] }
  0x83   :  { %1795 = vmatpush.bf16.msrb.mxu0 %v3387_v62  ;;  %v4456_v20 = vld [vmem:[#allocation2 + $0x724] sm:$0xf]  ;;  %v3736_v21 = vld [vmem:[#allocation2 + $0x730] sm:$0xf0]  ;;  %v3611_v26 = vor.u32 %v4424_v18, %v3608_v19  ;;  %v3182_v62 = vld [vmem:[#allocation2 + $0x2c8] sm:$0xf] }
  0x84   :  { %1808 = vmatpush.bf16.msrb.mxu1 %v3515_v63  ;;  %1821 = vmatpush.bf16.msrb.mxu2 %v3643_v0  ;;  %v4356_v23 = vld [vmem:[#allocation2 + $0x404] sm:$0xf]  ;;  %v3336_v24 = vld [vmem:[#allocation2 + $0x410] sm:$0xf0]  ;;  %v3739_v30 = vor.u32 %v4456_v20, %v3736_v21  ;;  %v4319_v63 = vld [vmem:[#allocation2 + $0x2d4] sm:$0xf0] }
  0x85   :  { %1834 = vmatpush.bf16.msrb.mxu3 %v3771_v4  ;;  %v4388_v27 = vld [vmem:[#allocation2 + $0x504] sm:$0xf]  ;;  %v3464_v28 = vld [vmem:[#allocation2 + $0x510] sm:$0xf0]  ;;  %v3339_v45 = vor.u32 %v4356_v23, %v3336_v24  ;;  %v3310_v0 = vld [vmem:[#allocation2 + $0x3c8] sm:$0xf]  ;;  %v3183_v4 = vor.u32 %v4319_v63, %v3182_v62 }
  0x86   :  { %v4420_v29 = vld [vmem:[#allocation2 + $0x604] sm:$0xf]  ;;  %v3592_v31 = vld [vmem:[#allocation2 + $0x610] sm:$0xf0]  ;;  %v3467_v49 = vor.u32 %v4388_v27, %v3464_v28  ;;  %v4251_v6 = vld [vmem:[#allocation2 + $0xb4] sm:$0xf0]  ;;  %v3311_v8 = vor.u32 %v4351_v1, %v3310_v0 }
  0x87   :  { %1796 = vmatpush.bf16.msrb.mxu0 %v3371_v10  ;;  %v4452_v35 = vld [vmem:[#allocation2 + $0x704] sm:$0xf]  ;;  %v3720_v36 = vld [vmem:[#allocation2 + $0x710] sm:$0xf0]  ;;  %v3595_v50 = vor.u32 %v4420_v29, %v3592_v31  ;;  %v3038_v7 = vld [vmem:[#allocation2 + $0x1a8] sm:$0xf]  ;;  %v2911_v14 = vor.u32 %v4251_v6, %v2910_v5 }
  0x88   :  { %1809 = vmatpush.bf16.msrb.mxu1 %v3499_v11  ;;  %1822 = vmatpush.bf16.msrb.mxu2 %v3627_v12  ;;  %v3723_v53 = vor.u32 %v4452_v35, %v3720_v36  ;;  %v4283_v9 = vld [vmem:[#allocation2 + $0x1b4] sm:$0xf0]  ;;  %v3166_v10 = vld [vmem:[#allocation2 + $0x2a8] sm:$0xf] }
  0x89   :  { %1835 = vmatpush.bf16.msrb.mxu3 %v3755_v16  ;;  %v4315_v11 = vld [vmem:[#allocation2 + $0x2b4] sm:$0xf0]  ;;  %v3294_v12 = vld [vmem:[#allocation2 + $0x3a8] sm:$0xf]  ;;  %v3039_v15 = vor.u32 %v4283_v9, %v3038_v7 }
  0x8a   :  { %v4347_v13 = vld [vmem:[#allocation2 + $0x3b4] sm:$0xf0]  ;;  %v3167_v16 = vor.u32 %v4315_v11, %v3166_v10  ;;  %v2894_v17 = vld [vmem:[#allocation2 + $0x88] sm:$0xf] }
  0x8b   :  { %1797 = vmatpush.bf16.msrb.mxu0 %v3355_v22  ;;  %v4247_v18 = vld [vmem:[#allocation2 + $0x94] sm:$0xf0]  ;;  %v3022_v19 = vld [vmem:[#allocation2 + $0x188] sm:$0xf]  ;;  %v3295_v20 = vor.u32 %v4347_v13, %v3294_v12 }
  0x8c   :  { %1810 = vmatpush.bf16.msrb.mxu1 %v3483_v25  ;;  %1823 = vmatpush.bf16.msrb.mxu2 %v3611_v26  ;;  %v4279_v21 = vld [vmem:[#allocation2 + $0x194] sm:$0xf0]  ;;  %v3150_v22 = vld [vmem:[#allocation2 + $0x288] sm:$0xf]  ;;  %v2895_v26 = vor.u32 %v4247_v18, %v2894_v17 }
  0x8d   :  { %1836 = vmatpush.bf16.msrb.mxu3 %v3739_v30  ;;  %v4311_v23 = vld [vmem:[#allocation2 + $0x294] sm:$0xf0]  ;;  %v3278_v24 = vld [vmem:[#allocation2 + $0x388] sm:$0xf]  ;;  %v3023_v27 = vor.u32 %v4279_v21, %v3022_v19 }
  0x8e   :  { %v4343_v25 = vld [vmem:[#allocation2 + $0x394] sm:$0xf0]  ;;  %v3151_v28 = vor.u32 %v4311_v23, %v3150_v22  ;;  %v2878_v29 = vld [vmem:[#allocation2 + $0x68] sm:$0xf] }
  0x8f   :  { %1798 = vmatpush.bf16.msrb.mxu0 %v3339_v45  ;;  %v4243_v30 = vld [vmem:[#allocation2 + $0x74] sm:$0xf0]  ;;  %v3006_v31 = vld [vmem:[#allocation2 + $0x168] sm:$0xf]  ;;  %v3279_v35 = vor.u32 %v4343_v25, %v3278_v24 }
  0x90   :  { %1811 = vmatpush.bf16.msrb.mxu1 %v3467_v49  ;;  %1824 = vmatpush.bf16.msrb.mxu2 %v3595_v50  ;;  %v4275_v36 = vld [vmem:[#allocation2 + $0x174] sm:$0xf0]  ;;  %v3134_v39 = vld [vmem:[#allocation2 + $0x268] sm:$0xf]  ;;  %v2879_v46 = vor.u32 %v4243_v30, %v2878_v29 }
  0x91   :  { %1837 = vmatpush.bf16.msrb.mxu3 %v3723_v53  ;;  %v4307_v43 = vld [vmem:[#allocation2 + $0x274] sm:$0xf0]  ;;  %v3262_v44 = vld [vmem:[#allocation2 + $0x368] sm:$0xf]  ;;  %v3007_v47 = vor.u32 %v4275_v36, %v3006_v31 }
  0x92   :  { %1799 = vmatmul.bf16.vlgmr.msrb.gmra.mxu0 %v4711_v37  ;;  %v4339_v45 = vld [vmem:[#allocation2 + $0x374] sm:$0xf0]  ;;  %v3135_v48 = vor.u32 %v4307_v43, %v3134_v39  ;;  %v2862_v49 = vld [vmem:[#allocation2 + $0x48] sm:$0xf] }
  0x93   :  { %1843 = vmatpush.bf16.msra.mxu0 %v2943_v54  ;;  %1825 = vmatmul.bf16.vlgmr.msrb.gmra.mxu2 %v4709_v32  ;;  %v4239_v50 = vld [vmem:[#allocation2 + $0x54] sm:$0xf0]  ;;  %v2990_v51 = vld [vmem:[#allocation2 + $0x148] sm:$0xf]  ;;  %v3263_v52 = vor.u32 %v4339_v45, %v3262_v44 }
  0x94   :  { %1856 = vmatpush.bf16.msra.mxu1 %v3071_v55  ;;  %1869 = vmatpush.bf16.msra.mxu2 %v3199_v56  ;;  %v4271_v53 = vld [vmem:[#allocation2 + $0x154] sm:$0xf0]  ;;  %v3118_v54 = vld [vmem:[#allocation2 + $0x248] sm:$0xf]  ;;  %v2863_v58 = vor.u32 %v4239_v50, %v2862_v49 }
  0x95   :  { %1882 = vmatpush.bf16.msra.mxu3 %v3327_v60  ;;  %1812 = vmatmul.bf16.vlgmr.msrb.gmra.mxu1 %v4715_v40  ;;  %v4303_v55 = vld [vmem:[#allocation2 + $0x254] sm:$0xf0]  ;;  %v3246_v56 = vld [vmem:[#allocation2 + $0x348] sm:$0xf]  ;;  %v2991_v59 = vor.u32 %v4271_v53, %v2990_v51 }
  0x96   :  { %1838 = vmatmul.bf16.vlgmr.msrb.gmra.mxu3 %v4713_v38  ;;  %v4335_v57 = vld [vmem:[#allocation2 + $0x354] sm:$0xf0]  ;;  %v3119_v60 = vor.u32 %v4303_v55, %v3118_v54  ;;  %v2846_v61 = vld [vmem:[#allocation2 + $0x28] sm:$0xf] }
  0x97   :  { %1844 = vmatpush.bf16.msra.mxu0 %v2927_v2  ;;  %v4235_v62 = vld [vmem:[#allocation2 + $0x34] sm:$0xf0]  ;;  %v2974_v63 = vld [vmem:[#allocation2 + $0x128] sm:$0xf]  ;;  %v3247_v0 = vor.u32 %v4335_v57, %v3246_v56 }
  0x98   :  { %1857 = vmatpush.bf16.msra.mxu1 %v3055_v3  ;;  %1870 = vmatpush.bf16.msra.mxu2 %v3183_v4  ;;  %v4267_v1 = vld [vmem:[#allocation2 + $0x134] sm:$0xf0]  ;;  %v3102_v2 = vld [vmem:[#allocation2 + $0x228] sm:$0xf]  ;;  %v2847_v6 = vor.u32 %v4235_v62, %v2846_v61 }
  0x99   :  { %1883 = vmatpush.bf16.msra.mxu3 %v3311_v8  ;;  %v4299_v3 = vld [vmem:[#allocation2 + $0x234] sm:$0xf0]  ;;  %v3230_v4 = vld [vmem:[#allocation2 + $0x328] sm:$0xf]  ;;  %v2975_v9 = vor.u32 %v4267_v1, %v2974_v63 }
  0x9a   :  { %v4331_v5 = vld [vmem:[#allocation2 + $0x334] sm:$0xf0]  ;;  %v2830_v7 = vld [vmem:[#allocation2 + $0x8] sm:$0xf]  ;;  %v3103_v10 = vor.u32 %v4299_v3, %v3102_v2 }
  0x9b   :  { %1845 = vmatpush.bf16.msra.mxu0 %v2911_v14  ;;  %v4231_v8 = vld [vmem:[#allocation2 + $0x14] sm:$0xf0]  ;;  %v2958_v11 = vld [vmem:[#allocation2 + $0x108] sm:$0xf]  ;;  %v3231_v14 = vor.u32 %v4331_v5, %v3230_v4 }
  0x9c   :  { %1858 = vmatpush.bf16.msra.mxu1 %v3039_v15  ;;  %1871 = vmatpush.bf16.msra.mxu2 %v3167_v16  ;;  %v4263_v12 = vld [vmem:[#allocation2 + $0x114] sm:$0xf0]  ;;  %v3086_v13 = vld [vmem:[#allocation2 + $0x208] sm:$0xf]  ;;  %v2831_v21 = vor.u32 %v4231_v8, %v2830_v7 }
  0x9d   :  { %1884 = vmatpush.bf16.msra.mxu3 %v3295_v20  ;;  %v4295_v15 = vld [vmem:[#allocation2 + $0x214] sm:$0xf0]  ;;  %v3214_v16 = vld [vmem:[#allocation2 + $0x308] sm:$0xf]  ;;  %v2959_v25 = vor.u32 %v4263_v12, %v2958_v11 }
  0x9e   :  { %v4327_v17 = vld [vmem:[#allocation2 + $0x314] sm:$0xf0]  ;;  %v3454_v18 = vld [vmem:[#allocation2 + $0x4e8] sm:$0xf] }
  0x9f   :  { %1846 = vmatpush.bf16.msra.mxu0 %v2895_v26  ;;  %v4387_v19 = vld [vmem:[#allocation2 + $0x4f4] sm:$0xf0]  ;;  %v3582_v20 = vld [vmem:[#allocation2 + $0x5e8] sm:$0xf]  ;;  %v3087_v26 = vor.u32 %v4295_v15, %v3086_v13  ;;  %v3215_v29 = vor.u32 %v4327_v17, %v3214_v16 }
  0xa0   :  { %1859 = vmatpush.bf16.msra.mxu1 %v3023_v27  ;;  %1872 = vmatpush.bf16.msra.mxu2 %v3151_v28  ;;  %v4419_v22 = vld [vmem:[#allocation2 + $0x5f4] sm:$0xf0]  ;;  %v3710_v23 = vld [vmem:[#allocation2 + $0x6e8] sm:$0xf]  ;;  %v3455_v30 = vor.u32 %v4387_v19, %v3454_v18 }
  0xa1   :  { %1885 = vmatpush.bf16.msra.mxu3 %v3279_v35  ;;  %v4451_v24 = vld [vmem:[#allocation2 + $0x6f4] sm:$0xf0]  ;;  %v3838_v27 = vld [vmem:[#allocation2 + $0x7e8] sm:$0xf]  ;;  %v3583_v31 = vor.u32 %v4419_v22, %v3582_v20 }
  0xa2   :  { %v4483_v28 = vld [vmem:[#allocation2 + $0x7f4] sm:$0xf0]  ;;  %v3711_v35 = vor.u32 %v4451_v24, %v3710_v23  ;;  %v3438_v36 = vld [vmem:[#allocation2 + $0x4c8] sm:$0xf] }
  0xa3   :  { %1847 = vmatpush.bf16.msra.mxu0 %v2879_v46  ;;  %v4383_v39 = vld [vmem:[#allocation2 + $0x4d4] sm:$0xf0]  ;;  %v3566_v43 = vld [vmem:[#allocation2 + $0x5c8] sm:$0xf]  ;;  %v3839_v44 = vor.u32 %v4483_v28, %v3838_v27 }
  0xa4   :  { %1860 = vmatpush.bf16.msra.mxu1 %v3007_v47  ;;  %1873 = vmatpush.bf16.msra.mxu2 %v3135_v48  ;;  %v4415_v45 = vld [vmem:[#allocation2 + $0x5d4] sm:$0xf0]  ;;  %v3694_v46 = vld [vmem:[#allocation2 + $0x6c8] sm:$0xf]  ;;  %v3439_v50 = vor.u32 %v4383_v39, %v3438_v36 }
  0xa5   :  { %1886 = vmatpush.bf16.msra.mxu3 %v3263_v52  ;;  %v4447_v47 = vld [vmem:[#allocation2 + $0x6d4] sm:$0xf0]  ;;  %v3822_v48 = vld [vmem:[#allocation2 + $0x7c8] sm:$0xf]  ;;  %v3567_v51 = vor.u32 %v4415_v45, %v3566_v43 }
  0xa6   :  { %v4479_v49 = vld [vmem:[#allocation2 + $0x7d4] sm:$0xf0]  ;;  %v3695_v52 = vor.u32 %v4447_v47, %v3694_v46  ;;  %v3422_v53 = vld [vmem:[#allocation2 + $0x4a8] sm:$0xf] }
  0xa7   :  { %1848 = vmatpush.bf16.msra.mxu0 %v2863_v58  ;;  %v4379_v54 = vld [vmem:[#allocation2 + $0x4b4] sm:$0xf0]  ;;  %v3550_v55 = vld [vmem:[#allocation2 + $0x5a8] sm:$0xf]  ;;  %v3823_v56 = vor.u32 %v4479_v49, %v3822_v48 }
  0xa8   :  { %1861 = vmatpush.bf16.msra.mxu1 %v2991_v59  ;;  %1874 = vmatpush.bf16.msra.mxu2 %v3119_v60  ;;  %v4411_v57 = vld [vmem:[#allocation2 + $0x5b4] sm:$0xf0]  ;;  %v3678_v58 = vld [vmem:[#allocation2 + $0x6a8] sm:$0xf]  ;;  %v3423_v62 = vor.u32 %v4379_v54, %v3422_v53 }
  0xa9   :  { %1887 = vmatpush.bf16.msra.mxu3 %v3247_v0  ;;  %v4443_v59 = vld [vmem:[#allocation2 + $0x6b4] sm:$0xf0]  ;;  %v3806_v60 = vld [vmem:[#allocation2 + $0x7a8] sm:$0xf]  ;;  %v3551_v63 = vor.u32 %v4411_v57, %v3550_v55 }
  0xaa   :  { %v4475_v61 = vld [vmem:[#allocation2 + $0x7b4] sm:$0xf0]  ;;  %v3679_v0 = vor.u32 %v4443_v59, %v3678_v58  ;;  %v3406_v1 = vld [vmem:[#allocation2 + $0x488] sm:$0xf] }
  0xab   :  { %1849 = vmatpush.bf16.msra.mxu0 %v2847_v6  ;;  %v4375_v2 = vld [vmem:[#allocation2 + $0x494] sm:$0xf0]  ;;  %v3534_v3 = vld [vmem:[#allocation2 + $0x588] sm:$0xf]  ;;  %v3807_v4 = vor.u32 %v4475_v61, %v3806_v60 }
  0xac   :  { %1862 = vmatpush.bf16.msra.mxu1 %v2975_v9  ;;  %1875 = vmatpush.bf16.msra.mxu2 %v3103_v10  ;;  %v4407_v5 = vld [vmem:[#allocation2 + $0x594] sm:$0xf0]  ;;  %v3662_v6 = vld [vmem:[#allocation2 + $0x688] sm:$0xf]  ;;  %v3407_v10 = vor.u32 %v4375_v2, %v3406_v1 }
  0xad   :  { %1888 = vmatpush.bf16.msra.mxu3 %v3231_v14  ;;  %v4439_v7 = vld [vmem:[#allocation2 + $0x694] sm:$0xf0]  ;;  %v3790_v8 = vld [vmem:[#allocation2 + $0x788] sm:$0xf]  ;;  %v3535_v11 = vor.u32 %v4407_v5, %v3534_v3 }
  0xae   :  { %v4471_v9 = vld [vmem:[#allocation2 + $0x794] sm:$0xf0]  ;;  %v3663_v12 = vor.u32 %v4439_v7, %v3662_v6  ;;  %v3390_v13 = vld [vmem:[#allocation2 + $0x468] sm:$0xf]  ;;  %v4257_v6 = vld [vmem:[#allocation2 + $0xec] sm:$0xf] }
  0xaf   :  { %1850 = vmatpush.bf16.msra.mxu0 %v2831_v21  ;;  %v4371_v14 = vld [vmem:[#allocation2 + $0x474] sm:$0xf0]  ;;  %v3518_v15 = vld [vmem:[#allocation2 + $0x568] sm:$0xf]  ;;  %v3791_v16 = vor.u32 %v4471_v9, %v3790_v8  ;;  %v2944_v7 = vld [vmem:[#allocation2 + $0xf8] sm:$0xf0] }
  0xb0   :  { %1863 = vmatpush.bf16.msra.mxu1 %v2959_v25  ;;  %1876 = vmatpush.bf16.msra.mxu2 %v3087_v26  ;;  %v4403_v17 = vld [vmem:[#allocation2 + $0x574] sm:$0xf0]  ;;  %v3646_v18 = vld [vmem:[#allocation2 + $0x668] sm:$0xf]  ;;  %v3391_v22 = vor.u32 %v4371_v14, %v3390_v13  ;;  %v4289_v8 = vld [vmem:[#allocation2 + $0x1ec] sm:$0xf] }
  0xb1   :  { %1889 = vmatpush.bf16.msra.mxu3 %v3215_v29  ;;  %v4435_v19 = vld [vmem:[#allocation2 + $0x674] sm:$0xf0]  ;;  %v3774_v20 = vld [vmem:[#allocation2 + $0x768] sm:$0xf]  ;;  %v3519_v24 = vor.u32 %v4403_v17, %v3518_v15  ;;  %v3200_v13 = vld [vmem:[#allocation2 + $0x2f8] sm:$0xf0] }
  0xb2   :  { %1851 = vmatmul.bf16.vlgmr.msra.gmra.mxu0 %v4696_v34  ;;  %v4467_v21 = vld [vmem:[#allocation2 + $0x774] sm:$0xf0]  ;;  %v3374_v23 = vld [vmem:[#allocation2 + $0x448] sm:$0xf]  ;;  %v3647_v25 = vor.u32 %v4435_v19, %v3646_v18  ;;  %v4353_v17 = vld [vmem:[#allocation2 + $0x3ec] sm:$0xf] }
  0xb3   :  { %1895 = vmatpush.bf16.msrb.mxu0 %v3455_v30  ;;  %1877 = vmatmul.bf16.vlgmr.msra.gmra.mxu2 %v4694_v33  ;;  %v4367_v26 = vld [vmem:[#allocation2 + $0x454] sm:$0xf0]  ;;  %v3502_v27 = vld [vmem:[#allocation2 + $0x548] sm:$0xf]  ;;  %v3775_v29 = vor.u32 %v4467_v21, %v3774_v20  ;;  %v3328_v18 = vld [vmem:[#allocation2 + $0x3f8] sm:$0xf0]  ;;  %v2947_v20 = vor.u32 %v4257_v6, %v2944_v7 }
  0xb4   :  { %1908 = vmatpush.bf16.msrb.mxu1 %v3583_v31  ;;  %1921 = vmatpush.bf16.msrb.mxu2 %v3711_v35  ;;  %v4399_v28 = vld [vmem:[#allocation2 + $0x554] sm:$0xf0]  ;;  %v3630_v30 = vld [vmem:[#allocation2 + $0x648] sm:$0xf]  ;;  %v3375_v43 = vor.u32 %v4367_v26, %v3374_v23  ;;  %v4285_v26 = vld [vmem:[#allocation2 + $0x1cc] sm:$0xf] }
  0xb5   :  { %1934 = vmatpush.bf16.msrb.mxu3 %v3839_v44  ;;  %1864 = vmatmul.bf16.vlgmr.msra.gmra.mxu1 %v4700_v42  ;;  %v4431_v31 = vld [vmem:[#allocation2 + $0x654] sm:$0xf0]  ;;  %v3758_v36 = vld [vmem:[#allocation2 + $0x748] sm:$0xf]  ;;  %v3503_v45 = vor.u32 %v4399_v28, %v3502_v27  ;;  %v3152_v6 = vld [vmem:[#allocation2 + $0x298] sm:$0xf0] }
  0xb6   :  { %1890 = vmatmul.bf16.vlgmr.msra.gmra.mxu3 %v4698_v41  ;;  %v4736_v35 = vld [vmem:[%s5000_s2] sm:$0xf]  ;;  %v3358_v44 = vld [vmem:[#allocation2 + $0x428] sm:$0xf]  ;;  %v3631_v46 = vor.u32 %v4431_v31, %v3630_v30  ;;  %v3056_v30 = vld [vmem:[#allocation2 + $0x1d8] sm:$0xf0] }
  0xb7   :  { %1896 = vmatpush.bf16.msrb.mxu0 %v3439_v50  ;;  %v4463_v39 = vld [vmem:[#allocation2 + $0x754] sm:$0xf0]  ;;  %v3486_v48 = vld [vmem:[#allocation2 + $0x528] sm:$0xf]  ;;  %v347_v49 = vperm.slane %v4736_v35, 0 }
  0xb8   :  { %1909 = vmatpush.bf16.msrb.mxu1 %v3567_v51  ;;  %1922 = vmatpush.bf16.msrb.mxu2 %v3695_v52  ;;  %v4363_v47 = vld [vmem:[#allocation2 + $0x434] sm:$0xf0]  ;;  %v3759_v50 = vor.u32 %v4463_v39, %v3758_v36  ;;  %v3614_v52 = vld [vmem:[#allocation2 + $0x628] sm:$0xf]  ;;  %v4317_v31 = vld [vmem:[#allocation2 + $0x2cc] sm:$0xf] }
  0xb9   :  { %1935 = vmatpush.bf16.msrb.mxu3 %v3823_v56  ;;  %v4395_v51 = vld [vmem:[#allocation2 + $0x534] sm:$0xf0]  ;;  %v3742_v54 = vld [vmem:[#allocation2 + $0x728] sm:$0xf]  ;;  %v3359_v56 = vor.u32 %v4363_v47, %v3358_v44  ;;  %v3184_v36 = vld [vmem:[#allocation2 + $0x2d8] sm:$0xf0]  ;;  %v3059_v47 = vor.u32 %v4285_v26, %v3056_v30 }
  0xba   :  { %v4427_v53 = vld [vmem:[#allocation2 + $0x634] sm:$0xf0]  ;;  %v3342_v57 = vld [vmem:[#allocation2 + $0x408] sm:$0xf]  ;;  %v3487_v60 = vor.u32 %v4395_v51, %v3486_v48  ;;  %v3312_v44 = vld [vmem:[#allocation2 + $0x3d8] sm:$0xf0]  ;;  %v3187_v48 = vor.u32 %v4317_v31, %v3184_v36 }
  0xbb   :  { %1897 = vmatpush.bf16.msrb.mxu0 %v3423_v62  ;;  %v4459_v55 = vld [vmem:[#allocation2 + $0x734] sm:$0xf0]  ;;  %v3615_v61 = vor.u32 %v4427_v53, %v3614_v52  ;;  %v3470_v62 = vld [vmem:[#allocation2 + $0x508] sm:$0xf]  ;;  %v4281_v51 = vld [vmem:[#allocation2 + $0x1ac] sm:$0xf] }
  0xbc   :  { %1910 = vmatpush.bf16.msrb.mxu1 %v3551_v63  ;;  %1923 = vmatpush.bf16.msrb.mxu2 %v3679_v0  ;;  %v4359_v58 = vld [vmem:[#allocation2 + $0x414] sm:$0xf0]  ;;  %v3598_v0 = vld [vmem:[#allocation2 + $0x608] sm:$0xf]  ;;  %v3743_v2 = vor.u32 %v4459_v55, %v3742_v54  ;;  %v3040_v54 = vld [vmem:[#allocation2 + $0x1b8] sm:$0xf0] }
  0xbd   :  { %1936 = vmatpush.bf16.msrb.mxu3 %v3807_v4  ;;  %v4391_v63 = vld [vmem:[#allocation2 + $0x514] sm:$0xf0]  ;;  %v3726_v4 = vld [vmem:[#allocation2 + $0x708] sm:$0xf]  ;;  %v4313_v55 = vld [vmem:[#allocation2 + $0x2ac] sm:$0xf] }
  0xbe   :  { %v4423_v3 = vld [vmem:[#allocation2 + $0x614] sm:$0xf0]  ;;  %v3471_v15 = vor.u32 %v4391_v63, %v3470_v62  ;;  %v4245_v63 = vld [vmem:[#allocation2 + $0x8c] sm:$0xf] }
  0xbf   :  { %1898 = vmatpush.bf16.msrb.mxu0 %v3407_v10  ;;  %v4455_v5 = vld [vmem:[#allocation2 + $0x714] sm:$0xf0]  ;;  %v3343_v10 = vor.u32 %v4359_v58, %v3342_v57  ;;  %v4345_v57 = vld [vmem:[#allocation2 + $0x3ac] sm:$0xf]  ;;  %v3296_v58 = vld [vmem:[#allocation2 + $0x3b8] sm:$0xf0] }
  0xc0   :  { %1911 = vmatpush.bf16.msrb.mxu1 %v3535_v11  ;;  %1924 = vmatpush.bf16.msrb.mxu2 %v3663_v12  ;;  %v3072_v11 = vld [vmem:[#allocation2 + $0x1f8] sm:$0xf0]  ;;  %v4321_v12 = vld [vmem:[#allocation2 + $0x2ec] sm:$0xf]  ;;  %v3727_v19 = vor.u32 %v4455_v5, %v3726_v4 }
  0xc1   :  { %1937 = vmatpush.bf16.msrb.mxu3 %v3791_v16  ;;  %v3599_v16 = vor.u32 %v4423_v3, %v3598_v0  ;;  %v3203_v23 = vor.u32 %v4321_v12, %v3200_v13  ;;  %v2896_v0 = vld [vmem:[#allocation2 + $0x98] sm:$0xf0]  ;;  %v3299_v3 = vor.u32 %v4345_v57, %v3296_v58  ;;  %v4309_v5 = vld [vmem:[#allocation2 + $0x28c] sm:$0xf] }
  0xc2   :  { %v1644_v59 = vpop.f32.mrf.mxu0  ;;  %v3024_v4 = vld [vmem:[#allocation2 + $0x198] sm:$0xf0]  ;;  %v4341_v7 = vld [vmem:[#allocation2 + $0x38c] sm:$0xf]  ;;  %v3155_v12 = vor.u32 %v4309_v5, %v3152_v6 }
  0xc3   :  { %1899 = vmatpush.bf16.msrb.mxu0 %v3391_v22  ;;  %v1645_v1 = vadd.f32 %v1644_v59, %v347_v49  ;;  %v1657_v9 = vpop.f32.mrf.mxu1  ;;  %v3075_v22 = vor.u32 %v4289_v8, %v3072_v11  ;;  %v4249_v49 = vld [vmem:[#allocation2 + $0xac] sm:$0xf]  ;;  %v3280_v8 = vld [vmem:[#allocation2 + $0x398] sm:$0xf0] }
  0xc4   :  { %1912 = vmatpush.bf16.msrb.mxu1 %v3519_v24  ;;  %1925 = vmatpush.bf16.msrb.mxu2 %v3647_v25  ;;  %v4253_v24 = vld [vmem:[#allocation2 + $0xcc] sm:$0xf]  ;;  %v2928_v25 = vld [vmem:[#allocation2 + $0xd8] sm:$0xf0] }
  0xc5   :  { %1938 = vmatpush.bf16.msrb.mxu3 %v3775_v29  ;;  %v1658_v14 = vadd.f32 %v1657_v9, %v1645_v1  ;;  %v3331_v29 = vor.u32 %v4353_v17, %v3328_v18  ;;  %v4277_v1 = vld [vmem:[#allocation2 + $0x18c] sm:$0xf]  ;;  %v2899_v9 = vor.u32 %v4245_v63, %v2896_v0  ;;  %v3283_v18 = vor.u32 %v4341_v7, %v3280_v8  ;;  %v3232_v63 = vld [vmem:[#allocation2 + $0x338] sm:$0xf0] }
  0xc6   :  { %v3027_v11 = vor.u32 %v4277_v1, %v3024_v4  ;;  %v4241_v13 = vld [vmem:[#allocation2 + $0x6c] sm:$0xf]  ;;  %v2960_v6 = vld [vmem:[#allocation2 + $0x118] sm:$0xf0] }
  0xc7   :  { %1900 = vmatpush.bf16.msrb.mxu0 %v3375_v43  ;;  %v1670_v21 = vpop.f32.mrf.mxu2  ;;  %v4349_v43 = vld [vmem:[#allocation2 + $0x3cc] sm:$0xf] }
  0xc8   :  { %1913 = vmatpush.bf16.msrb.mxu1 %v3503_v45  ;;  %1926 = vmatpush.bf16.msrb.mxu2 %v3631_v46  ;;  %v1671_v27 = vadd.f32 %v1670_v21, %v1658_v14  ;;  %v1683_v28 = vpop.f32.mrf.mxu3  ;;  %v2931_v46 = vor.u32 %v4253_v24, %v2928_v25  ;;  %v3315_v53 = vor.u32 %v4349_v43, %v3312_v44  ;;  %v2880_v14 = vld [vmem:[#allocation2 + $0x78] sm:$0xf0]  ;;  %v4269_v30 = vld [vmem:[#allocation2 + $0x14c] sm:$0xf] }
  0xc9   :  { %1939 = vmatpush.bf16.msrb.mxu3 %v3759_v50  ;;  %v2912_v50 = vld [vmem:[#allocation2 + $0xb8] sm:$0xf0]  ;;  %v2883_v25 = vor.u32 %v4241_v13, %v2880_v14  ;;  %v4301_v43 = vld [vmem:[#allocation2 + $0x24c] sm:$0xf] }
  0xca   :  { %v1646_v39 = vpop.f32.mrf.mxu0  ;;  %v1684_v45 = vadd.f32 %v1683_v28, %v1671_v27  ;;  %v2915_v59 = vor.u32 %v4249_v49, %v2912_v50  ;;  %v3136_v21 = vld [vmem:[#allocation2 + $0x278] sm:$0xf0]  ;;  %v4237_v28 = vld [vmem:[#allocation2 + $0x4c] sm:$0xf] }
  0xcb   :  { %1901 = vmatpush.bf16.msrb.mxu0 %v3359_v56  ;;  %v1659_v52 = vpop.f32.mrf.mxu1  ;;  %v3168_v56 = vld [vmem:[#allocation2 + $0x2b8] sm:$0xf0]  ;;  %v4229_v1 = vld [vmem:[#allocation2 + $0xc] sm:$0xf] }
  0xcc   :  { %1914 = vmatpush.bf16.msrb.mxu1 %v3487_v60  ;;  %1927 = vmatpush.bf16.msrb.mxu2 %v3615_v61  ;;  %v3043_v61 = vor.u32 %v4281_v51, %v3040_v54  ;;  %v3171_v62 = vor.u32 %v4313_v55, %v3168_v56  ;;  %v2992_v39 = vld [vmem:[#allocation2 + $0x158] sm:$0xf0]  ;;  %v4233_v54 = vld [vmem:[#allocation2 + $0x2c] sm:$0xf] }
  0xcd   :  { %1940 = vmatpush.bf16.msrb.mxu3 %v3743_v2  ;;  %v3120_v44 = vld [vmem:[#allocation2 + $0x258] sm:$0xf0]  ;;  %v2995_v52 = vor.u32 %v4269_v30, %v2992_v39  ;;  %v4265_v56 = vld [vmem:[#allocation2 + $0x12c] sm:$0xf] }
  0xce   :  { %v2848_v55 = vld [vmem:[#allocation2 + $0x38] sm:$0xf0]  ;;  %v4261_v5 = vld [vmem:[#allocation2 + $0x10c] sm:$0xf] }
  0xcf   :  { %1902 = vmatpush.bf16.msrb.mxu0 %v3343_v10  ;;  %v1672_v60 = vpop.f32.mrf.mxu2  ;;  %v2851_v0 = vor.u32 %v4233_v54, %v2848_v55  ;;  %v4293_v7 = vld [vmem:[#allocation2 + $0x20c] sm:$0xf]  ;;  %v3440_v30 = vld [vmem:[#allocation2 + $0x4d8] sm:$0xf0] }
  0xd0   :  { %1915 = vmatpush.bf16.msrb.mxu1 %v3471_v15  ;;  %1928 = vmatpush.bf16.msrb.mxu2 %v3599_v16  ;;  %v1685_v2 = vpop.f32.mrf.mxu3  ;;  %v4273_v15 = vld [vmem:[#allocation2 + $0x16c] sm:$0xf]  ;;  %v3568_v39 = vld [vmem:[#allocation2 + $0x5d8] sm:$0xf0] }
  0xd1   :  { %1941 = vmatpush.bf16.msrb.mxu3 %v3727_v19  ;;  %v3008_v19 = vld [vmem:[#allocation2 + $0x178] sm:$0xf0]  ;;  %v4297_v60 = vld [vmem:[#allocation2 + $0x22c] sm:$0xf] }
  0xd2   :  { %1903 = vmatmul.bf16.vlgmr.msrb.gmra.mxu0 %v4711_v37  ;;  %v3011_v26 = vor.u32 %v4273_v15, %v3008_v19  ;;  %v2832_v2 = vld [vmem:[#allocation2 + $0x18] sm:$0xf0]  ;;  %v4385_v14 = vld [vmem:[#allocation2 + $0x4ec] sm:$0xf] }
  0xd3   :  { %1947 = vmatpush.bf16.msra.mxu0 %v2947_v20  ;;  %1929 = vmatmul.bf16.vlgmr.msrb.gmra.mxu2 %v4709_v32  ;;  %v1696_v10 = vpop.f32.mrf.mxu0  ;;  %v4305_v20 = vld [vmem:[#allocation2 + $0x26c] sm:$0xf]  ;;  %v3456_v15 = vld [vmem:[#allocation2 + $0x4f8] sm:$0xf0] }
  0xd4   :  { %1960 = vmatpush.bf16.msra.mxu1 %v3075_v22  ;;  %1973 = vmatpush.bf16.msra.mxu2 %v3203_v23  ;;  %v1697_v16 = vadd.f32 %v1696_v10, %v1684_v45  ;;  %v1709_v17 = vpop.f32.mrf.mxu1  ;;  %v4337_v22 = vld [vmem:[#allocation2 + $0x36c] sm:$0xf]  ;;  %v3264_v23 = vld [vmem:[#allocation2 + $0x378] sm:$0xf0]  ;;  %v3139_v27 = vor.u32 %v4305_v20, %v3136_v21  ;;  %v2963_v21 = vor.u32 %v4261_v5, %v2960_v6 }
  0xd5   :  { %1986 = vmatpush.bf16.msra.mxu3 %v3331_v29  ;;  %1916 = vmatmul.bf16.vlgmr.msrb.gmra.mxu1 %v4715_v40  ;;  %v2864_v29 = vld [vmem:[#allocation2 + $0x58] sm:$0xf0]  ;;  %v3267_v36 = vor.u32 %v4337_v22, %v3264_v23  ;;  %v4449_v19 = vld [vmem:[#allocation2 + $0x6ec] sm:$0xf] }
  0xd6   :  { %1942 = vmatmul.bf16.vlgmr.msrb.gmra.mxu3 %v4713_v38  ;;  %v1710_v24 = vadd.f32 %v1709_v17, %v1697_v16  ;;  %v2867_v49 = vor.u32 %v4237_v28, %v2864_v29  ;;  %v3088_v10 = vld [vmem:[#allocation2 + $0x218] sm:$0xf0]  ;;  %v4417_v16 = vld [vmem:[#allocation2 + $0x5ec] sm:$0xf]  ;;  %v2835_v17 = vor.u32 %v4229_v1, %v2832_v2 }
  0xd7   :  { %1948 = vmatpush.bf16.msra.mxu0 %v2931_v46  ;;  %v3712_v20 = vld [vmem:[#allocation2 + $0x6f8] sm:$0xf0]  ;;  %v3091_v22 = vor.u32 %v4293_v7, %v3088_v10  ;;  %v4481_v23 = vld [vmem:[#allocation2 + $0x7ec] sm:$0xf] }
  0xd8   :  { %1961 = vmatpush.bf16.msra.mxu1 %v3059_v47  ;;  %1974 = vmatpush.bf16.msra.mxu2 %v3187_v48  ;;  %v1722_v31 = vpop.f32.mrf.mxu2  ;;  %v4333_v47 = vld [vmem:[#allocation2 + $0x34c] sm:$0xf]  ;;  %v3248_v48 = vld [vmem:[#allocation2 + $0x358] sm:$0xf0]  ;;  %v3715_v28 = vor.u32 %v4449_v19, %v3712_v20 }
  0xd9   :  { %1987 = vmatpush.bf16.msra.mxu3 %v3315_v53  ;;  %v1723_v45 = vadd.f32 %v1722_v31, %v1710_v24  ;;  %v1735_v46 = vpop.f32.mrf.mxu3  ;;  %v3123_v53 = vor.u32 %v4301_v43, %v3120_v44  ;;  %v3251_v58 = vor.u32 %v4333_v47, %v3248_v48  ;;  %v3840_v24 = vld [vmem:[#allocation2 + $0x7f8] sm:$0xf0]  ;;  %v4381_v29 = vld [vmem:[#allocation2 + $0x4cc] sm:$0xf] }
  0xda   :  { %v4413_v31 = vld [vmem:[#allocation2 + $0x5cc] sm:$0xf]  ;;  %v3696_v44 = vld [vmem:[#allocation2 + $0x6d8] sm:$0xf0]  ;;  %v3443_v47 = vor.u32 %v4381_v29, %v3440_v30 }
  0xdb   :  { %1949 = vmatpush.bf16.msra.mxu0 %v2915_v59  ;;  %v4743_v50 = vadd.f32 %v1735_v46, %v1723_v45  ;;  %v1698_v51 = vpop.f32.mrf.mxu0  ;;  %v2976_v59 = vld [vmem:[#allocation2 + $0x138] sm:$0xf0]  ;;  %v4445_v43 = vld [vmem:[#allocation2 + $0x6cc] sm:$0xf]  ;;  %v3571_v48 = vor.u32 %v4413_v31, %v3568_v39 }
  0xdc   :  { %1962 = vmatpush.bf16.msra.mxu1 %v3043_v61  ;;  %1975 = vmatpush.bf16.msra.mxu2 %v3171_v62  ;;  %v1711_v57 = vpop.f32.mrf.mxu1  ;;  %v3104_v61 = vld [vmem:[#allocation2 + $0x238] sm:$0xf0]  ;;  %v4329_v62 = vld [vmem:[#allocation2 + $0x32c] sm:$0xf] }
  0xdd   :  { %1988 = vmatpush.bf16.msra.mxu3 %v3299_v3  ;;  %v2979_v3 = vor.u32 %v4265_v56, %v2976_v59  ;;  %v3107_v4 = vor.u32 %v4297_v60, %v3104_v61  ;;  %v4477_v45 = vld [vmem:[#allocation2 + $0x7cc] sm:$0xf]  ;;  %v3824_v46 = vld [vmem:[#allocation2 + $0x7d8] sm:$0xf0] }
  0xde   :  { %v4377_v51 = vld [vmem:[#allocation2 + $0x4ac] sm:$0xf]  ;;  %v3827_v54 = vor.u32 %v4477_v45, %v3824_v46  ;;  %v3552_v55 = vld [vmem:[#allocation2 + $0x5b8] sm:$0xf0] }
  0xdf   :  { %1950 = vmatpush.bf16.msra.mxu0 %v2899_v9  ;;  %v3235_v9 = vor.u32 %v4329_v62, %v3232_v63  ;;  %v4441_v56 = vld [vmem:[#allocation2 + $0x6ac] sm:$0xf]  ;;  %v3680_v57 = vld [vmem:[#allocation2 + $0x6b8] sm:$0xf0] }
  0xe0   :  { %1963 = vmatpush.bf16.msra.mxu1 %v3027_v11  ;;  %1976 = vmatpush.bf16.msra.mxu2 %v3155_v12  ;;  %v1724_v8 = vpop.f32.mrf.mxu2  ;;  %v4325_v11 = vld [vmem:[#allocation2 + $0x30c] sm:$0xf]  ;;  %v3216_v12 = vld [vmem:[#allocation2 + $0x318] sm:$0xf0]  ;;  %v3683_v62 = vor.u32 %v4441_v56, %v3680_v57  ;;  %v348_v56 = vperm.slane %v4736_v35, 1 }
  0xe1   :  { %1989 = vmatpush.bf16.msra.mxu3 %v3283_v18  ;;  %v1737_v13 = vpop.f32.mrf.mxu3  ;;  %v3584_v18 = vld [vmem:[#allocation2 + $0x5f8] sm:$0xf0]  ;;  %v4373_v63 = vld [vmem:[#allocation2 + $0x48c] sm:$0xf]  ;;  %v4499_v35 = vld [vmem:[#allocation4 + $0x74] sm:$0xf0] }
  0xe2   :  { %v3808_v59 = vld [vmem:[#allocation2 + $0x7b8] sm:$0xf0]  ;;  %v4469_v5 = vld [vmem:[#allocation2 + $0x78c] sm:$0xf] }
  0xe3   :  { %1951 = vmatpush.bf16.msra.mxu0 %v2883_v25  ;;  %v3219_v25 = vor.u32 %v4325_v11, %v3216_v12  ;;  %v3536_v2 = vld [vmem:[#allocation2 + $0x598] sm:$0xf0]  ;;  %v4369_v8 = vld [vmem:[#allocation2 + $0x46c] sm:$0xf] }
  0xe4   :  { %1964 = vmatpush.bf16.msra.mxu1 %v3011_v26  ;;  %1977 = vmatpush.bf16.msra.mxu2 %v3139_v27  ;;  %v3459_v26 = vor.u32 %v4385_v14, %v3456_v15  ;;  %v3587_v27 = vor.u32 %v4417_v16, %v3584_v18  ;;  %v4401_v10 = vld [vmem:[#allocation2 + $0x56c] sm:$0xf]  ;;  %v3520_v13 = vld [vmem:[#allocation2 + $0x578] sm:$0xf0] }
  0xe5   :  { %1990 = vmatpush.bf16.msra.mxu3 %v3267_v36  ;;  %v3843_v36 = vor.u32 %v4481_v23, %v3840_v24  ;;  %v4433_v14 = vld [vmem:[#allocation2 + $0x66c] sm:$0xf]  ;;  %v3648_v15 = vld [vmem:[#allocation2 + $0x678] sm:$0xf0]  ;;  %v3523_v19 = vor.u32 %v4401_v10, %v3520_v13 }
  0xe6   :  { %v4465_v16 = vld [vmem:[#allocation2 + $0x76c] sm:$0xf]  ;;  %v3651_v20 = vor.u32 %v4433_v14, %v3648_v15  ;;  %v3760_v31 = vld [vmem:[#allocation2 + $0x758] sm:$0xf0] }
  0xe7   :  { %1952 = vmatpush.bf16.msra.mxu0 %v2867_v49  ;;  %v3699_v49 = vor.u32 %v4445_v43, %v3696_v44  ;;  %v4397_v23 = vld [vmem:[#allocation2 + $0x54c] sm:$0xf]  ;;  %v3360_v46 = vld [vmem:[#allocation2 + $0x438] sm:$0xf0] }
  0xe8   :  { %1965 = vmatpush.bf16.msra.mxu1 %v2995_v52  ;;  %1978 = vmatpush.bf16.msra.mxu2 %v3123_v53  ;;  %v3424_v52 = vld [vmem:[#allocation2 + $0x4b8] sm:$0xf0]  ;;  %v4409_v53 = vld [vmem:[#allocation2 + $0x5ac] sm:$0xf] }
  0xe9   :  { %1991 = vmatpush.bf16.msra.mxu3 %v3251_v58  ;;  %v4473_v58 = vld [vmem:[#allocation2 + $0x7ac] sm:$0xf]  ;;  %v3427_v60 = vor.u32 %v4377_v51, %v3424_v52  ;;  %v3555_v61 = vor.u32 %v4409_v53, %v3552_v55  ;;  %v3488_v51 = vld [vmem:[#allocation2 + $0x538] sm:$0xf0] }
  0xea   :  { %v3811_v1 = vor.u32 %v4473_v58, %v3808_v59  ;;  %v4461_v30 = vld [vmem:[#allocation2 + $0x74c] sm:$0xf]  ;;  %v3616_v53 = vld [vmem:[#allocation2 + $0x638] sm:$0xf0] }
  0xeb   :  { %1953 = vmatpush.bf16.msra.mxu0 %v2851_v0  ;;  %v3408_v0 = vld [vmem:[#allocation2 + $0x498] sm:$0xf0]  ;;  %v4361_v45 = vld [vmem:[#allocation2 + $0x42c] sm:$0xf] }
  0xec   :  { %1966 = vmatpush.bf16.msra.mxu1 %v2979_v3  ;;  %1979 = vmatpush.bf16.msra.mxu2 %v3107_v4  ;;  %v4437_v3 = vld [vmem:[#allocation2 + $0x68c] sm:$0xf]  ;;  %v3664_v4 = vld [vmem:[#allocation2 + $0x698] sm:$0xf0]  ;;  %v3363_v57 = vor.u32 %v4361_v45, %v3360_v46  ;;  %v3870_v45 = vld [vmem:[#allocation4 + $0x30] sm:$0xf] }
  0xed   :  { %1992 = vmatpush.bf16.msra.mxu3 %v3235_v9  ;;  %v3667_v7 = vor.u32 %v4437_v3, %v3664_v4  ;;  %v3392_v9 = vld [vmem:[#allocation2 + $0x478] sm:$0xf0]  ;;  %v4425_v52 = vld [vmem:[#allocation2 + $0x62c] sm:$0xf]  ;;  %v3934_v46 = vld [vmem:[#allocation4 + $0xb0] sm:$0xf] }
  0xee   :  { %v3395_v18 = vor.u32 %v4369_v8, %v3392_v9  ;;  %v3744_v55 = vld [vmem:[#allocation2 + $0x738] sm:$0xf0]  ;;  %v4357_v58 = vld [vmem:[#allocation2 + $0x40c] sm:$0xf]  ;;  %v4515_v8 = vld [vmem:[#allocation4 + $0xf4] sm:$0xf0] }
  0xef   :  { %1954 = vmatpush.bf16.msra.mxu0 %v2835_v17  ;;  %v4749_v6 = vpop.f32.mrf.mxu0  ;;  %v3776_v17 = vld [vmem:[#allocation2 + $0x778] sm:$0xf0]  ;;  %v4453_v3 = vld [vmem:[#allocation2 + $0x70c] sm:$0xf] }
  0xf0   :  { %1967 = vmatpush.bf16.msra.mxu1 %v2963_v21  ;;  %1980 = vmatpush.bf16.msra.mxu2 %v3091_v22  ;;  %v4365_v21 = vld [vmem:[#allocation2 + $0x44c] sm:$0xf]  ;;  %v3376_v22 = vld [vmem:[#allocation2 + $0x458] sm:$0xf0] }
  0xf1   :  { %1993 = vmatpush.bf16.msra.mxu3 %v3219_v25  ;;  %v3779_v25 = vor.u32 %v4465_v16, %v3776_v17  ;;  %v3894_v16 = vld [vmem:[#allocation4 + $0x60] sm:$0xf]  ;;  %v4497_v17 = vld [vmem:[#allocation4 + $0x64] sm:$0xf0] }
  0xf2   :  { %1955 = vmatmul.bf16.vlgmr.msra.gmra.mxu0 %v4696_v34  ;;  %v3792_v34 = vld [vmem:[#allocation2 + $0x798] sm:$0xf0]  ;;  %v4751_v11 = vpop.f32.mrf.mxu1 }
  0xf3   :  { %1999 = vmatpush.bf16.msrb.mxu0 %v3459_v26  ;;  %1981 = vmatmul.bf16.vlgmr.msra.gmra.mxu2 %v4694_v33  ;;  %v4405_v33 = vld [vmem:[#allocation2 + $0x58c] sm:$0xf]  ;;  %v3795_v12 = vor.u32 %v4469_v5, %v3792_v34  ;;  %v3504_v26 = vld [vmem:[#allocation2 + $0x558] sm:$0xf0]  ;;  %v3902_v34 = vld [vmem:[#allocation4 + $0x70] sm:$0xf] }
  0xf4   :  { %2012 = vmatpush.bf16.msrb.mxu1 %v3587_v27  ;;  %2025 = vmatpush.bf16.msrb.mxu2 %v3715_v28  ;;  %v4429_v27 = vld [vmem:[#allocation2 + $0x64c] sm:$0xf]  ;;  %v3632_v28 = vld [vmem:[#allocation2 + $0x658] sm:$0xf0]  ;;  %v3507_v43 = vor.u32 %v4397_v23, %v3504_v26  ;;  %v3903_v13 = vor.u32 %v4499_v35, %v3902_v34  ;;  %v4495_v23 = vld [vmem:[#allocation4 + $0x54] sm:$0xf0] }
  0xf5   :  { %2038 = vmatpush.bf16.msrb.mxu3 %v3843_v36  ;;  %1968 = vmatmul.bf16.vlgmr.msra.gmra.mxu1 %v4700_v42  ;;  %v3539_v42 = vor.u32 %v4405_v33, %v3536_v2  ;;  %v3379_v36 = vor.u32 %v4365_v21, %v3376_v22  ;;  %v3635_v44 = vor.u32 %v4429_v27, %v3632_v28  ;;  %v3600_v2 = vld [vmem:[#allocation2 + $0x618] sm:$0xf0]  ;;  %v3886_v22 = vld [vmem:[#allocation4 + $0x50] sm:$0xf] }
  0xf6   :  { %1994 = vmatmul.bf16.vlgmr.msra.gmra.mxu3 %v4698_v41  ;;  %v3411_v41 = vor.u32 %v4373_v63, %v3408_v0  ;;  %v4753_v24 = vpop.f32.mrf.mxu2  ;;  %v3472_v63 = vld [vmem:[#allocation2 + $0x518] sm:$0xf0]  ;;  %v3887_v26 = vor.u32 %v4495_v23, %v3886_v22  ;;  %v3918_v34 = vld [vmem:[#allocation4 + $0x90] sm:$0xf]  ;;  %v4514_v22 = vld [vmem:[#allocation4 + $0xf4] sm:$0xf] }
  0xf7   :  { %2000 = vmatpush.bf16.msrb.mxu0 %v3443_v47  ;;  %v1750_v39 = vpop.f32.mrf.mxu0  ;;  %v4393_v47 = vld [vmem:[#allocation2 + $0x52c] sm:$0xf]  ;;  %v3728_v5 = vld [vmem:[#allocation2 + $0x718] sm:$0xf0] }
  0xf8   :  { %2013 = vmatpush.bf16.msrb.mxu1 %v3571_v48  ;;  %2026 = vmatpush.bf16.msrb.mxu2 %v3699_v49  ;;  %v3763_v49 = vor.u32 %v4461_v30, %v3760_v31  ;;  %v3491_v59 = vor.u32 %v4393_v47, %v3488_v51  ;;  %v4493_v30 = vld [vmem:[#allocation4 + $0x44] sm:$0xf0]  ;;  %v3942_v31 = vld [vmem:[#allocation4 + $0xc0] sm:$0xf]  ;;  %v4531_v39 = vld [vmem:[#allocation4 + $0x174] sm:$0xf0] }
  0xf9   :  { %2039 = vmatpush.bf16.msrb.mxu3 %v3827_v54  ;;  %v4755_v29 = vpop.f32.mrf.mxu3  ;;  %v4457_v54 = vld [vmem:[#allocation2 + $0x72c] sm:$0xf]  ;;  %v4529_v51 = vld [vmem:[#allocation4 + $0x164] sm:$0xf0]  ;;  %v3968_v23 = vld [vmem:[#allocation4 + $0xf8] sm:$0xf0] }
  0xfa   :  { %v1763_v48 = vpop.f32.mrf.mxu1  ;;  %v3747_v33 = vor.u32 %v4457_v54, %v3744_v55 }
  0xfb   :  { %2001 = vmatpush.bf16.msrb.mxu0 %v3427_v60  ;;  %v3619_v60 = vor.u32 %v4425_v52, %v3616_v53 }
  0xfc   :  { %2014 = vmatpush.bf16.msrb.mxu1 %v3555_v61  ;;  %2027 = vmatpush.bf16.msrb.mxu2 %v3683_v62  ;;  %v3344_v61 = vld [vmem:[#allocation2 + $0x418] sm:$0xf0]  ;;  %v4389_v62 = vld [vmem:[#allocation2 + $0x50c] sm:$0xf] }
  0xfd   :  { %2040 = vmatpush.bf16.msrb.mxu3 %v3811_v1  ;;  %v4421_v1 = vld [vmem:[#allocation2 + $0x60c] sm:$0xf]  ;;  %v3475_v9 = vor.u32 %v4389_v62, %v3472_v63  ;;  %v4014_v62 = vld [vmem:[#allocation4 + $0x150] sm:$0xf]  ;;  %v4527_v63 = vld [vmem:[#allocation4 + $0x154] sm:$0xf0] }
  0xfe   :  { %v1776_v0 = vpop.f32.mrf.mxu2  ;;  %v3603_v10 = vor.u32 %v4421_v1, %v3600_v2 }
  0xff   :  { %2002 = vmatpush.bf16.msrb.mxu0 %v3411_v41  ;;  %v1749_v41 = vadd.f32 %v4749_v6, %v348_v56  ;;  %v3895_v6 = vor.u32 %v4497_v17, %v3894_v16  ;;  %v3862_v56 = vld [vmem:[#allocation4 + $0x20] sm:$0xf]  ;;  %v4015_v0 = vor.u32 %v4527_v63, %v4014_v62  ;;  %v4501_v16 = vld [vmem:[#allocation4 + $0x84] sm:$0xf0]  ;;  %v4498_v17 = vld [vmem:[#allocation4 + $0x74] sm:$0xf] }
 0x100   :  { %2015 = vmatpush.bf16.msrb.mxu1 %v3539_v42  ;;  %2028 = vmatpush.bf16.msrb.mxu2 %v3667_v7  ;;  %v3347_v42 = vor.u32 %v4357_v58, %v3344_v61  ;;  %v3966_v7 = vld [vmem:[#allocation4 + $0xf0] sm:$0xf]  ;;  %v3926_v58 = vld [vmem:[#allocation4 + $0xa0] sm:$0xf]  ;;  %v4508_v62 = vld [vmem:[#allocation4 + $0xc4] sm:$0xf] }
 0x101   :  { %2041 = vmatpush.bf16.msrb.mxu3 %v3795_v12  ;;  %v1789_v4 = vpop.f32.mrf.mxu3  ;;  %v3731_v12 = vor.u32 %v4453_v3, %v3728_v5  ;;  %v3967_v14 = vor.u32 %v4515_v8, %v3966_v7  ;;  %v1762_v15 = vadd.f32 %v4751_v11, %v1749_v41  ;;  %v3950_v11 = vld [vmem:[#allocation4 + $0xd0] sm:$0xf]  ;;  %v4487_v5 = vld [vmem:[#allocation4 + $0x14] sm:$0xf0]  ;;  %v4525_v7 = vld [vmem:[#allocation4 + $0x144] sm:$0xf0] }
 0x102   :  { %v3854_v4 = vld [vmem:[#allocation4 + $0x10] sm:$0xf]  ;;  %v4503_v41 = vld [vmem:[#allocation4 + $0x94] sm:$0xf0]  ;;  %v3944_v63 = vld [vmem:[#allocation4 + $0xc8] sm:$0xf0] }
 0x103   :  { %2003 = vmatpush.bf16.msrb.mxu0 %v3395_v18  ;;  %v3958_v18 = vld [vmem:[#allocation4 + $0xe0] sm:$0xf]  ;;  %v1775_v21 = vadd.f32 %v4753_v24, %v1762_v15  ;;  %v4509_v24 = vld [vmem:[#allocation4 + $0xc4] sm:$0xf0] }
 0x104   :  { %2016 = vmatpush.bf16.msrb.mxu1 %v3523_v19  ;;  %2029 = vmatpush.bf16.msrb.mxu2 %v3651_v20  ;;  %v4513_v19 = vld [vmem:[#allocation4 + $0xe4] sm:$0xf0]  ;;  %v3910_v15 = vld [vmem:[#allocation4 + $0x80] sm:$0xf] }
 0x105   :  { %2042 = vmatpush.bf16.msrb.mxu3 %v3779_v25  ;;  %v3959_v20 = vor.u32 %v4513_v19, %v3958_v18  ;;  %v4511_v25 = vld [vmem:[#allocation4 + $0xd4] sm:$0xf0]  ;;  %v1788_v27 = vadd.f32 %v4755_v29, %v1775_v21  ;;  %v3904_v19 = vld [vmem:[#allocation4 + $0x78] sm:$0xf0] }
 0x106   :  { %v3951_v28 = vor.u32 %v4511_v25, %v3950_v11  ;;  %v4507_v29 = vld [vmem:[#allocation4 + $0xb4] sm:$0xf0] }
 0x107   :  { %2004 = vmatpush.bf16.msrb.mxu0 %v3379_v36  ;;  %v4030_v36 = vld [vmem:[#allocation4 + $0x170] sm:$0xf]  ;;  %v3935_v55 = vor.u32 %v4507_v29, %v3934_v46  ;;  %v4523_v21 = vld [vmem:[#allocation4 + $0x134] sm:$0xf0]  ;;  %v3888_v29 = vld [vmem:[#allocation4 + $0x58] sm:$0xf0] }
 0x108   :  { %2017 = vmatpush.bf16.msrb.mxu1 %v3507_v43  ;;  %2030 = vmatpush.bf16.msrb.mxu2 %v3635_v44  ;;  %v4031_v43 = vor.u32 %v4531_v39, %v4030_v36  ;;  %v3943_v44 = vor.u32 %v4509_v24, %v3942_v31  ;;  %v3971_v31 = vor.u32 %v4514_v22, %v3968_v23  ;;  %v3896_v24 = vld [vmem:[#allocation4 + $0x68] sm:$0xf0]  ;;  %v3990_v36 = vld [vmem:[#allocation4 + $0x120] sm:$0xf]  ;;  %v4521_v39 = vld [vmem:[#allocation4 + $0x124] sm:$0xf0] }
 0x109   :  { %2043 = vmatpush.bf16.msrb.mxu3 %v3763_v49  ;;  %v4022_v49 = vld [vmem:[#allocation4 + $0x160] sm:$0xf]  ;;  %v4519_v46 = vld [vmem:[#allocation4 + $0x114] sm:$0xf0]  ;;  %v3856_v22 = vld [vmem:[#allocation4 + $0x18] sm:$0xf0] }
 0x10a   :  { %v4023_v52 = vor.u32 %v4529_v51, %v4022_v49  ;;  %v4510_v49 = vld [vmem:[#allocation4 + $0xd4] sm:$0xf] }
 0x10b   :  { %2005 = vmatpush.bf16.msrb.mxu0 %v3363_v57  ;;  %v4489_v57 = vld [vmem:[#allocation4 + $0x24] sm:$0xf0]  ;;  %v4502_v23 = vld [vmem:[#allocation4 + $0x94] sm:$0xf] }
 0x10c   :  { %2018 = vmatpush.bf16.msrb.mxu1 %v3491_v59  ;;  %2031 = vmatpush.bf16.msrb.mxu2 %v3619_v60  ;;  %v4505_v60 = vld [vmem:[#allocation4 + $0xa4] sm:$0xf0] }
 0x10d   :  { %2044 = vmatpush.bf16.msrb.mxu3 %v3747_v33  ;;  %v3863_v33 = vor.u32 %v4489_v57, %v3862_v56  ;;  %v3927_v3 = vor.u32 %v4505_v60, %v3926_v58  ;;  %v4032_v56 = vld [vmem:[#allocation4 + $0x178] sm:$0xf0]  ;;  %v3880_v60 = vld [vmem:[#allocation4 + $0x48] sm:$0xf0] }
 0x10f   :  { %2006 = vmatpush.bf16.msrb.mxu0 %v3347_v42  ;;  %v4006_v42 = vld [vmem:[#allocation4 + $0x140] sm:$0xf] }
 0x110   :  { %2019 = vmatpush.bf16.msrb.mxu1 %v3475_v9  ;;  %2032 = vmatpush.bf16.msrb.mxu2 %v3603_v10  ;;  %v4007_v8 = vor.u32 %v4525_v7, %v4006_v42  ;;  %v3855_v10 = vor.u32 %v4487_v5, %v3854_v4  ;;  %v4506_v4 = vld [vmem:[#allocation4 + $0xb4] sm:$0xf]  ;;  %v4024_v42 = vld [vmem:[#allocation4 + $0x168] sm:$0xf0] }
 0x111   :  { %2045 = vmatpush.bf16.msrb.mxu3 %v3731_v12  ;;  %v3846_v12 = vld [vmem:[#allocation4] sm:$0xf] }
 0x112   :  { %2007 = vmatmul.bf16.vlgmr.msrb.gmra.mxu0 %v4711_v37  ;;  %v3878_v37 = vld [vmem:[#allocation4 + $0x40] sm:$0xf]  ;;  %v1813_v48 = vpop.f32.mrf.mxu1 }
 0x113   :  { %2449 = vmatpush.bf16.msra.mxu0 %v3903_v13  ;;  %2020 = vmatmul.bf16.vlgmr.msrb.gmra.mxu1 %v4715_v40  ;;  %v3879_v40 = vor.u32 %v4493_v30, %v3878_v37  ;;  %v4485_v13 = vld [vmem:[#allocation4 + $0x4] sm:$0xf0]  ;;  %v3907_v37 = vor.u32 %v4498_v17, %v3904_v19  ;;  %v4496_v30 = vld [vmem:[#allocation4 + $0x64] sm:$0xf]  ;;  %v4016_v17 = vld [vmem:[#allocation4 + $0x158] sm:$0xf0] }
 0x114   :  { %2462 = vmatpush.bf16.msra.mxu1 %v3967_v14  ;;  %2033 = vmatmul.bf16.vlgmr.msrb.gmra.mxu2 %v4709_v32  ;;  %v1800_v32 = vpop.f32.mrf.mxu0  ;;  %v3919_v14 = vor.u32 %v4503_v41, %v3918_v34  ;;  %v3936_v34 = vld [vmem:[#allocation4 + $0xb8] sm:$0xf0]  ;;  %v4528_v41 = vld [vmem:[#allocation4 + $0x164] sm:$0xf] }
 0x115   :  { %2046 = vmatmul.bf16.vlgmr.msrb.gmra.mxu3 %v4713_v38  ;;  %v4491_v38 = vld [vmem:[#allocation4 + $0x34] sm:$0xf0]  ;;  %v1801_v47 = vadd.f32 %v1800_v32, %v1788_v27  ;;  %2475 = vmatpush.bf16.msra.mxu2 %v4031_v43  ;;  %v2051_v27 = vmax.f32 %v4743_v50, 0.0  ;;  %v4512_v43 = vld [vmem:[#allocation4 + $0xe4] sm:$0xf]  ;;  %v3991_v32 = vor.u32 %v4521_v39, %v3990_v36  ;;  %v3899_v50 = vor.u32 %v4496_v30, %v3896_v24 }
 0x116   :  { %v3871_v53 = vor.u32 %v4491_v38, %v3870_v45  ;;  %v1826_v59 = vpop.f32.mrf.mxu2  ;;  %v3982_v38 = vld [vmem:[#allocation4 + $0x110] sm:$0xf]  ;;  %v4027_v7 = vor.u32 %v4528_v41, %v4024_v42  ;;  %v4484_v36 = vld [vmem:[#allocation4 + $0x4] sm:$0xf] }
 0x117   :  { %2450 = vmatpush.bf16.msra.mxu0 %v3895_v6  ;;  %v1814_v54 = vadd.f32 %v1813_v48, %v1801_v47  ;;  %v4769_v45 = vpack.c.bf16 %v2051_v27, %v2051_v27  ;;  %v4494_v48 = vld [vmem:[#allocation4 + $0x54] sm:$0xf]  ;;  %v3983_v51 = vor.u32 %v4519_v46, %v3982_v38  ;;  %v4524_v27 = vld [vmem:[#allocation4 + $0x144] sm:$0xf]  ;;  %v3912_v38 = vld [vmem:[#allocation4 + $0x88] sm:$0xf0] }
 0x118   :  { %2463 = vmatpush.bf16.msra.mxu1 %v3959_v20  ;;  %v3998_v20 = vld [vmem:[#allocation4 + $0x130] sm:$0xf]  ;;  %v3891_v57 = vor.u32 %v4494_v48, %v3888_v29  ;;  %v4520_v29 = vld [vmem:[#allocation4 + $0x124] sm:$0xf] }
 0x119   :  { %2476 = vmatpush.bf16.msra.mxu2 %v4023_v52  ;;  %v1839_v61 = vpop.f32.mrf.mxu3  ;;  %v1827_v1 = vadd.f32 %v1826_v59, %v1814_v54  ;;  %v3999_v11 = vor.u32 %v4523_v21, %v3998_v20  ;;  %v3952_v52 = vld [vmem:[#allocation4 + $0xd8] sm:$0xf0]  ;;  %v4517_v54 = vld [vmem:[#allocation4 + $0x104] sm:$0xf0]  ;;  %v4492_v59 = vld [vmem:[#allocation4 + $0x44] sm:$0xf] }
 0x11a   :  { %v1815_v35 = vpop.f32.mrf.mxu1  ;;  %v3955_v58 = vor.u32 %v4510_v49, %v3952_v52  ;;  %v4486_v21 = vld [vmem:[#allocation4 + $0x14] sm:$0xf]  ;;  %v3992_v49 = vld [vmem:[#allocation4 + $0x128] sm:$0xf0] }
 0x11b   :  { %2451 = vmatpush.bf16.msra.mxu0 %v3887_v26  ;;  %v1840_v9 = vadd.f32 %v1839_v61, %v1827_v1  ;;  %v3847_v26 = vor.u32 %v4485_v13, %v3846_v12  ;;  %v3947_v1 = vor.u32 %v4508_v62, %v3944_v63  ;;  %v3864_v12 = vld [vmem:[#allocation4 + $0x28] sm:$0xf0]  ;;  %v4504_v13 = vld [vmem:[#allocation4 + $0xa4] sm:$0xf]  ;;  %v3859_v30 = vor.u32 %v4486_v21, %v3856_v22  ;;  %v4537_v21 = vld [vmem:[#allocation4 + $0x1a4] sm:$0xf0] }
 0x11c   :  { %2464 = vmatpush.bf16.msra.mxu1 %v3951_v28  ;;  %v1802_v2 = vpop.f32.mrf.mxu0  ;;  %v3911_v28 = vor.u32 %v4501_v16, %v3910_v15  ;;  %v4526_v16 = vld [vmem:[#allocation4 + $0x154] sm:$0xf]  ;;  %v4516_v62 = vld [vmem:[#allocation4 + $0x104] sm:$0xf]  ;;  %v3976_v63 = vld [vmem:[#allocation4 + $0x108] sm:$0xf0] }
 0x11d   :  { %2477 = vmatpush.bf16.msra.mxu2 %v4015_v0  ;;  %v2052_v25 = vmax.f32 %v1840_v9, 0.0  ;;  %v4490_v2 = vld [vmem:[#allocation4 + $0x34] sm:$0xf]  ;;  %v3939_v9 = vor.u32 %v4506_v4, %v3936_v34  ;;  %v4019_v19 = vor.u32 %v4526_v16, %v4016_v17  ;;  %v4543_v34 = vld [vmem:[#allocation4 + $0x1d4] sm:$0xf0] }
 0x11e   :  { %v1828_v18 = vpop.f32.mrf.mxu2 }
 0x11f   :  { %2452 = vmatpush.bf16.msra.mxu0 %v3879_v40  ;;  %v3960_v40 = vld [vmem:[#allocation4 + $0xe8] sm:$0xf0] }
 0x120   :  { %2465 = vmatpush.bf16.msra.mxu1 %v3943_v44  ;;  %v4767_v44 = vpack.c.bf16 %v2052_v25, %v2052_v25  ;;  %v3963_v47 = vor.u32 %v4512_v43, %v3960_v40  ;;  %v3920_v25 = vld [vmem:[#allocation4 + $0x98] sm:$0xf0]  ;;  %v3848_v43 = vld [vmem:[#allocation4 + $0x8] sm:$0xf0]  ;;  %v4522_v40 = vld [vmem:[#allocation4 + $0x134] sm:$0xf] }
 0x121   :  { %2478 = vmatpush.bf16.msra.mxu2 %v4007_v8  ;;  %v1841_v6 = vpop.f32.mrf.mxu3  ;;  %v3923_v39 = vor.u32 %v4502_v23, %v3920_v25 }
 0x123   :  { %2453 = vmatpush.bf16.msra.mxu0 %v3871_v53  ;;  %v3974_v53 = vld [vmem:[#allocation4 + $0x100] sm:$0xf] }
 0x124   :  { %2466 = vmatpush.bf16.msra.mxu1 %v3935_v55  ;;  %v4530_v55 = vld [vmem:[#allocation4 + $0x174] sm:$0xf]  ;;  %v3975_v61 = vor.u32 %v4517_v54, %v3974_v53  ;;  %v3851_v53 = vor.u32 %v4484_v36, %v3848_v43  ;;  %v4547_v54 = vld [vmem:[#allocation4 + $0x1f4] sm:$0xf0] }
 0x125   :  { %2479 = vmatpush.bf16.msra.mxu2 %v3999_v11  ;;  %v4035_v0 = vor.u32 %v4530_v55, %v4032_v56  ;;  %v4546_v36 = vld [vmem:[#allocation4 + $0x1f4] sm:$0xf] }
 0x127   :  { %2454 = vmatpush.bf16.msra.mxu0 %v3863_v33  ;;  %v3883_v33 = vor.u32 %v4492_v59, %v3880_v60  ;;  %v3984_v59 = vld [vmem:[#allocation4 + $0x118] sm:$0xf0] }
 0x128   :  { %2467 = vmatpush.bf16.msra.mxu1 %v3927_v3  ;;  %v3872_v3 = vld [vmem:[#allocation4 + $0x38] sm:$0xf0] }
 0x129   :  { %2480 = vmatpush.bf16.msra.mxu2 %v3991_v32  ;;  %v3875_v8 = vor.u32 %v4490_v2, %v3872_v3  ;;  %v4000_v32 = vld [vmem:[#allocation4 + $0x138] sm:$0xf0]  ;;  %v4086_v2 = vld [vmem:[#allocation4 + $0x1e0] sm:$0xf]  ;;  %v4545_v3 = vld [vmem:[#allocation4 + $0x1e4] sm:$0xf0] }
 0x12a   :  { %v4087_v4 = vor.u32 %v4545_v3, %v4086_v2  ;;  %v4048_v2 = vld [vmem:[#allocation4 + $0x198] sm:$0xf0] }
 0x12b   :  { %2455 = vmatpush.bf16.msra.mxu0 %v3855_v10  ;;  %v4488_v10 = vld [vmem:[#allocation4 + $0x24] sm:$0xf] }
 0x12c   :  { %2468 = vmatpush.bf16.msra.mxu1 %v3919_v14  ;;  %v3928_v14 = vld [vmem:[#allocation4 + $0xa8] sm:$0xf0]  ;;  %v3867_v6 = vor.u32 %v4488_v10, %v3864_v12 }
 0x12d   :  { %2481 = vmatpush.bf16.msra.mxu2 %v3983_v51  ;;  %v3931_v20 = vor.u32 %v4504_v13, %v3928_v14  ;;  %v4094_v51 = vld [vmem:[#allocation4 + $0x1f0] sm:$0xf] }
 0x12e   :  { %v4095_v56 = vor.u32 %v4547_v54, %v4094_v51  ;;  %v4062_v14 = vld [vmem:[#allocation4 + $0x1b0] sm:$0xf] }
 0x12f   :  { %2456 = vmatpush.bf16.msra.mxu0 %v3847_v26  ;;  %v1852_v5 = vpop.f32.mrf.mxu0 }
 0x130   :  { %2469 = vmatpush.bf16.msra.mxu1 %v3911_v28  ;;  %v4008_v28 = vld [vmem:[#allocation4 + $0x148] sm:$0xf0]  ;;  %2488 = vmatpush.bf16.msra.mxu3 %v4095_v56 }
 0x131   :  { %2482 = vmatpush.bf16.msra.mxu2 %v3975_v61 }
 0x132   :  { %2457 = vmatmul.bf16.vlgmr.msra.gmra.mxu0 %v4769_v45  ;;  %v4773_v35 = vpop.f32.mrf.mxu1 }
 0x133   :  { %2501 = vmatpush.bf16.msrb.mxu0 %v3907_v37  ;;  %2470 = vmatmul.bf16.vlgmr.msra.gmra.mxu1 %v4767_v44  ;;  %v4011_v37 = vor.u32 %v4524_v27, %v4008_v28  ;;  %v4535_v27 = vld [vmem:[#allocation4 + $0x194] sm:$0xf0] }
 0x134   :  { %2514 = vmatpush.bf16.msrb.mxu1 %v3971_v31  ;;  %v4778_v31 = vld [vmem:[%s5000_s2] sm:$0xf]  ;;  %2489 = vmatpush.bf16.msra.mxu3 %v4087_v4 }
 0x135   :  { %2527 = vmatpush.bf16.msrb.mxu2 %v4035_v0  ;;  %v349_v24 = vperm.slane %v4778_v31, 2 }
 0x136   :  { %v1878_v15 = vpop.f32.mrf.mxu2 }
 0x137   :  { %2502 = vmatpush.bf16.msrb.mxu0 %v3899_v50  ;;  %v1854_v11 = vpop.f32.mrf.mxu0  ;;  %v4500_v50 = vld [vmem:[#allocation4 + $0x84] sm:$0xf]  ;;  %v1853_v52 = vadd.f32 %v1852_v5, %v349_v24  ;;  %v4078_v5 = vld [vmem:[#allocation4 + $0x1d0] sm:$0xf] }
 0x138   :  { %2515 = vmatpush.bf16.msrb.mxu1 %v3963_v47  ;;  %v4003_v47 = vor.u32 %v4522_v40, %v4000_v32  ;;  %v3915_v55 = vor.u32 %v4500_v50, %v3912_v38  ;;  %v4544_v40 = vld [vmem:[#allocation4 + $0x1e4] sm:$0xf]  ;;  %v4088_v32 = vld [vmem:[#allocation4 + $0x1e8] sm:$0xf0] }
 0x139   :  { %2528 = vmatpush.bf16.msrb.mxu2 %v4027_v7  ;;  %v1891_v18 = vpop.f32.mrf.mxu3  ;;  %v1866_v60 = vadd.f32 %v4773_v35, %v1853_v52  ;;  %v4079_v7 = vor.u32 %v4543_v34, %v4078_v5  ;;  %v4091_v38 = vor.u32 %v4544_v40, %v4088_v32  ;;  %v4540_v52 = vld [vmem:[#allocation4 + $0x1c4] sm:$0xf]  ;;  %v4040_v34 = vld [vmem:[#allocation4 + $0x188] sm:$0xf0]  ;;  %v4563_v40 = vld [vmem:[%s5003_s5 + $0x74] sm:$0xf0] }
 0x13a   :  { %v1867_v26 = vpop.f32.mrf.mxu1  ;;  %v4532_v5 = vld [vmem:[#allocation4 + $0x184] sm:$0xf]  ;;  %v4562_v32 = vld [vmem:[%s5003_s5 + $0x74] sm:$0xf] }
 0x13b   :  { %2503 = vmatpush.bf16.msrb.mxu0 %v3891_v57  ;;  %v3995_v57 = vor.u32 %v4520_v29, %v3992_v49  ;;  %v1879_v0 = vadd.f32 %v1878_v15, %v1866_v60  ;;  %2490 = vmatpush.bf16.msra.mxu3 %v4079_v7  ;;  %v4539_v15 = vld [vmem:[#allocation4 + $0x1b4] sm:$0xf0]  ;;  %v4046_v26 = vld [vmem:[#allocation4 + $0x190] sm:$0xf] }
 0x13c   :  { %2516 = vmatpush.bf16.msrb.mxu1 %v3955_v58  ;;  %v4518_v58 = vld [vmem:[#allocation4 + $0x114] sm:$0xf]  ;;  %v4047_v28 = vor.u32 %v4535_v27, %v4046_v26 }
 0x13d   :  { %2529 = vmatpush.bf16.msrb.mxu2 %v4019_v19  ;;  %v3987_v61 = vor.u32 %v4518_v58, %v3984_v59  ;;  %v4063_v19 = vor.u32 %v4539_v15, %v4062_v14  ;;  %v4064_v58 = vld [vmem:[#allocation4 + $0x1b8] sm:$0xf0]  ;;  %v350_v59 = vperm.slane %v4778_v31, 3 }
 0x13e   :  { %v1880_v46 = vpop.f32.mrf.mxu2 }
 0x13f   :  { %2504 = vmatpush.bf16.msrb.mxu0 %v3883_v33  ;;  %v3979_v33 = vor.u32 %v4516_v62, %v3976_v63  ;;  %v4056_v62 = vld [vmem:[#allocation4 + $0x1a8] sm:$0xf0] }
 0x140   :  { %2517 = vmatpush.bf16.msrb.mxu1 %v3947_v1  ;;  %v1892_v1 = vadd.f32 %v1891_v18, %v1879_v0 }
 0x141   :  { %2530 = vmatpush.bf16.msrb.mxu2 %v4011_v37  ;;  %v1893_v48 = vpop.f32.mrf.mxu3  ;;  %v4038_v37 = vld [vmem:[#allocation4 + $0x180] sm:$0xf] }
 0x142   :  { %v4080_v48 = vld [vmem:[#allocation4 + $0x1d8] sm:$0xf0] }
 0x143   :  { %2505 = vmatpush.bf16.msrb.mxu0 %v3875_v8  ;;  %v4070_v8 = vld [vmem:[#allocation4 + $0x1c0] sm:$0xf] }
 0x144   :  { %2518 = vmatpush.bf16.msrb.mxu1 %v3939_v9  ;;  %v4541_v9 = vld [vmem:[#allocation4 + $0x1c4] sm:$0xf0] }
 0x145   :  { %2531 = vmatpush.bf16.msrb.mxu2 %v4003_v47  ;;  %v4542_v47 = vld [vmem:[#allocation4 + $0x1d4] sm:$0xf] }
 0x146   :  { %v4083_v29 = vor.u32 %v4542_v47, %v4080_v48  ;;  %v4561_v47 = vld [vmem:[%s5003_s5 + $0x64] sm:$0xf0] }
 0x147   :  { %2506 = vmatpush.bf16.msrb.mxu0 %v3867_v6 }
 0x148   :  { %2519 = vmatpush.bf16.msrb.mxu1 %v3931_v20  ;;  %v4054_v20 = vld [vmem:[#allocation4 + $0x1a0] sm:$0xf] }
 0x149   :  { %2532 = vmatpush.bf16.msrb.mxu2 %v3995_v57  ;;  %v4055_v11 = vor.u32 %v4537_v21, %v4054_v20  ;;  %v4538_v57 = vld [vmem:[#allocation4 + $0x1b4] sm:$0xf] }
 0x14a   :  { %v4067_v60 = vor.u32 %v4538_v57, %v4064_v58  ;;  %v4222_v57 = vld [vmem:[%s5003_s5 + $0xf0] sm:$0xf]  ;;  %v4579_v58 = vld [vmem:[%s5003_s5 + $0xf4] sm:$0xf0] }
 0x14b   :  { %2507 = vmatpush.bf16.msrb.mxu0 %v3859_v30  ;;  %v4533_v30 = vld [vmem:[#allocation4 + $0x184] sm:$0xf0] }
 0x14c   :  { %2520 = vmatpush.bf16.msrb.mxu1 %v3923_v39  ;;  %v4039_v24 = vor.u32 %v4533_v30, %v4038_v37  ;;  %v4096_v39 = vld [vmem:[#allocation4 + $0x1f8] sm:$0xf0] }
 0x14d   :  { %2533 = vmatpush.bf16.msrb.mxu2 %v3987_v61  ;;  %v4099_v43 = vor.u32 %v4546_v36, %v4096_v39  ;;  %v4536_v61 = vld [vmem:[#allocation4 + $0x1a4] sm:$0xf] }
 0x14f   :  { %2508 = vmatpush.bf16.msrb.mxu0 %v3851_v53  ;;  %v1904_v35 = vpop.f32.mrf.mxu0  ;;  %v4072_v53 = vld [vmem:[#allocation4 + $0x1c8] sm:$0xf0] }
 0x150   :  { %2521 = vmatpush.bf16.msrb.mxu1 %v3915_v55  ;;  %v1905_v41 = vadd.f32 %v1904_v35, %v1892_v1  ;;  %v4075_v55 = vor.u32 %v4540_v52, %v4072_v53  ;;  %v4534_v1 = vld [vmem:[#allocation4 + $0x194] sm:$0xf]  ;;  %v4142_v53 = vld [vmem:[%s5003_s5 + $0x50] sm:$0xf] }
 0x151   :  { %2534 = vmatpush.bf16.msrb.mxu2 %v3979_v33  ;;  %v4059_v33 = vor.u32 %v4536_v61, %v4056_v62  ;;  %v4051_v4 = vor.u32 %v4534_v1, %v4048_v2  ;;  %v4578_v61 = vld [vmem:[%s5003_s5 + $0xf4] sm:$0xf]  ;;  %v4224_v62 = vld [vmem:[%s5003_s5 + $0xf8] sm:$0xf0]  ;;  %v4557_v1 = vld [vmem:[%s5003_s5 + $0x44] sm:$0xf0] }
 0x152   :  { %2509 = vmatmul.bf16.vlgmr.msrb.gmra.mxu0 %v4769_v45  ;;  %v1917_v42 = vpop.f32.mrf.mxu1  ;;  %v4227_v2 = vor.u32 %v4578_v61, %v4224_v62  ;;  %v4182_v61 = vld [vmem:[%s5003_s5 + $0xa0] sm:$0xf]  ;;  %v4569_v62 = vld [vmem:[%s5003_s5 + $0xa4] sm:$0xf0] }
 0x153   :  { %2522 = vmatmul.bf16.vlgmr.msrb.gmra.mxu1 %v4767_v44  ;;  %v1918_v45 = vadd.f32 %v1917_v42, %v1905_v41  ;;  %v4071_v44 = vor.u32 %v4541_v9, %v4070_v8  ;;  %v4043_v41 = vor.u32 %v4532_v5, %v4040_v34  ;;  %v4136_v5 = vld [vmem:[%s5003_s5 + $0x48] sm:$0xf0]  ;;  %v4577_v34 = vld [vmem:[%s5003_s5 + $0xe4] sm:$0xf0] }
 0x155   :  { %2491 = vmatpush.bf16.msra.mxu3 %v4071_v44 }
 0x156   :  { %v1930_v10 = vpop.f32.mrf.mxu2 }
 0x157   :  { %v1931_v12 = vadd.f32 %v1930_v10, %v1918_v45  ;;  %v1906_v17 = vpop.f32.mrf.mxu0 }
 0x159   :  { %v1943_v13 = vpop.f32.mrf.mxu3  ;;  %2492 = vmatpush.bf16.msra.mxu3 %v4063_v19 }
 0x15a   :  { %v1944_v16 = vadd.f32 %v1943_v13, %v1931_v12  ;;  %v1919_v18 = vpop.f32.mrf.mxu1 }
 0x15c   :  { %v2053_v6 = vmax.f32 %v1944_v16, 0.0 }
 0x15d   :  { %2493 = vmatpush.bf16.msra.mxu3 %v4055_v11 }
 0x15e   :  { %v2057_v22 = vpack.c.bf16 %v2053_v6, %v2053_v6  ;;  %v1932_v23 = vpop.f32.mrf.mxu2  ;;  %v2123_v6 = vld [vmem:[%s5002_s4] sm:$0x3] }
 0x15f   :  { %v2125_v20 = vperm.slane %v2123_v6, 0  ;;  %v2126_v27 = vperm.slane %v2123_v6, 1 }
 0x160   :  { %2483 = vmatmul.bf16.vlgmr.msra.gmra.mxu2 %v2057_v22 }
 0x161   :  { %v1945_v25 = vpop.f32.mrf.mxu3  ;;  %2494 = vmatpush.bf16.msra.mxu3 %v4047_v28 }
 0x165   :  { %2495 = vmatpush.bf16.msra.mxu3 %v4039_v24 }
 0x169   :  { %2540 = vmatpush.bf16.msrb.mxu3 %v4099_v43  ;;  %v4158_v43 = vld [vmem:[%s5003_s5 + $0x70] sm:$0xf] }
 0x16d   :  { %2541 = vmatpush.bf16.msrb.mxu3 %v4091_v38  ;;  %v4160_v38 = vld [vmem:[%s5003_s5 + $0x78] sm:$0xf0] }
 0x16e   :  { %v4163_v48 = vor.u32 %v4562_v32, %v4160_v38  ;;  %v4102_v32 = vld [vmem:[%s5003_s5] sm:$0xf] }
 0x16f   :  { %v1956_v50 = vpop.f32.mrf.mxu0  ;;  %v4198_v38 = vld [vmem:[%s5003_s5 + $0xc0] sm:$0xf] }
 0x170   :  { %2535 = vmatmul.bf16.vlgmr.msrb.gmra.mxu2 %v2057_v22  ;;  %v1957_v3 = vadd.f32 %v1956_v50, %v350_v59  ;;  %v4159_v50 = vor.u32 %v4563_v40, %v4158_v43  ;;  %v4208_v43 = vld [vmem:[%s5003_s5 + $0xd8] sm:$0xf0] }
 0x171   :  { %2542 = vmatpush.bf16.msrb.mxu3 %v4083_v29  ;;  %v4560_v29 = vld [vmem:[%s5003_s5 + $0x64] sm:$0xf]  ;;  %2781 = vmatpush.bf16.msra.mxu2 %v4163_v48 }
 0x172   :  { %v1969_v46 = vpop.f32.mrf.mxu1  ;;  %2755 = vmatpush.bf16.msra.mxu0 %v4159_v50  ;;  %v4549_v50 = vld [vmem:[%s5003_s5 + $0x4] sm:$0xf0]  ;;  %v4548_v48 = vld [vmem:[%s5003_s5 + $0x4] sm:$0xf] }
 0x173   :  { %v1970_v35 = vadd.f32 %v1969_v46, %v1957_v3  ;;  %v4150_v46 = vld [vmem:[%s5003_s5 + $0x60] sm:$0xf] }
 0x174   :  { %v4214_v3 = vld [vmem:[%s5003_s5 + $0xe0] sm:$0xf] }
 0x175   :  { %2543 = vmatpush.bf16.msrb.mxu3 %v4075_v55  ;;  %v4558_v55 = vld [vmem:[%s5003_s5 + $0x54] sm:$0xf] }
 0x176   :  { %v1982_v49 = vpop.f32.mrf.mxu2 }
 0x177   :  { %v1958_v54 = vpop.f32.mrf.mxu0  ;;  %v1983_v42 = vadd.f32 %v1982_v49, %v1970_v35  ;;  %v4152_v49 = vld [vmem:[%s5003_s5 + $0x68] sm:$0xf0]  ;;  %v4215_v35 = vor.u32 %v4577_v34, %v4214_v3  ;;  %v4174_v3 = vld [vmem:[%s5003_s5 + $0x90] sm:$0xf] }
 0x178   :  { %v4155_v52 = vor.u32 %v4560_v29, %v4152_v49  ;;  %v4559_v54 = vld [vmem:[%s5003_s5 + $0x54] sm:$0xf0]  ;;  %v4104_v29 = vld [vmem:[%s5003_s5 + $0x8] sm:$0xf0] }
 0x179   :  { %v1995_v51 = vpop.f32.mrf.mxu3  ;;  %2544 = vmatpush.bf16.msrb.mxu3 %v4067_v60  ;;  %v4143_v59 = vor.u32 %v4559_v54, %v4142_v53  ;;  %v4223_v60 = vor.u32 %v4579_v58, %v4222_v57  ;;  %v4200_v53 = vld [vmem:[%s5003_s5 + $0xc8] sm:$0xf0]  ;;  %v4570_v57 = vld [vmem:[%s5003_s5 + $0xb4] sm:$0xf] }
 0x17a   :  { %v1971_v56 = vpop.f32.mrf.mxu1  ;;  %v1996_v31 = vadd.f32 %v1995_v51, %v1983_v42  ;;  %v4151_v51 = vor.u32 %v4561_v47, %v4150_v46  ;;  %2782 = vmatpush.bf16.msra.mxu2 %v4155_v52  ;;  %v4216_v42 = vld [vmem:[%s5003_s5 + $0xe8] sm:$0xf0]  ;;  %v4103_v46 = vor.u32 %v4549_v50, %v4102_v32  ;;  %v4573_v47 = vld [vmem:[%s5003_s5 + $0xc4] sm:$0xf0]  ;;  %v4572_v52 = vld [vmem:[%s5003_s5 + $0xc4] sm:$0xf] }
 0x17b   :  { %v4144_v56 = vld [vmem:[%s5003_s5 + $0x58] sm:$0xf0]  ;;  %2768 = vmatpush.bf16.msra.mxu1 %v4223_v60  ;;  %v4199_v49 = vor.u32 %v4573_v47, %v4198_v38  ;;  %v4203_v54 = vor.u32 %v4572_v52, %v4200_v53 }
 0x17c   :  { %2756 = vmatpush.bf16.msra.mxu0 %v4151_v51  ;;  %v4107_v51 = vor.u32 %v4548_v48, %v4104_v29 }
 0x17d   :  { %2545 = vmatpush.bf16.msrb.mxu3 %v4059_v33  ;;  %v4134_v33 = vld [vmem:[%s5003_s5 + $0x40] sm:$0xf] }
 0x17e   :  { %v1984_v63 = vpop.f32.mrf.mxu2 }
 0x17f   :  { %2769 = vmatpush.bf16.msra.mxu1 %v4215_v35  ;;  %v4176_v35 = vld [vmem:[%s5003_s5 + $0x98] sm:$0xf0] }
 0x180   :  { %2757 = vmatpush.bf16.msra.mxu0 %v4143_v59  ;;  %v4192_v59 = vld [vmem:[%s5003_s5 + $0xb8] sm:$0xf0] }
 0x181   :  { %v1997_v0 = vpop.f32.mrf.mxu3  ;;  %2546 = vmatpush.bf16.msrb.mxu3 %v4051_v4  ;;  %v4556_v4 = vld [vmem:[%s5003_s5 + $0x44] sm:$0xf]  ;;  %v4195_v60 = vor.u32 %v4570_v57, %v4192_v59 }
 0x182   :  { %v4147_v0 = vor.u32 %v4558_v55, %v4144_v56  ;;  %v4190_v55 = vld [vmem:[%s5003_s5 + $0xb0] sm:$0xf]  ;;  %v4571_v56 = vld [vmem:[%s5003_s5 + $0xb4] sm:$0xf0] }
 0x183   :  { %v4191_v58 = vor.u32 %v4571_v56, %v4190_v55 }
 0x184   :  { %2783 = vmatpush.bf16.msra.mxu2 %v4147_v0  ;;  %v4568_v0 = vld [vmem:[%s5003_s5 + $0xa4] sm:$0xf] }
 0x185   :  { %2547 = vmatpush.bf16.msrb.mxu3 %v4043_v41  ;;  %v4576_v41 = vld [vmem:[%s5003_s5 + $0xe4] sm:$0xf] }
 0x18f   :  { %v2008_v7 = vpop.f32.mrf.mxu0 }
 0x190   :  { %v2021_v45 = vpop.f32.mrf.mxu1  ;;  %v2009_v8 = vadd.f32 %v2008_v7, %v1996_v31  ;;  %v4135_v31 = vor.u32 %v4557_v1, %v4134_v33  ;;  %v4219_v7 = vor.u32 %v4576_v41, %v4216_v42  ;;  %v4184_v33 = vld [vmem:[%s5003_s5 + $0xa8] sm:$0xf0]  ;;  %v4183_v1 = vor.u32 %v4569_v62, %v4182_v61  ;;  %v4166_v42 = vld [vmem:[%s5003_s5 + $0x80] sm:$0xf] }
 0x192   :  { %v2022_v9 = vadd.f32 %v2021_v45, %v2009_v8  ;;  %v4139_v45 = vor.u32 %v4556_v4, %v4136_v5  ;;  %v4126_v8 = vld [vmem:[%s5003_s5 + $0x30] sm:$0xf]  ;;  %2758 = vmatpush.bf16.msra.mxu0 %v4135_v31  ;;  %v4567_v4 = vld [vmem:[%s5003_s5 + $0x94] sm:$0xf0]  ;;  %v4566_v5 = vld [vmem:[%s5003_s5 + $0x94] sm:$0xf] }
 0x193   :  { %v4175_v34 = vor.u32 %v4567_v4, %v4174_v3  ;;  %v4179_v41 = vor.u32 %v4566_v5, %v4176_v35  ;;  %v4565_v31 = vld [vmem:[%s5003_s5 + $0x84] sm:$0xf0] }
 0x194   :  { %2784 = vmatpush.bf16.msra.mxu2 %v4139_v45  ;;  %v4167_v45 = vor.u32 %v4565_v31, %v4166_v42 }
 0x197   :  { %v2034_v10 = vpop.f32.mrf.mxu2  ;;  %v2010_v13 = vpop.f32.mrf.mxu0 }
 0x198   :  { %v2035_v44 = vadd.f32 %v2034_v10, %v2022_v9  ;;  %v2047_v12 = vpop.f32.mrf.mxu3  ;;  %v2023_v14 = vpop.f32.mrf.mxu1  ;;  %v4555_v9 = vld [vmem:[%s5003_s5 + $0x34] sm:$0xf0]  ;;  %v4554_v10 = vld [vmem:[%s5003_s5 + $0x34] sm:$0xf] }
 0x19a   :  { %v2048_v15 = vadd.f32 %v2047_v12, %v2035_v44  ;;  %v4128_v44 = vld [vmem:[%s5003_s5 + $0x38] sm:$0xf0]  ;;  %v4127_v12 = vor.u32 %v4555_v9, %v4126_v8  ;;  %v4168_v8 = vld [vmem:[%s5003_s5 + $0x88] sm:$0xf0] }
 0x19b   :  { %v4131_v14 = vor.u32 %v4554_v10, %v4128_v44 }
 0x19c   :  { %v2054_v16 = vmax.f32 %v2048_v15, 0.0  ;;  %v4118_v15 = vld [vmem:[%s5003_s5 + $0x20] sm:$0xf]  ;;  %2759 = vmatpush.bf16.msra.mxu0 %v4127_v12 }
 0x19d   :  { %2785 = vmatpush.bf16.msra.mxu2 %v4131_v14 }
 0x19e   :  { %v2058_v17 = vpack.c.bf16 %v2054_v16, %v2054_v16  ;;  %v4553_v16 = vld [vmem:[%s5003_s5 + $0x24] sm:$0xf0] }
 0x19f   :  { %v2036_v18 = vpop.f32.mrf.mxu2 }
 0x1a0   :  { %v2049_v19 = vpop.f32.mrf.mxu3  ;;  %2496 = vmatmul.bf16.vlgmr.msra.gmra.mxu3 %v2058_v17  ;;  %v4120_v18 = vld [vmem:[%s5003_s5 + $0x28] sm:$0xf0] }
 0x1a1   :  { %2794 = vmatpush.bf16.msra.mxu3 %v4227_v2  ;;  %v4119_v19 = vor.u32 %v4553_v16, %v4118_v15  ;;  %v4187_v2 = vor.u32 %v4568_v0, %v4184_v33 }
 0x1a3   :  { %2760 = vmatpush.bf16.msra.mxu0 %v4119_v19 }
 0x1a5   :  { %2795 = vmatpush.bf16.msra.mxu3 %v4219_v7  ;;  %v4564_v7 = vld [vmem:[%s5003_s5 + $0x84] sm:$0xf] }
 0x1a6   :  { %v4171_v9 = vor.u32 %v4564_v7, %v4168_v8 }
 0x1af   :  { %v2458_v21 = vpop.f32.mrf.mxu0 }
 0x1b0   :  { %v2459_v22 = vadd.f32 %v2458_v21, %v2125_v20  ;;  %v2471_v23 = vpop.f32.mrf.mxu1  ;;  %2548 = vmatmul.bf16.vlgmr.msrb.gmra.mxu3 %v2058_v17  ;;  %v4552_v17 = vld [vmem:[%s5003_s5 + $0x24] sm:$0xf] }
 0x1b1   :  { %v4123_v6 = vor.u32 %v4552_v17, %v4120_v18 }
 0x1b2   :  { %v4788_v11 = vadd.f32 %v2471_v23, %v2459_v22  ;;  %v4110_v22 = vld [vmem:[%s5003_s5 + $0x10] sm:$0xf]  ;;  %v4551_v23 = vld [vmem:[%s5003_s5 + $0x14] sm:$0xf0] }
 0x1b3   :  { %2786 = vmatpush.bf16.msra.mxu2 %v4123_v6 }
 0x1b7   :  { %v2460_v25 = vpop.f32.mrf.mxu0 }
 0x1b8   :  { %v2473_v26 = vpop.f32.mrf.mxu1  ;;  %v4206_v25 = vld [vmem:[%s5003_s5 + $0xd0] sm:$0xf] }
 0x1b9   :  { %v4111_v26 = vor.u32 %v4551_v23, %v4110_v22 }
 0x1bb   :  { %2761 = vmatpush.bf16.msra.mxu0 %v4111_v26 }
 0x1bf   :  { %2762 = vmatpush.bf16.msra.mxu0 %v4103_v46 }
 0x1cf   :  { %v2510_v28 = vpop.f32.mrf.mxu0 }
 0x1d0   :  { %v2511_v37 = vadd.f32 %v2510_v28, %v2126_v27  ;;  %v2523_v30 = vpop.f32.mrf.mxu1  ;;  %v4575_v27 = vld [vmem:[%s5003_s5 + $0xd4] sm:$0xf0]  ;;  %v4550_v28 = vld [vmem:[%s5003_s5 + $0x14] sm:$0xf] }
 0x1d2   :  { %v4790_v24 = vadd.f32 %v2523_v30, %v2511_v37  ;;  %v4112_v37 = vld [vmem:[%s5003_s5 + $0x18] sm:$0xf0]  ;;  %v4207_v30 = vor.u32 %v4575_v27, %v4206_v25  ;;  %v2589_v25 = vld [vmem:[%s5004_s6] sm:$0x3] }
 0x1d3   :  { %v2592_v27 = vperm.slane %v2589_v25, 1 }
 0x1d4   :  { %2770 = vmatpush.bf16.msra.mxu1 %v4207_v30 }
 0x1d7   :  { %v2512_v36 = vpop.f32.mrf.mxu0 }
 0x1d8   :  { %v2525_v39 = vpop.f32.mrf.mxu1  ;;  %v4115_v36 = vor.u32 %v4550_v28, %v4112_v37  ;;  %2771 = vmatpush.bf16.msra.mxu1 %v4199_v49  ;;  %v2591_v28 = vperm.slane %v2589_v25, 0 }
 0x1d9   :  { %v4574_v39 = vld [vmem:[%s5003_s5 + $0xd4] sm:$0xf] }
 0x1da   :  { %v4211_v40 = vor.u32 %v4574_v39, %v4208_v43  ;;  %2787 = vmatpush.bf16.msra.mxu2 %v4115_v36 }
 0x1dc   :  { %2796 = vmatpush.bf16.msra.mxu3 %v4211_v40  ;;  %2772 = vmatpush.bf16.msra.mxu1 %v4191_v58 }
 0x1de   :  { %2788 = vmatpush.bf16.msra.mxu2 %v4107_v51 }
 0x1e0   :  { %2797 = vmatpush.bf16.msra.mxu3 %v4203_v54  ;;  %2773 = vmatpush.bf16.msra.mxu1 %v4183_v1 }
 0x1e3   :  { %v4840_v63 = vpop.f32.mrf.mxu2 }
 0x1e4   :  { %2798 = vmatpush.bf16.msra.mxu3 %v4195_v60  ;;  %2774 = vmatpush.bf16.msra.mxu1 %v4175_v34  ;;  %v2485_v10 = vadd.f32 %v4840_v63, %v4788_v11 }
 0x1e8   :  { %2799 = vmatpush.bf16.msra.mxu3 %v4187_v2  ;;  %2775 = vmatpush.bf16.msra.mxu1 %v4167_v45 }
 0x1eb   :  { %v2486_v13 = vpop.f32.mrf.mxu2 }
 0x1ec   :  { %2800 = vmatpush.bf16.msra.mxu3 %v4179_v41 }
 0x1f0   :  { %2801 = vmatpush.bf16.msra.mxu3 %v4171_v9 }
 0x1f3   :  { %v4890_v20 = vpop.f32.mrf.mxu2 }
 0x1f4   :  { %v2537_v16 = vadd.f32 %v4890_v20, %v4790_v24 }
 0x1fb   :  { %v2538_v21 = vpop.f32.mrf.mxu2 }
 0x223   :  { %v2497_v44 = vpop.f32.mrf.mxu3 }
 0x224   :  { %v2498_v12 = vadd.f32 %v2497_v44, %v2485_v10 }
 0x226   :  { %v2553_v13 = vmax.f32 %v2498_v12, 0.0 }
 0x228   :  { %v2555_v14 = vpack.c.bf16 %v2553_v13, %v2553_v13 }
 0x22a   :  { %2763 = vmatmul.bf16.vlgmr.msra.gmra.mxu0 %v2555_v14  ;;  %2789 = vmatmul.bf16.vlgmr.msra.gmra.mxu2 %v2555_v14 }
 0x22b   :  { %v2499_v15 = vpop.f32.mrf.mxu3 }
 0x233   :  { %v2549_v17 = vpop.f32.mrf.mxu3 }
 0x234   :  { %v2550_v18 = vadd.f32 %v2549_v17, %v2537_v16 }
 0x236   :  { %v2554_v19 = vmax.f32 %v2550_v18, 0.0 }
 0x238   :  { %v2556_v6 = vpack.c.bf16 %v2554_v19, %v2554_v19 }
 0x23a   :  { %2776 = vmatmul.bf16.vlgmr.msra.gmra.mxu1 %v2556_v6  ;;  %2802 = vmatmul.bf16.vlgmr.msra.gmra.mxu3 %v2556_v6 }
 0x23b   :  { %v2551_v21 = vpop.f32.mrf.mxu3 }
 0x2a7   :  { %v2764_v22 = vpop.f32.mrf.mxu0 }
 0x2a8   :  { %v2765_v20 = vadd.f32 %v2764_v22, %v2591_v28 }
 0x2ad   :  { %v2790_v23 = vpop.f32.mrf.mxu2 }
 0x2ae   :  { %v2791_v37 = vadd.f32 %v2790_v23, %v2592_v27 }
 0x2af   :  { %v2766_v11 = vpop.f32.mrf.mxu0 }
 0x2b5   :  { %v2792_v63 = vpop.f32.mrf.mxu2 }
 0x2b7   :  { %v2777_v26 = vpop.f32.mrf.mxu1 }
 0x2b8   :  { %v2778_v39 = vadd.f32 %v2777_v26, %v2765_v20 }
 0x2bd   :  { %v2803_v24 = vpop.f32.mrf.mxu3 }
 0x2be   :  { %v2804_v30 = vadd.f32 %v2803_v24, %v2791_v37 }
 0x2bf   :  { %v2779_v36 = vpop.f32.mrf.mxu1 }
 0x2c0   :  { %v2809_v43 = vrot.slane %v2804_v30, 6 }
 0x2c2   :  { %v2811_v40 = vsel %vm2810_vm0, %v2778_v39, %v2809_v43 }
 0x2c3   :  { %2813 = vst [vmem:[%s5005_s7] sm:$0xf] %v2811_v40 }
 0x2c5   :  { %v2805_v32 = vpop.f32.mrf.mxu3 }
 0x2c6   :  { %2818 = vsyncpa [#allocation3], 1 }
 0x2c7   :  { %2819 = vsyncpa [#allocation5], 1 }

</bundles_post_ra>
